<compile_context>
chip_gen: v6e
topology: v6e:2x2x1
jax: 0.10.0
libtpu: 0.0.40
codegen_flags: <defaults>
</compile_context>

<pallas_src>
import functools

import jax
import jax.numpy as jnp
from jax.experimental import pallas as pl
from jax.experimental.pallas import tpu as pltpu

LANES = 128                   # TPU lane width: GEMM outputs padded to this.
MXU_DTYPE = jnp.bfloat16      # MXU input dtype (f32 accumulate). jnp.float32 to disable.
MAX_CONV_ROW_TILE = 1024      # conv1 rows per grid step (multiple of 16).
CONV_SUBTILE = 256            # in-kernel row sub-chunk (bounds live vregs).
MAX_HEAD_ROW_TILE = 64        # images per grid step in the fused conv2+head kernel.


def _round_up(x, m):
    return (x + m - 1) // m * m


def _row_tiling(m, max_tile):
    """(row_tile, padded_rows). Tiles are multiples of 16 (bf16 sublane packing).
    When everything fits in one tile we still split into two grid steps so
    v7x's two TensorCores both get work on the 'parallel' axis."""
    m16 = _round_up(max(m, 1), 16)
    if m16 <= max_tile:
        if m16 >= 32:
            half = _round_up((m16 + 1) // 2, 16)
            return half, 2 * half
        return m16, m16
    return max_tile, _round_up(m16, max_tile)


# ---------------------------------------------------------------------------
# brelu: x<0 -> alpha*x ; 0<=x<=t -> x ; x>t -> (x-t)*alpha + t   (alpha=0.1)
# Monotone non-decreasing, so brelu(max(a,b)) == max(brelu(a), brelu(b)),
# and brelu(0) == 0 (used by the band-shifted conv2 accumulation).
# ---------------------------------------------------------------------------
def _brelu(x, t, alpha):
    return jnp.where(x < 0.0, x * alpha,
                     jnp.where(x > t, (x - t) * alpha + t, x))


# ------------------------------- kernels -----------------------------------
def _conv1_pool_brelu_kernel(x_ref, w_ref, b_ref, o_ref, *, t, alpha, sub):
    """im2col-GEMM conv1 + bias + 2x2 max-pool + brelu, bf16 output.

    x_ref: (4, tm, K)  four pool-offset im2col row blocks (bf16)
    w_ref: (K, 128)    weights, Cout zero-padded to 128 lanes (bf16)
    b_ref: (1, 128)    bias, zero-padded (f32)
    o_ref: (tm, 128)   pooled + brelu'd activations (bf16, lane-dense store)

    Rows are processed in static sub-chunks of `sub` so the four (sub,128) f32
    MXU results stay within a bounded number of live vregs even for tm=1024.
    """
    tm = x_ref.shape[1]
    w = w_ref[...]
    b = b_ref[...]
    off = 0
    while off < tm:                                   # static (unrolled) loop
        sz = min(sub, tm - off)
        rows = pl.ds(off, sz)
        d0 = jnp.dot(x_ref[0, rows, :], w, preferred_element_type=jnp.float32)
        d1 = jnp.dot(x_ref[1, rows, :], w, preferred_element_type=jnp.float32)
        d2 = jnp.dot(x_ref[2, rows, :], w, preferred_element_type=jnp.float32)
        d3 = jnp.dot(x_ref[3, rows, :], w, preferred_element_type=jnp.float32)
        # brelu is monotone => (max -> +bias -> brelu) == pool(brelu(conv+b)).
        acc = jnp.maximum(jnp.maximum(d0, d1), jnp.maximum(d2, d3))
        o_ref[rows, :] = _brelu(acc + b, t, alpha).astype(o_ref.dtype)
        off += sz


def _conv2_head_kernel(c2_ref, w2_ref, b2_ref, w3_ref, b3_ref, w4_ref, b4_ref,
                       w5_ref, b5_ref, o_ref, *, t_conv, t_fc, alpha, n_classes):
    """Fused conv2 + 2x2 max-pool + brelu + conv3 + brelu + fc1 + brelu + fc2
    + softmax.  Pooled conv2 activations never leave VMEM.

    c2_ref: (4, 16, tb, K2) pool-offset x pooled-position grouped im2col (bf16)
    w2_ref: (16, K2, 256)   conv2 weights, band-shifted per pooled position p
                            into output lanes [16p, 16p+16) (bf16)
    b2_ref: (16, 1, 256)    conv2 bias, band-shifted the same way (f32)
    w3/w4/w5, b3/b4/b5:     conv3 / fc1 / fc2 matrices and biases (zero padded)
    o_ref:  (tb, 128)       softmax probabilities (f32), classes in [:, :n_classes]
    """
    tb = c2_ref.shape[2]
    n_pos = w2_ref.shape[0]
    feat = w2_ref.shape[2]

    # conv2 + pool + brelu, accumulated directly into the flattened
    # (position, channel) feature layout conv3 expects: each position's
    # band-shifted weights yield zeros outside its 16-lane band, brelu(0)==0,
    # so a plain sum assembles the 256-wide feature vector with no scatter.
    acc = jnp.zeros((tb, feat), jnp.float32)
    for p in range(n_pos):
        w2p = w2_ref[p]
        d0 = jnp.dot(c2_ref[0, p], w2p, preferred_element_type=jnp.float32)
        d1 = jnp.dot(c2_ref[1, p], w2p, preferred_element_type=jnp.float32)
        d2 = jnp.dot(c2_ref[2, p], w2p, preferred_element_type=jnp.float32)
        d3 = jnp.dot(c2_ref[3, p], w2p, preferred_element_type=jnp.float32)
        m = jnp.maximum(jnp.maximum(d0, d1), jnp.maximum(d2, d3))
        acc = acc + _brelu(m + b2_ref[p], t_conv, alpha)

    # conv3 (4x4 spatial -> 1x1, i.e. a plain GEMM) + brelu
    h = jnp.dot(acc.astype(w3_ref.dtype), w3_ref[...],
                preferred_element_type=jnp.float32)
    h = _brelu(h + b3_ref[...], t_conv, alpha)
    # fc1 + brelu (threshold 3 = PyTorch default)
    h = jnp.dot(h.astype(w4_ref.dtype), w4_ref[...],
                preferred_element_type=jnp.float32)
    h = _brelu(h + b4_ref[...], t_fc, alpha)
    # fc2 + softmax (padded class lanes masked with -inf; exact normalization)
    logits = jnp.dot(h.astype(w5_ref.dtype), w5_ref[...],
                     preferred_element_type=jnp.float32) + b5_ref[...]
    lane = jax.lax.broadcasted_iota(jnp.int32, logits.shape, dimension=1)
    logits = jnp.where(lane < n_classes, logits, -jnp.inf)
    logits = logits - jnp.max(logits, axis=-1, keepdims=True)
    e = jnp.exp(logits)
    o_ref[...] = e / jnp.sum(e, axis=-1, keepdims=True)


# ------------------------------ host helpers --------------------------------
def _compiler_params():
    # 32 MiB scoped VMEM is safe on v5e/v6e (128 MiB physical) and v7x (64 MiB);
    # per-step footprints here are a few MiB.
    return pltpu.CompilerParams(
        dimension_semantics=("parallel",),
        vmem_limit_bytes=32 * 1024 * 1024)


def _pad_weight(w2d, k_pad, n_pad):
    K, N = w2d.shape
    return jnp.pad(w2d, ((0, k_pad - K), (0, n_pad - N))).astype(MXU_DTYPE)


def _pad_bias(b, n_pad):
    return jnp.pad(b, (0, n_pad - b.shape[0])).reshape(1, n_pad).astype(jnp.float32)


def _im2col_pooled(x, k):
    """x: (N,H,W,C) -> (4, N*Hp*Wp, k*k*C) im2col rows grouped by the 2x2 pool
    offset (di,dj); row order (n,py,px), feature order (ki,kj,c).  Done in the
    (already bf16) input dtype so the XLA relayout passes move half the bytes."""
    N, H, W, C = x.shape
    Ho, Wo = H - k + 1, W - k + 1
    assert Ho % 2 == 0 and Wo % 2 == 0, "2x2/2 pooling needs an even conv output"
    Hp, Wp = Ho // 2, Wo // 2
    slices = [x[:, i:i + Ho, j:j + Wo, :] for i in range(k) for j in range(k)]
    p = jnp.stack(slices, axis=3)                    # (N, Ho, Wo, k*k, C)
    p = p.reshape(N, Hp, 2, Wp, 2, k * k, C)
    p = p.transpose(2, 4, 0, 1, 3, 5, 6)             # (di, dj, N, Hp, Wp, k*k, C)
    return p.reshape(4, N * Hp * Wp, k * k * C), (N, Hp, Wp)


def _conv2_cols_pooled(h1, n_pad, k2_pad, k=5):
    """h1: (N, 12, 12, C) pooled conv1 output (bf16).
    Returns (4, 16, n_pad, k2_pad): pool offset d=(di,dj), pooled position
    p=(qy,qx) row-major, image n, feature (ki,kj,c)."""
    N, H, W, C = h1.shape
    Q = (H - k + 1) // 2                             # pooled output size (4)
    blocks = []
    for di in range(2):
        for dj in range(2):
            taps = []
            for ki in range(k):
                for kj in range(k):
                    y0, x0 = di + ki, dj + kj
                    taps.append(h1[:, y0:y0 + 2 * Q - 1:2,
                                   x0:x0 + 2 * Q - 1:2, :])   # (N, Q, Q, C)
            t = jnp.stack(taps, axis=3)              # (N, Q, Q, k*k, C)
            blocks.append(t.reshape(N, Q * Q, k * k * C))
    cols = jnp.stack(blocks, axis=0)                 # (4, N, 16, K2)
    cols = cols.transpose(0, 2, 1, 3)                # (4, 16, N, K2)
    return jnp.pad(cols, ((0, 0), (0, 0), (0, n_pad - N),
                          (0, k2_pad - k * k * C)))


# ------------------------------ fused layers ---------------------------------
def conv1_pool_brelu(x, w, b, *, t=4.0, alpha=0.1):
    """2x2/2-max-pool(brelu(conv1(x) + b, t)), channels-last, bf16 output.

    x: (N, 28, 28, 1) NHWC f32;  w: (6, 1, 5, 5) torch OIHW layout.
    Returns (N, 12, 12, 6) bf16.
    """
    Cout, Cin, k, _ = w.shape
    cols, (N, Hp, Wp) = _im2col_pooled(x.astype(MXU_DTYPE), k)
    K = Cin * k * k
    Kp = _round_up(K, 16)
    M = N * Hp * Wp
    tm, Mp = _row_tiling(M, MAX_CONV_ROW_TILE)
    cols = jnp.pad(cols, ((0, 0), (0, Mp - M), (0, Kp - K)))
    wm = _pad_weight(w.transpose(2, 3, 1, 0).reshape(K, Cout), Kp, LANES)
    bm = _pad_bias(b, LANES)

    out = pl.pallas_call(
        functools.partial(_conv1_pool_brelu_kernel, t=float(t),
                          alpha=float(alpha), sub=CONV_SUBTILE),
        out_shape=jax.ShapeDtypeStruct((Mp, LANES), MXU_DTYPE),
        grid=(Mp // tm,),
        in_specs=[
            pl.BlockSpec((4, tm, Kp), lambda i: (0, i, 0)),
            pl.BlockSpec((Kp, LANES), lambda i: (0, 0)),
            pl.BlockSpec((1, LANES), lambda i: (0, 0)),
        ],
        out_specs=pl.BlockSpec((tm, LANES), lambda i: (i, 0)),
        compiler_params=_compiler_params(),
    )(cols, wm, bm)
    return out[:M, :Cout].reshape(N, Hp, Wp, Cout)


def conv2_head_softmax(h1, params, *, t_conv=4.0, t_fc=3.0, alpha=0.1):
    """Fused conv2 + pool + brelu + conv3 + brelu + fc1 + brelu + fc2 + softmax.

    h1: (N, 12, 12, 6) pooled conv1 output (bf16).  Returns (N, 10) f32.
    """
    N, _, _, C1 = h1.shape
    w2, b2 = params["w2"], params["b2"]              # (16, 6, 5, 5), (16,)
    w3, b3 = params["w3"], params["b3"]              # (120, 16, 4, 4), (120,)
    wf1, bf1 = params["wf1"], params["bf1"]          # (120, 64), (64,)
    wf2, bf2 = params["wf2"], params["bf2"]          # (64, 10), (10,)
    C2 = w2.shape[0]                                 # 16
    k = w2.shape[2]                                  # 5
    P = w3.shape[2] * w3.shape[3]                    # 16 pooled positions
    F2 = P * C2                                      # 256 conv3 input features
    n_classes = wf2.shape[1]

    K2 = k * k * C1                                  # 150
    K2p = _round_up(K2, 16)                          # 160
    tb, Np = _row_tiling(N, MAX_HEAD_ROW_TILE)
    cols2 = _conv2_cols_pooled(h1, Np, K2p, k=k)     # (4, 16, Np, K2p) bf16

    # conv2 weights / bias, band-shifted per pooled position p so each partial
    # GEMM writes its 16 channels straight into lanes [16p, 16p+16) of the
    # flattened conv3 feature vector (no in-kernel reshape/scatter needed).
    w2mat = w2.transpose(2, 3, 1, 0).reshape(K2, C2)           # rows (ki,kj,ci)
    w2mat = jnp.pad(w2mat, ((0, K2p - K2), (0, 0))).astype(MXU_DTYPE)
    w2all = jnp.zeros((P, K2p, F2), MXU_DTYPE)
    b2all = jnp.zeros((P, 1, F2), jnp.float32)
    for p in range(P):
        w2all = w2all.at[p, :, p * C2:(p + 1) * C2].set(w2mat)
        b2all = b2all.at[p, 0, p * C2:(p + 1) * C2].set(b2.astype(jnp.float32))

    w3m = _pad_weight(w3.transpose(2, 3, 1, 0).reshape(F2, w3.shape[0]), F2, LANES)
    b3m = _pad_bias(b3, LANES)
    w4m = _pad_weight(wf1, LANES, LANES)             # padded conv3 lanes hit zero rows
    b4m = _pad_bias(bf1, LANES)
    w5m = _pad_weight(wf2, LANES, LANES)
    b5m = _pad_bias(bf2, LANES)

    out = pl.pallas_call(
        functools.partial(_conv2_head_kernel, t_conv=float(t_conv),
                          t_fc=float(t_fc), alpha=float(alpha),
                          n_classes=int(n_classes)),
        out_shape=jax.ShapeDtypeStruct((Np, LANES), jnp.float32),
        grid=(Np // tb,),
        in_specs=[
            pl.BlockSpec((4, P, tb, K2p), lambda i: (0, 0, i, 0)),
            pl.BlockSpec((P, K2p, F2), lambda i: (0, 0, 0)),
            pl.BlockSpec((P, 1, F2), lambda i: (0, 0, 0)),
            pl.BlockSpec((F2, LANES), lambda i: (0, 0)),
            pl.BlockSpec((1, LANES), lambda i: (0, 0)),
            pl.BlockSpec((LANES, LANES), lambda i: (0, 0)),
            pl.BlockSpec((1, LANES), lambda i: (0, 0)),
            pl.BlockSpec((LANES, LANES), lambda i: (0, 0)),
            pl.BlockSpec((1, LANES), lambda i: (0, 0)),
        ],
        out_specs=pl.BlockSpec((tb, LANES), lambda i: (i, 0)),
        compiler_params=_compiler_params(),
    )(cols2, w2all, b2all, w3m, b3m, w4m, b4m, w5m, b5m)
    return out[:N, :n_classes]


# --------------------------- parameter init ---------------------------------
def init_params(key):
    ks = jax.random.split(key, 10)

    def u(k, shape, fan_in):
        bound = 1.0 / jnp.sqrt(float(fan_in))
        return jax.random.uniform(k, shape, jnp.float32, -bound, bound)

    return {
        "w1": u(ks[0], (6, 1, 5, 5), 1 * 25),     "b1": u(ks[1], (6,), 1 * 25),
        "w2": u(ks[2], (16, 6, 5, 5), 6 * 25),    "b2": u(ks[3], (16,), 6 * 25),
        "w3": u(ks[4], (120, 16, 4, 4), 16 * 16), "b3": u(ks[5], (120,), 16 * 16),
        "wf1": u(ks[6], (120, 64), 120),          "bf1": u(ks[7], (64,), 120),
        "wf2": u(ks[8], (64, 10), 64),            "bf2": u(ks[9], (10,), 64),
    }


# ------------------------------ forward --------------------------------------
@jax.jit
def brelu_lenet_forward(x, params):
    """x: (N, 1, 28, 28) NCHW (torch convention) -> (N, 10) softmax probs."""
    h = jnp.transpose(x, (0, 2, 3, 1))                              # NHWC, once
    h = conv1_pool_brelu(h, params["w1"], params["b1"], t=4.0)      # (N,12,12,6) bf16
    return conv2_head_softmax(h, params)                            # (N, 10) f32


# --------------------- pure-JAX f32 reference (for checking) -----------------
def _reference_forward(x_nchw, params):
    x = jnp.transpose(x_nchw, (0, 2, 3, 1))

    def conv(h, w, b):
        y = jax.lax.conv_general_dilated(
            h, w, window_strides=(1, 1), padding="VALID",
            dimension_numbers=("NHWC", "OIHW", "NHWC"))
        return y + b

    def pool(h):
        n, hh, ww, c = h.shape
        return jnp.max(h.reshape(n, hh // 2, 2, ww // 2, 2, c), axis=(2, 4))

    h = pool(_brelu(conv(x, params["w1"], params["b1"]), 4.0, 0.1))
    h = pool(_brelu(conv(h, params["w2"], params["b2"]), 4.0, 0.1))
    h = _brelu(conv(h, params["w3"], params["b3"]), 4.0, 0.1)
    h = h.reshape(h.shape[0], -1)
    h = _brelu(h @ params["wf1"] + params["bf1"], 3.0, 0.1)
    return jax.nn.softmax(h @ params["wf2"] + params["bf2"], axis=-1)


if __name__ == "__main__":
    key = jax.random.PRNGKey(0)
    pkey, xkey = jax.random.split(key)
    params = init_params(pkey)
    # LeNet geometry needs a 28x28 single-channel input (conv3 collapses 4x4 -> 1x1).
    x = jax.random.normal(xkey, (2, 1, 28, 28), dtype=jnp.float32)

    out = jax.block_until_ready(brelu_lenet_forward(x, params))
    ref = _reference_forward(x, params)

    assert out.shape == (2, 10)
    assert bool(jnp.all(jnp.isfinite(out)))
    assert bool(jnp.allclose(jnp.sum(out, axis=1), 1.0, atol=1e-3))
    # bf16 MXU inputs => loose tolerance vs. the f32 reference.
    assert bool(jnp.allclose(out, ref, atol=3e-2)), (out, ref)
    print("KERNEL_OK")
</pallas_src>

<mosaic_0001>
module attributes {stable_mosaic.version = 11 : i64} {
  func.func @_conv1_pool_brelu_kernel(%arg0: i32, %arg1: memref<4x144x32xbf16, #tpu.memory_space<vmem>>, %arg2: memref<32x128xbf16, #tpu.memory_space<vmem>>, %arg3: memref<1x128xf32, #tpu.memory_space<vmem>>, %arg4: memref<144x128xbf16, #tpu.memory_space<vmem>>) attributes {dimension_semantics = [#tpu.dimension_semantics<parallel>], iteration_bounds = array<i64: 2>, scalar_prefetch = 0 : i64, scratch_operands = 0 : i64, tpu.core_type = #tpu.core_type<tc>, window_params = [{transform_indices = @transform_0, window_bounds = array<i64: 4, 144, 32>}, {pipeline_mode = #tpu.pipeline_mode<synchronous>, transform_indices = @transform_1, window_bounds = array<i64: 32, 128>}, {pipeline_mode = #tpu.pipeline_mode<synchronous>, transform_indices = @transform_2, window_bounds = array<i64: 1, 128>}, {transform_indices = @transform_3, window_bounds = array<i64: 144, 128>}]} {
    %c0 = arith.constant 0 : index
    %c0_0 = arith.constant 0 : index
    %0 = vector.load %arg2[%c0, %c0_0] : memref<32x128xbf16, #tpu.memory_space<vmem>>, vector<32x128xbf16>
    %c0_1 = arith.constant 0 : index
    %c0_2 = arith.constant 0 : index
    %1 = vector.load %arg3[%c0_1, %c0_2] : memref<1x128xf32, #tpu.memory_space<vmem>>, vector<1x128xf32>
    %c0_3 = arith.constant 0 : index
    %c0_4 = arith.constant 0 : index
    %c0_5 = arith.constant 0 : index
    %2 = vector.load %arg1[%c0_3, %c0_4, %c0_5] : memref<4x144x32xbf16, #tpu.memory_space<vmem>>, vector<1x144x32xbf16>
    %3 = vector.shape_cast %2 : vector<1x144x32xbf16> to vector<144x32xbf16>
    %cst = arith.constant dense<0.000000e+00> : vector<144x128xf32>
    %4 = tpu.matmul %3, %0, %cst {dimension_numbers = #tpu.dot_dimension_numbers<[1], [0], [0], [1], [0, 0, 1, 1], [], []>} : vector<144x32xbf16>, vector<32x128xbf16>, vector<144x128xf32> -> vector<144x128xf32>
    %c1 = arith.constant 1 : index
    %c0_6 = arith.constant 0 : index
    %c0_7 = arith.constant 0 : index
    %5 = vector.load %arg1[%c1, %c0_6, %c0_7] : memref<4x144x32xbf16, #tpu.memory_space<vmem>>, vector<1x144x32xbf16>
    %6 = vector.shape_cast %5 : vector<1x144x32xbf16> to vector<144x32xbf16>
    %cst_8 = arith.constant dense<0.000000e+00> : vector<144x128xf32>
    %7 = tpu.matmul %6, %0, %cst_8 {dimension_numbers = #tpu.dot_dimension_numbers<[1], [0], [0], [1], [0, 0, 1, 1], [], []>} : vector<144x32xbf16>, vector<32x128xbf16>, vector<144x128xf32> -> vector<144x128xf32>
    %c2 = arith.constant 2 : index
    %c0_9 = arith.constant 0 : index
    %c0_10 = arith.constant 0 : index
    %8 = vector.load %arg1[%c2, %c0_9, %c0_10] : memref<4x144x32xbf16, #tpu.memory_space<vmem>>, vector<1x144x32xbf16>
    %9 = vector.shape_cast %8 : vector<1x144x32xbf16> to vector<144x32xbf16>
    %cst_11 = arith.constant dense<0.000000e+00> : vector<144x128xf32>
    %10 = tpu.matmul %9, %0, %cst_11 {dimension_numbers = #tpu.dot_dimension_numbers<[1], [0], [0], [1], [0, 0, 1, 1], [], []>} : vector<144x32xbf16>, vector<32x128xbf16>, vector<144x128xf32> -> vector<144x128xf32>
    %c3 = arith.constant 3 : index
    %c0_12 = arith.constant 0 : index
    %c0_13 = arith.constant 0 : index
    %11 = vector.load %arg1[%c3, %c0_12, %c0_13] : memref<4x144x32xbf16, #tpu.memory_space<vmem>>, vector<1x144x32xbf16>
    %12 = vector.shape_cast %11 : vector<1x144x32xbf16> to vector<144x32xbf16>
    %cst_14 = arith.constant dense<0.000000e+00> : vector<144x128xf32>
    %13 = tpu.matmul %12, %0, %cst_14 {dimension_numbers = #tpu.dot_dimension_numbers<[1], [0], [0], [1], [0, 0, 1, 1], [], []>} : vector<144x32xbf16>, vector<32x128xbf16>, vector<144x128xf32> -> vector<144x128xf32>
    %14 = arith.maximumf %4, %7 : vector<144x128xf32>
    %15 = arith.maximumf %10, %13 : vector<144x128xf32>
    %16 = arith.maximumf %14, %15 : vector<144x128xf32>
    %17 = vector.broadcast %1 : vector<1x128xf32> to vector<144x128xf32>
    %18 = arith.addf %16, %17 : vector<144x128xf32>
    %cst_15 = arith.constant 0.000000e+00 : f32
    %19 = vector.broadcast %cst_15 : f32 to vector<144x128xf32>
    %20 = arith.cmpf olt, %18, %19 : vector<144x128xf32>
    %cst_16 = arith.constant 1.000000e-01 : f32
    %21 = vector.broadcast %cst_16 : f32 to vector<144x128xf32>
    %22 = arith.mulf %18, %21 : vector<144x128xf32>
    %cst_17 = arith.constant 4.000000e+00 : f32
    %23 = vector.broadcast %cst_17 : f32 to vector<144x128xf32>
    %24 = arith.cmpf ogt, %18, %23 : vector<144x128xf32>
    %cst_18 = arith.constant 4.000000e+00 : f32
    %25 = vector.broadcast %cst_18 : f32 to vector<144x128xf32>
    %26 = arith.subf %18, %25 : vector<144x128xf32>
    %cst_19 = arith.constant 1.000000e-01 : f32
    %27 = vector.broadcast %cst_19 : f32 to vector<144x128xf32>
    %28 = arith.mulf %26, %27 : vector<144x128xf32>
    %cst_20 = arith.constant 4.000000e+00 : f32
    %29 = vector.broadcast %cst_20 : f32 to vector<144x128xf32>
    %30 = arith.addf %28, %29 : vector<144x128xf32>
    %31 = arith.select %24, %30, %18 : vector<144x128xi1>, vector<144x128xf32>
    %32 = arith.select %20, %22, %31 : vector<144x128xi1>, vector<144x128xf32>
    %33 = arith.truncf %32 : vector<144x128xf32> to vector<144x128xbf16>
    %c0_21 = arith.constant 0 : index
    %c0_22 = arith.constant 0 : index
    %34 = vector.load %arg4[%c0_21, %c0_22] : memref<144x128xbf16, #tpu.memory_space<vmem>>, vector<144x128xbf16>
    tpu.vector_store %arg4[%c0_21, %c0_22], %33 {strides = array<i32>} : memref<144x128xbf16, #tpu.memory_space<vmem>>, vector<144x128xbf16>,
    return
  }
  func.func @transform_0(%arg0: i32) -> (i32, i32, i32) {
    %c0_i32 = arith.constant 0 : i32
    %c0_i32_0 = arith.constant 0 : i32
    %c0_i32_1 = arith.constant 0 : i32
    return %c0_i32, %arg0, %c0_i32_0 : i32, i32, i32
  }
  func.func @transform_1(%arg0: i32) -> (i32, i32) {
    %c0_i32 = arith.constant 0 : i32
    %c0_i32_0 = arith.constant 0 : i32
    %c0_i32_1 = arith.constant 0 : i32
    return %c0_i32, %c0_i32_0 : i32, i32
  }
  func.func @transform_2(%arg0: i32) -> (i32, i32) {
    %c0_i32 = arith.constant 0 : i32
    %c0_i32_0 = arith.constant 0 : i32
    %c0_i32_1 = arith.constant 0 : i32
    return %c0_i32, %c0_i32_0 : i32, i32
  }
  func.func @transform_3(%arg0: i32) -> (i32, i32) {
    %c0_i32 = arith.constant 0 : i32
    %c0_i32_0 = arith.constant 0 : i32
    return %arg0, %c0_i32 : i32, i32
  }
}

module attributes {stable_mosaic.version = 11 : i64} {
  func.func @_conv2_head_kernel(%arg0: i32, %arg1: memref<4x16x16x160xbf16, #tpu.memory_space<vmem>>, %arg2: memref<16x160x256xbf16, #tpu.memory_space<vmem>>, %arg3: memref<16x1x256xf32, #tpu.memory_space<vmem>>, %arg4: memref<256x128xbf16, #tpu.memory_space<vmem>>, %arg5: memref<1x128xf32, #tpu.memory_space<vmem>>, %arg6: memref<128x128xbf16, #tpu.memory_space<vmem>>, %arg7: memref<1x128xf32, #tpu.memory_space<vmem>>, %arg8: memref<128x128xbf16, #tpu.memory_space<vmem>>, %arg9: memref<1x128xf32, #tpu.memory_space<vmem>>, %arg10: memref<16x128xf32, #tpu.memory_space<vmem>>) attributes {dimension_semantics = [#tpu.dimension_semantics<parallel>], iteration_bounds = array<i64: 1>, scalar_prefetch = 0 : i64, scratch_operands = 0 : i64, tpu.core_type = #tpu.core_type<tc>, window_params = [{transform_indices = @transform_0, window_bounds = array<i64: 4, 16, 16, 160>}, {pipeline_mode = #tpu.pipeline_mode<synchronous>, transform_indices = @transform_1, window_bounds = array<i64: 16, 160, 256>}, {pipeline_mode = #tpu.pipeline_mode<synchronous>, transform_indices = @transform_2, window_bounds = array<i64: 16, 1, 256>}, {pipeline_mode = #tpu.pipeline_mode<synchronous>, transform_indices = @transform_3, window_bounds = array<i64: 256, 128>}, {pipeline_mode = #tpu.pipeline_mode<synchronous>, transform_indices = @transform_4, window_bounds = array<i64: 1, 128>}, {pipeline_mode = #tpu.pipeline_mode<synchronous>, transform_indices = @transform_5, window_bounds = array<i64: 128, 128>}, {pipeline_mode = #tpu.pipeline_mode<synchronous>, transform_indices = @transform_6, window_bounds = array<i64: 1, 128>}, {pipeline_mode = #tpu.pipeline_mode<synchronous>, transform_indices = @transform_7, window_bounds = array<i64: 128, 128>}, {pipeline_mode = #tpu.pipeline_mode<synchronous>, transform_indices = @transform_8, window_bounds = array<i64: 1, 128>}, {transform_indices = @transform_9, window_bounds = array<i64: 16, 128>}]} {
    %cst = arith.constant 0.000000e+00 : f32
    %0 = vector.broadcast %cst : f32 to vector<16x256xf32>
    %c0 = arith.constant 0 : index
    %c0_0 = arith.constant 0 : index
    %c0_1 = arith.constant 0 : index
    %1 = vector.load %arg2[%c0, %c0_0, %c0_1] : memref<16x160x256xbf16, #tpu.memory_space<vmem>>, vector<1x160x256xbf16>
    %2 = vector.shape_cast %1 : vector<1x160x256xbf16> to vector<160x256xbf16>
    %c0_2 = arith.constant 0 : index
    %c0_3 = arith.constant 0 : index
    %c0_4 = arith.constant 0 : index
    %c0_5 = arith.constant 0 : index
    %3 = vector.load %arg1[%c0_2, %c0_3, %c0_4, %c0_5] : memref<4x16x16x160xbf16, #tpu.memory_space<vmem>>, vector<1x1x16x160xbf16>
    %4 = vector.shape_cast %3 : vector<1x1x16x160xbf16> to vector<16x160xbf16>
    %cst_6 = arith.constant dense<0.000000e+00> : vector<16x256xf32>
    %5 = tpu.matmul %4, %2, %cst_6 {dimension_numbers = #tpu.dot_dimension_numbers<[1], [0], [0], [1], [0, 0, 1, 1], [], []>} : vector<16x160xbf16>, vector<160x256xbf16>, vector<16x256xf32> -> vector<16x256xf32>
    %c1 = arith.constant 1 : index
    %c0_7 = arith.constant 0 : index
    %c0_8 = arith.constant 0 : index
    %c0_9 = arith.constant 0 : index
    %6 = vector.load %arg1[%c1, %c0_7, %c0_8, %c0_9] : memref<4x16x16x160xbf16, #tpu.memory_space<vmem>>, vector<1x1x16x160xbf16>
    %7 = vector.shape_cast %6 : vector<1x1x16x160xbf16> to vector<16x160xbf16>
    %cst_10 = arith.constant dense<0.000000e+00> : vector<16x256xf32>
    %8 = tpu.matmul %7, %2, %cst_10 {dimension_numbers = #tpu.dot_dimension_numbers<[1], [0], [0], [1], [0, 0, 1, 1], [], []>} : vector<16x160xbf16>, vector<160x256xbf16>, vector<16x256xf32> -> vector<16x256xf32>
    %c2 = arith.constant 2 : index
    %c0_11 = arith.constant 0 : index
    %c0_12 = arith.constant 0 : index
    %c0_13 = arith.constant 0 : index
    %9 = vector.load %arg1[%c2, %c0_11, %c0_12, %c0_13] : memref<4x16x16x160xbf16, #tpu.memory_space<vmem>>, vector<1x1x16x160xbf16>
    %10 = vector.shape_cast %9 : vector<1x1x16x160xbf16> to vector<16x160xbf16>
    %cst_14 = arith.constant dense<0.000000e+00> : vector<16x256xf32>
    %11 = tpu.matmul %10, %2, %cst_14 {dimension_numbers = #tpu.dot_dimension_numbers<[1], [0], [0], [1], [0, 0, 1, 1], [], []>} : vector<16x160xbf16>, vector<160x256xbf16>, vector<16x256xf32> -> vector<16x256xf32>
    %c3 = arith.constant 3 : index
    %c0_15 = arith.constant 0 : index
    %c0_16 = arith.constant 0 : index
    %c0_17 = arith.constant 0 : index
    %12 = vector.load %arg1[%c3, %c0_15, %c0_16, %c0_17] : memref<4x16x16x160xbf16, #tpu.memory_space<vmem>>, vector<1x1x16x160xbf16>
    %13 = vector.shape_cast %12 : vector<1x1x16x160xbf16> to vector<16x160xbf16>
    %cst_18 = arith.constant dense<0.000000e+00> : vector<16x256xf32>
    %14 = tpu.matmul %13, %2, %cst_18 {dimension_numbers = #tpu.dot_dimension_numbers<[1], [0], [0], [1], [0, 0, 1, 1], [], []>} : vector<16x160xbf16>, vector<160x256xbf16>, vector<16x256xf32> -> vector<16x256xf32>
    %15 = arith.maximumf %5, %8 : vector<16x256xf32>
    %16 = arith.maximumf %11, %14 : vector<16x256xf32>
    %17 = arith.maximumf %15, %16 : vector<16x256xf32>
    %c0_19 = arith.constant 0 : index
    %c0_20 = arith.constant 0 : index
    %c0_21 = arith.constant 0 : index
    %18 = vector.load %arg3[%c0_19, %c0_20, %c0_21] : memref<16x1x256xf32, #tpu.memory_space<vmem>>, vector<1x1x256xf32>
    %19 = vector.shape_cast %18 : vector<1x1x256xf32> to vector<1x256xf32>
    %20 = vector.broadcast %19 : vector<1x256xf32> to vector<16x256xf32>
    %21 = arith.addf %17, %20 : vector<16x256xf32>
    %cst_22 = arith.constant 0.000000e+00 : f32
    %22 = vector.broadcast %cst_22 : f32 to vector<16x256xf32>
    %23 = arith.cmpf olt, %21, %22 : vector<16x256xf32>
    %cst_23 = arith.constant 1.000000e-01 : f32
    %24 = vector.broadcast %cst_23 : f32 to vector<16x256xf32>
    %25 = arith.mulf %21, %24 : vector<16x256xf32>
    %cst_24 = arith.constant 4.000000e+00 : f32
    %26 = vector.broadcast %cst_24 : f32 to vector<16x256xf32>
    %27 = arith.cmpf ogt, %21, %26 : vector<16x256xf32>
    %cst_25 = arith.constant 4.000000e+00 : f32
    %28 = vector.broadcast %cst_25 : f32 to vector<16x256xf32>
    %29 = arith.subf %21, %28 : vector<16x256xf32>
    %cst_26 = arith.constant 1.000000e-01 : f32
    %30 = vector.broadcast %cst_26 : f32 to vector<16x256xf32>
    %31 = arith.mulf %29, %30 : vector<16x256xf32>
    %cst_27 = arith.constant 4.000000e+00 : f32
    %32 = vector.broadcast %cst_27 : f32 to vector<16x256xf32>
    %33 = arith.addf %31, %32 : vector<16x256xf32>
    %34 = arith.select %27, %33, %21 : vector<16x256xi1>, vector<16x256xf32>
    %35 = arith.select %23, %25, %34 : vector<16x256xi1>, vector<16x256xf32>
    %36 = arith.addf %0, %35 : vector<16x256xf32>
    %c1_28 = arith.constant 1 : index
    %c0_29 = arith.constant 0 : index
    %c0_30 = arith.constant 0 : index
    %37 = vector.load %arg2[%c1_28, %c0_29, %c0_30] : memref<16x160x256xbf16, #tpu.memory_space<vmem>>, vector<1x160x256xbf16>
    %38 = vector.shape_cast %37 : vector<1x160x256xbf16> to vector<160x256xbf16>
    %c0_31 = arith.constant 0 : index
    %c1_32 = arith.constant 1 : index
    %c0_33 = arith.constant 0 : index
    %c0_34 = arith.constant 0 : index
    %39 = vector.load %arg1[%c0_31, %c1_32, %c0_33, %c0_34] : memref<4x16x16x160xbf16, #tpu.memory_space<vmem>>, vector<1x1x16x160xbf16>
    %40 = vector.shape_cast %39 : vector<1x1x16x160xbf16> to vector<16x160xbf16>
    %cst_35 = arith.constant dense<0.000000e+00> : vector<16x256xf32>
    %41 = tpu.matmul %40, %38, %cst_35 {dimension_numbers = #tpu.dot_dimension_numbers<[1], [0], [0], [1], [0, 0, 1, 1], [], []>} : vector<16x160xbf16>, vector<160x256xbf16>, vector<16x256xf32> -> vector<16x256xf32>
    %c1_36 = arith.constant 1 : index
    %c1_37 = arith.constant 1 : index
    %c0_38 = arith.constant 0 : index
    %c0_39 = arith.constant 0 : index
    %42 = vector.load %arg1[%c1_36, %c1_37, %c0_38, %c0_39] : memref<4x16x16x160xbf16, #tpu.memory_space<vmem>>, vector<1x1x16x160xbf16>
    %43 = vector.shape_cast %42 : vector<1x1x16x160xbf16> to vector<16x160xbf16>
    %cst_40 = arith.constant dense<0.000000e+00> : vector<16x256xf32>
    %44 = tpu.matmul %43, %38, %cst_40 {dimension_numbers = #tpu.dot_dimension_numbers<[1], [0], [0], [1], [0, 0, 1, 1], [], []>} : vector<16x160xbf16>, vector<160x256xbf16>, vector<16x256xf32> -> vector<16x256xf32>
    %c2_41 = arith.constant 2 : index
    %c1_42 = arith.constant 1 : index
    %c0_43 = arith.constant 0 : index
    %c0_44 = arith.constant 0 : index
    %45 = vector.load %arg1[%c2_41, %c1_42, %c0_43, %c0_44] : memref<4x16x16x160xbf16, #tpu.memory_space<vmem>>, vector<1x1x16x160xbf16>
    %46 = vector.shape_cast %45 : vector<1x1x16x160xbf16> to vector<16x160xbf16>
    %cst_45 = arith.constant dense<0.000000e+00> : vector<16x256xf32>
    %47 = tpu.matmul %46, %38, %cst_45 {dimension_numbers = #tpu.dot_dimension_numbers<[1], [0], [0], [1], [0, 0, 1, 1], [], []>} : vector<16x160xbf16>, vector<160x256xbf16>, vector<16x256xf32> -> vector<16x256xf32>
    %c3_46 = arith.constant 3 : index
    %c1_47 = arith.constant 1 : index
    %c0_48 = arith.constant 0 : index
    %c0_49 = arith.constant 0 : index
    %48 = vector.load %arg1[%c3_46, %c1_47, %c0_48, %c0_49] : memref<4x16x16x160xbf16, #tpu.memory_space<vmem>>, vector<1x1x16x160xbf16>
    %49 = vector.shape_cast %48 : vector<1x1x16x160xbf16> to vector<16x160xbf16>
    %cst_50 = arith.constant dense<0.000000e+00> : vector<16x256xf32>
    %50 = tpu.matmul %49, %38, %cst_50 {dimension_numbers = #tpu.dot_dimension_numbers<[1], [0], [0], [1], [0, 0, 1, 1], [], []>} : vector<16x160xbf16>, vector<160x256xbf16>, vector<16x256xf32> -> vector<16x256xf32>
    %51 = arith.maximumf %41, %44 : vector<16x256xf32>
    %52 = arith.maximumf %47, %50 : vector<16x256xf32>
    %53 = arith.maximumf %51, %52 : vector<16x256xf32>
    %c1_51 = arith.constant 1 : index
    %c0_52 = arith.constant 0 : index
    %c0_53 = arith.constant 0 : index
    %54 = vector.load %arg3[%c1_51, %c0_52, %c0_53] : memref<16x1x256xf32, #tpu.memory_space<vmem>>, vector<1x1x256xf32>
    %55 = vector.shape_cast %54 : vector<1x1x256xf32> to vector<1x256xf32>
    %56 = vector.broadcast %55 : vector<1x256xf32> to vector<16x256xf32>
    %57 = arith.addf %53, %56 : vector<16x256xf32>
    %cst_54 = arith.constant 0.000000e+00 : f32
    %58 = vector.broadcast %cst_54 : f32 to vector<16x256xf32>
    %59 = arith.cmpf olt, %57, %58 : vector<16x256xf32>
    %cst_55 = arith.constant 1.000000e-01 : f32
    %60 = vector.broadcast %cst_55 : f32 to vector<16x256xf32>
    %61 = arith.mulf %57, %60 : vector<16x256xf32>
    %cst_56 = arith.constant 4.000000e+00 : f32
    %62 = vector.broadcast %cst_56 : f32 to vector<16x256xf32>
    %63 = arith.cmpf ogt, %57, %62 : vector<16x256xf32>
    %cst_57 = arith.constant 4.000000e+00 : f32
    %64 = vector.broadcast %cst_57 : f32 to vector<16x256xf32>
    %65 = arith.subf %57, %64 : vector<16x256xf32>
    %cst_58 = arith.constant 1.000000e-01 : f32
    %66 = vector.broadcast %cst_58 : f32 to vector<16x256xf32>
    %67 = arith.mulf %65, %66 : vector<16x256xf32>
    %cst_59 = arith.constant 4.000000e+00 : f32
    %68 = vector.broadcast %cst_59 : f32 to vector<16x256xf32>
    %69 = arith.addf %67, %68 : vector<16x256xf32>
    %70 = arith.select %63, %69, %57 : vector<16x256xi1>, vector<16x256xf32>
    %71 = arith.select %59, %61, %70 : vector<16x256xi1>, vector<16x256xf32>
    %72 = arith.addf %36, %71 : vector<16x256xf32>
    %c2_60 = arith.constant 2 : index
    %c0_61 = arith.constant 0 : index
    %c0_62 = arith.constant 0 : index
    %73 = vector.load %arg2[%c2_60, %c0_61, %c0_62] : memref<16x160x256xbf16, #tpu.memory_space<vmem>>, vector<1x160x256xbf16>
    %74 = vector.shape_cast %73 : vector<1x160x256xbf16> to vector<160x256xbf16>
    %c0_63 = arith.constant 0 : index
    %c2_64 = arith.constant 2 : index
    %c0_65 = arith.constant 0 : index
    %c0_66 = arith.constant 0 : index
    %75 = vector.load %arg1[%c0_63, %c2_64, %c0_65, %c0_66] : memref<4x16x16x160xbf16, #tpu.memory_space<vmem>>, vector<1x1x16x160xbf16>
    %76 = vector.shape_cast %75 : vector<1x1x16x160xbf16> to vector<16x160xbf16>
    %cst_67 = arith.constant dense<0.000000e+00> : vector<16x256xf32>
    %77 = tpu.matmul %76, %74, %cst_67 {dimension_numbers = #tpu.dot_dimension_numbers<[1], [0], [0], [1], [0, 0, 1, 1], [], []>} : vector<16x160xbf16>, vector<160x256xbf16>, vector<16x256xf32> -> vector<16x256xf32>
    %c1_68 = arith.constant 1 : index
    %c2_69 = arith.constant 2 : index
    %c0_70 = arith.constant 0 : index
    %c0_71 = arith.constant 0 : index
    %78 = vector.load %arg1[%c1_68, %c2_69, %c0_70, %c0_71] : memref<4x16x16x160xbf16, #tpu.memory_space<vmem>>, vector<1x1x16x160xbf16>
    %79 = vector.shape_cast %78 : vector<1x1x16x160xbf16> to vector<16x160xbf16>
    %cst_72 = arith.constant dense<0.000000e+00> : vector<16x256xf32>
    %80 = tpu.matmul %79, %74, %cst_72 {dimension_numbers = #tpu.dot_dimension_numbers<[1], [0], [0], [1], [0, 0, 1, 1], [], []>} : vector<16x160xbf16>, vector<160x256xbf16>, vector<16x256xf32> -> vector<16x256xf32>
    %c2_73 = arith.constant 2 : index
    %c2_74 = arith.constant 2 : index
    %c0_75 = arith.constant 0 : index
    %c0_76 = arith.constant 0 : index
    %81 = vector.load %arg1[%c2_73, %c2_74, %c0_75, %c0_76] : memref<4x16x16x160xbf16, #tpu.memory_space<vmem>>, vector<1x1x16x160xbf16>
    %82 = vector.shape_cast %81 : vector<1x1x16x160xbf16> to vector<16x160xbf16>
    %cst_77 = arith.constant dense<0.000000e+00> : vector<16x256xf32>
    %83 = tpu.matmul %82, %74, %cst_77 {dimension_numbers = #tpu.dot_dimension_numbers<[1], [0], [0], [1], [0, 0, 1, 1], [], []>} : vector<16x160xbf16>, vector<160x256xbf16>, vector<16x256xf32> -> vector<16x256xf32>
    %c3_78 = arith.constant 3 : index
    %c2_79 = arith.constant 2 : index
    %c0_80 = arith.constant 0 : index
    %c0_81 = arith.constant 0 : index
    %84 = vector.load %arg1[%c3_78, %c2_79, %c0_80, %c0_81] : memref<4x16x16x160xbf16, #tpu.memory_space<vmem>>, vector<1x1x16x160xbf16>
    %85 = vector.shape_cast %84 : vector<1x1x16x160xbf16> to vector<16x160xbf16>
    %cst_82 = arith.constant dense<0.000000e+00> : vector<16x256xf32>
    %86 = tpu.matmul %85, %74, %cst_82 {dimension_numbers = #tpu.dot_dimension_numbers<[1], [0], [0], [1], [0, 0, 1, 1], [], []>} : vector<16x160xbf16>, vector<160x256xbf16>, vector<16x256xf32> -> vector<16x256xf32>
    %87 = arith.maximumf %77, %80 : vector<16x256xf32>
    %88 = arith.maximumf %83, %86 : vector<16x256xf32>
    %89 = arith.maximumf %87, %88 : vector<16x256xf32>
    %c2_83 = arith.constant 2 : index
    %c0_84 = arith.constant 0 : index
    %c0_85 = arith.constant 0 : index
    %90 = vector.load %arg3[%c2_83, %c0_84, %c0_85] : memref<16x1x256xf32, #tpu.memory_space<vmem>>, vector<1x1x256xf32>
    %91 = vector.shape_cast %90 : vector<1x1x256xf32> to vector<1x256xf32>
    %92 = vector.broadcast %91 : vector<1x256xf32> to vector<16x256xf32>
    %93 = arith.addf %89, %92 : vector<16x256xf32>
    %cst_86 = arith.constant 0.000000e+00 : f32
    %94 = vector.broadcast %cst_86 : f32 to vector<16x256xf32>
    %95 = arith.cmpf olt, %93, %94 : vector<16x256xf32>
    %cst_87 = arith.constant 1.000000e-01 : f32
    %96 = vector.broadcast %cst_87 : f32 to vector<16x256xf32>
    %97 = arith.mulf %93, %96 : vector<16x256xf32>
    %cst_88 = arith.constant 4.000000e+00 : f32
    %98 = vector.broadcast %cst_88 : f32 to vector<16x256xf32>
    %99 = arith.cmpf ogt, %93, %98 : vector<16x256xf32>
    %cst_89 = arith.constant 4.000000e+00 : f32
    %100 = vector.broadcast %cst_89 : f32 to vector<16x256xf32>
    %101 = arith.subf %93, %100 : vector<16x256xf32>
    %cst_90 = arith.constant 1.000000e-01 : f32
    %102 = vector.broadcast %cst_90 : f32 to vector<16x256xf32>
    %103 = arith.mulf %101, %102 : vector<16x256xf32>
    %cst_91 = arith.constant 4.000000e+00 : f32
    %104 = vector.broadcast %cst_91 : f32 to vector<16x256xf32>
    %105 = arith.addf %103, %104 : vector<16x256xf32>
    %106 = arith.select %99, %105, %93 : vector<16x256xi1>, vector<16x256xf32>
    %107 = arith.select %95, %97, %106 : vector<16x256xi1>, vector<16x256xf32>
    %108 = arith.addf %72, %107 : vector<16x256xf32>
    %c3_92 = arith.constant 3 : index
    %c0_93 = arith.constant 0 : index
    %c0_94 = arith.constant 0 : index
    %109 = vector.load %arg2[%c3_92, %c0_93, %c0_94] : memref<16x160x256xbf16, #tpu.memory_space<vmem>>, vector<1x160x256xbf16>
    %110 = vector.shape_cast %109 : vector<1x160x256xbf16> to vector<160x256xbf16>
    %c0_95 = arith.constant 0 : index
    %c3_96 = arith.constant 3 : index
    %c0_97 = arith.constant 0 : index
    %c0_98 = arith.constant 0 : index
    %111 = vector.load %arg1[%c0_95, %c3_96, %c0_97, %c0_98] : memref<4x16x16x160xbf16, #tpu.memory_space<vmem>>, vector<1x1x16x160xbf16>
    %112 = vector.shape_cast %111 : vector<1x1x16x160xbf16> to vector<16x160xbf16>
    %cst_99 = arith.constant dense<0.000000e+00> : vector<16x256xf32>
    %113 = tpu.matmul %112, %110, %cst_99 {dimension_numbers = #tpu.dot_dimension_numbers<[1], [0], [0], [1], [0, 0, 1, 1], [], []>} : vector<16x160xbf16>, vector<160x256xbf16>, vector<16x256xf32> -> vector<16x256xf32>
    %c1_100 = arith.constant 1 : index
    %c3_101 = arith.constant 3 : index
    %c0_102 = arith.constant 0 : index
    %c0_103 = arith.constant 0 : index
    %114 = vector.load %arg1[%c1_100, %c3_101, %c0_102, %c0_103] : memref<4x16x16x160xbf16, #tpu.memory_space<vmem>>, vector<1x1x16x160xbf16>
    %115 = vector.shape_cast %114 : vector<1x1x16x160xbf16> to vector<16x160xbf16>
    %cst_104 = arith.constant dense<0.000000e+00> : vector<16x256xf32>
    %116 = tpu.matmul %115, %110, %cst_104 {dimension_numbers = #tpu.dot_dimension_numbers<[1], [0], [0], [1], [0, 0, 1, 1], [], []>} : vector<16x160xbf16>, vector<160x256xbf16>, vector<16x256xf32> -> vector<16x256xf32>
    %c2_105 = arith.constant 2 : index
    %c3_106 = arith.constant 3 : index
    %c0_107 = arith.constant 0 : index
    %c0_108 = arith.constant 0 : index
    %117 = vector.load %arg1[%c2_105, %c3_106, %c0_107, %c0_108] : memref<4x16x16x160xbf16, #tpu.memory_space<vmem>>, vector<1x1x16x160xbf16>
    %118 = vector.shape_cast %117 : vector<1x1x16x160xbf16> to vector<16x160xbf16>
    %cst_109 = arith.constant dense<0.000000e+00> : vector<16x256xf32>
    %119 = tpu.matmul %118, %110, %cst_109 {dimension_numbers = #tpu.dot_dimension_numbers<[1], [0], [0], [1], [0, 0, 1, 1], [], []>} : vector<16x160xbf16>, vector<160x256xbf16>, vector<16x256xf32> -> vector<16x256xf32>
    %c3_110 = arith.constant 3 : index
    %c3_111 = arith.constant 3 : index
    %c0_112 = arith.constant 0 : index
    %c0_113 = arith.constant 0 : index
    %120 = vector.load %arg1[%c3_110, %c3_111, %c0_112, %c0_113] : memref<4x16x16x160xbf16, #tpu.memory_space<vmem>>, vector<1x1x16x160xbf16>
    %121 = vector.shape_cast %120 : vector<1x1x16x160xbf16> to vector<16x160xbf16>
    %cst_114 = arith.constant dense<0.000000e+00> : vector<16x256xf32>
    %122 = tpu.matmul %121, %110, %cst_114 {dimension_numbers = #tpu.dot_dimension_numbers<[1], [0], [0], [1], [0, 0, 1, 1], [], []>} : vector<16x160xbf16>, vector<160x256xbf16>, vector<16x256xf32> -> vector<16x256xf32>
    %123 = arith.maximumf %113, %116 : vector<16x256xf32>
    %124 = arith.maximumf %119, %122 : vector<16x256xf32>
    %125 = arith.maximumf %123, %124 : vector<16x256xf32>
    %c3_115 = arith.constant 3 : index
    %c0_116 = arith.constant 0 : index
    %c0_117 = arith.constant 0 : index
    %126 = vector.load %arg3[%c3_115, %c0_116, %c0_117] : memref<16x1x256xf32, #tpu.memory_space<vmem>>, vector<1x1x256xf32>
    %127 = vector.shape_cast %126 : vector<1x1x256xf32> to vector<1x256xf32>
    %128 = vector.broadcast %127 : vector<1x256xf32> to vector<16x256xf32>
    %129 = arith.addf %125, %128 : vector<16x256xf32>
    %cst_118 = arith.constant 0.000000e+00 : f32
    %130 = vector.broadcast %cst_118 : f32 to vector<16x256xf32>
    %131 = arith.cmpf olt, %129, %130 : vector<16x256xf32>
    %cst_119 = arith.constant 1.000000e-01 : f32
    %132 = vector.broadcast %cst_119 : f32 to vector<16x256xf32>
    %133 = arith.mulf %129, %132 : vector<16x256xf32>
    %cst_120 = arith.constant 4.000000e+00 : f32
    %134 = vector.broadcast %cst_120 : f32 to vector<16x256xf32>
    %135 = arith.cmpf ogt, %129, %134 : vector<16x256xf32>
    %cst_121 = arith.constant 4.000000e+00 : f32
    %136 = vector.broadcast %cst_121 : f32 to vector<16x256xf32>
    %137 = arith.subf %129, %136 : vector<16x256xf32>
    %cst_122 = arith.constant 1.000000e-01 : f32
    %138 = vector.broadcast %cst_122 : f32 to vector<16x256xf32>
    %139 = arith.mulf %137, %138 : vector<16x256xf32>
    %cst_123 = arith.constant 4.000000e+00 : f32
    %140 = vector.broadcast %cst_123 : f32 to vector<16x256xf32>
    %141 = arith.addf %139, %140 : vector<16x256xf32>
    %142 = arith.select %135, %141, %129 : vector<16x256xi1>, vector<16x256xf32>
    %143 = arith.select %131, %133, %142 : vector<16x256xi1>, vector<16x256xf32>
    %144 = arith.addf %108, %143 : vector<16x256xf32>
    %c4 = arith.constant 4 : index
    %c0_124 = arith.constant 0 : index
    %c0_125 = arith.constant 0 : index
    %145 = vector.load %arg2[%c4, %c0_124, %c0_125] : memref<16x160x256xbf16, #tpu.memory_space<vmem>>, vector<1x160x256xbf16>
    %146 = vector.shape_cast %145 : vector<1x160x256xbf16> to vector<160x256xbf16>
    %c0_126 = arith.constant 0 : index
    %c4_127 = arith.constant 4 : index
    %c0_128 = arith.constant 0 : index
    %c0_129 = arith.constant 0 : index
    %147 = vector.load %arg1[%c0_126, %c4_127, %c0_128, %c0_129] : memref<4x16x16x160xbf16, #tpu.memory_space<vmem>>, vector<1x1x16x160xbf16>
    %148 = vector.shape_cast %147 : vector<1x1x16x160xbf16> to vector<16x160xbf16>
    %cst_130 = arith.constant dense<0.000000e+00> : vector<16x256xf32>
    %149 = tpu.matmul %148, %146, %cst_130 {dimension_numbers = #tpu.dot_dimension_numbers<[1], [0], [0], [1], [0, 0, 1, 1], [], []>} : vector<16x160xbf16>, vector<160x256xbf16>, vector<16x256xf32> -> vector<16x256xf32>
    %c1_131 = arith.constant 1 : index
    %c4_132 = arith.constant 4 : index
    %c0_133 = arith.constant 0 : index
    %c0_134 = arith.constant 0 : index
    %150 = vector.load %arg1[%c1_131, %c4_132, %c0_133, %c0_134] : memref<4x16x16x160xbf16, #tpu.memory_space<vmem>>, vector<1x1x16x160xbf16>
    %151 = vector.shape_cast %150 : vector<1x1x16x160xbf16> to vector<16x160xbf16>
    %cst_135 = arith.constant dense<0.000000e+00> : vector<16x256xf32>
    %152 = tpu.matmul %151, %146, %cst_135 {dimension_numbers = #tpu.dot_dimension_numbers<[1], [0], [0], [1], [0, 0, 1, 1], [], []>} : vector<16x160xbf16>, vector<160x256xbf16>, vector<16x256xf32> -> vector<16x256xf32>
    %c2_136 = arith.constant 2 : index
    %c4_137 = arith.constant 4 : index
    %c0_138 = arith.constant 0 : index
    %c0_139 = arith.constant 0 : index
    %153 = vector.load %arg1[%c2_136, %c4_137, %c0_138, %c0_139] : memref<4x16x16x160xbf16, #tpu.memory_space<vmem>>, vector<1x1x16x160xbf16>
    %154 = vector.shape_cast %153 : vector<1x1x16x160xbf16> to vector<16x160xbf16>
    %cst_140 = arith.constant dense<0.000000e+00> : vector<16x256xf32>
    %155 = tpu.matmul %154, %146, %cst_140 {dimension_numbers = #tpu.dot_dimension_numbers<[1], [0], [0], [1], [0, 0, 1, 1], [], []>} : vector<16x160xbf16>, vector<160x256xbf16>, vector<16x256xf32> -> vector<16x256xf32>
    %c3_141 = arith.constant 3 : index
    %c4_142 = arith.constant 4 : index
    %c0_143 = arith.constant 0 : index
    %c0_144 = arith.constant 0 : index
    %156 = vector.load %arg1[%c3_141, %c4_142, %c0_143, %c0_144] : memref<4x16x16x160xbf16, #tpu.memory_space<vmem>>, vector<1x1x16x160xbf16>
    %157 = vector.shape_cast %156 : vector<1x1x16x160xbf16> to vector<16x160xbf16>
    %cst_145 = arith.constant dense<0.000000e+00> : vector<16x256xf32>
    %158 = tpu.matmul %157, %146, %cst_145 {dimension_numbers = #tpu.dot_dimension_numbers<[1], [0], [0], [1], [0, 0, 1, 1], [], []>} : vector<16x160xbf16>, vector<160x256xbf16>, vector<16x256xf32> -> vector<16x256xf32>
    %159 = arith.maximumf %149, %152 : vector<16x256xf32>
    %160 = arith.maximumf %155, %158 : vector<16x256xf32>
    %161 = arith.maximumf %159, %160 : vector<16x256xf32>
    %c4_146 = arith.constant 4 : index
    %c0_147 = arith.constant 0 : index
    %c0_148 = arith.constant 0 : index
    %162 = vector.load %arg3[%c4_146, %c0_147, %c0_148] : memref<16x1x256xf32, #tpu.memory_space<vmem>>, vector<1x1x256xf32>
    %163 = vector.shape_cast %162 : vector<1x1x256xf32> to vector<1x256xf32>
    %164 = vector.broadcast %163 : vector<1x256xf32> to vector<16x256xf32>
    %165 = arith.addf %161, %164 : vector<16x256xf32>
    %cst_149 = arith.constant 0.000000e+00 : f32
    %166 = vector.broadcast %cst_149 : f32 to vector<16x256xf32>
    %167 = arith.cmpf olt, %165, %166 : vector<16x256xf32>
    %cst_150 = arith.constant 1.000000e-01 : f32
    %168 = vector.broadcast %cst_150 : f32 to vector<16x256xf32>
    %169 = arith.mulf %165, %168 : vector<16x256xf32>
    %cst_151 = arith.constant 4.000000e+00 : f32
    %170 = vector.broadcast %cst_151 : f32 to vector<16x256xf32>
    %171 = arith.cmpf ogt, %165, %170 : vector<16x256xf32>
    %cst_152 = arith.constant 4.000000e+00 : f32
    %172 = vector.broadcast %cst_152 : f32 to vector<16x256xf32>
    %173 = arith.subf %165, %172 : vector<16x256xf32>
    %cst_153 = arith.constant 1.000000e-01 : f32
    %174 = vector.broadcast %cst_153 : f32 to vector<16x256xf32>
    %175 = arith.mulf %173, %174 : vector<16x256xf32>
    %cst_154 = arith.constant 4.000000e+00 : f32
    %176 = vector.broadcast %cst_154 : f32 to vector<16x256xf32>
    %177 = arith.addf %175, %176 : vector<16x256xf32>
    %178 = arith.select %171, %177, %165 : vector<16x256xi1>, vector<16x256xf32>
    %179 = arith.select %167, %169, %178 : vector<16x256xi1>, vector<16x256xf32>
    %180 = arith.addf %144, %179 : vector<16x256xf32>
    %c5 = arith.constant 5 : index
    %c0_155 = arith.constant 0 : index
    %c0_156 = arith.constant 0 : index
    %181 = vector.load %arg2[%c5, %c0_155, %c0_156] : memref<16x160x256xbf16, #tpu.memory_space<vmem>>, vector<1x160x256xbf16>
    %182 = vector.shape_cast %181 : vector<1x160x256xbf16> to vector<160x256xbf16>
    %c0_157 = arith.constant 0 : index
    %c5_158 = arith.constant 5 : index
    %c0_159 = arith.constant 0 : index
    %c0_160 = arith.constant 0 : index
    %183 = vector.load %arg1[%c0_157, %c5_158, %c0_159, %c0_160] : memref<4x16x16x160xbf16, #tpu.memory_space<vmem>>, vector<1x1x16x160xbf16>
    %184 = vector.shape_cast %183 : vector<1x1x16x160xbf16> to vector<16x160xbf16>
    %cst_161 = arith.constant dense<0.000000e+00> : vector<16x256xf32>
    %185 = tpu.matmul %184, %182, %cst_161 {dimension_numbers = #tpu.dot_dimension_numbers<[1], [0], [0], [1], [0, 0, 1, 1], [], []>} : vector<16x160xbf16>, vector<160x256xbf16>, vector<16x256xf32> -> vector<16x256xf32>
    %c1_162 = arith.constant 1 : index
    %c5_163 = arith.constant 5 : index
    %c0_164 = arith.constant 0 : index
    %c0_165 = arith.constant 0 : index
    %186 = vector.load %arg1[%c1_162, %c5_163, %c0_164, %c0_165] : memref<4x16x16x160xbf16, #tpu.memory_space<vmem>>, vector<1x1x16x160xbf16>
    %187 = vector.shape_cast %186 : vector<1x1x16x160xbf16> to vector<16x160xbf16>
    %cst_166 = arith.constant dense<0.000000e+00> : vector<16x256xf32>
    %188 = tpu.matmul %187, %182, %cst_166 {dimension_numbers = #tpu.dot_dimension_numbers<[1], [0], [0], [1], [0, 0, 1, 1], [], []>} : vector<16x160xbf16>, vector<160x256xbf16>, vector<16x256xf32> -> vector<16x256xf32>
    %c2_167 = arith.constant 2 : index
    %c5_168 = arith.constant 5 : index
    %c0_169 = arith.constant 0 : index
    %c0_170 = arith.constant 0 : index
    %189 = vector.load %arg1[%c2_167, %c5_168, %c0_169, %c0_170] : memref<4x16x16x160xbf16, #tpu.memory_space<vmem>>, vector<1x1x16x160xbf16>
    %190 = vector.shape_cast %189 : vector<1x1x16x160xbf16> to vector<16x160xbf16>
    %cst_171 = arith.constant dense<0.000000e+00> : vector<16x256xf32>
    %191 = tpu.matmul %190, %182, %cst_171 {dimension_numbers = #tpu.dot_dimension_numbers<[1], [0], [0], [1], [0, 0, 1, 1], [], []>} : vector<16x160xbf16>, vector<160x256xbf16>, vector<16x256xf32> -> vector<16x256xf32>
    %c3_172 = arith.constant 3 : index
    %c5_173 = arith.constant 5 : index
    %c0_174 = arith.constant 0 : index
    %c0_175 = arith.constant 0 : index
    %192 = vector.load %arg1[%c3_172, %c5_173, %c0_174, %c0_175] : memref<4x16x16x160xbf16, #tpu.memory_space<vmem>>, vector<1x1x16x160xbf16>
    %193 = vector.shape_cast %192 : vector<1x1x16x160xbf16> to vector<16x160xbf16>
    %cst_176 = arith.constant dense<0.000000e+00> : vector<16x256xf32>
    %194 = tpu.matmul %193, %182, %cst_176 {dimension_numbers = #tpu.dot_dimension_numbers<[1], [0], [0], [1], [0, 0, 1, 1], [], []>} : vector<16x160xbf16>, vector<160x256xbf16>, vector<16x256xf32> -> vector<16x256xf32>
    %195 = arith.maximumf %185, %188 : vector<16x256xf32>
    %196 = arith.maximumf %191, %194 : vector<16x256xf32>
    %197 = arith.maximumf %195, %196 : vector<16x256xf32>
    %c5_177 = arith.constant 5 : index
    %c0_178 = arith.constant 0 : index
    %c0_179 = arith.constant 0 : index
    %198 = vector.load %arg3[%c5_177, %c0_178, %c0_179] : memref<16x1x256xf32, #tpu.memory_space<vmem>>, vector<1x1x256xf32>
    %199 = vector.shape_cast %198 : vector<1x1x256xf32> to vector<1x256xf32>
    %200 = vector.broadcast %199 : vector<1x256xf32> to vector<16x256xf32>
    %201 = arith.addf %197, %200 : vector<16x256xf32>
    %cst_180 = arith.constant 0.000000e+00 : f32
    %202 = vector.broadcast %cst_180 : f32 to vector<16x256xf32>
    %203 = arith.cmpf olt, %201, %202 : vector<16x256xf32>
    %cst_181 = arith.constant 1.000000e-01 : f32
    %204 = vector.broadcast %cst_181 : f32 to vector<16x256xf32>
    %205 = arith.mulf %201, %204 : vector<16x256xf32>
    %cst_182 = arith.constant 4.000000e+00 : f32
    %206 = vector.broadcast %cst_182 : f32 to vector<16x256xf32>
    %207 = arith.cmpf ogt, %201, %206 : vector<16x256xf32>
    %cst_183 = arith.constant 4.000000e+00 : f32
    %208 = vector.broadcast %cst_183 : f32 to vector<16x256xf32>
    %209 = arith.subf %201, %208 : vector<16x256xf32>
    %cst_184 = arith.constant 1.000000e-01 : f32
    %210 = vector.broadcast %cst_184 : f32 to vector<16x256xf32>
    %211 = arith.mulf %209, %210 : vector<16x256xf32>
    %cst_185 = arith.constant 4.000000e+00 : f32
    %212 = vector.broadcast %cst_185 : f32 to vector<16x256xf32>
    %213 = arith.addf %211, %212 : vector<16x256xf32>
    %214 = arith.select %207, %213, %201 : vector<16x256xi1>, vector<16x256xf32>
    %215 = arith.select %203, %205, %214 : vector<16x256xi1>, vector<16x256xf32>
    %216 = arith.addf %180, %215 : vector<16x256xf32>
    %c6 = arith.constant 6 : index
    %c0_186 = arith.constant 0 : index
    %c0_187 = arith.constant 0 : index
    %217 = vector.load %arg2[%c6, %c0_186, %c0_187] : memref<16x160x256xbf16, #tpu.memory_space<vmem>>, vector<1x160x256xbf16>
    %218 = vector.shape_cast %217 : vector<1x160x256xbf16> to vector<160x256xbf16>
    %c0_188 = arith.constant 0 : index
    %c6_189 = arith.constant 6 : index
    %c0_190 = arith.constant 0 : index
    %c0_191 = arith.constant 0 : index
    %219 = vector.load %arg1[%c0_188, %c6_189, %c0_190, %c0_191] : memref<4x16x16x160xbf16, #tpu.memory_space<vmem>>, vector<1x1x16x160xbf16>
    %220 = vector.shape_cast %219 : vector<1x1x16x160xbf16> to vector<16x160xbf16>
    %cst_192 = arith.constant dense<0.000000e+00> : vector<16x256xf32>
    %221 = tpu.matmul %220, %218, %cst_192 {dimension_numbers = #tpu.dot_dimension_numbers<[1], [0], [0], [1], [0, 0, 1, 1], [], []>} : vector<16x160xbf16>, vector<160x256xbf16>, vector<16x256xf32> -> vector<16x256xf32>
    %c1_193 = arith.constant 1 : index
    %c6_194 = arith.constant 6 : index
    %c0_195 = arith.constant 0 : index
    %c0_196 = arith.constant 0 : index
    %222 = vector.load %arg1[%c1_193, %c6_194, %c0_195, %c0_196] : memref<4x16x16x160xbf16, #tpu.memory_space<vmem>>, vector<1x1x16x160xbf16>
    %223 = vector.shape_cast %222 : vector<1x1x16x160xbf16> to vector<16x160xbf16>
    %cst_197 = arith.constant dense<0.000000e+00> : vector<16x256xf32>
    %224 = tpu.matmul %223, %218, %cst_197 {dimension_numbers = #tpu.dot_dimension_numbers<[1], [0], [0], [1], [0, 0, 1, 1], [], []>} : vector<16x160xbf16>, vector<160x256xbf16>, vector<16x256xf32> -> vector<16x256xf32>
    %c2_198 = arith.constant 2 : index
    %c6_199 = arith.constant 6 : index
    %c0_200 = arith.constant 0 : index
    %c0_201 = arith.constant 0 : index
    %225 = vector.load %arg1[%c2_198, %c6_199, %c0_200, %c0_201] : memref<4x16x16x160xbf16, #tpu.memory_space<vmem>>, vector<1x1x16x160xbf16>
    %226 = vector.shape_cast %225 : vector<1x1x16x160xbf16> to vector<16x160xbf16>
    %cst_202 = arith.constant dense<0.000000e+00> : vector<16x256xf32>
    %227 = tpu.matmul %226, %218, %cst_202 {dimension_numbers = #tpu.dot_dimension_numbers<[1], [0], [0], [1], [0, 0, 1, 1], [], []>} : vector<16x160xbf16>, vector<160x256xbf16>, vector<16x256xf32> -> vector<16x256xf32>
    %c3_203 = arith.constant 3 : index
    %c6_204 = arith.constant 6 : index
    %c0_205 = arith.constant 0 : index
    %c0_206 = arith.constant 0 : index
    %228 = vector.load %arg1[%c3_203, %c6_204, %c0_205, %c0_206] : memref<4x16x16x160xbf16, #tpu.memory_space<vmem>>, vector<1x1x16x160xbf16>
    %229 = vector.shape_cast %228 : vector<1x1x16x160xbf16> to vector<16x160xbf16>
    %cst_207 = arith.constant dense<0.000000e+00> : vector<16x256xf32>
    %230 = tpu.matmul %229, %218, %cst_207 {dimension_numbers = #tpu.dot_dimension_numbers<[1], [0], [0], [1], [0, 0, 1, 1], [], []>} : vector<16x160xbf16>, vector<160x256xbf16>, vector<16x256xf32> -> vector<16x256xf32>
    %231 = arith.maximumf %221, %224 : vector<16x256xf32>
    %232 = arith.maximumf %227, %230 : vector<16x256xf32>
    %233 = arith.maximumf %231, %232 : vector<16x256xf32>
    %c6_208 = arith.constant 6 : index
    %c0_209 = arith.constant 0 : index
    %c0_210 = arith.constant 0 : index
    %234 = vector.load %arg3[%c6_208, %c0_209, %c0_210] : memref<16x1x256xf32, #tpu.memory_space<vmem>>, vector<1x1x256xf32>
    %235 = vector.shape_cast %234 : vector<1x1x256xf32> to vector<1x256xf32>
    %236 = vector.broadcast %235 : vector<1x256xf32> to vector<16x256xf32>
    %237 = arith.addf %233, %236 : vector<16x256xf32>
    %cst_211 = arith.constant 0.000000e+00 : f32
    %238 = vector.broadcast %cst_211 : f32 to vector<16x256xf32>
    %239 = arith.cmpf olt, %237, %238 : vector<16x256xf32>
    %cst_212 = arith.constant 1.000000e-01 : f32
    %240 = vector.broadcast %cst_212 : f32 to vector<16x256xf32>
    %241 = arith.mulf %237, %240 : vector<16x256xf32>
    %cst_213 = arith.constant 4.000000e+00 : f32
    %242 = vector.broadcast %cst_213 : f32 to vector<16x256xf32>
    %243 = arith.cmpf ogt, %237, %242 : vector<16x256xf32>
    %cst_214 = arith.constant 4.000000e+00 : f32
    %244 = vector.broadcast %cst_214 : f32 to vector<16x256xf32>
    %245 = arith.subf %237, %244 : vector<16x256xf32>
    %cst_215 = arith.constant 1.000000e-01 : f32
    %246 = vector.broadcast %cst_215 : f32 to vector<16x256xf32>
    %247 = arith.mulf %245, %246 : vector<16x256xf32>
    %cst_216 = arith.constant 4.000000e+00 : f32
    %248 = vector.broadcast %cst_216 : f32 to vector<16x256xf32>
    %249 = arith.addf %247, %248 : vector<16x256xf32>
    %250 = arith.select %243, %249, %237 : vector<16x256xi1>, vector<16x256xf32>
    %251 = arith.select %239, %241, %250 : vector<16x256xi1>, vector<16x256xf32>
    %252 = arith.addf %216, %251 : vector<16x256xf32>
    %c7 = arith.constant 7 : index
    %c0_217 = arith.constant 0 : index
    %c0_218 = arith.constant 0 : index
    %253 = vector.load %arg2[%c7, %c0_217, %c0_218] : memref<16x160x256xbf16, #tpu.memory_space<vmem>>, vector<1x160x256xbf16>
    %254 = vector.shape_cast %253 : vector<1x160x256xbf16> to vector<160x256xbf16>
    %c0_219 = arith.constant 0 : index
    %c7_220 = arith.constant 7 : index
    %c0_221 = arith.constant 0 : index
    %c0_222 = arith.constant 0 : index
    %255 = vector.load %arg1[%c0_219, %c7_220, %c0_221, %c0_222] : memref<4x16x16x160xbf16, #tpu.memory_space<vmem>>, vector<1x1x16x160xbf16>
    %256 = vector.shape_cast %255 : vector<1x1x16x160xbf16> to vector<16x160xbf16>
    %cst_223 = arith.constant dense<0.000000e+00> : vector<16x256xf32>
    %257 = tpu.matmul %256, %254, %cst_223 {dimension_numbers = #tpu.dot_dimension_numbers<[1], [0], [0], [1], [0, 0, 1, 1], [], []>} : vector<16x160xbf16>, vector<160x256xbf16>, vector<16x256xf32> -> vector<16x256xf32>
    %c1_224 = arith.constant 1 : index
    %c7_225 = arith.constant 7 : index
    %c0_226 = arith.constant 0 : index
    %c0_227 = arith.constant 0 : index
    %258 = vector.load %arg1[%c1_224, %c7_225, %c0_226, %c0_227] : memref<4x16x16x160xbf16, #tpu.memory_space<vmem>>, vector<1x1x16x160xbf16>
    %259 = vector.shape_cast %258 : vector<1x1x16x160xbf16> to vector<16x160xbf16>
    %cst_228 = arith.constant dense<0.000000e+00> : vector<16x256xf32>
    %260 = tpu.matmul %259, %254, %cst_228 {dimension_numbers = #tpu.dot_dimension_numbers<[1], [0], [0], [1], [0, 0, 1, 1], [], []>} : vector<16x160xbf16>, vector<160x256xbf16>, vector<16x256xf32> -> vector<16x256xf32>
    %c2_229 = arith.constant 2 : index
    %c7_230 = arith.constant 7 : index
    %c0_231 = arith.constant 0 : index
    %c0_232 = arith.constant 0 : index
    %261 = vector.load %arg1[%c2_229, %c7_230, %c0_231, %c0_232] : memref<4x16x16x160xbf16, #tpu.memory_space<vmem>>, vector<1x1x16x160xbf16>
    %262 = vector.shape_cast %261 : vector<1x1x16x160xbf16> to vector<16x160xbf16>
    %cst_233 = arith.constant dense<0.000000e+00> : vector<16x256xf32>
    %263 = tpu.matmul %262, %254, %cst_233 {dimension_numbers = #tpu.dot_dimension_numbers<[1], [0], [0], [1], [0, 0, 1, 1], [], []>} : vector<16x160xbf16>, vector<160x256xbf16>, vector<16x256xf32> -> vector<16x256xf32>
    %c3_234 = arith.constant 3 : index
    %c7_235 = arith.constant 7 : index
    %c0_236 = arith.constant 0 : index
    %c0_237 = arith.constant 0 : index
    %264 = vector.load %arg1[%c3_234, %c7_235, %c0_236, %c0_237] : memref<4x16x16x160xbf16, #tpu.memory_space<vmem>>, vector<1x1x16x160xbf16>
    %265 = vector.shape_cast %264 : vector<1x1x16x160xbf16> to vector<16x160xbf16>
    %cst_238 = arith.constant dense<0.000000e+00> : vector<16x256xf32>
    %266 = tpu.matmul %265, %254, %cst_238 {dimension_numbers = #tpu.dot_dimension_numbers<[1], [0], [0], [1], [0, 0, 1, 1], [], []>} : vector<16x160xbf16>, vector<160x256xbf16>, vector<16x256xf32> -> vector<16x256xf32>
    %267 = arith.maximumf %257, %260 : vector<16x256xf32>
    %268 = arith.maximumf %263, %266 : vector<16x256xf32>
    %269 = arith.maximumf %267, %268 : vector<16x256xf32>
    %c7_239 = arith.constant 7 : index
    %c0_240 = arith.constant 0 : index
    %c0_241 = arith.constant 0 : index
    %270 = vector.load %arg3[%c7_239, %c0_240, %c0_241] : memref<16x1x256xf32, #tpu.memory_space<vmem>>, vector<1x1x256xf32>
    %271 = vector.shape_cast %270 : vector<1x1x256xf32> to vector<1x256xf32>
    %272 = vector.broadcast %271 : vector<1x256xf32> to vector<16x256xf32>
    %273 = arith.addf %269, %272 : vector<16x256xf32>
    %cst_242 = arith.constant 0.000000e+00 : f32
    %274 = vector.broadcast %cst_242 : f32 to vector<16x256xf32>
    %275 = arith.cmpf olt, %273, %274 : vector<16x256xf32>
    %cst_243 = arith.constant 1.000000e-01 : f32
    %276 = vector.broadcast %cst_243 : f32 to vector<16x256xf32>
    %277 = arith.mulf %273, %276 : vector<16x256xf32>
    %cst_244 = arith.constant 4.000000e+00 : f32
    %278 = vector.broadcast %cst_244 : f32 to vector<16x256xf32>
    %279 = arith.cmpf ogt, %273, %278 : vector<16x256xf32>
    %cst_245 = arith.constant 4.000000e+00 : f32
    %280 = vector.broadcast %cst_245 : f32 to vector<16x256xf32>
    %281 = arith.subf %273, %280 : vector<16x256xf32>
    %cst_246 = arith.constant 1.000000e-01 : f32
    %282 = vector.broadcast %cst_246 : f32 to vector<16x256xf32>
    %283 = arith.mulf %281, %282 : vector<16x256xf32>
    %cst_247 = arith.constant 4.000000e+00 : f32
    %284 = vector.broadcast %cst_247 : f32 to vector<16x256xf32>
    %285 = arith.addf %283, %284 : vector<16x256xf32>
    %286 = arith.select %279, %285, %273 : vector<16x256xi1>, vector<16x256xf32>
    %287 = arith.select %275, %277, %286 : vector<16x256xi1>, vector<16x256xf32>
    %288 = arith.addf %252, %287 : vector<16x256xf32>
    %c8 = arith.constant 8 : index
    %c0_248 = arith.constant 0 : index
    %c0_249 = arith.constant 0 : index
    %289 = vector.load %arg2[%c8, %c0_248, %c0_249] : memref<16x160x256xbf16, #tpu.memory_space<vmem>>, vector<1x160x256xbf16>
    %290 = vector.shape_cast %289 : vector<1x160x256xbf16> to vector<160x256xbf16>
    %c0_250 = arith.constant 0 : index
    %c8_251 = arith.constant 8 : index
    %c0_252 = arith.constant 0 : index
    %c0_253 = arith.constant 0 : index
    %291 = vector.load %arg1[%c0_250, %c8_251, %c0_252, %c0_253] : memref<4x16x16x160xbf16, #tpu.memory_space<vmem>>, vector<1x1x16x160xbf16>
    %292 = vector.shape_cast %291 : vector<1x1x16x160xbf16> to vector<16x160xbf16>
    %cst_254 = arith.constant dense<0.000000e+00> : vector<16x256xf32>
    %293 = tpu.matmul %292, %290, %cst_254 {dimension_numbers = #tpu.dot_dimension_numbers<[1], [0], [0], [1], [0, 0, 1, 1], [], []>} : vector<16x160xbf16>, vector<160x256xbf16>, vector<16x256xf32> -> vector<16x256xf32>
    %c1_255 = arith.constant 1 : index
    %c8_256 = arith.constant 8 : index
    %c0_257 = arith.constant 0 : index
    %c0_258 = arith.constant 0 : index
    %294 = vector.load %arg1[%c1_255, %c8_256, %c0_257, %c0_258] : memref<4x16x16x160xbf16, #tpu.memory_space<vmem>>, vector<1x1x16x160xbf16>
    %295 = vector.shape_cast %294 : vector<1x1x16x160xbf16> to vector<16x160xbf16>
    %cst_259 = arith.constant dense<0.000000e+00> : vector<16x256xf32>
    %296 = tpu.matmul %295, %290, %cst_259 {dimension_numbers = #tpu.dot_dimension_numbers<[1], [0], [0], [1], [0, 0, 1, 1], [], []>} : vector<16x160xbf16>, vector<160x256xbf16>, vector<16x256xf32> -> vector<16x256xf32>
    %c2_260 = arith.constant 2 : index
    %c8_261 = arith.constant 8 : index
    %c0_262 = arith.constant 0 : index
    %c0_263 = arith.constant 0 : index
    %297 = vector.load %arg1[%c2_260, %c8_261, %c0_262, %c0_263] : memref<4x16x16x160xbf16, #tpu.memory_space<vmem>>, vector<1x1x16x160xbf16>
    %298 = vector.shape_cast %297 : vector<1x1x16x160xbf16> to vector<16x160xbf16>
    %cst_264 = arith.constant dense<0.000000e+00> : vector<16x256xf32>
    %299 = tpu.matmul %298, %290, %cst_264 {dimension_numbers = #tpu.dot_dimension_numbers<[1], [0], [0], [1], [0, 0, 1, 1], [], []>} : vector<16x160xbf16>, vector<160x256xbf16>, vector<16x256xf32> -> vector<16x256xf32>
    %c3_265 = arith.constant 3 : index
    %c8_266 = arith.constant 8 : index
    %c0_267 = arith.constant 0 : index
    %c0_268 = arith.constant 0 : index
    %300 = vector.load %arg1[%c3_265, %c8_266, %c0_267, %c0_268] : memref<4x16x16x160xbf16, #tpu.memory_space<vmem>>, vector<1x1x16x160xbf16>
    %301 = vector.shape_cast %300 : vector<1x1x16x160xbf16> to vector<16x160xbf16>
    %cst_269 = arith.constant dense<0.000000e+00> : vector<16x256xf32>
    %302 = tpu.matmul %301, %290, %cst_269 {dimension_numbers = #tpu.dot_dimension_numbers<[1], [0], [0], [1], [0, 0, 1, 1], [], []>} : vector<16x160xbf16>, vector<160x256xbf16>, vector<16x256xf32> -> vector<16x256xf32>
    %303 = arith.maximumf %293, %296 : vector<16x256xf32>
    %304 = arith.maximumf %299, %302 : vector<16x256xf32>
    %305 = arith.maximumf %303, %304 : vector<16x256xf32>
    %c8_270 = arith.constant 8 : index
    %c0_271 = arith.constant 0 : index
    %c0_272 = arith.constant 0 : index
    %306 = vector.load %arg3[%c8_270, %c0_271, %c0_272] : memref<16x1x256xf32, #tpu.memory_space<vmem>>, vector<1x1x256xf32>
    %307 = vector.shape_cast %306 : vector<1x1x256xf32> to vector<1x256xf32>
    %308 = vector.broadcast %307 : vector<1x256xf32> to vector<16x256xf32>
    %309 = arith.addf %305, %308 : vector<16x256xf32>
    %cst_273 = arith.constant 0.000000e+00 : f32
    %310 = vector.broadcast %cst_273 : f32 to vector<16x256xf32>
    %311 = arith.cmpf olt, %309, %310 : vector<16x256xf32>
    %cst_274 = arith.constant 1.000000e-01 : f32
    %312 = vector.broadcast %cst_274 : f32 to vector<16x256xf32>
    %313 = arith.mulf %309, %312 : vector<16x256xf32>
    %cst_275 = arith.constant 4.000000e+00 : f32
    %314 = vector.broadcast %cst_275 : f32 to vector<16x256xf32>
    %315 = arith.cmpf ogt, %309, %314 : vector<16x256xf32>
    %cst_276 = arith.constant 4.000000e+00 : f32
    %316 = vector.broadcast %cst_276 : f32 to vector<16x256xf32>
    %317 = arith.subf %309, %316 : vector<16x256xf32>
    %cst_277 = arith.constant 1.000000e-01 : f32
    %318 = vector.broadcast %cst_277 : f32 to vector<16x256xf32>
    %319 = arith.mulf %317, %318 : vector<16x256xf32>
    %cst_278 = arith.constant 4.000000e+00 : f32
    %320 = vector.broadcast %cst_278 : f32 to vector<16x256xf32>
    %321 = arith.addf %319, %320 : vector<16x256xf32>
    %322 = arith.select %315, %321, %309 : vector<16x256xi1>, vector<16x256xf32>
    %323 = arith.select %311, %313, %322 : vector<16x256xi1>, vector<16x256xf32>
    %324 = arith.addf %288, %323 : vector<16x256xf32>
    %c9 = arith.constant 9 : index
    %c0_279 = arith.constant 0 : index
    %c0_280 = arith.constant 0 : index
    %325 = vector.load %arg2[%c9, %c0_279, %c0_280] : memref<16x160x256xbf16, #tpu.memory_space<vmem>>, vector<1x160x256xbf16>
    %326 = vector.shape_cast %325 : vector<1x160x256xbf16> to vector<160x256xbf16>
    %c0_281 = arith.constant 0 : index
    %c9_282 = arith.constant 9 : index
    %c0_283 = arith.constant 0 : index
    %c0_284 = arith.constant 0 : index
    %327 = vector.load %arg1[%c0_281, %c9_282, %c0_283, %c0_284] : memref<4x16x16x160xbf16, #tpu.memory_space<vmem>>, vector<1x1x16x160xbf16>
    %328 = vector.shape_cast %327 : vector<1x1x16x160xbf16> to vector<16x160xbf16>
    %cst_285 = arith.constant dense<0.000000e+00> : vector<16x256xf32>
    %329 = tpu.matmul %328, %326, %cst_285 {dimension_numbers = #tpu.dot_dimension_numbers<[1], [0], [0], [1], [0, 0, 1, 1], [], []>} : vector<16x160xbf16>, vector<160x256xbf16>, vector<16x256xf32> -> vector<16x256xf32>
    %c1_286 = arith.constant 1 : index
    %c9_287 = arith.constant 9 : index
    %c0_288 = arith.constant 0 : index
    %c0_289 = arith.constant 0 : index
    %330 = vector.load %arg1[%c1_286, %c9_287, %c0_288, %c0_289] : memref<4x16x16x160xbf16, #tpu.memory_space<vmem>>, vector<1x1x16x160xbf16>
    %331 = vector.shape_cast %330 : vector<1x1x16x160xbf16> to vector<16x160xbf16>
    %cst_290 = arith.constant dense<0.000000e+00> : vector<16x256xf32>
    %332 = tpu.matmul %331, %326, %cst_290 {dimension_numbers = #tpu.dot_dimension_numbers<[1], [0], [0], [1], [0, 0, 1, 1], [], []>} : vector<16x160xbf16>, vector<160x256xbf16>, vector<16x256xf32> -> vector<16x256xf32>
    %c2_291 = arith.constant 2 : index
    %c9_292 = arith.constant 9 : index
    %c0_293 = arith.constant 0 : index
    %c0_294 = arith.constant 0 : index
    %333 = vector.load %arg1[%c2_291, %c9_292, %c0_293, %c0_294] : memref<4x16x16x160xbf16, #tpu.memory_space<vmem>>, vector<1x1x16x160xbf16>
    %334 = vector.shape_cast %333 : vector<1x1x16x160xbf16> to vector<16x160xbf16>
    %cst_295 = arith.constant dense<0.000000e+00> : vector<16x256xf32>
    %335 = tpu.matmul %334, %326, %cst_295 {dimension_numbers = #tpu.dot_dimension_numbers<[1], [0], [0], [1], [0, 0, 1, 1], [], []>} : vector<16x160xbf16>, vector<160x256xbf16>, vector<16x256xf32> -> vector<16x256xf32>
    %c3_296 = arith.constant 3 : index
    %c9_297 = arith.constant 9 : index
    %c0_298 = arith.constant 0 : index
    %c0_299 = arith.constant 0 : index
    %336 = vector.load %arg1[%c3_296, %c9_297, %c0_298, %c0_299] : memref<4x16x16x160xbf16, #tpu.memory_space<vmem>>, vector<1x1x16x160xbf16>
    %337 = vector.shape_cast %336 : vector<1x1x16x160xbf16> to vector<16x160xbf16>
    %cst_300 = arith.constant dense<0.000000e+00> : vector<16x256xf32>
    %338 = tpu.matmul %337, %326, %cst_300 {dimension_numbers = #tpu.dot_dimension_numbers<[1], [0], [0], [1], [0, 0, 1, 1], [], []>} : vector<16x160xbf16>, vector<160x256xbf16>, vector<16x256xf32> -> vector<16x256xf32>
    %339 = arith.maximumf %329, %332 : vector<16x256xf32>
    %340 = arith.maximumf %335, %338 : vector<16x256xf32>
    %341 = arith.maximumf %339, %340 : vector<16x256xf32>
    %c9_301 = arith.constant 9 : index
    %c0_302 = arith.constant 0 : index
    %c0_303 = arith.constant 0 : index
    %342 = vector.load %arg3[%c9_301, %c0_302, %c0_303] : memref<16x1x256xf32, #tpu.memory_space<vmem>>, vector<1x1x256xf32>
    %343 = vector.shape_cast %342 : vector<1x1x256xf32> to vector<1x256xf32>
    %344 = vector.broadcast %343 : vector<1x256xf32> to vector<16x256xf32>
    %345 = arith.addf %341, %344 : vector<16x256xf32>
    %cst_304 = arith.constant 0.000000e+00 : f32
    %346 = vector.broadcast %cst_304 : f32 to vector<16x256xf32>
    %347 = arith.cmpf olt, %345, %346 : vector<16x256xf32>
    %cst_305 = arith.constant 1.000000e-01 : f32
    %348 = vector.broadcast %cst_305 : f32 to vector<16x256xf32>
    %349 = arith.mulf %345, %348 : vector<16x256xf32>
    %cst_306 = arith.constant 4.000000e+00 : f32
    %350 = vector.broadcast %cst_306 : f32 to vector<16x256xf32>
    %351 = arith.cmpf ogt, %345, %350 : vector<16x256xf32>
    %cst_307 = arith.constant 4.000000e+00 : f32
    %352 = vector.broadcast %cst_307 : f32 to vector<16x256xf32>
    %353 = arith.subf %345, %352 : vector<16x256xf32>
    %cst_308 = arith.constant 1.000000e-01 : f32
    %354 = vector.broadcast %cst_308 : f32 to vector<16x256xf32>
    %355 = arith.mulf %353, %354 : vector<16x256xf32>
    %cst_309 = arith.constant 4.000000e+00 : f32
    %356 = vector.broadcast %cst_309 : f32 to vector<16x256xf32>
    %357 = arith.addf %355, %356 : vector<16x256xf32>
    %358 = arith.select %351, %357, %345 : vector<16x256xi1>, vector<16x256xf32>
    %359 = arith.select %347, %349, %358 : vector<16x256xi1>, vector<16x256xf32>
    %360 = arith.addf %324, %359 : vector<16x256xf32>
    %c10 = arith.constant 10 : index
    %c0_310 = arith.constant 0 : index
    %c0_311 = arith.constant 0 : index
    %361 = vector.load %arg2[%c10, %c0_310, %c0_311] : memref<16x160x256xbf16, #tpu.memory_space<vmem>>, vector<1x160x256xbf16>
    %362 = vector.shape_cast %361 : vector<1x160x256xbf16> to vector<160x256xbf16>
    %c0_312 = arith.constant 0 : index
    %c10_313 = arith.constant 10 : index
    %c0_314 = arith.constant 0 : index
    %c0_315 = arith.constant 0 : index
    %363 = vector.load %arg1[%c0_312, %c10_313, %c0_314, %c0_315] : memref<4x16x16x160xbf16, #tpu.memory_space<vmem>>, vector<1x1x16x160xbf16>
    %364 = vector.shape_cast %363 : vector<1x1x16x160xbf16> to vector<16x160xbf16>
    %cst_316 = arith.constant dense<0.000000e+00> : vector<16x256xf32>
    %365 = tpu.matmul %364, %362, %cst_316 {dimension_numbers = #tpu.dot_dimension_numbers<[1], [0], [0], [1], [0, 0, 1, 1], [], []>} : vector<16x160xbf16>, vector<160x256xbf16>, vector<16x256xf32> -> vector<16x256xf32>
    %c1_317 = arith.constant 1 : index
    %c10_318 = arith.constant 10 : index
    %c0_319 = arith.constant 0 : index
    %c0_320 = arith.constant 0 : index
    %366 = vector.load %arg1[%c1_317, %c10_318, %c0_319, %c0_320] : memref<4x16x16x160xbf16, #tpu.memory_space<vmem>>, vector<1x1x16x160xbf16>
    %367 = vector.shape_cast %366 : vector<1x1x16x160xbf16> to vector<16x160xbf16>
    %cst_321 = arith.constant dense<0.000000e+00> : vector<16x256xf32>
    %368 = tpu.matmul %367, %362, %cst_321 {dimension_numbers = #tpu.dot_dimension_numbers<[1], [0], [0], [1], [0, 0, 1, 1], [], []>} : vector<16x160xbf16>, vector<160x256xbf16>, vector<16x256xf32> -> vector<16x256xf32>
    %c2_322 = arith.constant 2 : index
    %c10_323 = arith.constant 10 : index
    %c0_324 = arith.constant 0 : index
    %c0_325 = arith.constant 0 : index
    %369 = vector.load %arg1[%c2_322, %c10_323, %c0_324, %c0_325] : memref<4x16x16x160xbf16, #tpu.memory_space<vmem>>, vector<1x1x16x160xbf16>
    %370 = vector.shape_cast %369 : vector<1x1x16x160xbf16> to vector<16x160xbf16>
    %cst_326 = arith.constant dense<0.000000e+00> : vector<16x256xf32>
    %371 = tpu.matmul %370, %362, %cst_326 {dimension_numbers = #tpu.dot_dimension_numbers<[1], [0], [0], [1], [0, 0, 1, 1], [], []>} : vector<16x160xbf16>, vector<160x256xbf16>, vector<16x256xf32> -> vector<16x256xf32>
    %c3_327 = arith.constant 3 : index
    %c10_328 = arith.constant 10 : index
    %c0_329 = arith.constant 0 : index
    %c0_330 = arith.constant 0 : index
    %372 = vector.load %arg1[%c3_327, %c10_328, %c0_329, %c0_330] : memref<4x16x16x160xbf16, #tpu.memory_space<vmem>>, vector<1x1x16x160xbf16>
    %373 = vector.shape_cast %372 : vector<1x1x16x160xbf16> to vector<16x160xbf16>
    %cst_331 = arith.constant dense<0.000000e+00> : vector<16x256xf32>
    %374 = tpu.matmul %373, %362, %cst_331 {dimension_numbers = #tpu.dot_dimension_numbers<[1], [0], [0], [1], [0, 0, 1, 1], [], []>} : vector<16x160xbf16>, vector<160x256xbf16>, vector<16x256xf32> -> vector<16x256xf32>
    %375 = arith.maximumf %365, %368 : vector<16x256xf32>
    %376 = arith.maximumf %371, %374 : vector<16x256xf32>
    %377 = arith.maximumf %375, %376 : vector<16x256xf32>
    %c10_332 = arith.constant 10 : index
    %c0_333 = arith.constant 0 : index
    %c0_334 = arith.constant 0 : index
    %378 = vector.load %arg3[%c10_332, %c0_333, %c0_334] : memref<16x1x256xf32, #tpu.memory_space<vmem>>, vector<1x1x256xf32>
    %379 = vector.shape_cast %378 : vector<1x1x256xf32> to vector<1x256xf32>
    %380 = vector.broadcast %379 : vector<1x256xf32> to vector<16x256xf32>
    %381 = arith.addf %377, %380 : vector<16x256xf32>
    %cst_335 = arith.constant 0.000000e+00 : f32
    %382 = vector.broadcast %cst_335 : f32 to vector<16x256xf32>
    %383 = arith.cmpf olt, %381, %382 : vector<16x256xf32>
    %cst_336 = arith.constant 1.000000e-01 : f32
    %384 = vector.broadcast %cst_336 : f32 to vector<16x256xf32>
    %385 = arith.mulf %381, %384 : vector<16x256xf32>
    %cst_337 = arith.constant 4.000000e+00 : f32
    %386 = vector.broadcast %cst_337 : f32 to vector<16x256xf32>
    %387 = arith.cmpf ogt, %381, %386 : vector<16x256xf32>
    %cst_338 = arith.constant 4.000000e+00 : f32
    %388 = vector.broadcast %cst_338 : f32 to vector<16x256xf32>
    %389 = arith.subf %381, %388 : vector<16x256xf32>
    %cst_339 = arith.constant 1.000000e-01 : f32
    %390 = vector.broadcast %cst_339 : f32 to vector<16x256xf32>
    %391 = arith.mulf %389, %390 : vector<16x256xf32>
    %cst_340 = arith.constant 4.000000e+00 : f32
    %392 = vector.broadcast %cst_340 : f32 to vector<16x256xf32>
    %393 = arith.addf %391, %392 : vector<16x256xf32>
    %394 = arith.select %387, %393, %381 : vector<16x256xi1>, vector<16x256xf32>
    %395 = arith.select %383, %385, %394 : vector<16x256xi1>, vector<16x256xf32>
    %396 = arith.addf %360, %395 : vector<16x256xf32>
    %c11 = arith.constant 11 : index
    %c0_341 = arith.constant 0 : index
    %c0_342 = arith.constant 0 : index
    %397 = vector.load %arg2[%c11, %c0_341, %c0_342] : memref<16x160x256xbf16, #tpu.memory_space<vmem>>, vector<1x160x256xbf16>
    %398 = vector.shape_cast %397 : vector<1x160x256xbf16> to vector<160x256xbf16>
    %c0_343 = arith.constant 0 : index
    %c11_344 = arith.constant 11 : index
    %c0_345 = arith.constant 0 : index
    %c0_346 = arith.constant 0 : index
    %399 = vector.load %arg1[%c0_343, %c11_344, %c0_345, %c0_346] : memref<4x16x16x160xbf16, #tpu.memory_space<vmem>>, vector<1x1x16x160xbf16>
    %400 = vector.shape_cast %399 : vector<1x1x16x160xbf16> to vector<16x160xbf16>
    %cst_347 = arith.constant dense<0.000000e+00> : vector<16x256xf32>
    %401 = tpu.matmul %400, %398, %cst_347 {dimension_numbers = #tpu.dot_dimension_numbers<[1], [0], [0], [1], [0, 0, 1, 1], [], []>} : vector<16x160xbf16>, vector<160x256xbf16>, vector<16x256xf32> -> vector<16x256xf32>
    %c1_348 = arith.constant 1 : index
    %c11_349 = arith.constant 11 : index
    %c0_350 = arith.constant 0 : index
    %c0_351 = arith.constant 0 : index
    %402 = vector.load %arg1[%c1_348, %c11_349, %c0_350, %c0_351] : memref<4x16x16x160xbf16, #tpu.memory_space<vmem>>, vector<1x1x16x160xbf16>
    %403 = vector.shape_cast %402 : vector<1x1x16x160xbf16> to vector<16x160xbf16>
    %cst_352 = arith.constant dense<0.000000e+00> : vector<16x256xf32>
    %404 = tpu.matmul %403, %398, %cst_352 {dimension_numbers = #tpu.dot_dimension_numbers<[1], [0], [0], [1], [0, 0, 1, 1], [], []>} : vector<16x160xbf16>, vector<160x256xbf16>, vector<16x256xf32> -> vector<16x256xf32>
    %c2_353 = arith.constant 2 : index
    %c11_354 = arith.constant 11 : index
    %c0_355 = arith.constant 0 : index
    %c0_356 = arith.constant 0 : index
    %405 = vector.load %arg1[%c2_353, %c11_354, %c0_355, %c0_356] : memref<4x16x16x160xbf16, #tpu.memory_space<vmem>>, vector<1x1x16x160xbf16>
    %406 = vector.shape_cast %405 : vector<1x1x16x160xbf16> to vector<16x160xbf16>
    %cst_357 = arith.constant dense<0.000000e+00> : vector<16x256xf32>
    %407 = tpu.matmul %406, %398, %cst_357 {dimension_numbers = #tpu.dot_dimension_numbers<[1], [0], [0], [1], [0, 0, 1, 1], [], []>} : vector<16x160xbf16>, vector<160x256xbf16>, vector<16x256xf32> -> vector<16x256xf32>
    %c3_358 = arith.constant 3 : index
    %c11_359 = arith.constant 11 : index
    %c0_360 = arith.constant 0 : index
    %c0_361 = arith.constant 0 : index
    %408 = vector.load %arg1[%c3_358, %c11_359, %c0_360, %c0_361] : memref<4x16x16x160xbf16, #tpu.memory_space<vmem>>, vector<1x1x16x160xbf16>
    %409 = vector.shape_cast %408 : vector<1x1x16x160xbf16> to vector<16x160xbf16>
    %cst_362 = arith.constant dense<0.000000e+00> : vector<16x256xf32>
    %410 = tpu.matmul %409, %398, %cst_362 {dimension_numbers = #tpu.dot_dimension_numbers<[1], [0], [0], [1], [0, 0, 1, 1], [], []>} : vector<16x160xbf16>, vector<160x256xbf16>, vector<16x256xf32> -> vector<16x256xf32>
    %411 = arith.maximumf %401, %404 : vector<16x256xf32>
    %412 = arith.maximumf %407, %410 : vector<16x256xf32>
    %413 = arith.maximumf %411, %412 : vector<16x256xf32>
    %c11_363 = arith.constant 11 : index
    %c0_364 = arith.constant 0 : index
    %c0_365 = arith.constant 0 : index
    %414 = vector.load %arg3[%c11_363, %c0_364, %c0_365] : memref<16x1x256xf32, #tpu.memory_space<vmem>>, vector<1x1x256xf32>
    %415 = vector.shape_cast %414 : vector<1x1x256xf32> to vector<1x256xf32>
    %416 = vector.broadcast %415 : vector<1x256xf32> to vector<16x256xf32>
    %417 = arith.addf %413, %416 : vector<16x256xf32>
    %cst_366 = arith.constant 0.000000e+00 : f32
    %418 = vector.broadcast %cst_366 : f32 to vector<16x256xf32>
    %419 = arith.cmpf olt, %417, %418 : vector<16x256xf32>
    %cst_367 = arith.constant 1.000000e-01 : f32
    %420 = vector.broadcast %cst_367 : f32 to vector<16x256xf32>
    %421 = arith.mulf %417, %420 : vector<16x256xf32>
    %cst_368 = arith.constant 4.000000e+00 : f32
    %422 = vector.broadcast %cst_368 : f32 to vector<16x256xf32>
    %423 = arith.cmpf ogt, %417, %422 : vector<16x256xf32>
    %cst_369 = arith.constant 4.000000e+00 : f32
    %424 = vector.broadcast %cst_369 : f32 to vector<16x256xf32>
    %425 = arith.subf %417, %424 : vector<16x256xf32>
    %cst_370 = arith.constant 1.000000e-01 : f32
    %426 = vector.broadcast %cst_370 : f32 to vector<16x256xf32>
    %427 = arith.mulf %425, %426 : vector<16x256xf32>
    %cst_371 = arith.constant 4.000000e+00 : f32
    %428 = vector.broadcast %cst_371 : f32 to vector<16x256xf32>
    %429 = arith.addf %427, %428 : vector<16x256xf32>
    %430 = arith.select %423, %429, %417 : vector<16x256xi1>, vector<16x256xf32>
    %431 = arith.select %419, %421, %430 : vector<16x256xi1>, vector<16x256xf32>
    %432 = arith.addf %396, %431 : vector<16x256xf32>
    %c12 = arith.constant 12 : index
    %c0_372 = arith.constant 0 : index
    %c0_373 = arith.constant 0 : index
    %433 = vector.load %arg2[%c12, %c0_372, %c0_373] : memref<16x160x256xbf16, #tpu.memory_space<vmem>>, vector<1x160x256xbf16>
    %434 = vector.shape_cast %433 : vector<1x160x256xbf16> to vector<160x256xbf16>
    %c0_374 = arith.constant 0 : index
    %c12_375 = arith.constant 12 : index
    %c0_376 = arith.constant 0 : index
    %c0_377 = arith.constant 0 : index
    %435 = vector.load %arg1[%c0_374, %c12_375, %c0_376, %c0_377] : memref<4x16x16x160xbf16, #tpu.memory_space<vmem>>, vector<1x1x16x160xbf16>
    %436 = vector.shape_cast %435 : vector<1x1x16x160xbf16> to vector<16x160xbf16>
    %cst_378 = arith.constant dense<0.000000e+00> : vector<16x256xf32>
    %437 = tpu.matmul %436, %434, %cst_378 {dimension_numbers = #tpu.dot_dimension_numbers<[1], [0], [0], [1], [0, 0, 1, 1], [], []>} : vector<16x160xbf16>, vector<160x256xbf16>, vector<16x256xf32> -> vector<16x256xf32>
    %c1_379 = arith.constant 1 : index
    %c12_380 = arith.constant 12 : index
    %c0_381 = arith.constant 0 : index
    %c0_382 = arith.constant 0 : index
    %438 = vector.load %arg1[%c1_379, %c12_380, %c0_381, %c0_382] : memref<4x16x16x160xbf16, #tpu.memory_space<vmem>>, vector<1x1x16x160xbf16>
    %439 = vector.shape_cast %438 : vector<1x1x16x160xbf16> to vector<16x160xbf16>
    %cst_383 = arith.constant dense<0.000000e+00> : vector<16x256xf32>
    %440 = tpu.matmul %439, %434, %cst_383 {dimension_numbers = #tpu.dot_dimension_numbers<[1], [0], [0], [1], [0, 0, 1, 1], [], []>} : vector<16x160xbf16>, vector<160x256xbf16>, vector<16x256xf32> -> vector<16x256xf32>
    %c2_384 = arith.constant 2 : index
    %c12_385 = arith.constant 12 : index
    %c0_386 = arith.constant 0 : index
    %c0_387 = arith.constant 0 : index
    %441 = vector.load %arg1[%c2_384, %c12_385, %c0_386, %c0_387] : memref<4x16x16x160xbf16, #tpu.memory_space<vmem>>, vector<1x1x16x160xbf16>
    %442 = vector.shape_cast %441 : vector<1x1x16x160xbf16> to vector<16x160xbf16>
    %cst_388 = arith.constant dense<0.000000e+00> : vector<16x256xf32>
    %443 = tpu.matmul %442, %434, %cst_388 {dimension_numbers = #tpu.dot_dimension_numbers<[1], [0], [0], [1], [0, 0, 1, 1], [], []>} : vector<16x160xbf16>, vector<160x256xbf16>, vector<16x256xf32> -> vector<16x256xf32>
    %c3_389 = arith.constant 3 : index
    %c12_390 = arith.constant 12 : index
    %c0_391 = arith.constant 0 : index
    %c0_392 = arith.constant 0 : index
    %444 = vector.load %arg1[%c3_389, %c12_390, %c0_391, %c0_392] : memref<4x16x16x160xbf16, #tpu.memory_space<vmem>>, vector<1x1x16x160xbf16>
    %445 = vector.shape_cast %444 : vector<1x1x16x160xbf16> to vector<16x160xbf16>
    %cst_393 = arith.constant dense<0.000000e+00> : vector<16x256xf32>
    %446 = tpu.matmul %445, %434, %cst_393 {dimension_numbers = #tpu.dot_dimension_numbers<[1], [0], [0], [1], [0, 0, 1, 1], [], []>} : vector<16x160xbf16>, vector<160x256xbf16>, vector<16x256xf32> -> vector<16x256xf32>
    %447 = arith.maximumf %437, %440 : vector<16x256xf32>
    %448 = arith.maximumf %443, %446 : vector<16x256xf32>
    %449 = arith.maximumf %447, %448 : vector<16x256xf32>
    %c12_394 = arith.constant 12 : index
    %c0_395 = arith.constant 0 : index
    %c0_396 = arith.constant 0 : index
    %450 = vector.load %arg3[%c12_394, %c0_395, %c0_396] : memref<16x1x256xf32, #tpu.memory_space<vmem>>, vector<1x1x256xf32>
    %451 = vector.shape_cast %450 : vector<1x1x256xf32> to vector<1x256xf32>
    %452 = vector.broadcast %451 : vector<1x256xf32> to vector<16x256xf32>
    %453 = arith.addf %449, %452 : vector<16x256xf32>
    %cst_397 = arith.constant 0.000000e+00 : f32
    %454 = vector.broadcast %cst_397 : f32 to vector<16x256xf32>
    %455 = arith.cmpf olt, %453, %454 : vector<16x256xf32>
    %cst_398 = arith.constant 1.000000e-01 : f32
    %456 = vector.broadcast %cst_398 : f32 to vector<16x256xf32>
    %457 = arith.mulf %453, %456 : vector<16x256xf32>
    %cst_399 = arith.constant 4.000000e+00 : f32
    %458 = vector.broadcast %cst_399 : f32 to vector<16x256xf32>
    %459 = arith.cmpf ogt, %453, %458 : vector<16x256xf32>
    %cst_400 = arith.constant 4.000000e+00 : f32
    %460 = vector.broadcast %cst_400 : f32 to vector<16x256xf32>
    %461 = arith.subf %453, %460 : vector<16x256xf32>
    %cst_401 = arith.constant 1.000000e-01 : f32
    %462 = vector.broadcast %cst_401 : f32 to vector<16x256xf32>
    %463 = arith.mulf %461, %462 : vector<16x256xf32>
    %cst_402 = arith.constant 4.000000e+00 : f32
    %464 = vector.broadcast %cst_402 : f32 to vector<16x256xf32>
    %465 = arith.addf %463, %464 : vector<16x256xf32>
    %466 = arith.select %459, %465, %453 : vector<16x256xi1>, vector<16x256xf32>
    %467 = arith.select %455, %457, %466 : vector<16x256xi1>, vector<16x256xf32>
    %468 = arith.addf %432, %467 : vector<16x256xf32>
    %c13 = arith.constant 13 : index
    %c0_403 = arith.constant 0 : index
    %c0_404 = arith.constant 0 : index
    %469 = vector.load %arg2[%c13, %c0_403, %c0_404] : memref<16x160x256xbf16, #tpu.memory_space<vmem>>, vector<1x160x256xbf16>
    %470 = vector.shape_cast %469 : vector<1x160x256xbf16> to vector<160x256xbf16>
    %c0_405 = arith.constant 0 : index
    %c13_406 = arith.constant 13 : index
    %c0_407 = arith.constant 0 : index
    %c0_408 = arith.constant 0 : index
    %471 = vector.load %arg1[%c0_405, %c13_406, %c0_407, %c0_408] : memref<4x16x16x160xbf16, #tpu.memory_space<vmem>>, vector<1x1x16x160xbf16>
    %472 = vector.shape_cast %471 : vector<1x1x16x160xbf16> to vector<16x160xbf16>
    %cst_409 = arith.constant dense<0.000000e+00> : vector<16x256xf32>
    %473 = tpu.matmul %472, %470, %cst_409 {dimension_numbers = #tpu.dot_dimension_numbers<[1], [0], [0], [1], [0, 0, 1, 1], [], []>} : vector<16x160xbf16>, vector<160x256xbf16>, vector<16x256xf32> -> vector<16x256xf32>
    %c1_410 = arith.constant 1 : index
    %c13_411 = arith.constant 13 : index
    %c0_412 = arith.constant 0 : index
    %c0_413 = arith.constant 0 : index
    %474 = vector.load %arg1[%c1_410, %c13_411, %c0_412, %c0_413] : memref<4x16x16x160xbf16, #tpu.memory_space<vmem>>, vector<1x1x16x160xbf16>
    %475 = vector.shape_cast %474 : vector<1x1x16x160xbf16> to vector<16x160xbf16>
    %cst_414 = arith.constant dense<0.000000e+00> : vector<16x256xf32>
    %476 = tpu.matmul %475, %470, %cst_414 {dimension_numbers = #tpu.dot_dimension_numbers<[1], [0], [0], [1], [0, 0, 1, 1], [], []>} : vector<16x160xbf16>, vector<160x256xbf16>, vector<16x256xf32> -> vector<16x256xf32>
    %c2_415 = arith.constant 2 : index
    %c13_416 = arith.constant 13 : index
    %c0_417 = arith.constant 0 : index
    %c0_418 = arith.constant 0 : index
    %477 = vector.load %arg1[%c2_415, %c13_416, %c0_417, %c0_418] : memref<4x16x16x160xbf16, #tpu.memory_space<vmem>>, vector<1x1x16x160xbf16>
    %478 = vector.shape_cast %477 : vector<1x1x16x160xbf16> to vector<16x160xbf16>
    %cst_419 = arith.constant dense<0.000000e+00> : vector<16x256xf32>
    %479 = tpu.matmul %478, %470, %cst_419 {dimension_numbers = #tpu.dot_dimension_numbers<[1], [0], [0], [1], [0, 0, 1, 1], [], []>} : vector<16x160xbf16>, vector<160x256xbf16>, vector<16x256xf32> -> vector<16x256xf32>
    %c3_420 = arith.constant 3 : index
    %c13_421 = arith.constant 13 : index
    %c0_422 = arith.constant 0 : index
    %c0_423 = arith.constant 0 : index
    %480 = vector.load %arg1[%c3_420, %c13_421, %c0_422, %c0_423] : memref<4x16x16x160xbf16, #tpu.memory_space<vmem>>, vector<1x1x16x160xbf16>
    %481 = vector.shape_cast %480 : vector<1x1x16x160xbf16> to vector<16x160xbf16>
    %cst_424 = arith.constant dense<0.000000e+00> : vector<16x256xf32>
    %482 = tpu.matmul %481, %470, %cst_424 {dimension_numbers = #tpu.dot_dimension_numbers<[1], [0], [0], [1], [0, 0, 1, 1], [], []>} : vector<16x160xbf16>, vector<160x256xbf16>, vector<16x256xf32> -> vector<16x256xf32>
    %483 = arith.maximumf %473, %476 : vector<16x256xf32>
    %484 = arith.maximumf %479, %482 : vector<16x256xf32>
    %485 = arith.maximumf %483, %484 : vector<16x256xf32>
    %c13_425 = arith.constant 13 : index
    %c0_426 = arith.constant 0 : index
    %c0_427 = arith.constant 0 : index
    %486 = vector.load %arg3[%c13_425, %c0_426, %c0_427] : memref<16x1x256xf32, #tpu.memory_space<vmem>>, vector<1x1x256xf32>
    %487 = vector.shape_cast %486 : vector<1x1x256xf32> to vector<1x256xf32>
    %488 = vector.broadcast %487 : vector<1x256xf32> to vector<16x256xf32>
    %489 = arith.addf %485, %488 : vector<16x256xf32>
    %cst_428 = arith.constant 0.000000e+00 : f32
    %490 = vector.broadcast %cst_428 : f32 to vector<16x256xf32>
    %491 = arith.cmpf olt, %489, %490 : vector<16x256xf32>
    %cst_429 = arith.constant 1.000000e-01 : f32
    %492 = vector.broadcast %cst_429 : f32 to vector<16x256xf32>
    %493 = arith.mulf %489, %492 : vector<16x256xf32>
    %cst_430 = arith.constant 4.000000e+00 : f32
    %494 = vector.broadcast %cst_430 : f32 to vector<16x256xf32>
    %495 = arith.cmpf ogt, %489, %494 : vector<16x256xf32>
    %cst_431 = arith.constant 4.000000e+00 : f32
    %496 = vector.broadcast %cst_431 : f32 to vector<16x256xf32>
    %497 = arith.subf %489, %496 : vector<16x256xf32>
    %cst_432 = arith.constant 1.000000e-01 : f32
    %498 = vector.broadcast %cst_432 : f32 to vector<16x256xf32>
    %499 = arith.mulf %497, %498 : vector<16x256xf32>
    %cst_433 = arith.constant 4.000000e+00 : f32
    %500 = vector.broadcast %cst_433 : f32 to vector<16x256xf32>
    %501 = arith.addf %499, %500 : vector<16x256xf32>
    %502 = arith.select %495, %501, %489 : vector<16x256xi1>, vector<16x256xf32>
    %503 = arith.select %491, %493, %502 : vector<16x256xi1>, vector<16x256xf32>
    %504 = arith.addf %468, %503 : vector<16x256xf32>
    %c14 = arith.constant 14 : index
    %c0_434 = arith.constant 0 : index
    %c0_435 = arith.constant 0 : index
    %505 = vector.load %arg2[%c14, %c0_434, %c0_435] : memref<16x160x256xbf16, #tpu.memory_space<vmem>>, vector<1x160x256xbf16>
    %506 = vector.shape_cast %505 : vector<1x160x256xbf16> to vector<160x256xbf16>
    %c0_436 = arith.constant 0 : index
    %c14_437 = arith.constant 14 : index
    %c0_438 = arith.constant 0 : index
    %c0_439 = arith.constant 0 : index
    %507 = vector.load %arg1[%c0_436, %c14_437, %c0_438, %c0_439] : memref<4x16x16x160xbf16, #tpu.memory_space<vmem>>, vector<1x1x16x160xbf16>
    %508 = vector.shape_cast %507 : vector<1x1x16x160xbf16> to vector<16x160xbf16>
    %cst_440 = arith.constant dense<0.000000e+00> : vector<16x256xf32>
    %509 = tpu.matmul %508, %506, %cst_440 {dimension_numbers = #tpu.dot_dimension_numbers<[1], [0], [0], [1], [0, 0, 1, 1], [], []>} : vector<16x160xbf16>, vector<160x256xbf16>, vector<16x256xf32> -> vector<16x256xf32>
    %c1_441 = arith.constant 1 : index
    %c14_442 = arith.constant 14 : index
    %c0_443 = arith.constant 0 : index
    %c0_444 = arith.constant 0 : index
    %510 = vector.load %arg1[%c1_441, %c14_442, %c0_443, %c0_444] : memref<4x16x16x160xbf16, #tpu.memory_space<vmem>>, vector<1x1x16x160xbf16>
    %511 = vector.shape_cast %510 : vector<1x1x16x160xbf16> to vector<16x160xbf16>
    %cst_445 = arith.constant dense<0.000000e+00> : vector<16x256xf32>
    %512 = tpu.matmul %511, %506, %cst_445 {dimension_numbers = #tpu.dot_dimension_numbers<[1], [0], [0], [1], [0, 0, 1, 1], [], []>} : vector<16x160xbf16>, vector<160x256xbf16>, vector<16x256xf32> -> vector<16x256xf32>
    %c2_446 = arith.constant 2 : index
    %c14_447 = arith.constant 14 : index
    %c0_448 = arith.constant 0 : index
    %c0_449 = arith.constant 0 : index
    %513 = vector.load %arg1[%c2_446, %c14_447, %c0_448, %c0_449] : memref<4x16x16x160xbf16, #tpu.memory_space<vmem>>, vector<1x1x16x160xbf16>
    %514 = vector.shape_cast %513 : vector<1x1x16x160xbf16> to vector<16x160xbf16>
    %cst_450 = arith.constant dense<0.000000e+00> : vector<16x256xf32>
    %515 = tpu.matmul %514, %506, %cst_450 {dimension_numbers = #tpu.dot_dimension_numbers<[1], [0], [0], [1], [0, 0, 1, 1], [], []>} : vector<16x160xbf16>, vector<160x256xbf16>, vector<16x256xf32> -> vector<16x256xf32>
    %c3_451 = arith.constant 3 : index
    %c14_452 = arith.constant 14 : index
    %c0_453 = arith.constant 0 : index
    %c0_454 = arith.constant 0 : index
    %516 = vector.load %arg1[%c3_451, %c14_452, %c0_453, %c0_454] : memref<4x16x16x160xbf16, #tpu.memory_space<vmem>>, vector<1x1x16x160xbf16>
    %517 = vector.shape_cast %516 : vector<1x1x16x160xbf16> to vector<16x160xbf16>
    %cst_455 = arith.constant dense<0.000000e+00> : vector<16x256xf32>
    %518 = tpu.matmul %517, %506, %cst_455 {dimension_numbers = #tpu.dot_dimension_numbers<[1], [0], [0], [1], [0, 0, 1, 1], [], []>} : vector<16x160xbf16>, vector<160x256xbf16>, vector<16x256xf32> -> vector<16x256xf32>
    %519 = arith.maximumf %509, %512 : vector<16x256xf32>
    %520 = arith.maximumf %515, %518 : vector<16x256xf32>
    %521 = arith.maximumf %519, %520 : vector<16x256xf32>
    %c14_456 = arith.constant 14 : index
    %c0_457 = arith.constant 0 : index
    %c0_458 = arith.constant 0 : index
    %522 = vector.load %arg3[%c14_456, %c0_457, %c0_458] : memref<16x1x256xf32, #tpu.memory_space<vmem>>, vector<1x1x256xf32>
    %523 = vector.shape_cast %522 : vector<1x1x256xf32> to vector<1x256xf32>
    %524 = vector.broadcast %523 : vector<1x256xf32> to vector<16x256xf32>
    %525 = arith.addf %521, %524 : vector<16x256xf32>
    %cst_459 = arith.constant 0.000000e+00 : f32
    %526 = vector.broadcast %cst_459 : f32 to vector<16x256xf32>
    %527 = arith.cmpf olt, %525, %526 : vector<16x256xf32>
    %cst_460 = arith.constant 1.000000e-01 : f32
    %528 = vector.broadcast %cst_460 : f32 to vector<16x256xf32>
    %529 = arith.mulf %525, %528 : vector<16x256xf32>
    %cst_461 = arith.constant 4.000000e+00 : f32
    %530 = vector.broadcast %cst_461 : f32 to vector<16x256xf32>
    %531 = arith.cmpf ogt, %525, %530 : vector<16x256xf32>
    %cst_462 = arith.constant 4.000000e+00 : f32
    %532 = vector.broadcast %cst_462 : f32 to vector<16x256xf32>
    %533 = arith.subf %525, %532 : vector<16x256xf32>
    %cst_463 = arith.constant 1.000000e-01 : f32
    %534 = vector.broadcast %cst_463 : f32 to vector<16x256xf32>
    %535 = arith.mulf %533, %534 : vector<16x256xf32>
    %cst_464 = arith.constant 4.000000e+00 : f32
    %536 = vector.broadcast %cst_464 : f32 to vector<16x256xf32>
    %537 = arith.addf %535, %536 : vector<16x256xf32>
    %538 = arith.select %531, %537, %525 : vector<16x256xi1>, vector<16x256xf32>
    %539 = arith.select %527, %529, %538 : vector<16x256xi1>, vector<16x256xf32>
    %540 = arith.addf %504, %539 : vector<16x256xf32>
    %c15 = arith.constant 15 : index
    %c0_465 = arith.constant 0 : index
    %c0_466 = arith.constant 0 : index
    %541 = vector.load %arg2[%c15, %c0_465, %c0_466] : memref<16x160x256xbf16, #tpu.memory_space<vmem>>, vector<1x160x256xbf16>
    %542 = vector.shape_cast %541 : vector<1x160x256xbf16> to vector<160x256xbf16>
    %c0_467 = arith.constant 0 : index
    %c15_468 = arith.constant 15 : index
    %c0_469 = arith.constant 0 : index
    %c0_470 = arith.constant 0 : index
    %543 = vector.load %arg1[%c0_467, %c15_468, %c0_469, %c0_470] : memref<4x16x16x160xbf16, #tpu.memory_space<vmem>>, vector<1x1x16x160xbf16>
    %544 = vector.shape_cast %543 : vector<1x1x16x160xbf16> to vector<16x160xbf16>
    %cst_471 = arith.constant dense<0.000000e+00> : vector<16x256xf32>
    %545 = tpu.matmul %544, %542, %cst_471 {dimension_numbers = #tpu.dot_dimension_numbers<[1], [0], [0], [1], [0, 0, 1, 1], [], []>} : vector<16x160xbf16>, vector<160x256xbf16>, vector<16x256xf32> -> vector<16x256xf32>
    %c1_472 = arith.constant 1 : index
    %c15_473 = arith.constant 15 : index
    %c0_474 = arith.constant 0 : index
    %c0_475 = arith.constant 0 : index
    %546 = vector.load %arg1[%c1_472, %c15_473, %c0_474, %c0_475] : memref<4x16x16x160xbf16, #tpu.memory_space<vmem>>, vector<1x1x16x160xbf16>
    %547 = vector.shape_cast %546 : vector<1x1x16x160xbf16> to vector<16x160xbf16>
    %cst_476 = arith.constant dense<0.000000e+00> : vector<16x256xf32>
    %548 = tpu.matmul %547, %542, %cst_476 {dimension_numbers = #tpu.dot_dimension_numbers<[1], [0], [0], [1], [0, 0, 1, 1], [], []>} : vector<16x160xbf16>, vector<160x256xbf16>, vector<16x256xf32> -> vector<16x256xf32>
    %c2_477 = arith.constant 2 : index
    %c15_478 = arith.constant 15 : index
    %c0_479 = arith.constant 0 : index
    %c0_480 = arith.constant 0 : index
    %549 = vector.load %arg1[%c2_477, %c15_478, %c0_479, %c0_480] : memref<4x16x16x160xbf16, #tpu.memory_space<vmem>>, vector<1x1x16x160xbf16>
    %550 = vector.shape_cast %549 : vector<1x1x16x160xbf16> to vector<16x160xbf16>
    %cst_481 = arith.constant dense<0.000000e+00> : vector<16x256xf32>
    %551 = tpu.matmul %550, %542, %cst_481 {dimension_numbers = #tpu.dot_dimension_numbers<[1], [0], [0], [1], [0, 0, 1, 1], [], []>} : vector<16x160xbf16>, vector<160x256xbf16>, vector<16x256xf32> -> vector<16x256xf32>
    %c3_482 = arith.constant 3 : index
    %c15_483 = arith.constant 15 : index
    %c0_484 = arith.constant 0 : index
    %c0_485 = arith.constant 0 : index
    %552 = vector.load %arg1[%c3_482, %c15_483, %c0_484, %c0_485] : memref<4x16x16x160xbf16, #tpu.memory_space<vmem>>, vector<1x1x16x160xbf16>
    %553 = vector.shape_cast %552 : vector<1x1x16x160xbf16> to vector<16x160xbf16>
    %cst_486 = arith.constant dense<0.000000e+00> : vector<16x256xf32>
    %554 = tpu.matmul %553, %542, %cst_486 {dimension_numbers = #tpu.dot_dimension_numbers<[1], [0], [0], [1], [0, 0, 1, 1], [], []>} : vector<16x160xbf16>, vector<160x256xbf16>, vector<16x256xf32> -> vector<16x256xf32>
    %555 = arith.maximumf %545, %548 : vector<16x256xf32>
    %556 = arith.maximumf %551, %554 : vector<16x256xf32>
    %557 = arith.maximumf %555, %556 : vector<16x256xf32>
    %c15_487 = arith.constant 15 : index
    %c0_488 = arith.constant 0 : index
    %c0_489 = arith.constant 0 : index
    %558 = vector.load %arg3[%c15_487, %c0_488, %c0_489] : memref<16x1x256xf32, #tpu.memory_space<vmem>>, vector<1x1x256xf32>
    %559 = vector.shape_cast %558 : vector<1x1x256xf32> to vector<1x256xf32>
    %560 = vector.broadcast %559 : vector<1x256xf32> to vector<16x256xf32>
    %561 = arith.addf %557, %560 : vector<16x256xf32>
    %cst_490 = arith.constant 0.000000e+00 : f32
    %562 = vector.broadcast %cst_490 : f32 to vector<16x256xf32>
    %563 = arith.cmpf olt, %561, %562 : vector<16x256xf32>
    %cst_491 = arith.constant 1.000000e-01 : f32
    %564 = vector.broadcast %cst_491 : f32 to vector<16x256xf32>
    %565 = arith.mulf %561, %564 : vector<16x256xf32>
    %cst_492 = arith.constant 4.000000e+00 : f32
    %566 = vector.broadcast %cst_492 : f32 to vector<16x256xf32>
    %567 = arith.cmpf ogt, %561, %566 : vector<16x256xf32>
    %cst_493 = arith.constant 4.000000e+00 : f32
    %568 = vector.broadcast %cst_493 : f32 to vector<16x256xf32>
    %569 = arith.subf %561, %568 : vector<16x256xf32>
    %cst_494 = arith.constant 1.000000e-01 : f32
    %570 = vector.broadcast %cst_494 : f32 to vector<16x256xf32>
    %571 = arith.mulf %569, %570 : vector<16x256xf32>
    %cst_495 = arith.constant 4.000000e+00 : f32
    %572 = vector.broadcast %cst_495 : f32 to vector<16x256xf32>
    %573 = arith.addf %571, %572 : vector<16x256xf32>
    %574 = arith.select %567, %573, %561 : vector<16x256xi1>, vector<16x256xf32>
    %575 = arith.select %563, %565, %574 : vector<16x256xi1>, vector<16x256xf32>
    %576 = arith.addf %540, %575 : vector<16x256xf32>
    %577 = arith.truncf %576 : vector<16x256xf32> to vector<16x256xbf16>
    %c0_496 = arith.constant 0 : index
    %c0_497 = arith.constant 0 : index
    %578 = vector.load %arg4[%c0_496, %c0_497] : memref<256x128xbf16, #tpu.memory_space<vmem>>, vector<256x128xbf16>
    %cst_498 = arith.constant dense<0.000000e+00> : vector<16x128xf32>
    %579 = tpu.matmul %577, %578, %cst_498 {dimension_numbers = #tpu.dot_dimension_numbers<[1], [0], [0], [1], [0, 0, 1, 1], [], []>} : vector<16x256xbf16>, vector<256x128xbf16>, vector<16x128xf32> -> vector<16x128xf32>
    %c0_499 = arith.constant 0 : index
    %c0_500 = arith.constant 0 : index
    %580 = vector.load %arg5[%c0_499, %c0_500] : memref<1x128xf32, #tpu.memory_space<vmem>>, vector<1x128xf32>
    %581 = vector.broadcast %580 : vector<1x128xf32> to vector<16x128xf32>
    %582 = arith.addf %579, %581 : vector<16x128xf32>
    %cst_501 = arith.constant 0.000000e+00 : f32
    %583 = vector.broadcast %cst_501 : f32 to vector<16x128xf32>
    %584 = arith.cmpf olt, %582, %583 : vector<16x128xf32>
    %cst_502 = arith.constant 1.000000e-01 : f32
    %585 = vector.broadcast %cst_502 : f32 to vector<16x128xf32>
    %586 = arith.mulf %582, %585 : vector<16x128xf32>
    %cst_503 = arith.constant 4.000000e+00 : f32
    %587 = vector.broadcast %cst_503 : f32 to vector<16x128xf32>
    %588 = arith.cmpf ogt, %582, %587 : vector<16x128xf32>
    %cst_504 = arith.constant 4.000000e+00 : f32
    %589 = vector.broadcast %cst_504 : f32 to vector<16x128xf32>
    %590 = arith.subf %582, %589 : vector<16x128xf32>
    %cst_505 = arith.constant 1.000000e-01 : f32
    %591 = vector.broadcast %cst_505 : f32 to vector<16x128xf32>
    %592 = arith.mulf %590, %591 : vector<16x128xf32>
    %cst_506 = arith.constant 4.000000e+00 : f32
    %593 = vector.broadcast %cst_506 : f32 to vector<16x128xf32>
    %594 = arith.addf %592, %593 : vector<16x128xf32>
    %595 = arith.select %588, %594, %582 : vector<16x128xi1>, vector<16x128xf32>
    %596 = arith.select %584, %586, %595 : vector<16x128xi1>, vector<16x128xf32>
    %597 = arith.truncf %596 : vector<16x128xf32> to vector<16x128xbf16>
    %c0_507 = arith.constant 0 : index
    %c0_508 = arith.constant 0 : index
    %598 = vector.load %arg6[%c0_507, %c0_508] : memref<128x128xbf16, #tpu.memory_space<vmem>>, vector<128x128xbf16>
    %cst_509 = arith.constant dense<0.000000e+00> : vector<16x128xf32>
    %599 = tpu.matmul %597, %598, %cst_509 {dimension_numbers = #tpu.dot_dimension_numbers<[1], [0], [0], [1], [0, 0, 1, 1], [], []>} : vector<16x128xbf16>, vector<128x128xbf16>, vector<16x128xf32> -> vector<16x128xf32>
    %c0_510 = arith.constant 0 : index
    %c0_511 = arith.constant 0 : index
    %600 = vector.load %arg7[%c0_510, %c0_511] : memref<1x128xf32, #tpu.memory_space<vmem>>, vector<1x128xf32>
    %601 = vector.broadcast %600 : vector<1x128xf32> to vector<16x128xf32>
    %602 = arith.addf %599, %601 : vector<16x128xf32>
    %cst_512 = arith.constant 0.000000e+00 : f32
    %603 = vector.broadcast %cst_512 : f32 to vector<16x128xf32>
    %604 = arith.cmpf olt, %602, %603 : vector<16x128xf32>
    %cst_513 = arith.constant 1.000000e-01 : f32
    %605 = vector.broadcast %cst_513 : f32 to vector<16x128xf32>
    %606 = arith.mulf %602, %605 : vector<16x128xf32>
    %cst_514 = arith.constant 3.000000e+00 : f32
    %607 = vector.broadcast %cst_514 : f32 to vector<16x128xf32>
    %608 = arith.cmpf ogt, %602, %607 : vector<16x128xf32>
    %cst_515 = arith.constant 3.000000e+00 : f32
    %609 = vector.broadcast %cst_515 : f32 to vector<16x128xf32>
    %610 = arith.subf %602, %609 : vector<16x128xf32>
    %cst_516 = arith.constant 1.000000e-01 : f32
    %611 = vector.broadcast %cst_516 : f32 to vector<16x128xf32>
    %612 = arith.mulf %610, %611 : vector<16x128xf32>
    %cst_517 = arith.constant 3.000000e+00 : f32
    %613 = vector.broadcast %cst_517 : f32 to vector<16x128xf32>
    %614 = arith.addf %612, %613 : vector<16x128xf32>
    %615 = arith.select %608, %614, %602 : vector<16x128xi1>, vector<16x128xf32>
    %616 = arith.select %604, %606, %615 : vector<16x128xi1>, vector<16x128xf32>
    %617 = arith.truncf %616 : vector<16x128xf32> to vector<16x128xbf16>
    %c0_518 = arith.constant 0 : index
    %c0_519 = arith.constant 0 : index
    %618 = vector.load %arg8[%c0_518, %c0_519] : memref<128x128xbf16, #tpu.memory_space<vmem>>, vector<128x128xbf16>
    %cst_520 = arith.constant dense<0.000000e+00> : vector<16x128xf32>
    %619 = tpu.matmul %617, %618, %cst_520 {dimension_numbers = #tpu.dot_dimension_numbers<[1], [0], [0], [1], [0, 0, 1, 1], [], []>} : vector<16x128xbf16>, vector<128x128xbf16>, vector<16x128xf32> -> vector<16x128xf32>
    %c0_521 = arith.constant 0 : index
    %c0_522 = arith.constant 0 : index
    %620 = vector.load %arg9[%c0_521, %c0_522] : memref<1x128xf32, #tpu.memory_space<vmem>>, vector<1x128xf32>
    %621 = vector.broadcast %620 : vector<1x128xf32> to vector<16x128xf32>
    %622 = arith.addf %619, %621 : vector<16x128xf32>
    %623 = tpu.iota {dimensions = array<i32: 1>} : vector<16x128xi32>
    %c10_i32 = arith.constant 10 : i32
    %624 = vector.broadcast %c10_i32 : i32 to vector<16x128xi32>
    %625 = arith.cmpi slt, %623, %624 : vector<16x128xi32>
    %cst_523 = arith.constant 0xFF800000 : f32
    %626 = vector.broadcast %cst_523 : f32 to vector<16x128xf32>
    %627 = arith.select %625, %622, %626 : vector<16x128xi1>, vector<16x128xf32>
    %cst_524 = arith.constant dense<0xFF800000> : vector<16xf32>
    %628 = vector.multi_reduction <maximumf>, %627, %cst_524 [1] : vector<16x128xf32> to vector<16xf32>
    %629 = vector.shape_cast %628 : vector<16xf32> to vector<16x1xf32>
    %630 = vector.broadcast %629 : vector<16x1xf32> to vector<16x128xf32>
    %631 = arith.subf %627, %630 : vector<16x128xf32>
    %632 = math.exp %631 : vector<16x128xf32>
    %cst_525 = arith.constant dense<0.000000e+00> : vector<16xf32>
    %633 = vector.multi_reduction <add>, %632, %cst_525 [1] : vector<16x128xf32> to vector<16xf32>
    %634 = vector.shape_cast %633 : vector<16xf32> to vector<16x1xf32>
    %635 = vector.broadcast %634 : vector<16x1xf32> to vector<16x128xf32>
    %636 = arith.divf %632, %635 : vector<16x128xf32>
    %c0_526 = arith.constant 0 : index
    %c0_527 = arith.constant 0 : index
    %637 = vector.load %arg10[%c0_526, %c0_527] : memref<16x128xf32, #tpu.memory_space<vmem>>, vector<16x128xf32>
    tpu.vector_store %arg10[%c0_526, %c0_527], %636 {strides = array<i32>} : memref<16x128xf32, #tpu.memory_space<vmem>>, vector<16x128xf32>,
    return
  }
  func.func @transform_0(%arg0: i32) -> (i32, i32, i32, i32) {
    %c0_i32 = arith.constant 0 : i32
    %c0_i32_0 = arith.constant 0 : i32
    %c0_i32_1 = arith.constant 0 : i32
    %c0_i32_2 = arith.constant 0 : i32
    return %c0_i32, %c0_i32_0, %arg0, %c0_i32_1 : i32, i32, i32, i32
  }
  func.func @transform_1(%arg0: i32) -> (i32, i32, i32) {
    %c0_i32 = arith.constant 0 : i32
    %c0_i32_0 = arith.constant 0 : i32
    %c0_i32_1 = arith.constant 0 : i32
    %c0_i32_2 = arith.constant 0 : i32
    return %c0_i32, %c0_i32_0, %c0_i32_1 : i32, i32, i32
  }
  func.func @transform_2(%arg0: i32) -> (i32, i32, i32) {
    %c0_i32 = arith.constant 0 : i32
    %c0_i32_0 = arith.constant 0 : i32
    %c0_i32_1 = arith.constant 0 : i32
    %c0_i32_2 = arith.constant 0 : i32
    return %c0_i32, %c0_i32_0, %c0_i32_1 : i32, i32, i32
  }
  func.func @transform_3(%arg0: i32) -> (i32, i32) {
    %c0_i32 = arith.constant 0 : i32
    %c0_i32_0 = arith.constant 0 : i32
    %c0_i32_1 = arith.constant 0 : i32
    return %c0_i32, %c0_i32_0 : i32, i32
  }
  func.func @transform_4(%arg0: i32) -> (i32, i32) {
    %c0_i32 = arith.constant 0 : i32
    %c0_i32_0 = arith.constant 0 : i32
    %c0_i32_1 = arith.constant 0 : i32
    return %c0_i32, %c0_i32_0 : i32, i32
  }
  func.func @transform_5(%arg0: i32) -> (i32, i32) {
    %c0_i32 = arith.constant 0 : i32
    %c0_i32_0 = arith.constant 0 : i32
    %c0_i32_1 = arith.constant 0 : i32
    return %c0_i32, %c0_i32_0 : i32, i32
  }
  func.func @transform_6(%arg0: i32) -> (i32, i32) {
    %c0_i32 = arith.constant 0 : i32
    %c0_i32_0 = arith.constant 0 : i32
    %c0_i32_1 = arith.constant 0 : i32
    return %c0_i32, %c0_i32_0 : i32, i32
  }
  func.func @transform_7(%arg0: i32) -> (i32, i32) {
    %c0_i32 = arith.constant 0 : i32
    %c0_i32_0 = arith.constant 0 : i32
    %c0_i32_1 = arith.constant 0 : i32
    return %c0_i32, %c0_i32_0 : i32, i32
  }
  func.func @transform_8(%arg0: i32) -> (i32, i32) {
    %c0_i32 = arith.constant 0 : i32
    %c0_i32_0 = arith.constant 0 : i32
    %c0_i32_1 = arith.constant 0 : i32
    return %c0_i32, %c0_i32_0 : i32, i32
  }
  func.func @transform_9(%arg0: i32) -> (i32, i32) {
    %c0_i32 = arith.constant 0 : i32
    %c0_i32_0 = arith.constant 0 : i32
    return %arg0, %c0_i32 : i32, i32
  }
}

</mosaic_0001>

<bundles_post_ra>
// kernel: brelu_lenet_forward.2
= control target key start
LH: loop header
LB: loop body
LE: loop exit
PB: predicated region body
PF: predicated region fallthrough
CT: control target
= control target key end

     0   :  { %s2239_s12 = smov 0   ;;  %s2241_s13 = smov 0   ;;  %s2726_s0 = inlined_call_operand.vmem [shape: bf16[4,288,32], index: 0, kind: input, shape index: {}]   ;;  %s2727_s1 = inlined_call_operand.vmem [shape: bf16[32,128], index: 1, kind: input, shape index: {}]   ;;  %s2728_s2 = inlined_call_operand.vmem [shape: f32[1,128], index: 2, kind: input, shape index: {}]   ;;  %s2729_s3 = inlined_call_operand.vmem [shape: bf16[288,128], index: 3, kind: output, shape index: {}]  }
   0x1   :  { %s2243_s14 = smov 0  }
   0x2 LB: > { %s1677_s15 = sadd.s32 4294967295, %s2215_s14   ;;  %s2256_s16 = sadd.s32 1, %s2215_s14   ;;  %s2215_s14 = sphi %s2243_s14, %s2736_s14   ;;  %s2211_s13 = sphi %s2241_s13, %s2735_s13   ;;  %s2207_s12 = sphi %s2239_s12, %s2734_s12  }
   0x3   : > { %s17_s17 = ssub.s32 %s2215_s14, %s2256_s16  ;;  %s20_s18 = sadd.s32 1, %s2211_s13 }
   0x4   : > { %p18_p0 = scmp.eq.s32.totalorder %s17_s17, 0  ;;  %p27_p1 = scmp.ne.s32.totalorder %s2211_s13, %s2207_s12 }
   0x5   : > { %p28_p2 = scmp.eq.s32.totalorder %s2215_s14, 0  ;;  %p1680_p4 = scmp.ge.s32.totalorder %s2215_s14, 2 }
   0x6   : > { %s2265_s19 = scalar_select %p18_p0, %s2211_s13, %s20_s18  }
   0x7   : > { %p29_p3 = por %p28_p2, %p27_p1  ;;  %127 = sbr.rel (%p1680_p4) target bundleno = 35 (0x23), region = 24 }
   0xc   : > { %130 = sbr.rel (!%p29_p3) target bundleno = 35 (0x23), region = 28  ;;  %s132_s20 = sand.u32 (%p29_p3), 1, %s2211_s13  }
   0xd   : > { %s1851_s21 = smul.u32 (%p29_p3), 72, %s2215_s14 }
   0xe   : > { %s2127_s22 = smul.u32 (%p29_p3), 288, %s132_s20 }
   0xf   : > { %s2273_s25 = scalar_lea.vmem (%p29_p3), %s2726_s0, %s1851_s21 }
  0x10   : > { %v154_v0 = vld [vmem:[%s2273_s25] sm:$0xff] (%p29_p3)   ;;  %v158_v1 = vld [vmem:[%s2273_s25 + $0x8] sm:$0xff] (%p29_p3)   ;;  %v162_v2 = vld [vmem:[%s2273_s25 + $0x10] sm:$0xff] (%p29_p3)   ;;  %s2278_s26 = scalar_lea.vmem (%p29_p3), [#allocation2], %s2127_s22 }
  0x11   : > { %155 = vst [vmem:[%s2278_s26] sm:$0xff] %v154_v0   ;;  %159 = vst [vmem:[%s2278_s26 + $0x8] sm:$0xff] %v158_v1   ;;  %v166_v3 = vld [vmem:[%s2273_s25 + $0x18] sm:$0xff]   ;;  %v170_v4 = vld [vmem:[%s2273_s25 + $0x20] sm:$0xff]  }
  0x12   : > { %163 = vst [vmem:[%s2278_s26 + $0x10] sm:$0xff] %v162_v2   ;;  %v174_v5 = vld [vmem:[%s2273_s25 + $0x28] sm:$0xff]   ;;  %167 = vst [vmem:[%s2278_s26 + $0x18] sm:$0xff] %v166_v3   ;;  %v178_v6 = vld [vmem:[%s2273_s25 + $0x30] sm:$0xff]  }
  0x13   : > { %171 = vst [vmem:[%s2278_s26 + $0x20] sm:$0xff] %v170_v4   ;;  %175 = vst [vmem:[%s2278_s26 + $0x28] sm:$0xff] %v174_v5   ;;  %v182_v7 = vld [vmem:[%s2273_s25 + $0x38] sm:$0xff]   ;;  %v186_v8 = vld [vmem:[%s2273_s25 + $0x40] sm:$0xff]  }
  0x14   : > { %179 = vst [vmem:[%s2278_s26 + $0x30] sm:$0xff] %v178_v6   ;;  %183 = vst [vmem:[%s2278_s26 + $0x38] sm:$0xff] %v182_v7   ;;  %v190_v9 = vld [vmem:[%s2273_s25 + $0x90] sm:$0xff]   ;;  %v194_v10 = vld [vmem:[%s2273_s25 + $0x98] sm:$0xff]  }
  0x15   : > { %187 = vst [vmem:[%s2278_s26 + $0x40] sm:$0xff] %v186_v8   ;;  %v198_v11 = vld [vmem:[%s2273_s25 + $0xa0] sm:$0xff]   ;;  %191 = vst [vmem:[%s2278_s26 + $0x48] sm:$0xff] %v190_v9   ;;  %v202_v12 = vld [vmem:[%s2273_s25 + $0xa8] sm:$0xff]  }
  0x16   : > { %195 = vst [vmem:[%s2278_s26 + $0x50] sm:$0xff] %v194_v10   ;;  %199 = vst [vmem:[%s2278_s26 + $0x58] sm:$0xff] %v198_v11   ;;  %v206_v13 = vld [vmem:[%s2273_s25 + $0xb0] sm:$0xff]   ;;  %v210_v14 = vld [vmem:[%s2273_s25 + $0xb8] sm:$0xff]  }
  0x17   : > { %203 = vst [vmem:[%s2278_s26 + $0x60] sm:$0xff] %v202_v12   ;;  %207 = vst [vmem:[%s2278_s26 + $0x68] sm:$0xff] %v206_v13   ;;  %v214_v15 = vld [vmem:[%s2273_s25 + $0xc0] sm:$0xff]   ;;  %v218_v16 = vld [vmem:[%s2273_s25 + $0xc8] sm:$0xff]  }
  0x18   : > { %211 = vst [vmem:[%s2278_s26 + $0x70] sm:$0xff] %v210_v14   ;;  %v222_v17 = vld [vmem:[%s2273_s25 + $0xd0] sm:$0xff]   ;;  %215 = vst [vmem:[%s2278_s26 + $0x78] sm:$0xff] %v214_v15   ;;  %v226_v18 = vld [vmem:[%s2273_s25 + $0x120] sm:$0xff]  }
  0x19   : > { %219 = vst [vmem:[%s2278_s26 + $0x80] sm:$0xff] %v218_v16   ;;  %223 = vst [vmem:[%s2278_s26 + $0x88] sm:$0xff] %v222_v17   ;;  %v230_v19 = vld [vmem:[%s2273_s25 + $0x128] sm:$0xff]   ;;  %v234_v20 = vld [vmem:[%s2273_s25 + $0x130] sm:$0xff]  }
  0x1a   : > { %227 = vst [vmem:[%s2278_s26 + $0x90] sm:$0xff] %v226_v18   ;;  %231 = vst [vmem:[%s2278_s26 + $0x98] sm:$0xff] %v230_v19   ;;  %v238_v21 = vld [vmem:[%s2273_s25 + $0x138] sm:$0xff]   ;;  %v242_v22 = vld [vmem:[%s2273_s25 + $0x140] sm:$0xff]  }
  0x1b   : > { %235 = vst [vmem:[%s2278_s26 + $0xa0] sm:$0xff] %v234_v20   ;;  %v246_v23 = vld [vmem:[%s2273_s25 + $0x148] sm:$0xff]   ;;  %239 = vst [vmem:[%s2278_s26 + $0xa8] sm:$0xff] %v238_v21   ;;  %v250_v24 = vld [vmem:[%s2273_s25 + $0x150] sm:$0xff]  }
  0x1c   : > { %243 = vst [vmem:[%s2278_s26 + $0xb0] sm:$0xff] %v242_v22   ;;  %247 = vst [vmem:[%s2278_s26 + $0xb8] sm:$0xff] %v246_v23   ;;  %v254_v25 = vld [vmem:[%s2273_s25 + $0x158] sm:$0xff]   ;;  %v258_v26 = vld [vmem:[%s2273_s25 + $0x160] sm:$0xff]  }
  0x1d   : > { %251 = vst [vmem:[%s2278_s26 + $0xc0] sm:$0xff] %v250_v24   ;;  %255 = vst [vmem:[%s2278_s26 + $0xc8] sm:$0xff] %v254_v25   ;;  %v262_v27 = vld [vmem:[%s2273_s25 + $0x1b0] sm:$0xff]   ;;  %v266_v28 = vld [vmem:[%s2273_s25 + $0x1b8] sm:$0xff]  }
  0x1e   : > { %259 = vst [vmem:[%s2278_s26 + $0xd0] sm:$0xff] %v258_v26   ;;  %v270_v29 = vld [vmem:[%s2273_s25 + $0x1c0] sm:$0xff]   ;;  %263 = vst [vmem:[%s2278_s26 + $0xd8] sm:$0xff] %v262_v27   ;;  %v274_v30 = vld [vmem:[%s2273_s25 + $0x1c8] sm:$0xff]  }
  0x1f   : > { %267 = vst [vmem:[%s2278_s26 + $0xe0] sm:$0xff] %v266_v28   ;;  %271 = vst [vmem:[%s2278_s26 + $0xe8] sm:$0xff] %v270_v29   ;;  %v278_v31 = vld [vmem:[%s2273_s25 + $0x1d0] sm:$0xff]   ;;  %v282_v32 = vld [vmem:[%s2273_s25 + $0x1d8] sm:$0xff]  }
  0x20   : > { %275 = vst [vmem:[%s2278_s26 + $0xf0] sm:$0xff] %v274_v30   ;;  %279 = vst [vmem:[%s2278_s26 + $0xf8] sm:$0xff] %v278_v31   ;;  %v286_v33 = vld [vmem:[%s2273_s25 + $0x1e0] sm:$0xff]   ;;  %v290_v34 = vld [vmem:[%s2273_s25 + $0x1e8] sm:$0xff]  }
  0x21   : > { %283 = vst [vmem:[%s2278_s26 + $0x100] sm:$0xff] %v282_v32   ;;  %v294_v35 = vld [vmem:[%s2273_s25 + $0x1f0] sm:$0xff]   ;;  %287 = vst [vmem:[%s2278_s26 + $0x108] sm:$0xff] %v286_v33  }
  0x22   : > { %291 = vst [vmem:[%s2278_s26 + $0x110] sm:$0xff] %v290_v34   ;;  %295 = vst [vmem:[%s2278_s26 + $0x118] sm:$0xff] %v294_v35  }
  0x23 PF: > { %p1682_p5 = scmp.ge.s32.totalorder %s2215_s14, 1  ;;  %p464_p6 = scmp.lt.s32.totalorder %s2215_s14, 3 }
  0x25   : > { %p465_p7 = pnand %p1682_p5, %p464_p6 }
  0x26   : > { %s471_s4 = sand.u32 (!%p465_p7), 1, %s2207_s12   ;;  %s495_s9 = smul.u32 (!%p465_p7), 18, %s1677_s15 }
  0x27   : > { %468 = sbr.rel (%p465_p7) target bundleno = 403 (0x193), region = 69 }
  0x28   : > { %s2128_s5 = smul.u32 (!%p465_p7), 288, %s471_s4  ;;  %p496_p8 = scmp.lt.s32.totalorder (!%p465_p7), %s495_s9, 35 }
  0x2a   : > { %s2366_s6 = scalar_lea.vmem (!%p465_p7), [#allocation2], %s2128_s5 }
  0x2c   : > { %v2155_v36 = vld [vmem:[%s2727_s1 + $0x8] sm:$0xff]   ;;  %v2217_v37 = vmov 0.0   ;;  %v2156_v38 = vld [vmem:[%s2727_s1] sm:$0xff]   ;;  %vm2218_vm0 = vmmov 0   ;;  %vm582_vm1 = vcmask 261120   ;;  %v2160_v42 = vld [vmem:[%s2366_s6 + $0x50] sm:$0xff]  }
  0x2d   : > { %1967 = vmatprep.subr.bf16.mxu0 %v2217_v37  ;;  %2007 = vmatprep.subr.bf16.mxu1 %v2217_v37  ;;  %v2157_v39 = vld [vmem:[%s2366_s6] sm:$0xff]   ;;  %v2158_v40 = vld [vmem:[%s2366_s6 + $0x48] sm:$0xff]   ;;  %v2161_v43 = vld [vmem:[%s2366_s6 + $0x10] sm:$0xff]   ;;  %s2738_s9 = smov (!%p496_p8, %s495_s9), 35 }
  0x2e   : > { %1968 = vmatpush3.bf16.msra.mxu0 %v2155_v36  ;;  %2008 = vmatpush3.bf16.msra.mxu1 %v2155_v36  ;;  %v2159_v41 = vld [vmem:[%s2366_s6 + $0x8] sm:$0xff]   ;;  %v2162_v44 = vld [vmem:[%s2366_s6 + $0x58] sm:$0xff]   ;;  %v2164_v46 = vld [vmem:[%s2366_s6 + $0x60] sm:$0xff]   ;;  %s1683_s10 = sshll.u32 %s2738_s9, 2 }
  0x2f   : > { %1969 = vmatprep.subr.bf16.mxu0 %v2217_v37  ;;  %2009 = vmatprep.subr.bf16.mxu1 %v2217_v37  ;;  %v2163_v45 = vld [vmem:[%s2366_s6 + $0x18] sm:$0xff]   ;;  %v2165_v47 = vld [vmem:[%s2366_s6 + $0x20] sm:$0xff]   ;;  %v2166_v48 = vld [vmem:[%s2366_s6 + $0x68] sm:$0xff]   ;;  %s2649_s14 = scalar_lea.vmem %s2729_s3, %s1683_s10 }
  0x30   : > { %1971 = vmatprep.mubr.msk.bf16.mxu0 %vm2218_vm0, %v2217_v37  ;;  %2011 = vmatprep.mubr.msk.bf16.mxu1 %vm2218_vm0, %v2217_v37  ;;  %v2167_v49 = vld [vmem:[%s2366_s6 + $0x28] sm:$0xff]   ;;  %v2168_v50 = vld [vmem:[%s2366_s6 + $0x70] sm:$0xff]   ;;  %v2170_v52 = vld [vmem:[%s2366_s6 + $0x78] sm:$0xff]  }
  0x31   : > { %v2169_v51 = vld [vmem:[%s2366_s6 + $0x30] sm:$0xff]   ;;  %v2171_v53 = vld [vmem:[%s2366_s6 + $0x38] sm:$0xff]   ;;  %v2172_v54 = vld [vmem:[%s2366_s6 + $0x80] sm:$0xff]  }
  0x32   : > { %1970 = vmatpush3.bf16.msra.mxu0 %v2156_v38  ;;  %2010 = vmatpush3.bf16.msra.mxu1 %v2156_v38  ;;  %v2173_v55 = vld [vmem:[%s2366_s6 + $0x40] sm:$0xff]   ;;  %v2174_v56 = vld [vmem:[%s2366_s6 + $0x88] sm:$0xff]   ;;  %v2175_v57 = vld [vmem:[%s2366_s6 + $0x90] sm:$0xff]  }
  0x33   : > { %2047 = vmatprep.subr.bf16.mxu0 %v2217_v37  ;;  %2087 = vmatprep.subr.bf16.mxu1 %v2217_v37  ;;  %v2176_v58 = vld [vmem:[%s2366_s6 + $0xd8] sm:$0xff]   ;;  %v2178_v60 = vld [vmem:[%s2366_s6 + $0xe0] sm:$0xff]   ;;  %v2180_v62 = vld [vmem:[%s2366_s6 + $0xe8] sm:$0xff]  }
  0x34   : > { %v2177_v59 = vld [vmem:[%s2366_s6 + $0x98] sm:$0xff]   ;;  %v2179_v61 = vld [vmem:[%s2366_s6 + $0xa0] sm:$0xff]   ;;  %v2181_v63 = vld [vmem:[%s2366_s6 + $0xa8] sm:$0xff]  }
  0x35   : > { %1972 = vmatmul.mubr.msk.bf16.vlgmr.msra.gmra.mxu0 %vm582_vm1, %v2157_v39  ;;  %2012 = vmatmul.mubr.msk.bf16.vlgmr.msra.gmra.mxu1 %vm582_vm1, %v2158_v40  ;;  %v2182_v0 = vld [vmem:[%s2366_s6 + $0xf0] sm:$0xff]   ;;  %v2184_v2 = vld [vmem:[%s2366_s6 + $0xf8] sm:$0xff]   ;;  %v2186_v4 = vld [vmem:[%s2366_s6 + $0x100] sm:$0xff]  }
  0x36   : > { %2048 = vmatpush3.bf16.msra.mxu0 %v2155_v36  ;;  %2088 = vmatpush3.bf16.msra.mxu1 %v2155_v36  ;;  %v2183_v1 = vld [vmem:[%s2366_s6 + $0xb0] sm:$0xff]   ;;  %v2185_v3 = vld [vmem:[%s2366_s6 + $0xb8] sm:$0xff]   ;;  %v2187_v5 = vld [vmem:[%s2366_s6 + $0xc0] sm:$0xff]  }
  0x37   : > { %1975 = vmatprep.mubr.msk.bf16.mxu0 %vm2218_vm0, %v2217_v37  ;;  %2015 = vmatprep.mubr.msk.bf16.mxu1 %vm2218_vm0, %v2217_v37  ;;  %v2188_v6 = vld [vmem:[%s2366_s6 + $0x108] sm:$0xff]   ;;  %v2190_v8 = vld [vmem:[%s2366_s6 + $0x110] sm:$0xff]   ;;  %v2192_v10 = vld [vmem:[%s2366_s6 + $0x118] sm:$0xff]  }
  0x38   : > { %2049 = vmatprep.subr.bf16.mxu0 %v2217_v37  ;;  %2089 = vmatprep.subr.bf16.mxu1 %v2217_v37  ;;  %v2189_v7 = vld [vmem:[%s2366_s6 + $0xc8] sm:$0xff]   ;;  %v2191_v9 = vld [vmem:[%s2366_s6 + $0xd0] sm:$0xff]  }
  0x3a   : > { %2050 = vmatpush3.bf16.msra.mxu0 %v2156_v38  ;;  %2090 = vmatpush3.bf16.msra.mxu1 %v2156_v38 }
  0x3d   : > { %1976 = vmatmul.mubr.msk.bf16.gmra.mxu0 %vm582_vm1, %v2159_v41  ;;  %2016 = vmatmul.mubr.msk.bf16.gmra.mxu1 %vm582_vm1, %v2160_v42 }
  0x3e   : > { %1979 = vmatprep.mubr.msk.bf16.mxu0 %vm2218_vm0, %v2217_v37  ;;  %2019 = vmatprep.mubr.msk.bf16.mxu1 %vm2218_vm0, %v2217_v37 }
  0x45   : > { %1980 = vmatmul.mubr.msk.bf16.gmra.mxu0 %vm582_vm1, %v2161_v43  ;;  %2020 = vmatmul.mubr.msk.bf16.gmra.mxu1 %vm582_vm1, %v2162_v44 }
  0x46   : > { %1983 = vmatprep.mubr.msk.bf16.mxu0 %vm2218_vm0, %v2217_v37  ;;  %2023 = vmatprep.mubr.msk.bf16.mxu1 %vm2218_vm0, %v2217_v37 }
  0x4d   : > { %1984 = vmatmul.mubr.msk.bf16.gmra.mxu0 %vm582_vm1, %v2163_v45  ;;  %2024 = vmatmul.mubr.msk.bf16.gmra.mxu1 %vm582_vm1, %v2164_v46 }
  0x4e   : > { %1987 = vmatprep.mubr.msk.bf16.mxu0 %vm2218_vm0, %v2217_v37  ;;  %2027 = vmatprep.mubr.msk.bf16.mxu1 %vm2218_vm0, %v2217_v37 }
  0x55   : > { %1988 = vmatmul.mubr.msk.bf16.gmra.mxu0 %vm582_vm1, %v2165_v47  ;;  %2028 = vmatmul.mubr.msk.bf16.gmra.mxu1 %vm582_vm1, %v2166_v48 }
  0x56   : > { %1991 = vmatprep.mubr.msk.bf16.mxu0 %vm2218_vm0, %v2217_v37  ;;  %2031 = vmatprep.mubr.msk.bf16.mxu1 %vm2218_vm0, %v2217_v37 }
  0x5d   : > { %1992 = vmatmul.mubr.msk.bf16.gmra.mxu0 %vm582_vm1, %v2167_v49  ;;  %2032 = vmatmul.mubr.msk.bf16.gmra.mxu1 %vm582_vm1, %v2168_v50 }
  0x5e   : > { %1995 = vmatprep.mubr.msk.bf16.mxu0 %vm2218_vm0, %v2217_v37  ;;  %2035 = vmatprep.mubr.msk.bf16.mxu1 %vm2218_vm0, %v2217_v37 }
  0x65   : > { %1996 = vmatmul.mubr.msk.bf16.gmra.mxu0 %vm582_vm1, %v2169_v51  ;;  %2036 = vmatmul.mubr.msk.bf16.gmra.mxu1 %vm582_vm1, %v2170_v52 }
  0x66   : > { %1999 = vmatprep.mubr.msk.bf16.mxu0 %vm2218_vm0, %v2217_v37  ;;  %2039 = vmatprep.mubr.msk.bf16.mxu1 %vm2218_vm0, %v2217_v37 }
  0x6d   : > { %2000 = vmatmul.mubr.msk.bf16.gmra.mxu0 %vm582_vm1, %v2171_v53  ;;  %2040 = vmatmul.mubr.msk.bf16.gmra.mxu1 %vm582_vm1, %v2172_v54 }
  0x6e   : > { %2003 = vmatprep.mubr.msk.bf16.mxu0 %vm2218_vm0, %v2217_v37  ;;  %2043 = vmatprep.mubr.msk.bf16.mxu1 %vm2218_vm0, %v2217_v37 }
  0x75   : > { %2004 = vmatmul.mubr.msk.bf16.gmra.mxu0 %vm582_vm1, %v2173_v55  ;;  %2044 = vmatmul.mubr.msk.bf16.gmra.mxu1 %vm582_vm1, %v2174_v56 }
  0x76   : > { %2051 = vmatprep.mubr.msk.bf16.mxu0 %vm2218_vm0, %v2217_v37  ;;  %2091 = vmatprep.mubr.msk.bf16.mxu1 %vm2218_vm0, %v2217_v37 }
  0x7d   : > { %2052 = vmatmul.mubr.msk.bf16.vlgmr.msra.gmra.mxu0 %vm582_vm1, %v2175_v57  ;;  %2092 = vmatmul.mubr.msk.bf16.vlgmr.msra.gmra.mxu1 %vm582_vm1, %v2176_v58 }
  0x7e   : > { %2055 = vmatprep.mubr.msk.bf16.mxu0 %vm2218_vm0, %v2217_v37  ;;  %2095 = vmatprep.mubr.msk.bf16.mxu1 %vm2218_vm0, %v2217_v37 }
  0x85   : > { %2056 = vmatmul.mubr.msk.bf16.gmra.mxu0 %vm582_vm1, %v2177_v59  ;;  %2096 = vmatmul.mubr.msk.bf16.gmra.mxu1 %vm582_vm1, %v2178_v60 }
  0x86   : > { %2059 = vmatprep.mubr.msk.bf16.mxu0 %vm2218_vm0, %v2217_v37  ;;  %2099 = vmatprep.mubr.msk.bf16.mxu1 %vm2218_vm0, %v2217_v37 }
  0x8d   : > { %2060 = vmatmul.mubr.msk.bf16.gmra.mxu0 %vm582_vm1, %v2179_v61  ;;  %2100 = vmatmul.mubr.msk.bf16.gmra.mxu1 %vm582_vm1, %v2180_v62 }
  0x8e   : > { %2063 = vmatprep.mubr.msk.bf16.mxu0 %vm2218_vm0, %v2217_v37  ;;  %2103 = vmatprep.mubr.msk.bf16.mxu1 %vm2218_vm0, %v2217_v37 }
  0x95   : > { %2064 = vmatmul.mubr.msk.bf16.gmra.mxu0 %vm582_vm1, %v2181_v63  ;;  %2104 = vmatmul.mubr.msk.bf16.gmra.mxu1 %vm582_vm1, %v2182_v0 }
  0x96   : > { %2067 = vmatprep.mubr.msk.bf16.mxu0 %vm2218_vm0, %v2217_v37  ;;  %2107 = vmatprep.mubr.msk.bf16.mxu1 %vm2218_vm0, %v2217_v37 }
  0x9d   : > { %2068 = vmatmul.mubr.msk.bf16.gmra.mxu0 %vm582_vm1, %v2183_v1  ;;  %2108 = vmatmul.mubr.msk.bf16.gmra.mxu1 %vm582_vm1, %v2184_v2 }
  0x9e   : > { %2071 = vmatprep.mubr.msk.bf16.mxu0 %vm2218_vm0, %v2217_v37  ;;  %2111 = vmatprep.mubr.msk.bf16.mxu1 %vm2218_vm0, %v2217_v37 }
  0xa5   : > { %2072 = vmatmul.mubr.msk.bf16.gmra.mxu0 %vm582_vm1, %v2185_v3  ;;  %2112 = vmatmul.mubr.msk.bf16.gmra.mxu1 %vm582_vm1, %v2186_v4 }
  0xa6   : > { %2075 = vmatprep.mubr.msk.bf16.mxu0 %vm2218_vm0, %v2217_v37  ;;  %2115 = vmatprep.mubr.msk.bf16.mxu1 %vm2218_vm0, %v2217_v37 }
  0xad   : > { %2076 = vmatmul.mubr.msk.bf16.gmra.mxu0 %vm582_vm1, %v2187_v5  ;;  %2116 = vmatmul.mubr.msk.bf16.gmra.mxu1 %vm582_vm1, %v2188_v6 }
  0xae   : > { %2079 = vmatprep.mubr.msk.bf16.mxu0 %vm2218_vm0, %v2217_v37  ;;  %2119 = vmatprep.mubr.msk.bf16.mxu1 %vm2218_vm0, %v2217_v37 }
  0xb5   : > { %2080 = vmatmul.mubr.msk.bf16.gmra.mxu0 %vm582_vm1, %v2189_v7  ;;  %2120 = vmatmul.mubr.msk.bf16.gmra.mxu1 %vm582_vm1, %v2190_v8 }
  0xb6   : > { %2083 = vmatprep.mubr.msk.bf16.mxu0 %vm2218_vm0, %v2217_v37  ;;  %2123 = vmatprep.mubr.msk.bf16.mxu1 %vm2218_vm0, %v2217_v37 }
  0xbd   : > { %2084 = vmatmul.mubr.msk.bf16.gmra.mxu0 %vm582_vm1, %v2191_v9  ;;  %2124 = vmatmul.mubr.msk.bf16.gmra.mxu1 %vm582_vm1, %v2192_v10 }
  0xf5   : > { %v2512_v11 = vpop.f32.mrf.mxu0  ;;  %v2514_v12 = vpop.f32.mrf.mxu1 }
  0xf6   : > { %v1303_v13 = vmax.f32 %v2512_v11, %v2514_v12 }
  0xf7   : > { %v1973_v14 = vpop.f32.mrf.mxu0  ;;  %v2013_v15 = vpop.f32.mrf.mxu1 }
  0xf9   : > { %v2518_v16 = vpop.f32.mrf.mxu0  ;;  %v2520_v17 = vpop.f32.mrf.mxu1 }
  0xfa   : > { %v1304_v18 = vmax.f32 %v2518_v16, %v2520_v17 }
  0xfb   : > { %v1974_v19 = vpop.f32.mrf.mxu0  ;;  %v2014_v20 = vpop.f32.mrf.mxu1 }
  0xfd   : > { %v2524_v21 = vpop.f32.mrf.mxu0  ;;  %v2526_v22 = vpop.f32.mrf.mxu1 }
  0xfe   : > { %v1305_v23 = vmax.f32 %v2524_v21, %v2526_v22 }
  0xff   : > { %v1977_v24 = vpop.f32.mrf.mxu0  ;;  %v2017_v25 = vpop.f32.mrf.mxu1 }
 0x101   : > { %v2530_v26 = vpop.f32.mrf.mxu0  ;;  %v2532_v27 = vpop.f32.mrf.mxu1 }
 0x102   : > { %v1306_v28 = vmax.f32 %v2530_v26, %v2532_v27 }
 0x103   : > { %v1978_v29 = vpop.f32.mrf.mxu0  ;;  %v2018_v30 = vpop.f32.mrf.mxu1 }
 0x105   : > { %v2536_v31 = vpop.f32.mrf.mxu0  ;;  %v2538_v32 = vpop.f32.mrf.mxu1 }
 0x106   : > { %v1307_v33 = vmax.f32 %v2536_v31, %v2538_v32 }
 0x107   : > { %v1981_v34 = vpop.f32.mrf.mxu0  ;;  %v2021_v35 = vpop.f32.mrf.mxu1 }
 0x109   : > { %v2542_v36 = vpop.f32.mrf.mxu0  ;;  %v2544_v37 = vpop.f32.mrf.mxu1 }
 0x10a   : > { %v1308_v38 = vmax.f32 %v2542_v36, %v2544_v37 }
 0x10b   : > { %v1982_v39 = vpop.f32.mrf.mxu0  ;;  %v2022_v40 = vpop.f32.mrf.mxu1 }
 0x10d   : > { %v2548_v41 = vpop.f32.mrf.mxu0  ;;  %v2550_v42 = vpop.f32.mrf.mxu1 }
 0x10e   : > { %v1309_v43 = vmax.f32 %v2548_v41, %v2550_v42 }
 0x10f   : > { %v1985_v44 = vpop.f32.mrf.mxu0  ;;  %v2025_v45 = vpop.f32.mrf.mxu1 }
 0x111   : > { %v2554_v46 = vpop.f32.mrf.mxu0  ;;  %v2556_v47 = vpop.f32.mrf.mxu1 }
 0x112   : > { %v1310_v48 = vmax.f32 %v2554_v46, %v2556_v47 }
 0x113   : > { %v1986_v49 = vpop.f32.mrf.mxu0  ;;  %v2026_v50 = vpop.f32.mrf.mxu1 }
 0x115   : > { %v2560_v51 = vpop.f32.mrf.mxu0  ;;  %v2562_v52 = vpop.f32.mrf.mxu1 }
 0x116   : > { %v1311_v53 = vmax.f32 %v2560_v51, %v2562_v52 }
 0x117   : > { %v1989_v54 = vpop.f32.mrf.mxu0  ;;  %v2029_v55 = vpop.f32.mrf.mxu1 }
 0x119   : > { %v2566_v56 = vpop.f32.mrf.mxu0  ;;  %v2568_v57 = vpop.f32.mrf.mxu1 }
 0x11a   : > { %v1312_v58 = vmax.f32 %v2566_v56, %v2568_v57 }
 0x11b   : > { %v1990_v59 = vpop.f32.mrf.mxu0  ;;  %v2030_v60 = vpop.f32.mrf.mxu1 }
 0x11d   : > { %v2572_v61 = vpop.f32.mrf.mxu0  ;;  %v2574_v62 = vpop.f32.mrf.mxu1 }
 0x11e   : > { %v1313_v63 = vmax.f32 %v2572_v61, %v2574_v62 }
 0x11f   : > { %v1993_v0 = vpop.f32.mrf.mxu0  ;;  %v2033_v1 = vpop.f32.mrf.mxu1 }
 0x121   : > { %v2578_v2 = vpop.f32.mrf.mxu0  ;;  %v2580_v3 = vpop.f32.mrf.mxu1 }
 0x122   : > { %v1314_v4 = vmax.f32 %v2578_v2, %v2580_v3 }
 0x123   : > { %v1994_v5 = vpop.f32.mrf.mxu0  ;;  %v2034_v6 = vpop.f32.mrf.mxu1 }
 0x125   : > { %v2584_v7 = vpop.f32.mrf.mxu0  ;;  %v2586_v8 = vpop.f32.mrf.mxu1 }
 0x126   : > { %v1315_v9 = vmax.f32 %v2584_v7, %v2586_v8 }
 0x127   : > { %v1997_v10 = vpop.f32.mrf.mxu0  ;;  %v2037_v14 = vpop.f32.mrf.mxu1 }
 0x129   : > { %v2590_v15 = vpop.f32.mrf.mxu0  ;;  %v2592_v19 = vpop.f32.mrf.mxu1 }
 0x12a   : > { %v1316_v20 = vmax.f32 %v2590_v15, %v2592_v19 }
 0x12b   : > { %v1998_v24 = vpop.f32.mrf.mxu0  ;;  %v2038_v25 = vpop.f32.mrf.mxu1 }
 0x12d   : > { %v2596_v29 = vpop.f32.mrf.mxu0  ;;  %v2598_v30 = vpop.f32.mrf.mxu1 }
 0x12e   : > { %v2730_v15 = vmax.f32 %v2596_v29, %v2598_v30 }
 0x12f   : > { %v2001_v35 = vpop.f32.mrf.mxu0  ;;  %v2041_v39 = vpop.f32.mrf.mxu1 }
 0x130   : > { %v2623_v39 = vld [vmem:[%s2728_s2] ss:$0 sm:$0xff] }
 0x131   : > { %v2602_v40 = vpop.f32.mrf.mxu0  ;;  %v2604_v44 = vpop.f32.mrf.mxu1 }
 0x132   : > { %v2731_v29 = vmax.f32 %v2602_v40, %v2604_v44 }
 0x133   : > { %v2002_v49 = vpop.f32.mrf.mxu0  ;;  %v2042_v50 = vpop.f32.mrf.mxu1 }
 0x135   : > { %v2608_v54 = vpop.f32.mrf.mxu0  ;;  %v2610_v55 = vpop.f32.mrf.mxu1 }
 0x136   : > { %v2732_v40 = vmax.f32 %v2608_v54, %v2610_v55 }
 0x137   : > { %v2005_v60 = vpop.f32.mrf.mxu0  ;;  %v2045_v0 = vpop.f32.mrf.mxu1 }
 0x139   : > { %v2614_v1 = vpop.f32.mrf.mxu0  ;;  %v2616_v5 = vpop.f32.mrf.mxu1 }
 0x13a   : > { %v2733_v54 = vmax.f32 %v2614_v1, %v2616_v5 }
 0x13b   : > { %v2006_v10 = vpop.f32.mrf.mxu0  ;;  %v2046_v14 = vpop.f32.mrf.mxu1 }
 0x13d   : > { %v1036_v24 = vpop.f32.mrf.mxu0  ;;  %v1232_v25 = vpop.f32.mrf.mxu1 }
 0x13e   : > { %v1321_v35 = vmax.f32 %v1036_v24, %v1232_v25 }
 0x13f   : > { %v2053_v49 = vpop.f32.mrf.mxu0  ;;  %v2093_v50 = vpop.f32.mrf.mxu1 }
 0x140   : > { %v1339_v60 = vmax.f32 %v1303_v13, %v1321_v35 }
 0x141   : > { %v1039_v0 = vpop.f32.mrf.mxu0  ;;  %v1235_v6 = vpop.f32.mrf.mxu1 }
 0x142   : > { %v1363_v10 = vadd.f32 %v2623_v39, %v1339_v60  ;;  %v1322_v14 = vmax.f32 %v1039_v0, %v1235_v6 }
 0x143   : > { %v2054_v59 = vpop.f32.mrf.mxu0  ;;  %v2094_v24 = vpop.f32.mrf.mxu1 }
 0x144   : > { %v1813_v25 = vadd.f32 -4.0, %v1363_v10  ;;  %v1340_v49 = vmax.f32 %v1304_v18, %v1322_v14  ;;  %vm1417_vm2 = vcmp.gt.f32.partialorder %v1363_v10, 4.0  ;;  %vm1381_vm4 = vcmp.lt.f32.partialorder %v1363_v10, 0.0 }
 0x145   : > { %v1044_v50 = vpop.f32.mrf.mxu0  ;;  %v1240_v45 = vpop.f32.mrf.mxu1 }
 0x146   : > { %v1453_v34 = vmul.f32 0.1, %v1813_v25  ;;  %v1323_v11 = vmax.f32 %v1044_v50, %v1240_v45  ;;  %v1364_v12 = vadd.f32 %v2623_v39, %v1340_v49  ;;  %v1399_v49 = vmul.f32 0.1, %v1363_v10 }
 0x147   : > { %v2057_v13 = vpop.f32.mrf.mxu0  ;;  %v2097_v35 = vpop.f32.mrf.mxu1 }
 0x148   : > { %v1341_v6 = vmax.f32 %v1305_v23, %v1323_v11  ;;  %v1471_v59 = vadd.f32 4.0, %v1453_v34  ;;  %v1814_v60 = vadd.f32 -4.0, %v1364_v12  ;;  %v1400_v11 = vmul.f32 0.1, %v1364_v12 }
 0x149   : > { %v1047_v0 = vpop.f32.mrf.mxu0  ;;  %v1243_v16 = vpop.f32.mrf.mxu1  ;;  %vm1418_vm3 = vcmp.gt.f32.partialorder %v1364_v12, 4.0  ;;  %vm1382_vm5 = vcmp.lt.f32.partialorder %v1364_v12, 0.0 }
 0x14a   : > { %v1365_v17 = vadd.f32 %v2623_v39, %v1341_v6  ;;  %v1324_v18 = vmax.f32 %v1047_v0, %v1243_v16  ;;  %v1454_v14 = vmul.f32 0.1, %v1814_v60  ;;  %v1489_v50 = vsel %vm1417_vm2, %v1471_v59, %v1363_v10 }
 0x14b   : > { %v2058_v45 = vpop.f32.mrf.mxu0  ;;  %v2098_v24 = vpop.f32.mrf.mxu1  ;;  %v1507_v59 = vsel %vm1381_vm4, %v1399_v49, %v1489_v50 }
 0x14c   : > { %v1815_v25 = vadd.f32 -4.0, %v1365_v17  ;;  %v1472_v21 = vadd.f32 4.0, %v1454_v14  ;;  %v1342_v22 = vmax.f32 %v1306_v28, %v1324_v18  ;;  %vm1419_vm6 = vcmp.gt.f32.partialorder %v1365_v17, 4.0 }
 0x14d   : > { %v1052_v23 = vpop.f32.mrf.mxu0  ;;  %v1248_v34 = vpop.f32.mrf.mxu1  ;;  %vm1383_vm8 = vcmp.lt.f32.partialorder %v1365_v17, 0.0 }
 0x14e   : > { %v1455_v13 = vmul.f32 0.1, %v1815_v25  ;;  %v1325_v35 = vmax.f32 %v1052_v23, %v1248_v34  ;;  %v1490_v6 = vsel %vm1418_vm3, %v1472_v21, %v1364_v12  ;;  %v1366_v60 = vadd.f32 %v2623_v39, %v1342_v22 }
 0x14f   : > { %v2061_v0 = vpop.f32.mrf.mxu0  ;;  %v2101_v16 = vpop.f32.mrf.mxu1  ;;  %v1508_v26 = vsel %vm1382_vm5, %v1400_v11, %v1490_v6 }
 0x150   : > { %v1343_v27 = vmax.f32 %v1307_v33, %v1325_v35  ;;  %v1873_v28 = vpack.c.bf16 %v1508_v26, %v1507_v59  ;;  %v1473_v12 = vadd.f32 4.0, %v1455_v13  ;;  %v1816_v14 = vadd.f32 -4.0, %v1366_v60 }
 0x151   : > { %v1055_v10 = vpop.f32.mrf.mxu0  ;;  %v1251_v18 = vpop.f32.mrf.mxu1  ;;  %v1401_v33 = vmul.f32 0.1, %v1365_v17  ;;  %v1402_v13 = vmul.f32 0.1, %v1366_v60  ;;  %vm1420_vm7 = vcmp.gt.f32.partialorder %v1366_v60, 4.0  ;;  %vm1384_vm9 = vcmp.lt.f32.partialorder %v1366_v60, 0.0 }
 0x152   : > { %v1367_v45 = vadd.f32 %v2623_v39, %v1343_v27  ;;  %v1326_v24 = vmax.f32 %v1055_v10, %v1251_v18  ;;  %1874 = vst [vmem:[%s2649_s14] sm:$0xff] %v1873_v28   ;;  %v1456_v50 = vmul.f32 0.1, %v1816_v14  ;;  %v1491_v23 = vsel %vm1419_vm6, %v1473_v12, %v1365_v17 }
 0x153   : > { %v2062_v25 = vpop.f32.mrf.mxu0  ;;  %v2102_v49 = vpop.f32.mrf.mxu1  ;;  %v1509_v37 = vsel %vm1383_vm8, %v1401_v33, %v1491_v23 }
 0x154   : > { %v1817_v21 = vadd.f32 -4.0, %v1367_v45  ;;  %v1344_v22 = vmax.f32 %v1308_v38, %v1326_v24  ;;  %v1474_v34 = vadd.f32 4.0, %v1456_v50  ;;  %vm1421_vm10 = vcmp.gt.f32.partialorder %v1367_v45, 4.0 }
 0x155   : > { %v1060_v31 = vpop.f32.mrf.mxu0  ;;  %v1256_v32 = vpop.f32.mrf.mxu1  ;;  %v1403_v49 = vmul.f32 0.1, %v1367_v45  ;;  %vm1385_vm12 = vcmp.lt.f32.partialorder %v1367_v45, 0.0 }
 0x156   : > { %v1327_v11 = vmax.f32 %v1060_v31, %v1256_v32  ;;  %v1457_v35 = vmul.f32 0.1, %v1817_v21  ;;  %v1368_v6 = vadd.f32 %v2623_v39, %v1344_v22  ;;  %v1492_v59 = vsel %vm1420_vm7, %v1474_v34, %v1366_v60 }
 0x157   : > { %v2065_v0 = vpop.f32.mrf.mxu0  ;;  %v2105_v16 = vpop.f32.mrf.mxu1  ;;  %v1510_v38 = vsel %vm1384_vm9, %v1402_v13, %v1492_v59 }
 0x158   : > { %v1345_v36 = vmax.f32 %v1309_v43, %v1327_v11  ;;  %v1878_v28 = vpack.c.bf16 %v1510_v38, %v1509_v37  ;;  %v1475_v10 = vadd.f32 4.0, %v1457_v35  ;;  %v1818_v18 = vadd.f32 -4.0, %v1368_v6 }
 0x159   : > { %v1063_v26 = vpop.f32.mrf.mxu0  ;;  %v1259_v27 = vpop.f32.mrf.mxu1  ;;  %v1404_v31 = vmul.f32 0.1, %v1368_v6  ;;  %vm1422_vm11 = vcmp.gt.f32.partialorder %v1368_v6, 4.0  ;;  %vm1386_vm13 = vcmp.lt.f32.partialorder %v1368_v6, 0.0 }
 0x15a   : > { %v1369_v12 = vadd.f32 %v2623_v39, %v1345_v36  ;;  %v1328_v14 = vmax.f32 %v1063_v26, %v1259_v27  ;;  %1915 = vst [vmem:[%s2649_s14 + $0x8] sm:$0xff] %v1878_v28   ;;  %v1458_v17 = vmul.f32 0.1, %v1818_v18  ;;  %v1493_v50 = vsel %vm1421_vm10, %v1475_v10, %v1367_v45 }
 0x15b   : > { %v2066_v24 = vpop.f32.mrf.mxu0  ;;  %v2106_v25 = vpop.f32.mrf.mxu1  ;;  %v1511_v47 = vsel %vm1385_vm12, %v1403_v49, %v1493_v50 }
 0x15c   : > { %v1819_v60 = vadd.f32 -4.0, %v1369_v12  ;;  %v1346_v41 = vmax.f32 %v1310_v48, %v1328_v14  ;;  %v1476_v21 = vadd.f32 4.0, %v1458_v17  ;;  %vm1423_vm14 = vcmp.gt.f32.partialorder %v1369_v12, 4.0 }
 0x15d   : > { %v1068_v42 = vpop.f32.mrf.mxu0  ;;  %v1264_v43 = vpop.f32.mrf.mxu1  ;;  %v1405_v27 = vmul.f32 0.1, %v1369_v12  ;;  %vm1387_vm0 = vcmp.lt.f32.partialorder %v1369_v12, 0.0 }
 0x15e   : > { %v1329_v22 = vmax.f32 %v1068_v42, %v1264_v43  ;;  %v1459_v32 = vmul.f32 0.1, %v1819_v60  ;;  %v1370_v33 = vadd.f32 %v2623_v39, %v1346_v41  ;;  %v1494_v11 = vsel %vm1422_vm11, %v1476_v21, %v1368_v6 }
 0x15f   : > { %v2069_v23 = vpop.f32.mrf.mxu0  ;;  %v2109_v34 = vpop.f32.mrf.mxu1  ;;  %v1512_v48 = vsel %vm1386_vm13, %v1404_v31, %v1494_v11 }
 0x160   : > { %v1347_v46 = vmax.f32 %v1311_v53, %v1329_v22  ;;  %v1883_v0 = vpack.c.bf16 %v1512_v48, %v1511_v47  ;;  %v1477_v16 = vadd.f32 4.0, %v1459_v32  ;;  %v1820_v59 = vadd.f32 -4.0, %v1370_v33 }
 0x161   : > { %v1071_v13 = vpop.f32.mrf.mxu0  ;;  %v1267_v35 = vpop.f32.mrf.mxu1  ;;  %v1406_v14 = vmul.f32 0.1, %v1370_v33  ;;  %vm1424_vm15 = vcmp.gt.f32.partialorder %v1370_v33, 4.0  ;;  %vm1388_vm1 = vcmp.lt.f32.partialorder %v1370_v33, 0.0 }
 0x162   : > { %v1371_v36 = vadd.f32 %v2623_v39, %v1347_v46  ;;  %v1330_v37 = vmax.f32 %v1071_v13, %v1267_v35  ;;  %1916 = vst [vmem:[%s2649_s14 + $0x10] sm:$0xff] %v1883_v0   ;;  %v1460_v45 = vmul.f32 0.1, %v1820_v59  ;;  %v1495_v28 = vsel %vm1423_vm14, %v1477_v16, %v1369_v12 }
 0x163   : > { %v2070_v38 = vpop.f32.mrf.mxu0  ;;  %v2110_v26 = vpop.f32.mrf.mxu1  ;;  %v1513_v57 = vsel %vm1387_vm0, %v1405_v27, %v1495_v28 }
 0x164   : > { %v1821_v6 = vadd.f32 -4.0, %v1371_v36  ;;  %v1348_v51 = vmax.f32 %v1312_v58, %v1330_v37  ;;  %v1478_v10 = vadd.f32 4.0, %v1460_v45  ;;  %vm1425_vm2 = vcmp.gt.f32.partialorder %v1371_v36, 4.0 }
 0x165   : > { %v1076_v52 = vpop.f32.mrf.mxu0  ;;  %v1272_v53 = vpop.f32.mrf.mxu1  ;;  %v1407_v34 = vmul.f32 0.1, %v1371_v36  ;;  %vm1389_vm4 = vcmp.lt.f32.partialorder %v1371_v36, 0.0 }
 0x166   : > { %v1331_v18 = vmax.f32 %v1076_v52, %v1272_v53  ;;  %v1461_v24 = vmul.f32 0.1, %v1821_v6  ;;  %v1372_v25 = vadd.f32 %v2623_v39, %v1348_v51  ;;  %v1496_v41 = vsel %vm1424_vm15, %v1478_v10, %v1370_v33 }
 0x167   : > { %v2073_v17 = vpop.f32.mrf.mxu0  ;;  %v2113_v60 = vpop.f32.mrf.mxu1  ;;  %v1514_v58 = vsel %vm1388_vm1, %v1406_v14, %v1496_v41 }
 0x168   : > { %v1349_v56 = vmax.f32 %v1313_v63, %v1331_v18  ;;  %v1888_v49 = vpack.c.bf16 %v1514_v58, %v1513_v57  ;;  %v1479_v50 = vadd.f32 4.0, %v1461_v24  ;;  %v1822_v21 = vadd.f32 -4.0, %v1372_v25 }
 0x169   : > { %v1079_v42 = vpop.f32.mrf.mxu0  ;;  %v1275_v43 = vpop.f32.mrf.mxu1  ;;  %v1408_v48 = vmul.f32 0.1, %v1372_v25  ;;  %vm1426_vm3 = vcmp.gt.f32.partialorder %v1372_v25, 4.0  ;;  %vm1390_vm5 = vcmp.lt.f32.partialorder %v1372_v25, 0.0 }
 0x16a   : > { %v1373_v22 = vadd.f32 %v2623_v39, %v1349_v56  ;;  %v1332_v31 = vmax.f32 %v1079_v42, %v1275_v43  ;;  %1917 = vst [vmem:[%s2649_s14 + $0x18] sm:$0xff] %v1888_v49   ;;  %v1462_v12 = vmul.f32 0.1, %v1822_v21  ;;  %v1497_v11 = vsel %vm1425_vm2, %v1479_v50, %v1371_v36 }
 0x16b   : > { %v2074_v32 = vpop.f32.mrf.mxu0  ;;  %v2114_v23 = vpop.f32.mrf.mxu1  ;;  %v1515_v3 = vsel %vm1389_vm4, %v1407_v34, %v1497_v11 }
 0x16c   : > { %v1823_v33 = vadd.f32 -4.0, %v1373_v22  ;;  %v1350_v61 = vmax.f32 %v1314_v4, %v1332_v31  ;;  %v1480_v46 = vadd.f32 4.0, %v1462_v12  ;;  %vm1427_vm6 = vcmp.gt.f32.partialorder %v1373_v22, 4.0 }
 0x16d   : > { %v1084_v62 = vpop.f32.mrf.mxu0  ;;  %v1280_v63 = vpop.f32.mrf.mxu1  ;;  %v1409_v10 = vmul.f32 0.1, %v1373_v22  ;;  %vm1391_vm8 = vcmp.lt.f32.partialorder %v1373_v22, 0.0 }
 0x16e   : > { %v1333_v47 = vmax.f32 %v1084_v62, %v1280_v63  ;;  %v1463_v13 = vmul.f32 0.1, %v1823_v33  ;;  %v1374_v35 = vadd.f32 %v2623_v39, %v1350_v61  ;;  %v1498_v59 = vsel %vm1426_vm3, %v1480_v46, %v1372_v25 }
 0x16f   : > { %v2077_v0 = vpop.f32.mrf.mxu0  ;;  %v2117_v16 = vpop.f32.mrf.mxu1  ;;  %v1516_v4 = vsel %vm1390_vm5, %v1408_v48, %v1498_v59 }
 0x170   : > { %v1351_v2 = vmax.f32 %v1315_v9, %v1333_v47  ;;  %v1893_v26 = vpack.c.bf16 %v1516_v4, %v1515_v3  ;;  %v1481_v45 = vadd.f32 4.0, %v1463_v13  ;;  %v1824_v6 = vadd.f32 -4.0, %v1374_v35 }
 0x171   : > { %v1087_v37 = vpop.f32.mrf.mxu0  ;;  %v1283_v38 = vpop.f32.mrf.mxu1  ;;  %v1410_v25 = vmul.f32 0.1, %v1374_v35  ;;  %vm1428_vm7 = vcmp.gt.f32.partialorder %v1374_v35, 4.0  ;;  %vm1392_vm9 = vcmp.lt.f32.partialorder %v1374_v35, 0.0 }
 0x172   : > { %v1375_v51 = vadd.f32 %v2623_v39, %v1351_v2  ;;  %v1334_v52 = vmax.f32 %v1087_v37, %v1283_v38  ;;  %1918 = vst [vmem:[%s2649_s14 + $0x20] sm:$0xff] %v1893_v26   ;;  %v1464_v36 = vmul.f32 0.1, %v1824_v6  ;;  %v1499_v18 = vsel %vm1427_vm6, %v1481_v45, %v1373_v22 }
 0x173   : > { %v2078_v53 = vpop.f32.mrf.mxu0  ;;  %v2118_v27 = vpop.f32.mrf.mxu1 }
 0x174   : > { %v1825_v28 = vadd.f32 -4.0, %v1375_v51  ;;  %v1352_v7 = vmax.f32 %v1316_v20, %v1334_v52  ;;  %v1482_v14 = vadd.f32 4.0, %v1464_v36  ;;  %v1517_v20 = vsel %vm1391_vm8, %v1409_v10, %v1499_v18 }
 0x175   : > { %v1092_v8 = vpop.f32.mrf.mxu0  ;;  %v1288_v9 = vpop.f32.mrf.mxu1  ;;  %vm1429_vm10 = vcmp.gt.f32.partialorder %v1375_v51, 4.0  ;;  %v1411_v63 = vmul.f32 0.1, %v1375_v51  ;;  %vm1393_vm12 = vcmp.lt.f32.partialorder %v1375_v51, 0.0 }
 0x176   : > { %v1335_v24 = vmax.f32 %v1092_v8, %v1288_v9  ;;  %v1465_v17 = vmul.f32 0.1, %v1825_v28  ;;  %v1376_v60 = vadd.f32 %v2623_v39, %v1352_v7  ;;  %v1500_v57 = vsel %vm1428_vm7, %v1482_v14, %v1374_v35 }
 0x177   : > { %v2081_v41 = vpop.f32.mrf.mxu0  ;;  %v2121_v56 = vpop.f32.mrf.mxu1  ;;  %v1518_v58 = vsel %vm1392_vm9, %v1410_v25, %v1500_v57 }
 0x178   : > { %v1353_v19 = vmax.f32 %v2730_v15, %v1335_v24  ;;  %v1898_v49 = vpack.c.bf16 %v1518_v58, %v1517_v20  ;;  %v1483_v50 = vadd.f32 4.0, %v1465_v17  ;;  %v1826_v21 = vadd.f32 -4.0, %v1376_v60 }
 0x179   : > { %v1095_v42 = vpop.f32.mrf.mxu0  ;;  %v1291_v43 = vpop.f32.mrf.mxu1  ;;  %v1412_v47 = vmul.f32 0.1, %v1376_v60  ;;  %vm1430_vm11 = vcmp.gt.f32.partialorder %v1376_v60, 4.0  ;;  %vm1394_vm13 = vcmp.lt.f32.partialorder %v1376_v60, 0.0 }
 0x17a   : > { %v1377_v31 = vadd.f32 %v2623_v39, %v1353_v19  ;;  %v1336_v32 = vmax.f32 %v1095_v42, %v1291_v43  ;;  %1919 = vst [vmem:[%s2649_s14 + $0x28] sm:$0xff] %v1898_v49   ;;  %v1466_v22 = vmul.f32 0.1, %v1826_v21  ;;  %v1501_v34 = vsel %vm1429_vm10, %v1483_v50, %v1375_v51 }
 0x17b   : > { %v2082_v23 = vpop.f32.mrf.mxu0  ;;  %v2122_v12 = vpop.f32.mrf.mxu1  ;;  %v1519_v59 = vsel %vm1393_vm12, %v1411_v63, %v1501_v34 }
 0x17c   : > { %v1827_v33 = vadd.f32 -4.0, %v1377_v31  ;;  %v1354_v30 = vmax.f32 %v2731_v29, %v1336_v32  ;;  %v1484_v11 = vadd.f32 4.0, %v1466_v22  ;;  %vm1431_vm14 = vcmp.gt.f32.partialorder %v1377_v31, 4.0 }
 0x17d   : > { %v1100_v61 = vpop.f32.mrf.mxu0  ;;  %v1296_v62 = vpop.f32.mrf.mxu1  ;;  %v1413_v36 = vmul.f32 0.1, %v1377_v31  ;;  %vm1395_vm0 = vcmp.lt.f32.partialorder %v1377_v31, 0.0 }
 0x17e   : > { %v1337_v46 = vmax.f32 %v1100_v61, %v1296_v62  ;;  %v1467_v48 = vmul.f32 0.1, %v1827_v33  ;;  %v1378_v13 = vadd.f32 %v2623_v39, %v1354_v30  ;;  %v1502_v16 = vsel %vm1430_vm11, %v1484_v11, %v1376_v60 }
 0x17f   : > { %v2085_v35 = vpop.f32.mrf.mxu0  ;;  %v2125_v0 = vpop.f32.mrf.mxu1  ;;  %v1520_v2 = vsel %vm1394_vm13, %v1412_v47, %v1502_v16 }
 0x180   : > { %v1355_v44 = vmax.f32 %v2732_v40, %v1337_v46  ;;  %v1903_v37 = vpack.c.bf16 %v1520_v2, %v1519_v59  ;;  %v1485_v38 = vadd.f32 4.0, %v1467_v48  ;;  %v1828_v26 = vadd.f32 -4.0, %v1378_v13 }
 0x181   : > { %v1103_v3 = vpop.f32.mrf.mxu0  ;;  %v1299_v4 = vpop.f32.mrf.mxu1  ;;  %v1414_v8 = vmul.f32 0.1, %v1378_v13  ;;  %vm1432_vm15 = vcmp.gt.f32.partialorder %v1378_v13, 4.0  ;;  %vm1396_vm1 = vcmp.lt.f32.partialorder %v1378_v13, 0.0 }
 0x182   : > { %v1379_v45 = vadd.f32 %v2623_v39, %v1355_v44  ;;  %v1338_v6 = vmax.f32 %v1103_v3, %v1299_v4  ;;  %1920 = vst [vmem:[%s2649_s14 + $0x30] sm:$0xff] %v1903_v37   ;;  %v1468_v51 = vmul.f32 0.1, %v1828_v26  ;;  %v1503_v28 = vsel %vm1431_vm14, %v1485_v38, %v1377_v31 }
 0x183   : > { %v2086_v52 = vpop.f32.mrf.mxu0  ;;  %v2126_v53 = vpop.f32.mrf.mxu1  ;;  %v1521_v14 = vsel %vm1395_vm0, %v1413_v36, %v1503_v28 }
 0x184   : > { %v1829_v27 = vadd.f32 -4.0, %v1379_v45  ;;  %v1356_v55 = vmax.f32 %v2733_v54, %v1338_v6  ;;  %v1486_v7 = vadd.f32 4.0, %v1468_v51  ;;  %vm1433_vm2 = vcmp.gt.f32.partialorder %v1379_v45, 4.0 }
 0x185   : > { %v1415_v56 = vmul.f32 0.1, %v1379_v45  ;;  %vm1397_vm4 = vcmp.lt.f32.partialorder %v1379_v45, 0.0 }
 0x186   : > { %v1469_v9 = vmul.f32 0.1, %v1829_v27  ;;  %v1380_v10 = vadd.f32 %v2623_v39, %v1356_v55  ;;  %v1504_v18 = vsel %vm1432_vm15, %v1486_v7, %v1378_v13 }
 0x187   : > { %v1522_v24 = vsel %vm1396_vm1, %v1414_v8, %v1504_v18 }
 0x188   : > { %v1908_v25 = vpack.c.bf16 %v1522_v24, %v1521_v14  ;;  %v1487_v17 = vadd.f32 4.0, %v1469_v9  ;;  %v1830_v60 = vadd.f32 -4.0, %v1380_v10  ;;  %v1416_v57 = vmul.f32 0.1, %v1380_v10 }
 0x189   : > { %vm1434_vm3 = vcmp.gt.f32.partialorder %v1380_v10, 4.0  ;;  %vm1398_vm5 = vcmp.lt.f32.partialorder %v1380_v10, 0.0 }
 0x18a   : > { %1921 = vst [vmem:[%s2649_s14 + $0x38] sm:$0xff] %v1908_v25   ;;  %v1470_v1 = vmul.f32 0.1, %v1830_v60  ;;  %v1505_v5 = vsel %vm1433_vm2, %v1487_v17, %v1379_v45 }
 0x18b   : > { %v1523_v15 = vsel %vm1397_vm4, %v1415_v56, %v1505_v5 }
 0x18c   : > { %v1488_v41 = vadd.f32 4.0, %v1470_v1 }
 0x18e   : > { %v1506_v39 = vsel %vm1434_vm3, %v1488_v41, %v1380_v10 }
 0x18f   : > { %v1524_v19 = vsel %vm1398_vm5, %v1416_v57, %v1506_v39 }
 0x190   : > { %v1913_v20 = vpack.c.bf16 %v1524_v19, %v1523_v15 }
 0x192   : > { %1922 = vst [vmem:[%s2649_s14 + $0x40] sm:$0xff] %v1913_v20  }
 0x193 PF: > { %p10_p9 = scmp.ge.s32.totalorder %s2256_s16, 4   ;;  %s2734_s12 = smov %s2211_s13 }
 0x194   : > { %s2735_s13 = smov %s2265_s19  ;;  %s2736_s14 = smov %s2256_s16 }
 0x195   :  { %12 = sbr.rel (!%p10_p9) target bundleno = 2 (0x2), region = 111 }

// kernel: brelu_lenet_forward.3
= control target key start
LH: loop header
LB: loop body
LE: loop exit
PB: predicated region body
PF: predicated region fallthrough
CT: control target
= control target key end

     0   :  { %vm164_vm0 = vcmask 261120   ;;  %s13184_s1 = inlined_call_operand.vmem [shape: bf16[16,160,256], index: 1, kind: input, shape index: {}]   ;;  %s13185_s0 = inlined_call_operand.vmem [shape: bf16[4,16,16,160], index: 0, kind: input, shape index: {}]   ;;  %s13186_s2 = inlined_call_operand.vmem [shape: f32[16,1,256], index: 2, kind: input, shape index: {}]   ;;  %s13187_s3 = inlined_call_operand.vmem [shape: bf16[256,128], index: 3, kind: input, shape index: {}]   ;;  %s13188_s5 = inlined_call_operand.vmem [shape: bf16[128,128], index: 5, kind: input, shape index: {}]   ;;  %s13189_s7 = inlined_call_operand.vmem [shape: bf16[128,128], index: 7, kind: input, shape index: {}]   ;;  %s13190_s4 = inlined_call_operand.vmem [shape: f32[1,128], index: 4, kind: input, shape index: {}]   ;;  %s13191_s6 = inlined_call_operand.vmem [shape: f32[1,128], index: 6, kind: input, shape index: {}]   ;;  %s13192_s8 = inlined_call_operand.vmem [shape: f32[1,128], index: 8, kind: input, shape index: {}]   ;;  %s13193_s9 = inlined_call_operand.vmem [shape: f32[16,128], index: 9, kind: output, shape index: {}]  }
   0x1   :  { %v9089_v0 = vld [vmem:[%s13184_s1 + $0x74] ss:$8 sps:$4 sm:$0xff]   ;;  %v9094_v1 = vld [vmem:[%s13184_s1 + $0x70] ss:$8 sps:$4 sm:$0xff]   ;;  %v9101_v2 = vld [vmem:[%s13184_s1 + $0x64] ss:$8 sps:$4 sm:$0xff]  }
   0x2   :  { %168 = vmatprep.subr.bf16.mxu0 %v9089_v0  ;;  %226 = vmatprep.subr.bf16.mxu1 %v9089_v0  ;;  %v9108_v3 = vld [vmem:[%s13184_s1 + $0x60] ss:$8 sps:$4 sm:$0xff]   ;;  %v9115_v4 = vld [vmem:[%s13184_s1 + $0x54] ss:$8 sps:$4 sm:$0xff]   ;;  %v9122_v5 = vld [vmem:[%s13184_s1 + $0x50] ss:$8 sps:$4 sm:$0xff]  }
   0x3   :  { %169 = vmatpush1.bf16.msra.mxu0 %v9094_v1  ;;  %227 = vmatpush1.bf16.msra.mxu1 %v9094_v1  ;;  %v9129_v6 = vld [vmem:[%s13184_s1 + $0x44] ss:$8 sps:$4 sm:$0xff]   ;;  %v9136_v7 = vld [vmem:[%s13184_s1 + $0x40] ss:$8 sps:$4 sm:$0xff]   ;;  %v9143_v8 = vld [vmem:[%s13184_s1 + $0x34] ss:$8 sps:$4 sm:$0xff]  }
   0x4   :  { %170 = vmatprep.subr.bf16.mxu0 %v9101_v2  ;;  %228 = vmatprep.subr.bf16.mxu1 %v9101_v2  ;;  %v8354_v9 = vld [vmem:[%s13185_s0 + $0x4] ss:$8 sps:$4 sm:$0xff]   ;;  %v9153_v10 = vld [vmem:[%s13184_s1 + $0x30] ss:$8 sps:$4 sm:$0xff]   ;;  %v8339_v13 = vld [vmem:[%s13184_s1 + $0x20] ss:$8 sps:$4 sm:$0xff]  }
   0x5   :  { %v8357_v11 = vld [vmem:[%s13185_s0 + $0x104] ss:$8 sps:$4 sm:$0xff]   ;;  %7206 = vmatprep.mubr.msk.bf16.mxu0 %vm164_vm0, %v8354_v9  ;;  %v8340_v14 = vld [vmem:[%s13184_s1 + $0x14] ss:$8 sps:$4 sm:$0xff]   ;;  %v8342_v15 = vld [vmem:[%s13184_s1 + $0x10] ss:$8 sps:$4 sm:$0xff]  }
   0x6   :  { %v8337_v12 = vld [vmem:[%s13184_s1 + $0x24] ss:$8 sps:$4 sm:$0xff]   ;;  %7211 = vmatprep.mubr.msk.bf16.mxu1 %vm164_vm0, %v8357_v11  ;;  %v8345_v17 = vld [vmem:[%s13184_s1] ss:$8 sps:$4 sm:$0xff]   ;;  %v8346_v18 = vld [vmem:[%s13184_s1 + $0x94] ss:$8 sps:$4 sm:$0xff]  }
   0x7   :  { %171 = vmatpush1.bf16.msra.mxu0 %v9108_v3  ;;  %229 = vmatpush1.bf16.msra.mxu1 %v9108_v3  ;;  %v8343_v16 = vld [vmem:[%s13184_s1 + $0x4] ss:$8 sps:$4 sm:$0xff]   ;;  %v8348_v19 = vld [vmem:[%s13184_s1 + $0x90] ss:$8 sps:$4 sm:$0xff]   ;;  %v8351_v21 = vld [vmem:[%s13184_s1 + $0x80] ss:$8 sps:$4 sm:$0xff]  }
   0x8   :  { %172 = vmatprep.subr.bf16.mxu0 %v9115_v4  ;;  %230 = vmatprep.subr.bf16.mxu1 %v9115_v4  ;;  %v8349_v20 = vld [vmem:[%s13184_s1 + $0x84] ss:$8 sps:$4 sm:$0xff]   ;;  %v8352_v22 = vld [vmem:[%s13185_s0] ss:$8 sps:$4 sm:$0xff]   ;;  %v9231_v26 = vld [vmem:[%s13184_s1 + $0x114] ss:$8 sps:$4 sm:$0xff]  }
   0x9   :  { %v8355_v23 = vld [vmem:[%s13185_s0 + $0x100] ss:$8 sps:$4 sm:$0xff]   ;;  %v8358_v24 = vld [vmem:[%s13185_s0 + $0x204] ss:$8 sps:$4 sm:$0xff]   ;;  %v9242_v29 = vld [vmem:[%s13184_s1 + $0x110] ss:$8 sps:$4 sm:$0xff]  }
   0xa   :  { %v8360_v25 = vld [vmem:[%s13185_s0 + $0x304] ss:$8 sps:$4 sm:$0xff]   ;;  %v8362_v27 = vld [vmem:[%s13185_s0 + $0x200] ss:$8 sps:$4 sm:$0xff]   ;;  %v8394_v31 = vld [vmem:[%s13185_s0 + $0x14] ss:$8 sps:$4 sm:$0xff]  }
   0xb   :  { %173 = vmatpush1.bf16.msra.mxu0 %v9122_v5  ;;  %231 = vmatpush1.bf16.msra.mxu1 %v9122_v5  ;;  %v8363_v28 = vld [vmem:[%s13185_s0 + $0x300] ss:$8 sps:$4 sm:$0xff]   ;;  %v9247_v30 = vld [vmem:[%s13184_s1 + $0x104] ss:$8 sps:$4 sm:$0xff]   ;;  %v8396_v32 = vld [vmem:[%s13185_s0 + $0x114] ss:$8 sps:$4 sm:$0xff]  }
   0xc   :  { %174 = vmatprep.subr.bf16.mxu0 %v9129_v6  ;;  %232 = vmatprep.subr.bf16.mxu1 %v9129_v6  ;;  %v9260_v33 = vld [vmem:[%s13184_s1 + $0x100] ss:$8 sps:$4 sm:$0xff]   ;;  %v9265_v34 = vld [vmem:[%s13184_s1 + $0xf4] ss:$8 sps:$4 sm:$0xff]   ;;  %v9274_v35 = vld [vmem:[%s13184_s1 + $0xf0] ss:$8 sps:$4 sm:$0xff]  }
   0xd   :  { %v9281_v36 = vld [vmem:[%s13184_s1 + $0xe4] ss:$8 sps:$4 sm:$0xff]   ;;  %v9290_v37 = vld [vmem:[%s13184_s1 + $0xe0] ss:$8 sps:$4 sm:$0xff]   ;;  %v9295_v38 = vld [vmem:[%s13184_s1 + $0xd4] ss:$8 sps:$4 sm:$0xff]  }
   0xe   :  { %v9304_v39 = vld [vmem:[%s13184_s1 + $0xd0] ss:$8 sps:$4 sm:$0xff]   ;;  %v9309_v40 = vld [vmem:[%s13184_s1 + $0xc4] ss:$8 sps:$4 sm:$0xff]   ;;  %v8381_v41 = vld [vmem:[%s13184_s1 + $0xc0] ss:$8 sps:$4 sm:$0xff]  }
   0xf   :  { %175 = vmatpush1.bf16.msra.mxu0 %v9136_v7  ;;  %233 = vmatpush1.bf16.msra.mxu1 %v9136_v7  ;;  %v8382_v42 = vld [vmem:[%s13184_s1 + $0xb4] ss:$8 sps:$4 sm:$0xff]   ;;  %v8384_v43 = vld [vmem:[%s13184_s1 + $0xb0] ss:$8 sps:$4 sm:$0xff]   ;;  %v8385_v44 = vld [vmem:[%s13184_s1 + $0xa4] ss:$8 sps:$4 sm:$0xff]  }
  0x10   :  { %176 = vmatprep.subr.bf16.mxu0 %v9143_v8  ;;  %234 = vmatprep.subr.bf16.mxu1 %v9143_v8  ;;  %v8387_v45 = vld [vmem:[%s13184_s1 + $0xa0] ss:$8 sps:$4 sm:$0xff]   ;;  %v8388_v46 = vld [vmem:[%s13184_s1 + $0x134] ss:$8 sps:$4 sm:$0xff]   ;;  %v8390_v47 = vld [vmem:[%s13184_s1 + $0x130] ss:$8 sps:$4 sm:$0xff]  }
  0x11   :  { %v8391_v48 = vld [vmem:[%s13184_s1 + $0x124] ss:$8 sps:$4 sm:$0xff]   ;;  %v8393_v49 = vld [vmem:[%s13184_s1 + $0x120] ss:$8 sps:$4 sm:$0xff]   ;;  %v8398_v50 = vld [vmem:[%s13185_s0 + $0x10] ss:$8 sps:$4 sm:$0xff]  }
  0x12   :  { %v8399_v51 = vld [vmem:[%s13185_s0 + $0x110] ss:$8 sps:$4 sm:$0xff]   ;;  %v8400_v52 = vld [vmem:[%s13185_s0 + $0x214] ss:$8 sps:$4 sm:$0xff]   ;;  %v9401_v58 = vld [vmem:[%s13184_s1 + $0x1a4] ss:$8 sps:$4 sm:$0xff]  }
  0x13   :  { %177 = vmatpush1.bf16.msra.mxu0 %v9153_v10  ;;  %235 = vmatpush1.bf16.msra.mxu1 %v9153_v10  ;;  %v8402_v53 = vld [vmem:[%s13185_s0 + $0x314] ss:$8 sps:$4 sm:$0xff]   ;;  %v8404_v54 = vld [vmem:[%s13185_s0 + $0x210] ss:$8 sps:$4 sm:$0xff]   ;;  %v8436_v59 = vld [vmem:[%s13185_s0 + $0x24] ss:$8 sps:$4 sm:$0xff]  }
  0x14   :  { %178 = vmatprep.subr.bf16.mxu0 %v8337_v12  ;;  %236 = vmatprep.subr.bf16.mxu1 %v8337_v12  ;;  %v8405_v55 = vld [vmem:[%s13185_s0 + $0x310] ss:$8 sps:$4 sm:$0xff]   ;;  %v9391_v56 = vld [vmem:[%s13184_s1 + $0x1b4] ss:$8 sps:$4 sm:$0xff]   ;;  %v8438_v60 = vld [vmem:[%s13185_s0 + $0x124] ss:$8 sps:$4 sm:$0xff]  }
  0x15   :  { %v9396_v57 = vld [vmem:[%s13184_s1 + $0x1b0] ss:$8 sps:$4 sm:$0xff]   ;;  %v9414_v61 = vld [vmem:[%s13184_s1 + $0x1a0] ss:$8 sps:$4 sm:$0xff]   ;;  %v9419_v62 = vld [vmem:[%s13184_s1 + $0x194] ss:$8 sps:$4 sm:$0xff]  }
  0x16   :  { %v9428_v63 = vld [vmem:[%s13184_s1 + $0x190] ss:$8 sps:$4 sm:$0xff]   ;;  %v8429_v9 = vld [vmem:[%s13184_s1 + $0x140] ss:$8 sps:$4 sm:$0xff]  }
  0x17   :  { %179 = vmatpush1.bf16.msra.mxu0 %v8339_v13  ;;  %237 = vmatpush1.bf16.msra.mxu1 %v8339_v13  ;;  %v8432_v11 = vld [vmem:[%s13184_s1 + $0x1d0] ss:$8 sps:$4 sm:$0xff]  }
  0x18   :  { %180 = vmatprep.subr.bf16.mxu0 %v8340_v14  ;;  %238 = vmatprep.subr.bf16.mxu1 %v8340_v14 }
  0x1b   :  { %181 = vmatpush1.bf16.msra.mxu0 %v8342_v15  ;;  %239 = vmatpush1.bf16.msra.mxu1 %v8342_v15 }
  0x1c   :  { %182 = vmatprep.subr.bf16.mxu0 %v8343_v16  ;;  %240 = vmatprep.subr.bf16.mxu1 %v8343_v16 }
  0x1f   :  { %183 = vmatpush1.bf16.msra.mxu0 %v8345_v17  ;;  %241 = vmatpush1.bf16.msra.mxu1 %v8345_v17 }
  0x20   :  { %196 = vmatprep.subr.bf16.mxu0 %v8346_v18  ;;  %254 = vmatprep.subr.bf16.mxu1 %v8346_v18 }
  0x23   :  { %197 = vmatpush2.bf16.msra.mxu0 %v8348_v19  ;;  %255 = vmatpush2.bf16.msra.mxu1 %v8348_v19 }
  0x24   :  { %198 = vmatprep.subr.bf16.mxu0 %v8349_v20  ;;  %256 = vmatprep.subr.bf16.mxu1 %v8349_v20 }
  0x27   :  { %199 = vmatpush2.bf16.msra.mxu0 %v8351_v21  ;;  %257 = vmatpush2.bf16.msra.mxu1 %v8351_v21 }
  0x28   :  { %284 = vmatprep.subr.bf16.mxu0 %v9089_v0  ;;  %342 = vmatprep.subr.bf16.mxu1 %v9089_v0  ;;  %v9435_v0 = vld [vmem:[%s13184_s1 + $0x184] ss:$8 sps:$4 sm:$0xff]  }
  0x2a   :  { %201 = vmatmul.mubr.bf16.vlgmr.msra.gmra.mxu0 %v8352_v22  ;;  %259 = vmatmul.mubr.bf16.vlgmr.msra.gmra.mxu1 %v8355_v23  ;;  %v9553_v23 = vld [vmem:[%s13184_s1 + $0x254] ss:$8 sps:$4 sm:$0xff]  }
  0x2b   :  { %285 = vmatpush1.bf16.msra.mxu0 %v9094_v1  ;;  %343 = vmatpush1.bf16.msra.mxu1 %v9094_v1  ;;  %v9444_v1 = vld [vmem:[%s13184_s1 + $0x180] ss:$8 sps:$4 sm:$0xff]  }
  0x2c   :  { %286 = vmatprep.subr.bf16.mxu0 %v9101_v2  ;;  %344 = vmatprep.subr.bf16.mxu1 %v9101_v2  ;;  %v9449_v2 = vld [vmem:[%s13184_s1 + $0x174] ss:$8 sps:$4 sm:$0xff]  }
  0x2d   :  { %7216 = vmatprep.mubr.msk.bf16.mxu0 %vm164_vm0, %v8358_v24  ;;  %7221 = vmatprep.mubr.msk.bf16.mxu1 %vm164_vm0, %v8360_v25 }
  0x2f   :  { %287 = vmatpush1.bf16.msra.mxu0 %v9108_v3  ;;  %345 = vmatpush1.bf16.msra.mxu1 %v9108_v3  ;;  %v9458_v3 = vld [vmem:[%s13184_s1 + $0x170] ss:$8 sps:$4 sm:$0xff]  }
  0x30   :  { %288 = vmatprep.subr.bf16.mxu0 %v9115_v4  ;;  %346 = vmatprep.subr.bf16.mxu1 %v9115_v4  ;;  %v9463_v4 = vld [vmem:[%s13184_s1 + $0x164] ss:$8 sps:$4 sm:$0xff]  }
  0x33   :  { %289 = vmatpush1.bf16.msra.mxu0 %v9122_v5  ;;  %347 = vmatpush1.bf16.msra.mxu1 %v9122_v5  ;;  %v8423_v5 = vld [vmem:[%s13184_s1 + $0x160] ss:$8 sps:$4 sm:$0xff]  }
  0x34   :  { %290 = vmatprep.subr.bf16.mxu0 %v9129_v6  ;;  %348 = vmatprep.subr.bf16.mxu1 %v9129_v6  ;;  %v8424_v6 = vld [vmem:[%s13184_s1 + $0x154] ss:$8 sps:$4 sm:$0xff]  }
  0x37   :  { %291 = vmatpush1.bf16.msra.mxu0 %v9136_v7  ;;  %349 = vmatpush1.bf16.msra.mxu1 %v9136_v7  ;;  %v8426_v7 = vld [vmem:[%s13184_s1 + $0x150] ss:$8 sps:$4 sm:$0xff]  }
  0x38   :  { %292 = vmatprep.subr.bf16.mxu0 %v9143_v8  ;;  %350 = vmatprep.subr.bf16.mxu1 %v9143_v8  ;;  %v8427_v8 = vld [vmem:[%s13184_s1 + $0x144] ss:$8 sps:$4 sm:$0xff]  }
  0x3b   :  { %293 = vmatpush1.bf16.msra.mxu0 %v9153_v10  ;;  %351 = vmatpush1.bf16.msra.mxu1 %v9153_v10  ;;  %v8430_v10 = vld [vmem:[%s13184_s1 + $0x1d4] ss:$8 sps:$4 sm:$0xff]  }
  0x3c   :  { %294 = vmatprep.subr.bf16.mxu0 %v8337_v12  ;;  %352 = vmatprep.subr.bf16.mxu1 %v8337_v12  ;;  %v8433_v12 = vld [vmem:[%s13184_s1 + $0x1c4] ss:$8 sps:$4 sm:$0xff]  }
  0x3f   :  { %295 = vmatpush1.bf16.msra.mxu0 %v8339_v13  ;;  %353 = vmatpush1.bf16.msra.mxu1 %v8339_v13  ;;  %v9500_v13 = vld [vmem:[%s13184_s1 + $0x1c0] ss:$8 sps:$4 sm:$0xff]  }
  0x40   :  { %296 = vmatprep.subr.bf16.mxu0 %v8340_v14  ;;  %354 = vmatprep.subr.bf16.mxu1 %v8340_v14  ;;  %v8440_v14 = vld [vmem:[%s13185_s0 + $0x20] ss:$8 sps:$4 sm:$0xff]  }
  0x43   :  { %297 = vmatpush1.bf16.msra.mxu0 %v8342_v15  ;;  %355 = vmatpush1.bf16.msra.mxu1 %v8342_v15  ;;  %v8441_v15 = vld [vmem:[%s13185_s0 + $0x120] ss:$8 sps:$4 sm:$0xff]  }
  0x44   :  { %298 = vmatprep.subr.bf16.mxu0 %v8343_v16  ;;  %356 = vmatprep.subr.bf16.mxu1 %v8343_v16  ;;  %v8442_v16 = vld [vmem:[%s13185_s0 + $0x224] ss:$8 sps:$4 sm:$0xff]  }
  0x47   :  { %299 = vmatpush1.bf16.msra.mxu0 %v8345_v17  ;;  %357 = vmatpush1.bf16.msra.mxu1 %v8345_v17  ;;  %v8444_v17 = vld [vmem:[%s13185_s0 + $0x324] ss:$8 sps:$4 sm:$0xff]  }
  0x48   :  { %312 = vmatprep.subr.bf16.mxu0 %v8346_v18  ;;  %370 = vmatprep.subr.bf16.mxu1 %v8346_v18 }
  0x4b   :  { %313 = vmatpush2.bf16.msra.mxu0 %v8348_v19  ;;  %371 = vmatpush2.bf16.msra.mxu1 %v8348_v19 }
  0x4c   :  { %314 = vmatprep.subr.bf16.mxu0 %v8349_v20  ;;  %372 = vmatprep.subr.bf16.mxu1 %v8349_v20 }
  0x4f   :  { %315 = vmatpush2.bf16.msra.mxu0 %v8351_v21  ;;  %373 = vmatpush2.bf16.msra.mxu1 %v8351_v21 }
  0x50   :  { %585 = vmatprep.subr.bf16.mxu0 %v9231_v26  ;;  %643 = vmatprep.subr.bf16.mxu1 %v9231_v26 }
  0x52   :  { %317 = vmatmul.mubr.bf16.vlgmr.msra.gmra.mxu0 %v8362_v27  ;;  %375 = vmatmul.mubr.bf16.vlgmr.msra.gmra.mxu1 %v8363_v28  ;;  %v8446_v27 = vld [vmem:[%s13185_s0 + $0x220] ss:$8 sps:$4 sm:$0xff]  }
  0x53   :  { %586 = vmatpush1.bf16.msra.mxu0 %v9242_v29  ;;  %644 = vmatpush1.bf16.msra.mxu1 %v9242_v29  ;;  %v8447_v28 = vld [vmem:[%s13185_s0 + $0x320] ss:$8 sps:$4 sm:$0xff]  }
  0x54   :  { %587 = vmatprep.subr.bf16.mxu0 %v9247_v30  ;;  %645 = vmatprep.subr.bf16.mxu1 %v9247_v30 }
  0x55   :  { %7270 = vmatprep.mubr.msk.bf16.mxu0 %vm164_vm0, %v8394_v31  ;;  %7275 = vmatprep.mubr.msk.bf16.mxu1 %vm164_vm0, %v8396_v32  ;;  %v9581_v31 = vld [vmem:[%s13184_s1 + $0x244] ss:$8 sps:$4 sm:$0xff]   ;;  %v8478_v32 = vld [vmem:[%s13185_s0 + $0x34] ss:$8 sps:$4 sm:$0xff]  }
  0x57   :  { %588 = vmatpush1.bf16.msra.mxu0 %v9260_v33  ;;  %646 = vmatpush1.bf16.msra.mxu1 %v9260_v33 }
  0x58   :  { %589 = vmatprep.subr.bf16.mxu0 %v9265_v34  ;;  %647 = vmatprep.subr.bf16.mxu1 %v9265_v34 }
  0x5b   :  { %590 = vmatpush1.bf16.msra.mxu0 %v9274_v35  ;;  %648 = vmatpush1.bf16.msra.mxu1 %v9274_v35 }
  0x5c   :  { %591 = vmatprep.subr.bf16.mxu0 %v9281_v36  ;;  %649 = vmatprep.subr.bf16.mxu1 %v9281_v36 }
  0x5f   :  { %592 = vmatpush1.bf16.msra.mxu0 %v9290_v37  ;;  %650 = vmatpush1.bf16.msra.mxu1 %v9290_v37 }
  0x60   :  { %593 = vmatprep.subr.bf16.mxu0 %v9295_v38  ;;  %651 = vmatprep.subr.bf16.mxu1 %v9295_v38 }
  0x63   :  { %594 = vmatpush1.bf16.msra.mxu0 %v9304_v39  ;;  %652 = vmatpush1.bf16.msra.mxu1 %v9304_v39 }
  0x64   :  { %595 = vmatprep.subr.bf16.mxu0 %v9309_v40  ;;  %653 = vmatprep.subr.bf16.mxu1 %v9309_v40 }
  0x67   :  { %596 = vmatpush1.bf16.msra.mxu0 %v8381_v41  ;;  %654 = vmatpush1.bf16.msra.mxu1 %v8381_v41 }
  0x68   :  { %597 = vmatprep.subr.bf16.mxu0 %v8382_v42  ;;  %655 = vmatprep.subr.bf16.mxu1 %v8382_v42 }
  0x6b   :  { %598 = vmatpush1.bf16.msra.mxu0 %v8384_v43  ;;  %656 = vmatpush1.bf16.msra.mxu1 %v8384_v43 }
  0x6c   :  { %599 = vmatprep.subr.bf16.mxu0 %v8385_v44  ;;  %657 = vmatprep.subr.bf16.mxu1 %v8385_v44 }
  0x6f   :  { %600 = vmatpush1.bf16.msra.mxu0 %v8387_v45  ;;  %658 = vmatpush1.bf16.msra.mxu1 %v8387_v45 }
  0x70   :  { %613 = vmatprep.subr.bf16.mxu0 %v8388_v46  ;;  %671 = vmatprep.subr.bf16.mxu1 %v8388_v46 }
  0x73   :  { %614 = vmatpush2.bf16.msra.mxu0 %v8390_v47  ;;  %672 = vmatpush2.bf16.msra.mxu1 %v8390_v47 }
  0x74   :  { %615 = vmatprep.subr.bf16.mxu0 %v8391_v48  ;;  %673 = vmatprep.subr.bf16.mxu1 %v8391_v48 }
  0x77   :  { %616 = vmatpush2.bf16.msra.mxu0 %v8393_v49  ;;  %674 = vmatpush2.bf16.msra.mxu1 %v8393_v49 }
  0x78   :  { %701 = vmatprep.subr.bf16.mxu0 %v9231_v26  ;;  %759 = vmatprep.subr.bf16.mxu1 %v9231_v26 }
  0x7a   :  { %618 = vmatmul.mubr.bf16.vlgmr.msra.gmra.mxu0 %v8398_v50  ;;  %676 = vmatmul.mubr.bf16.vlgmr.msra.gmra.mxu1 %v8399_v51  ;;  %v9705_v51 = vld [vmem:[%s13184_s1 + $0x264] ss:$8 sps:$4 sm:$0xff]  }
  0x7b   :  { %702 = vmatpush1.bf16.msra.mxu0 %v9242_v29  ;;  %760 = vmatpush1.bf16.msra.mxu1 %v9242_v29 }
  0x7c   :  { %703 = vmatprep.subr.bf16.mxu0 %v9247_v30  ;;  %761 = vmatprep.subr.bf16.mxu1 %v9247_v30  ;;  %v9574_v30 = vld [vmem:[%s13184_s1 + $0x250] ss:$8 sps:$4 sm:$0xff]  }
  0x7d   :  { %7280 = vmatprep.mubr.msk.bf16.mxu0 %vm164_vm0, %v8400_v52  ;;  %7285 = vmatprep.mubr.msk.bf16.mxu1 %vm164_vm0, %v8402_v53 }
  0x7f   :  { %704 = vmatpush1.bf16.msra.mxu0 %v9260_v33  ;;  %762 = vmatpush1.bf16.msra.mxu1 %v9260_v33  ;;  %v8480_v33 = vld [vmem:[%s13185_s0 + $0x134] ss:$8 sps:$4 sm:$0xff]  }
  0x80   :  { %705 = vmatprep.subr.bf16.mxu0 %v9265_v34  ;;  %763 = vmatprep.subr.bf16.mxu1 %v9265_v34  ;;  %v9594_v34 = vld [vmem:[%s13184_s1 + $0x240] ss:$8 sps:$4 sm:$0xff]  }
  0x83   :  { %706 = vmatpush1.bf16.msra.mxu0 %v9274_v35  ;;  %764 = vmatpush1.bf16.msra.mxu1 %v9274_v35  ;;  %v9601_v35 = vld [vmem:[%s13184_s1 + $0x234] ss:$8 sps:$4 sm:$0xff]  }
  0x84   :  { %707 = vmatprep.subr.bf16.mxu0 %v9281_v36  ;;  %765 = vmatprep.subr.bf16.mxu1 %v9281_v36  ;;  %v9610_v36 = vld [vmem:[%s13184_s1 + $0x230] ss:$8 sps:$4 sm:$0xff]  }
  0x87   :  { %708 = vmatpush1.bf16.msra.mxu0 %v9290_v37  ;;  %766 = vmatpush1.bf16.msra.mxu1 %v9290_v37  ;;  %v9617_v37 = vld [vmem:[%s13184_s1 + $0x224] ss:$8 sps:$4 sm:$0xff]  }
  0x88   :  { %709 = vmatprep.subr.bf16.mxu0 %v9295_v38  ;;  %767 = vmatprep.subr.bf16.mxu1 %v9295_v38  ;;  %v9624_v38 = vld [vmem:[%s13184_s1 + $0x220] ss:$8 sps:$4 sm:$0xff]  }
  0x8b   :  { %710 = vmatpush1.bf16.msra.mxu0 %v9304_v39  ;;  %768 = vmatpush1.bf16.msra.mxu1 %v9304_v39  ;;  %v9631_v39 = vld [vmem:[%s13184_s1 + $0x214] ss:$8 sps:$4 sm:$0xff]  }
  0x8c   :  { %711 = vmatprep.subr.bf16.mxu0 %v9309_v40  ;;  %769 = vmatprep.subr.bf16.mxu1 %v9309_v40  ;;  %v9638_v40 = vld [vmem:[%s13184_s1 + $0x210] ss:$8 sps:$4 sm:$0xff]  }
  0x8f   :  { %712 = vmatpush1.bf16.msra.mxu0 %v8381_v41  ;;  %770 = vmatpush1.bf16.msra.mxu1 %v8381_v41  ;;  %v9645_v41 = vld [vmem:[%s13184_s1 + $0x204] ss:$8 sps:$4 sm:$0xff]  }
  0x90   :  { %713 = vmatprep.subr.bf16.mxu0 %v8382_v42  ;;  %771 = vmatprep.subr.bf16.mxu1 %v8382_v42  ;;  %v9652_v42 = vld [vmem:[%s13184_s1 + $0x200] ss:$8 sps:$4 sm:$0xff]  }
  0x93   :  { %714 = vmatpush1.bf16.msra.mxu0 %v8384_v43  ;;  %772 = vmatpush1.bf16.msra.mxu1 %v8384_v43  ;;  %v9659_v43 = vld [vmem:[%s13184_s1 + $0x1f4] ss:$8 sps:$4 sm:$0xff]  }
  0x94   :  { %715 = vmatprep.subr.bf16.mxu0 %v8385_v44  ;;  %773 = vmatprep.subr.bf16.mxu1 %v8385_v44  ;;  %v9666_v44 = vld [vmem:[%s13184_s1 + $0x1f0] ss:$8 sps:$4 sm:$0xff]  }
  0x97   :  { %716 = vmatpush1.bf16.msra.mxu0 %v8387_v45  ;;  %774 = vmatpush1.bf16.msra.mxu1 %v8387_v45  ;;  %v9673_v45 = vld [vmem:[%s13184_s1 + $0x1e4] ss:$8 sps:$4 sm:$0xff]  }
  0x98   :  { %729 = vmatprep.subr.bf16.mxu0 %v8388_v46  ;;  %787 = vmatprep.subr.bf16.mxu1 %v8388_v46  ;;  %v9680_v46 = vld [vmem:[%s13184_s1 + $0x1e0] ss:$8 sps:$4 sm:$0xff]  }
  0x9b   :  { %730 = vmatpush2.bf16.msra.mxu0 %v8390_v47  ;;  %788 = vmatpush2.bf16.msra.mxu1 %v8390_v47  ;;  %v9687_v47 = vld [vmem:[%s13184_s1 + $0x274] ss:$8 sps:$4 sm:$0xff]  }
  0x9c   :  { %731 = vmatprep.subr.bf16.mxu0 %v8391_v48  ;;  %789 = vmatprep.subr.bf16.mxu1 %v8391_v48  ;;  %v9694_v48 = vld [vmem:[%s13184_s1 + $0x270] ss:$8 sps:$4 sm:$0xff]  }
  0x9f   :  { %732 = vmatpush2.bf16.msra.mxu0 %v8393_v49  ;;  %790 = vmatpush2.bf16.msra.mxu1 %v8393_v49 }
  0xa0   :  { %1003 = vmatprep.subr.bf16.mxu0 %v9391_v56  ;;  %1061 = vmatprep.subr.bf16.mxu1 %v9391_v56 }
  0xa2   :  { %734 = vmatmul.mubr.bf16.vlgmr.msra.gmra.mxu0 %v8404_v54  ;;  %792 = vmatmul.mubr.bf16.vlgmr.msra.gmra.mxu1 %v8405_v55  ;;  %v9712_v55 = vld [vmem:[%s13184_s1 + $0x260] ss:$8 sps:$4 sm:$0xff]  }
  0xa3   :  { %1004 = vmatpush1.bf16.msra.mxu0 %v9396_v57  ;;  %1062 = vmatpush1.bf16.msra.mxu1 %v9396_v57 }
  0xa4   :  { %1005 = vmatprep.subr.bf16.mxu0 %v9401_v58  ;;  %1063 = vmatprep.subr.bf16.mxu1 %v9401_v58 }
  0xa5   :  { %7335 = vmatprep.mubr.msk.bf16.mxu0 %vm164_vm0, %v8436_v59  ;;  %7340 = vmatprep.mubr.msk.bf16.mxu1 %vm164_vm0, %v8438_v60 }
  0xa7   :  { %1006 = vmatpush1.bf16.msra.mxu0 %v9414_v61  ;;  %1064 = vmatpush1.bf16.msra.mxu1 %v9414_v61 }
  0xa8   :  { %1007 = vmatprep.subr.bf16.mxu0 %v9419_v62  ;;  %1065 = vmatprep.subr.bf16.mxu1 %v9419_v62 }
  0xab   :  { %1008 = vmatpush1.bf16.msra.mxu0 %v9428_v63  ;;  %1066 = vmatpush1.bf16.msra.mxu1 %v9428_v63 }
  0xac   :  { %1009 = vmatprep.subr.bf16.mxu0 %v9435_v0  ;;  %1067 = vmatprep.subr.bf16.mxu1 %v9435_v0 }
  0xaf   :  { %1010 = vmatpush1.bf16.msra.mxu0 %v9444_v1  ;;  %1068 = vmatpush1.bf16.msra.mxu1 %v9444_v1 }
  0xb0   :  { %1011 = vmatprep.subr.bf16.mxu0 %v9449_v2  ;;  %1069 = vmatprep.subr.bf16.mxu1 %v9449_v2 }
  0xb3   :  { %1012 = vmatpush1.bf16.msra.mxu0 %v9458_v3  ;;  %1070 = vmatpush1.bf16.msra.mxu1 %v9458_v3 }
  0xb4   :  { %1013 = vmatprep.subr.bf16.mxu0 %v9463_v4  ;;  %1071 = vmatprep.subr.bf16.mxu1 %v9463_v4 }
  0xb7   :  { %1014 = vmatpush1.bf16.msra.mxu0 %v8423_v5  ;;  %1072 = vmatpush1.bf16.msra.mxu1 %v8423_v5 }
  0xb8   :  { %1015 = vmatprep.subr.bf16.mxu0 %v8424_v6  ;;  %1073 = vmatprep.subr.bf16.mxu1 %v8424_v6 }
  0xbb   :  { %1016 = vmatpush1.bf16.msra.mxu0 %v8426_v7  ;;  %1074 = vmatpush1.bf16.msra.mxu1 %v8426_v7 }
  0xbc   :  { %1017 = vmatprep.subr.bf16.mxu0 %v8427_v8  ;;  %1075 = vmatprep.subr.bf16.mxu1 %v8427_v8 }
  0xbf   :  { %1018 = vmatpush1.bf16.msra.mxu0 %v8429_v9  ;;  %1076 = vmatpush1.bf16.msra.mxu1 %v8429_v9 }
  0xc0   :  { %1031 = vmatprep.subr.bf16.mxu0 %v8430_v10  ;;  %1089 = vmatprep.subr.bf16.mxu1 %v8430_v10 }
  0xc3   :  { %1032 = vmatpush2.bf16.msra.mxu0 %v8432_v11  ;;  %1090 = vmatpush2.bf16.msra.mxu1 %v8432_v11 }
  0xc4   :  { %1033 = vmatprep.subr.bf16.mxu0 %v8433_v12  ;;  %1091 = vmatprep.subr.bf16.mxu1 %v8433_v12 }
  0xc7   :  { %1034 = vmatpush2.bf16.msra.mxu0 %v9500_v13  ;;  %1092 = vmatpush2.bf16.msra.mxu1 %v9500_v13 }
  0xc8   :  { %1119 = vmatprep.subr.bf16.mxu0 %v9391_v56  ;;  %1177 = vmatprep.subr.bf16.mxu1 %v9391_v56 }
  0xca   :  { %1036 = vmatmul.mubr.bf16.vlgmr.msra.gmra.mxu0 %v8440_v14  ;;  %1094 = vmatmul.mubr.bf16.vlgmr.msra.gmra.mxu1 %v8441_v15 }
  0xcb   :  { %1120 = vmatpush1.bf16.msra.mxu0 %v9396_v57  ;;  %1178 = vmatpush1.bf16.msra.mxu1 %v9396_v57 }
  0xcc   :  { %1121 = vmatprep.subr.bf16.mxu0 %v9401_v58  ;;  %1179 = vmatprep.subr.bf16.mxu1 %v9401_v58 }
  0xcd   :  { %7345 = vmatprep.mubr.msk.bf16.mxu0 %vm164_vm0, %v8442_v16  ;;  %7350 = vmatprep.mubr.msk.bf16.mxu1 %vm164_vm0, %v8444_v17  ;;  %v8488_v16 = vld [vmem:[%s13185_s0 + $0x230] ss:$8 sps:$4 sm:$0xff]  }
  0xce   :  { %v8489_v17 = vld [vmem:[%s13185_s0 + $0x330] ss:$8 sps:$4 sm:$0xff]  }
  0xcf   :  { %1122 = vmatpush1.bf16.msra.mxu0 %v9414_v61  ;;  %1180 = vmatpush1.bf16.msra.mxu1 %v9414_v61 }
  0xd0   :  { %1123 = vmatprep.subr.bf16.mxu0 %v9419_v62  ;;  %1181 = vmatprep.subr.bf16.mxu1 %v9419_v62  ;;  %v8482_v62 = vld [vmem:[%s13185_s0 + $0x30] ss:$8 sps:$4 sm:$0xff]  }
  0xd3   :  { %1124 = vmatpush1.bf16.msra.mxu0 %v9428_v63  ;;  %1182 = vmatpush1.bf16.msra.mxu1 %v9428_v63  ;;  %v8483_v63 = vld [vmem:[%s13185_s0 + $0x130] ss:$8 sps:$4 sm:$0xff]  }
  0xd4   :  { %1125 = vmatprep.subr.bf16.mxu0 %v9435_v0  ;;  %1183 = vmatprep.subr.bf16.mxu1 %v9435_v0 }
  0xd7   :  { %1126 = vmatpush1.bf16.msra.mxu0 %v9444_v1  ;;  %1184 = vmatpush1.bf16.msra.mxu1 %v9444_v1 }
  0xd8   :  { %1127 = vmatprep.subr.bf16.mxu0 %v9449_v2  ;;  %1185 = vmatprep.subr.bf16.mxu1 %v9449_v2  ;;  %v8484_v2 = vld [vmem:[%s13185_s0 + $0x234] ss:$8 sps:$4 sm:$0xff]  }
  0xdb   :  { %1128 = vmatpush1.bf16.msra.mxu0 %v9458_v3  ;;  %1186 = vmatpush1.bf16.msra.mxu1 %v9458_v3  ;;  %v8486_v3 = vld [vmem:[%s13185_s0 + $0x334] ss:$8 sps:$4 sm:$0xff]  }
  0xdc   :  { %1129 = vmatprep.subr.bf16.mxu0 %v9463_v4  ;;  %1187 = vmatprep.subr.bf16.mxu1 %v9463_v4 }
  0xdf   :  { %1130 = vmatpush1.bf16.msra.mxu0 %v8423_v5  ;;  %1188 = vmatpush1.bf16.msra.mxu1 %v8423_v5 }
  0xe0   :  { %1131 = vmatprep.subr.bf16.mxu0 %v8424_v6  ;;  %1189 = vmatprep.subr.bf16.mxu1 %v8424_v6 }
  0xe3   :  { %1132 = vmatpush1.bf16.msra.mxu0 %v8426_v7  ;;  %1190 = vmatpush1.bf16.msra.mxu1 %v8426_v7 }
  0xe4   :  { %1133 = vmatprep.subr.bf16.mxu0 %v8427_v8  ;;  %1191 = vmatprep.subr.bf16.mxu1 %v8427_v8 }
  0xe7   :  { %1134 = vmatpush1.bf16.msra.mxu0 %v8429_v9  ;;  %1192 = vmatpush1.bf16.msra.mxu1 %v8429_v9 }
  0xe8   :  { %1147 = vmatprep.subr.bf16.mxu0 %v8430_v10  ;;  %1205 = vmatprep.subr.bf16.mxu1 %v8430_v10 }
  0xea   :  { %v9540_v18 = vpop.f32.mrf.mxu0  ;;  %v9542_v19 = vpop.f32.mrf.mxu1 }
  0xeb   :  { %v385_v20 = vmax.f32 %v9540_v18, %v9542_v19  ;;  %1148 = vmatpush2.bf16.msra.mxu0 %v8432_v11  ;;  %1206 = vmatpush2.bf16.msra.mxu1 %v8432_v11  ;;  %v9823_v19 = vld [vmem:[%s13184_s1 + $0x2f0] ss:$8 sps:$4 sm:$0xff]  }
  0xec   :  { %v9546_v21 = vpop.f32.mrf.mxu0  ;;  %v9548_v22 = vpop.f32.mrf.mxu1  ;;  %1149 = vmatprep.subr.bf16.mxu0 %v8433_v12  ;;  %1207 = vmatprep.subr.bf16.mxu1 %v8433_v12  ;;  %v9802_v12 = vld [vmem:[%s13184_s1 + $0x2f4] ss:$8 sps:$4 sm:$0xff]  }
  0xed   :  { %v386_v24 = vmax.f32 %v9546_v21, %v9548_v22  ;;  %v8520_v21 = vld [vmem:[%s13185_s0 + $0x44] ss:$8 sps:$4 sm:$0xff]  }
  0xee   :  { %v9557_v25 = vpop.f32.mrf.mxu0  ;;  %v9559_v26 = vpop.f32.mrf.mxu1  ;;  %v8522_v22 = vld [vmem:[%s13185_s0 + $0x144] ss:$8 sps:$4 sm:$0xff]  }
  0xef   :  { %v387_v29 = vmax.f32 %v9557_v25, %v9559_v26  ;;  %1150 = vmatpush2.bf16.msra.mxu0 %v9500_v13  ;;  %1208 = vmatpush2.bf16.msra.mxu1 %v9500_v13  ;;  %v9859_v25 = vld [vmem:[%s13184_s1 + $0x2d0] ss:$8 sps:$4 sm:$0xff]   ;;  %v9866_v26 = vld [vmem:[%s13184_s1 + $0x2c4] ss:$8 sps:$4 sm:$0xff]  }
  0xf0   :  { %1421 = vmatprep.subr.bf16.mxu0 %v9553_v23  ;;  %1479 = vmatprep.subr.bf16.mxu1 %v9553_v23  ;;  %v9696_v49 = vpop.f32.mrf.mxu0  ;;  %v9698_v50 = vpop.f32.mrf.mxu1 }
  0xf2   :  { %1152 = vmatmul.mubr.bf16.vlgmr.msra.gmra.mxu0 %v8446_v27  ;;  %1210 = vmatmul.mubr.bf16.vlgmr.msra.gmra.mxu1 %v8447_v28  ;;  %v9873_v27 = vld [vmem:[%s13184_s1 + $0x2c0] ss:$8 sps:$4 sm:$0xff]   ;;  %v399_v28 = vlaneseq }
  0xf3   :  { %1422 = vmatpush1.bf16.msra.mxu0 %v9574_v30  ;;  %1480 = vmatpush1.bf16.msra.mxu1 %v9574_v30 }
  0xf4   :  { %1423 = vmatprep.subr.bf16.mxu0 %v9581_v31  ;;  %1481 = vmatprep.subr.bf16.mxu1 %v9581_v31 }
  0xf5   :  { %7400 = vmatprep.mubr.msk.bf16.mxu0 %vm164_vm0, %v8478_v32  ;;  %7405 = vmatprep.mubr.msk.bf16.mxu1 %vm164_vm0, %v8480_v33  ;;  %v9895_v32 = vld [vmem:[%s13184_s1 + $0x2a4] ss:$8 sps:$4 sm:$0xff]   ;;  %v9902_v33 = vld [vmem:[%s13184_s1 + $0x2a0] ss:$8 sps:$4 sm:$0xff]  }
  0xf7   :  { %1424 = vmatpush1.bf16.msra.mxu0 %v9594_v34  ;;  %1482 = vmatpush1.bf16.msra.mxu1 %v9594_v34 }
  0xf8   :  { %1425 = vmatprep.subr.bf16.mxu0 %v9601_v35  ;;  %1483 = vmatprep.subr.bf16.mxu1 %v9601_v35 }
  0xfb   :  { %1426 = vmatpush1.bf16.msra.mxu0 %v9610_v36  ;;  %1484 = vmatpush1.bf16.msra.mxu1 %v9610_v36 }
  0xfc   :  { %1427 = vmatprep.subr.bf16.mxu0 %v9617_v37  ;;  %1485 = vmatprep.subr.bf16.mxu1 %v9617_v37 }
  0xff   :  { %1428 = vmatpush1.bf16.msra.mxu0 %v9624_v38  ;;  %1486 = vmatpush1.bf16.msra.mxu1 %v9624_v38 }
 0x100   :  { %1429 = vmatprep.subr.bf16.mxu0 %v9631_v39  ;;  %1487 = vmatprep.subr.bf16.mxu1 %v9631_v39 }
 0x103   :  { %1430 = vmatpush1.bf16.msra.mxu0 %v9638_v40  ;;  %1488 = vmatpush1.bf16.msra.mxu1 %v9638_v40 }
 0x104   :  { %1431 = vmatprep.subr.bf16.mxu0 %v9645_v41  ;;  %1489 = vmatprep.subr.bf16.mxu1 %v9645_v41 }
 0x107   :  { %1432 = vmatpush1.bf16.msra.mxu0 %v9652_v42  ;;  %1490 = vmatpush1.bf16.msra.mxu1 %v9652_v42 }
 0x108   :  { %1433 = vmatprep.subr.bf16.mxu0 %v9659_v43  ;;  %1491 = vmatprep.subr.bf16.mxu1 %v9659_v43 }
 0x10b   :  { %1434 = vmatpush1.bf16.msra.mxu0 %v9666_v44  ;;  %1492 = vmatpush1.bf16.msra.mxu1 %v9666_v44 }
 0x10c   :  { %1435 = vmatprep.subr.bf16.mxu0 %v9673_v45  ;;  %1493 = vmatprep.subr.bf16.mxu1 %v9673_v45 }
 0x10f   :  { %1436 = vmatpush1.bf16.msra.mxu0 %v9680_v46  ;;  %1494 = vmatpush1.bf16.msra.mxu1 %v9680_v46 }
 0x110   :  { %1449 = vmatprep.subr.bf16.mxu0 %v9687_v47  ;;  %1507 = vmatprep.subr.bf16.mxu1 %v9687_v47 }
 0x112   :  { %v318_v52 = vpop.f32.mrf.mxu0  ;;  %v376_v53 = vpop.f32.mrf.mxu1 }
 0x113   :  { %v389_v54 = vmax.f32 %v318_v52, %v376_v53  ;;  %1450 = vmatpush2.bf16.msra.mxu0 %v9694_v48  ;;  %1508 = vmatpush2.bf16.msra.mxu1 %v9694_v48  ;;  %v7286_v52 = vld [vmem:[%s13186_s2 + $0x2] sm:$0x3]  ;;  %v9977_v53 = vld [vmem:[%s13184_s1 + $0x304] ss:$8 sps:$4 sm:$0xff]  }
 0x114   :  { %v320_v56 = vpop.f32.mrf.mxu0  ;;  %v378_v57 = vpop.f32.mrf.mxu1  ;;  %1451 = vmatprep.subr.bf16.mxu0 %v9705_v51  ;;  %1509 = vmatprep.subr.bf16.mxu1 %v9705_v51 }
 0x115   :  { %v9719_v58 = vmax.f32 %v385_v20, %v389_v54  ;;  %v390_v59 = vmax.f32 %v320_v56, %v378_v57  ;;  %v9830_v20 = vld [vmem:[%s13184_s1 + $0x2e4] ss:$8 sps:$4 sm:$0xff]  }
 0x116   :  { %v322_v60 = vpop.f32.mrf.mxu0  ;;  %v380_v61 = vpop.f32.mrf.mxu1 }
 0x117   :  { %v9730_v0 = vmax.f32 %v386_v24, %v390_v59  ;;  %v391_v1 = vmax.f32 %v322_v60, %v380_v61  ;;  %1452 = vmatpush2.bf16.msra.mxu0 %v9712_v55  ;;  %1510 = vmatpush2.bf16.msra.mxu1 %v9712_v55  ;;  %v9850_v24 = vld [vmem:[%s13184_s1 + $0x2d4] ss:$8 sps:$4 sm:$0xff]   ;;  %v9986_v59 = vld [vmem:[%s13184_s1 + $0x300] ss:$8 sps:$4 sm:$0xff]  }
 0x118   :  { %1537 = vmatprep.subr.bf16.mxu0 %v9553_v23  ;;  %1595 = vmatprep.subr.bf16.mxu1 %v9553_v23  ;;  %v9779_v5 = vpop.f32.mrf.mxu0  ;;  %v9781_v6 = vpop.f32.mrf.mxu1  ;;  %v9843_v23 = vld [vmem:[%s13184_s1 + $0x2e0] ss:$8 sps:$4 sm:$0xff]  }
 0x119   :  { %v9745_v4 = vmax.f32 %v387_v29, %v391_v1  ;;  %v9880_v29 = vld [vmem:[%s13184_s1 + $0x2b4] ss:$8 sps:$4 sm:$0xff]  }
 0x11a   :  { %1454 = vmatmul.mubr.bf16.vlgmr.msra.gmra.mxu0 %v8482_v62  ;;  %1512 = vmatmul.mubr.bf16.vlgmr.msra.gmra.mxu1 %v8483_v63 }
 0x11b   :  { %1538 = vmatpush1.bf16.msra.mxu0 %v9574_v30  ;;  %1596 = vmatpush1.bf16.msra.mxu1 %v9574_v30  ;;  %v9887_v30 = vld [vmem:[%s13184_s1 + $0x2b0] ss:$8 sps:$4 sm:$0xff]  }
 0x11c   :  { %1539 = vmatprep.subr.bf16.mxu0 %v9581_v31  ;;  %1597 = vmatprep.subr.bf16.mxu1 %v9581_v31  ;;  %v400_v31 = vshrl.u32 %v399_v28, 7 }
 0x11d   :  { %7410 = vmatprep.mubr.msk.bf16.mxu0 %vm164_vm0, %v8484_v2  ;;  %7415 = vmatprep.mubr.msk.bf16.mxu1 %vm164_vm0, %v8486_v3 }
 0x11f   :  { %1540 = vmatpush1.bf16.msra.mxu0 %v9594_v34  ;;  %1598 = vmatpush1.bf16.msra.mxu1 %v9594_v34  ;;  %v9904_v34 = vsub.s32 0, %v400_v31 }
 0x120   :  { %1541 = vmatprep.subr.bf16.mxu0 %v9601_v35  ;;  %1599 = vmatprep.subr.bf16.mxu1 %v9601_v35  ;;  %v9911_v35 = vld [vmem:[%s13184_s1 + $0x294] ss:$8 sps:$4 sm:$0xff]  }
 0x123   :  { %1542 = vmatpush1.bf16.msra.mxu0 %v9610_v36  ;;  %1600 = vmatpush1.bf16.msra.mxu1 %v9610_v36  ;;  %v397_v36 = vld [vmem:[%s13186_s2] sm:$0x3] }
 0x124   :  { %1543 = vmatprep.subr.bf16.mxu0 %v9617_v37  ;;  %1601 = vmatprep.subr.bf16.mxu1 %v9617_v37  ;;  %v9916_v37 = vsub.s32 1, %v400_v31 }
 0x126   :  { %v9997_v2 = vrot.slane %v7286_v52, %v9916_v37 }
 0x127   :  { %1544 = vmatpush1.bf16.msra.mxu0 %v9624_v38  ;;  %1602 = vmatpush1.bf16.msra.mxu1 %v9624_v38  ;;  %v9923_v38 = vld [vmem:[%s13184_s1 + $0x290] ss:$8 sps:$4 sm:$0xff]  }
 0x128   :  { %1545 = vmatprep.subr.bf16.mxu0 %v9631_v39  ;;  %1603 = vmatprep.subr.bf16.mxu1 %v9631_v39  ;;  %v402_v39 = vrot.slane %v397_v36, %v9904_v34 }
 0x12a   :  { %v9989_v61 = vadd.f32 %v402_v39, %v9745_v4  ;;  %v8524_v4 = vld [vmem:[%s13185_s0 + $0x40] ss:$8 sps:$4 sm:$0xff]  }
 0x12b   :  { %1546 = vmatpush1.bf16.msra.mxu0 %v9638_v40  ;;  %1604 = vmatpush1.bf16.msra.mxu1 %v9638_v40  ;;  %v9931_v40 = vld [vmem:[%s13184_s1 + $0x284] ss:$8 sps:$4 sm:$0xff]  }
 0x12c   :  { %1547 = vmatprep.subr.bf16.mxu0 %v9645_v41  ;;  %1605 = vmatprep.subr.bf16.mxu1 %v9645_v41  ;;  %v9934_v41 = vrot.slane %v397_v36, %v9916_v37  ;;  %v7224_v31 = vadd.f32 -4.0, %v9989_v61  ;;  %vm423_vm9 = vcmp.gt.f32.partialorder %v9989_v61, 4.0  ;;  %vm415_vm11 = vcmp.lt.f32.partialorder %v9989_v61, 0.0 }
 0x12f   :  { %1548 = vmatpush1.bf16.msra.mxu0 %v9652_v42  ;;  %1606 = vmatpush1.bf16.msra.mxu1 %v9652_v42  ;;  %v9941_v42 = vld [vmem:[%s13184_s1 + $0x280] ss:$8 sps:$4 sm:$0xff]  }
 0x130   :  { %1549 = vmatprep.subr.bf16.mxu0 %v9659_v43  ;;  %1607 = vmatprep.subr.bf16.mxu1 %v9659_v43  ;;  %v9944_v43 = vadd.f32 %v402_v39, %v9719_v58  ;;  %v820_v58 = vrot.slane %v7286_v52, %v9904_v34  ;;  %v8526_v39 = vld [vmem:[%s13185_s0 + $0x244] ss:$8 sps:$4 sm:$0xff]  }
 0x132   :  { %vm421_vm1 = vcmp.gt.f32.partialorder %v9944_v43, 4.0  ;;  %vm413_vm2 = vcmp.lt.f32.partialorder %v9944_v43, 0.0 }
 0x133   :  { %1550 = vmatpush1.bf16.msra.mxu0 %v9666_v44  ;;  %1608 = vmatpush1.bf16.msra.mxu1 %v9666_v44  ;;  %v9951_v44 = vld [vmem:[%s13184_s1 + $0x314] ss:$8 sps:$4 sm:$0xff]  }
 0x134   :  { %1551 = vmatprep.subr.bf16.mxu0 %v9673_v45  ;;  %1609 = vmatprep.subr.bf16.mxu1 %v9673_v45  ;;  %v9955_v45 = vadd.f32 %v9934_v41, %v9730_v0 }
 0x136   :  { %v7223_v56 = vadd.f32 -4.0, %v9955_v45  ;;  %vm422_vm3 = vcmp.gt.f32.partialorder %v9955_v45, 4.0  ;;  %vm414_vm7 = vcmp.lt.f32.partialorder %v9955_v45, 0.0 }
 0x137   :  { %1552 = vmatpush1.bf16.msra.mxu0 %v9680_v46  ;;  %1610 = vmatpush1.bf16.msra.mxu1 %v9680_v46  ;;  %v9962_v46 = vld [vmem:[%s13184_s1 + $0x310] ss:$8 sps:$4 sm:$0xff]  }
 0x138   :  { %1565 = vmatprep.subr.bf16.mxu0 %v9687_v47  ;;  %1623 = vmatprep.subr.bf16.mxu1 %v9687_v47  ;;  %v7222_v47 = vadd.f32 -4.0, %v9944_v43 }
 0x13a   :  { %v9785_v7 = vpop.f32.mrf.mxu0  ;;  %v9787_v8 = vpop.f32.mrf.mxu1  ;;  %v429_v60 = vmul.f32 0.1, %v7222_v47 }
 0x13b   :  { %v802_v9 = vmax.f32 %v9785_v7, %v9787_v8  ;;  %1566 = vmatpush2.bf16.msra.mxu0 %v9694_v48  ;;  %1624 = vmatpush2.bf16.msra.mxu1 %v9694_v48 }
 0x13c   :  { %v9793_v10 = vpop.f32.mrf.mxu0  ;;  %v9795_v11 = vpop.f32.mrf.mxu1  ;;  %1567 = vmatprep.subr.bf16.mxu0 %v9705_v51  ;;  %1625 = vmatprep.subr.bf16.mxu1 %v9705_v51 }
 0x13d   :  { %v803_v13 = vmax.f32 %v9793_v10, %v9795_v11  ;;  %v8528_v10 = vld [vmem:[%s13185_s0 + $0x344] ss:$8 sps:$4 sm:$0xff]  }
 0x13e   :  { %v9806_v14 = vpop.f32.mrf.mxu0  ;;  %v9808_v15 = vpop.f32.mrf.mxu1 }
 0x13f   :  { %v804_v18 = vmax.f32 %v9806_v14, %v9808_v15  ;;  %1568 = vmatpush2.bf16.msra.mxu0 %v9712_v55  ;;  %1626 = vmatpush2.bf16.msra.mxu1 %v9712_v55  ;;  %v417_v14 = vmul.f32 0.1, %v9944_v43 }
 0x140   :  { %1839 = vmatprep.subr.bf16.mxu0 %v9802_v12  ;;  %1897 = vmatprep.subr.bf16.mxu1 %v9802_v12  ;;  %v9965_v48 = vpop.f32.mrf.mxu0  ;;  %v9967_v51 = vpop.f32.mrf.mxu1 }
 0x142   :  { %1570 = vmatmul.mubr.bf16.vlgmr.msra.gmra.mxu0 %v8488_v16  ;;  %1628 = vmatmul.mubr.bf16.vlgmr.msra.gmra.mxu1 %v8489_v17  ;;  %v8525_v17 = vld [vmem:[%s13185_s0 + $0x140] ss:$8 sps:$4 sm:$0xff]  }
 0x143   :  { %1840 = vmatpush1.bf16.msra.mxu0 %v9823_v19  ;;  %1898 = vmatpush1.bf16.msra.mxu1 %v9823_v19 }
 0x144   :  { %1841 = vmatprep.subr.bf16.mxu0 %v9830_v20  ;;  %1899 = vmatprep.subr.bf16.mxu1 %v9830_v20 }
 0x145   :  { %7465 = vmatprep.mubr.msk.bf16.mxu0 %vm164_vm0, %v8520_v21  ;;  %7470 = vmatprep.mubr.msk.bf16.mxu1 %vm164_vm0, %v8522_v22  ;;  %v430_v21 = vmul.f32 0.1, %v7223_v56 }
 0x147   :  { %1842 = vmatpush1.bf16.msra.mxu0 %v9843_v23  ;;  %1900 = vmatpush1.bf16.msra.mxu1 %v9843_v23 }
 0x148   :  { %1843 = vmatprep.subr.bf16.mxu0 %v9850_v24  ;;  %1901 = vmatprep.subr.bf16.mxu1 %v9850_v24 }
 0x14b   :  { %1844 = vmatpush1.bf16.msra.mxu0 %v9859_v25  ;;  %1902 = vmatpush1.bf16.msra.mxu1 %v9859_v25 }
 0x14c   :  { %1845 = vmatprep.subr.bf16.mxu0 %v9866_v26  ;;  %1903 = vmatprep.subr.bf16.mxu1 %v9866_v26 }
 0x14f   :  { %1846 = vmatpush1.bf16.msra.mxu0 %v9873_v27  ;;  %1904 = vmatpush1.bf16.msra.mxu1 %v9873_v27 }
 0x150   :  { %1847 = vmatprep.subr.bf16.mxu0 %v9880_v29  ;;  %1905 = vmatprep.subr.bf16.mxu1 %v9880_v29 }
 0x153   :  { %1848 = vmatpush1.bf16.msra.mxu0 %v9887_v30  ;;  %1906 = vmatpush1.bf16.msra.mxu1 %v9887_v30 }
 0x154   :  { %1849 = vmatprep.subr.bf16.mxu0 %v9895_v32  ;;  %1907 = vmatprep.subr.bf16.mxu1 %v9895_v32 }
 0x157   :  { %1850 = vmatpush1.bf16.msra.mxu0 %v9902_v33  ;;  %1908 = vmatpush1.bf16.msra.mxu1 %v9902_v33 }
 0x158   :  { %1851 = vmatprep.subr.bf16.mxu0 %v9911_v35  ;;  %1909 = vmatprep.subr.bf16.mxu1 %v9911_v35 }
 0x15b   :  { %1852 = vmatpush1.bf16.msra.mxu0 %v9923_v38  ;;  %1910 = vmatpush1.bf16.msra.mxu1 %v9923_v38 }
 0x15c   :  { %1853 = vmatprep.subr.bf16.mxu0 %v9931_v40  ;;  %1911 = vmatprep.subr.bf16.mxu1 %v9931_v40 }
 0x15f   :  { %1854 = vmatpush1.bf16.msra.mxu0 %v9941_v42  ;;  %1912 = vmatpush1.bf16.msra.mxu1 %v9941_v42 }
 0x160   :  { %1867 = vmatprep.subr.bf16.mxu0 %v9951_v44  ;;  %1925 = vmatprep.subr.bf16.mxu1 %v9951_v44 }
 0x162   :  { %v735_v54 = vpop.f32.mrf.mxu0  ;;  %v793_v55 = vpop.f32.mrf.mxu1 }
 0x163   :  { %v806_v57 = vmax.f32 %v735_v54, %v793_v55  ;;  %1868 = vmatpush2.bf16.msra.mxu0 %v9962_v46  ;;  %1926 = vmatpush2.bf16.msra.mxu1 %v9962_v46  ;;  %v431_v54 = vmul.f32 0.1, %v7224_v31 }
 0x164   :  { %v737_v62 = vpop.f32.mrf.mxu0  ;;  %v795_v63 = vpop.f32.mrf.mxu1  ;;  %1869 = vmatprep.subr.bf16.mxu0 %v9977_v53  ;;  %1927 = vmatprep.subr.bf16.mxu1 %v9977_v53 }
 0x165   :  { %v810_v0 = vmax.f32 %v802_v9, %v806_v57  ;;  %v807_v1 = vmax.f32 %v737_v62, %v795_v63  ;;  %v433_v9 = vadd.f32 4.0, %v429_v60 }
 0x166   :  { %v739_v3 = vpop.f32.mrf.mxu0  ;;  %v797_v16 = vpop.f32.mrf.mxu1 }
 0x167   :  { %v827_v22 = vadd.f32 %v820_v58, %v810_v0  ;;  %v811_v7 = vmax.f32 %v803_v13, %v807_v1  ;;  %v808_v8 = vmax.f32 %v739_v3, %v797_v16  ;;  %1870 = vmatpush2.bf16.msra.mxu0 %v9986_v59  ;;  %1928 = vmatpush2.bf16.msra.mxu1 %v9986_v59  ;;  %v418_v0 = vmul.f32 0.1, %v9955_v45 }
 0x168   :  { %1955 = vmatprep.subr.bf16.mxu0 %v9802_v12  ;;  %2013 = vmatprep.subr.bf16.mxu1 %v9802_v12  ;;  %v434_v12 = vadd.f32 4.0, %v430_v21  ;;  %v437_v52 = vsel %vm421_vm1, %v433_v9, %v9944_v43  ;;  %v435_v43 = vadd.f32 4.0, %v431_v54  ;;  %v10174_v54 = vld [vmem:[%s13184_s1 + $0x354] ss:$8 sps:$4 sm:$0xff]  }
 0x169   :  { %v7287_v36 = vadd.f32 -4.0, %v827_v22  ;;  %v828_v11 = vadd.f32 %v9997_v2, %v811_v7  ;;  %v812_v13 = vmax.f32 %v804_v18, %v808_v8  ;;  %vm839_vm4 = vcmp.gt.f32.partialorder %v827_v22, 4.0 }
 0x16a   :  { %1872 = vmatmul.mubr.bf16.vlgmr.msra.gmra.mxu0 %v8524_v4  ;;  %1930 = vmatmul.mubr.bf16.vlgmr.msra.gmra.mxu1 %v8525_v17  ;;  %v441_v57 = vsel %vm413_vm2, %v417_v14, %v437_v52  ;;  %v438_v60 = vsel %vm422_vm3, %v434_v12, %v9955_v45  ;;  %vm831_vm5 = vcmp.lt.f32.partialorder %v827_v22, 0.0  ;;  %v419_v45 = vmul.f32 0.1, %v9989_v61  ;;  %v10153_v12 = vld [vmem:[%s13184_s1 + $0x370] ss:$8 sps:$4 sm:$0xff]  }
 0x16b   :  { %v847_v47 = vmul.f32 0.1, %v7287_v36  ;;  %1956 = vmatpush1.bf16.msra.mxu0 %v9823_v19  ;;  %2014 = vmatpush1.bf16.msra.mxu1 %v9823_v19  ;;  %v7288_v55 = vadd.f32 -4.0, %v828_v11  ;;  %v829_v18 = vadd.f32 %v820_v58, %v812_v13  ;;  %v835_v19 = vmul.f32 0.1, %v827_v22 }
 0x16c   :  { %1957 = vmatprep.subr.bf16.mxu0 %v9830_v20  ;;  %2015 = vmatprep.subr.bf16.mxu1 %v9830_v20  ;;  %v836_v3 = vmul.f32 0.1, %v828_v11  ;;  %vm840_vm6 = vcmp.gt.f32.partialorder %v828_v11, 4.0  ;;  %vm832_vm8 = vcmp.lt.f32.partialorder %v828_v11, 0.0  ;;  %v10117_v36 = vld [vmem:[%s13184_s1 + $0x390] ss:$8 sps:$4 sm:$0xff]  }
 0x16d   :  { %v851_v15 = vadd.f32 4.0, %v847_v47  ;;  %7475 = vmatprep.mubr.msk.bf16.mxu0 %vm164_vm0, %v8526_v39  ;;  %7480 = vmatprep.mubr.msk.bf16.mxu1 %vm164_vm0, %v8528_v10  ;;  %v848_v56 = vmul.f32 0.1, %v7288_v55  ;;  %v7289_v63 = vadd.f32 -4.0, %v829_v18  ;;  %v837_v7 = vmul.f32 0.1, %v829_v18 }
 0x16e   :  { %vm841_vm10 = vcmp.gt.f32.partialorder %v829_v18, 4.0  ;;  %vm833_vm12 = vcmp.lt.f32.partialorder %v829_v18, 0.0  ;;  %v10124_v39 = vld [vmem:[%s13184_s1 + $0x384] ss:$8 sps:$4 sm:$0xff]   ;;  %v8562_v10 = vld [vmem:[%s13185_s0 + $0x54] ss:$8 sps:$4 sm:$0xff]  }
 0x16f   :  { %v855_v20 = vsel %vm839_vm4, %v851_v15, %v827_v22  ;;  %1958 = vmatpush1.bf16.msra.mxu0 %v9843_v23  ;;  %2016 = vmatpush1.bf16.msra.mxu1 %v9843_v23  ;;  %v852_v62 = vadd.f32 4.0, %v848_v56  ;;  %v849_v4 = vmul.f32 0.1, %v7289_v63  ;;  %v442_v23 = vsel %vm414_vm7, %v418_v0, %v438_v60  ;;  %v10144_v13 = vld [vmem:[%s13184_s1 + $0x374] ss:$8 sps:$4 sm:$0xff]  }
 0x170   :  { %v859_v58 = vsel %vm831_vm5, %v835_v19, %v855_v20  ;;  %1959 = vmatprep.subr.bf16.mxu0 %v9850_v24  ;;  %2017 = vmatprep.subr.bf16.mxu1 %v9850_v24  ;;  %v439_v24 = vsel %vm423_vm9, %v435_v43, %v9989_v61  ;;  %v10160_v47 = vld [vmem:[%s13184_s1 + $0x364] ss:$8 sps:$4 sm:$0xff]   ;;  %v10167_v52 = vld [vmem:[%s13184_s1 + $0x360] ss:$8 sps:$4 sm:$0xff]   ;;  %v10181_v55 = vld [vmem:[%s13184_s1 + $0x350] ss:$8 sps:$4 sm:$0xff]  }
 0x171   :  { %v10040_v1 = vadd.f32 %v859_v58, %v441_v57  ;;  %v856_v16 = vsel %vm840_vm6, %v852_v62, %v828_v11  ;;  %v853_v22 = vadd.f32 4.0, %v849_v4  ;;  %v443_v9 = vsel %vm415_vm11, %v419_v45, %v439_v24  ;;  %v10137_v11 = vld [vmem:[%s13184_s1 + $0x380] ss:$8 sps:$4 sm:$0xff]   ;;  %v10188_v14 = vld [vmem:[%s13184_s1 + $0x344] ss:$8 sps:$4 sm:$0xff]  }
 0x172   :  { %v860_v17 = vsel %vm832_vm8, %v836_v3, %v856_v16  ;;  %v10195_v15 = vld [vmem:[%s13184_s1 + $0x340] ss:$8 sps:$4 sm:$0xff]   ;;  %v10209_v19 = vld [vmem:[%s13184_s1 + $0x330] ss:$8 sps:$4 sm:$0xff]   ;;  %v10216_v56 = vld [vmem:[%s13184_s1 + $0x324] ss:$8 sps:$4 sm:$0xff]  }
 0x173   :  { %1960 = vmatpush1.bf16.msra.mxu0 %v9859_v25  ;;  %2018 = vmatpush1.bf16.msra.mxu1 %v9859_v25  ;;  %v10047_v21 = vadd.f32 %v860_v17, %v442_v23  ;;  %v857_v8 = vsel %vm841_vm10, %v853_v22, %v829_v18  ;;  %v10202_v18 = vld [vmem:[%s13184_s1 + $0x334] ss:$8 sps:$4 sm:$0xff]   ;;  %v10223_v57 = vld [vmem:[%s13184_s1 + $0x320] ss:$8 sps:$4 sm:$0xff]   ;;  %v10237_v20 = vld [vmem:[%s13184_s1 + $0x3b0] ss:$8 sps:$4 sm:$0xff]  }
 0x174   :  { %1961 = vmatprep.subr.bf16.mxu0 %v9866_v26  ;;  %2019 = vmatprep.subr.bf16.mxu1 %v9866_v26  ;;  %v861_v31 = vsel %vm833_vm12, %v837_v7, %v857_v8  ;;  %v10073_v26 = vpop.f32.mrf.mxu0  ;;  %v10230_v60 = vld [vmem:[%s13184_s1 + $0x3b4] ss:$8 sps:$4 sm:$0xff]   ;;  %v7351_v62 = vld [vmem:[%s13186_s2 + $0x4] sm:$0x3]  ;;  %v10259_v23 = vld [vmem:[%s13184_s1 + $0x3a0] ss:$8 sps:$4 sm:$0xff]  }
 0x175   :  { %v10055_v25 = vadd.f32 %v861_v31, %v443_v9  ;;  %v10251_v63 = vld [vmem:[%s13184_s1 + $0x3a4] ss:$8 sps:$4 sm:$0xff]   ;;  %v1238_v4 = vrot.slane %v7351_v62, %v9904_v34  ;;  %v10267_v7 = vrot.slane %v7351_v62, %v9916_v37  ;;  %v8566_v31 = vld [vmem:[%s13185_s0 + $0x50] ss:$8 sps:$4 sm:$0xff]  }
 0x177   :  { %1962 = vmatpush1.bf16.msra.mxu0 %v9873_v27  ;;  %2020 = vmatpush1.bf16.msra.mxu1 %v9873_v27  ;;  %v10075_v27 = vpop.f32.mrf.mxu1 }
 0x178   :  { %1963 = vmatprep.subr.bf16.mxu0 %v9880_v29  ;;  %2021 = vmatprep.subr.bf16.mxu1 %v9880_v29 }
 0x17b   :  { %1964 = vmatpush1.bf16.msra.mxu0 %v9887_v30  ;;  %2022 = vmatpush1.bf16.msra.mxu1 %v9887_v30 }
 0x17c   :  { %1965 = vmatprep.subr.bf16.mxu0 %v9895_v32  ;;  %2023 = vmatprep.subr.bf16.mxu1 %v9895_v32 }
 0x17f   :  { %1966 = vmatpush1.bf16.msra.mxu0 %v9902_v33  ;;  %2024 = vmatpush1.bf16.msra.mxu1 %v9902_v33 }
 0x180   :  { %1967 = vmatprep.subr.bf16.mxu0 %v9911_v35  ;;  %2025 = vmatprep.subr.bf16.mxu1 %v9911_v35 }
 0x183   :  { %1968 = vmatpush1.bf16.msra.mxu0 %v9923_v38  ;;  %2026 = vmatpush1.bf16.msra.mxu1 %v9923_v38  ;;  %v10096_v38 = vld [vmem:[%s13184_s1 + $0x394] ss:$8 sps:$4 sm:$0xff]  }
 0x184   :  { %1969 = vmatprep.subr.bf16.mxu0 %v9931_v40  ;;  %2027 = vmatprep.subr.bf16.mxu1 %v9931_v40 }
 0x187   :  { %1970 = vmatpush1.bf16.msra.mxu0 %v9941_v42  ;;  %2028 = vmatpush1.bf16.msra.mxu1 %v9941_v42 }
 0x188   :  { %1983 = vmatprep.subr.bf16.mxu0 %v9951_v44  ;;  %2041 = vmatprep.subr.bf16.mxu1 %v9951_v44 }
 0x18a   :  { %v10079_v29 = vpop.f32.mrf.mxu0  ;;  %v10081_v30 = vpop.f32.mrf.mxu1 }
 0x18b   :  { %v1220_v32 = vmax.f32 %v10079_v29, %v10081_v30  ;;  %1984 = vmatpush2.bf16.msra.mxu0 %v9962_v46  ;;  %2042 = vmatpush2.bf16.msra.mxu1 %v9962_v46  ;;  %v8530_v46 = vld [vmem:[%s13185_s0 + $0x240] ss:$8 sps:$4 sm:$0xff]  }
 0x18c   :  { %v10087_v33 = vpop.f32.mrf.mxu0  ;;  %v10089_v35 = vpop.f32.mrf.mxu1  ;;  %1985 = vmatprep.subr.bf16.mxu0 %v9977_v53  ;;  %2043 = vmatprep.subr.bf16.mxu1 %v9977_v53  ;;  %v8531_v53 = vld [vmem:[%s13185_s0 + $0x340] ss:$8 sps:$4 sm:$0xff]  }
 0x18d   :  { %v1221_v40 = vmax.f32 %v10087_v33, %v10089_v35 }
 0x18e   :  { %v10100_v42 = vpop.f32.mrf.mxu0  ;;  %v10102_v44 = vpop.f32.mrf.mxu1 }
 0x18f   :  { %v1222_v61 = vmax.f32 %v10100_v42, %v10102_v44  ;;  %1986 = vmatpush2.bf16.msra.mxu0 %v9986_v59  ;;  %2044 = vmatpush2.bf16.msra.mxu1 %v9986_v59  ;;  %v8564_v59 = vld [vmem:[%s13185_s0 + $0x154] ss:$8 sps:$4 sm:$0xff]  }
 0x190   :  { %2257 = vmatprep.subr.bf16.mxu0 %v10096_v38  ;;  %2315 = vmatprep.subr.bf16.mxu1 %v10096_v38  ;;  %v10239_v43 = vpop.f32.mrf.mxu0  ;;  %v10241_v58 = vpop.f32.mrf.mxu1 }
 0x192   :  { %1988 = vmatmul.mubr.bf16.vlgmr.msra.gmra.mxu0 %v8530_v46  ;;  %2046 = vmatmul.mubr.bf16.vlgmr.msra.gmra.mxu1 %v8531_v53  ;;  %v8567_v46 = vld [vmem:[%s13185_s0 + $0x150] ss:$8 sps:$4 sm:$0xff]  }
 0x193   :  { %2258 = vmatpush1.bf16.msra.mxu0 %v10117_v36  ;;  %2316 = vmatpush1.bf16.msra.mxu1 %v10117_v36 }
 0x194   :  { %2259 = vmatprep.subr.bf16.mxu0 %v10124_v39  ;;  %2317 = vmatprep.subr.bf16.mxu1 %v10124_v39 }
 0x195   :  { %7530 = vmatprep.mubr.msk.bf16.mxu0 %vm164_vm0, %v8562_v10  ;;  %7535 = vmatprep.mubr.msk.bf16.mxu1 %vm164_vm0, %v8564_v59  ;;  %v8568_v10 = vld [vmem:[%s13185_s0 + $0x254] ss:$8 sps:$4 sm:$0xff]  }
 0x196   :  { %v8570_v59 = vld [vmem:[%s13185_s0 + $0x354] ss:$8 sps:$4 sm:$0xff]  }
 0x197   :  { %2260 = vmatpush1.bf16.msra.mxu0 %v10137_v11  ;;  %2318 = vmatpush1.bf16.msra.mxu1 %v10137_v11 }
 0x198   :  { %2261 = vmatprep.subr.bf16.mxu0 %v10144_v13  ;;  %2319 = vmatprep.subr.bf16.mxu1 %v10144_v13 }
 0x19b   :  { %2262 = vmatpush1.bf16.msra.mxu0 %v10153_v12  ;;  %2320 = vmatpush1.bf16.msra.mxu1 %v10153_v12 }
 0x19c   :  { %2263 = vmatprep.subr.bf16.mxu0 %v10160_v47  ;;  %2321 = vmatprep.subr.bf16.mxu1 %v10160_v47 }
 0x19f   :  { %2264 = vmatpush1.bf16.msra.mxu0 %v10167_v52  ;;  %2322 = vmatpush1.bf16.msra.mxu1 %v10167_v52 }
 0x1a0   :  { %2265 = vmatprep.subr.bf16.mxu0 %v10174_v54  ;;  %2323 = vmatprep.subr.bf16.mxu1 %v10174_v54 }
 0x1a3   :  { %2266 = vmatpush1.bf16.msra.mxu0 %v10181_v55  ;;  %2324 = vmatpush1.bf16.msra.mxu1 %v10181_v55 }
 0x1a4   :  { %2267 = vmatprep.subr.bf16.mxu0 %v10188_v14  ;;  %2325 = vmatprep.subr.bf16.mxu1 %v10188_v14 }
 0x1a7   :  { %2268 = vmatpush1.bf16.msra.mxu0 %v10195_v15  ;;  %2326 = vmatpush1.bf16.msra.mxu1 %v10195_v15 }
 0x1a8   :  { %2269 = vmatprep.subr.bf16.mxu0 %v10202_v18  ;;  %2327 = vmatprep.subr.bf16.mxu1 %v10202_v18 }
 0x1ab   :  { %2270 = vmatpush1.bf16.msra.mxu0 %v10209_v19  ;;  %2328 = vmatpush1.bf16.msra.mxu1 %v10209_v19 }
 0x1ac   :  { %2271 = vmatprep.subr.bf16.mxu0 %v10216_v56  ;;  %2329 = vmatprep.subr.bf16.mxu1 %v10216_v56 }
 0x1af   :  { %2272 = vmatpush1.bf16.msra.mxu0 %v10223_v57  ;;  %2330 = vmatpush1.bf16.msra.mxu1 %v10223_v57 }
 0x1b0   :  { %2285 = vmatprep.subr.bf16.mxu0 %v10230_v60  ;;  %2343 = vmatprep.subr.bf16.mxu1 %v10230_v60 }
 0x1b2   :  { %v1153_v0 = vpop.f32.mrf.mxu0  ;;  %v1211_v3 = vpop.f32.mrf.mxu1 }
 0x1b3   :  { %v1224_v16 = vmax.f32 %v1153_v0, %v1211_v3  ;;  %2286 = vmatpush2.bf16.msra.mxu0 %v10237_v20  ;;  %2344 = vmatpush2.bf16.msra.mxu1 %v10237_v20 }
 0x1b4   :  { %v1155_v17 = vpop.f32.mrf.mxu0  ;;  %v1213_v24 = vpop.f32.mrf.mxu1  ;;  %2287 = vmatprep.subr.bf16.mxu0 %v10251_v63  ;;  %2345 = vmatprep.subr.bf16.mxu1 %v10251_v63 }
 0x1b5   :  { %v1228_v22 = vmax.f32 %v1220_v32, %v1224_v16  ;;  %v1225_v45 = vmax.f32 %v1155_v17, %v1213_v24 }
 0x1b6   :  { %v1157_v8 = vpop.f32.mrf.mxu0  ;;  %v1215_v9 = vpop.f32.mrf.mxu1 }
 0x1b7   :  { %v1245_v53 = vadd.f32 %v1238_v4, %v1228_v22  ;;  %v1229_v29 = vmax.f32 %v1221_v40, %v1225_v45  ;;  %v1226_v30 = vmax.f32 %v1157_v8, %v1215_v9  ;;  %2288 = vmatpush2.bf16.msra.mxu0 %v10259_v23  ;;  %2346 = vmatpush2.bf16.msra.mxu1 %v10259_v23 }
 0x1b8   :  { %2373 = vmatprep.subr.bf16.mxu0 %v10096_v38  ;;  %2431 = vmatprep.subr.bf16.mxu1 %v10096_v38 }
 0x1b9   :  { %v7352_v32 = vadd.f32 -4.0, %v1245_v53  ;;  %v1246_v33 = vadd.f32 %v10267_v7, %v1229_v29  ;;  %v1230_v35 = vmax.f32 %v1222_v61, %v1226_v30  ;;  %v1253_v42 = vmul.f32 0.1, %v1245_v53  ;;  %v8606_v29 = vld [vmem:[%s13185_s0 + $0x164] ss:$8 sps:$4 sm:$0xff]  }
 0x1ba   :  { %2290 = vmatmul.mubr.bf16.vlgmr.msra.gmra.mxu0 %v8566_v31  ;;  %2348 = vmatmul.mubr.bf16.vlgmr.msra.gmra.mxu1 %v8567_v46  ;;  %vm1257_vm13 = vcmp.gt.f32.partialorder %v1245_v53, 4.0  ;;  %vm1249_vm14 = vcmp.lt.f32.partialorder %v1245_v53, 0.0  ;;  %v10388_v46 = vld [vmem:[%s13184_s1 + $0x424] ss:$8 sps:$4 sm:$0xff]   ;;  %v10403_v30 = vld [vmem:[%s13184_s1 + $0x420] ss:$8 sps:$4 sm:$0xff]  }
 0x1bb   :  { %v1265_v40 = vmul.f32 0.1, %v7352_v32  ;;  %2374 = vmatpush1.bf16.msra.mxu0 %v10117_v36  ;;  %2432 = vmatpush1.bf16.msra.mxu1 %v10117_v36  ;;  %v7353_v38 = vadd.f32 -4.0, %v1246_v33  ;;  %v1247_v0 = vadd.f32 %v1238_v4, %v1230_v35  ;;  %v1254_v4 = vmul.f32 0.1, %v1246_v33 }
 0x1bc   :  { %2375 = vmatprep.subr.bf16.mxu0 %v10124_v39  ;;  %2433 = vmatprep.subr.bf16.mxu1 %v10124_v39  ;;  %vm1258_vm15 = vcmp.gt.f32.partialorder %v1246_v33, 4.0  ;;  %vm1250_vm1 = vcmp.lt.f32.partialorder %v1246_v33, 0.0  ;;  %v10410_v32 = vld [vmem:[%s13184_s1 + $0x414] ss:$8 sps:$4 sm:$0xff]  }
 0x1bd   :  { %v1269_v62 = vadd.f32 4.0, %v1265_v40  ;;  %7540 = vmatprep.mubr.msk.bf16.mxu0 %vm164_vm0, %v8568_v10  ;;  %7545 = vmatprep.mubr.msk.bf16.mxu1 %vm164_vm0, %v8570_v59  ;;  %v1266_v44 = vmul.f32 0.1, %v7353_v38  ;;  %v7354_v16 = vadd.f32 -4.0, %v1247_v0  ;;  %vm1259_vm2 = vcmp.gt.f32.partialorder %v1247_v0, 4.0 }
 0x1be   :  { %vm1251_vm3 = vcmp.lt.f32.partialorder %v1247_v0, 0.0  ;;  %v10419_v10 = vld [vmem:[%s13184_s1 + $0x410] ss:$8 sps:$4 sm:$0xff]   ;;  %v10426_v59 = vld [vmem:[%s13184_s1 + $0x404] ss:$8 sps:$4 sm:$0xff]  }
 0x1bf   :  { %v1273_v61 = vsel %vm1257_vm13, %v1269_v62, %v1245_v53  ;;  %2376 = vmatpush1.bf16.msra.mxu0 %v10137_v11  ;;  %2434 = vmatpush1.bf16.msra.mxu1 %v10137_v11  ;;  %v1270_v3 = vadd.f32 4.0, %v1266_v44  ;;  %v1267_v24 = vmul.f32 0.1, %v7354_v16  ;;  %v8604_v53 = vld [vmem:[%s13185_s0 + $0x64] ss:$8 sps:$4 sm:$0xff]  }
 0x1c0   :  { %v1277_v36 = vsel %vm1249_vm14, %v1253_v42, %v1273_v61  ;;  %2377 = vmatprep.subr.bf16.mxu0 %v10144_v13  ;;  %2435 = vmatprep.subr.bf16.mxu1 %v10144_v13  ;;  %v10440_v35 = vld [vmem:[%s13184_s1 + $0x3f4] ss:$8 sps:$4 sm:$0xff]   ;;  %v10447_v40 = vld [vmem:[%s13184_s1 + $0x3f0] ss:$8 sps:$4 sm:$0xff]   ;;  %v10454_v38 = vld [vmem:[%s13184_s1 + $0x3e4] ss:$8 sps:$4 sm:$0xff]   ;;  %v392_v42 = vmax.f32 %v9779_v5, %v9781_v6  ;;  %v388_v61 = vmax.f32 %v9696_v49, %v9698_v50 }
 0x1c1   :  { %v10303_v39 = vadd.f32 %v1277_v36, %v10040_v1  ;;  %v1274_v17 = vsel %vm1258_vm15, %v1270_v3, %v1246_v33  ;;  %v1271_v45 = vadd.f32 4.0, %v1267_v24  ;;  %v1255_v1 = vmul.f32 0.1, %v1247_v0  ;;  %v10433_v33 = vld [vmem:[%s13184_s1 + $0x400] ss:$8 sps:$4 sm:$0xff]  }
 0x1c2   :  { %v1278_v22 = vsel %vm1250_vm1, %v1254_v4, %v1274_v17  ;;  %v10461_v62 = vld [vmem:[%s13184_s1 + $0x3e0] ss:$8 sps:$4 sm:$0xff]   ;;  %v10477_v44 = vld [vmem:[%s13184_s1 + $0x3d0] ss:$8 sps:$4 sm:$0xff]   ;;  %v809_v36 = vmax.f32 %v10073_v26, %v10075_v27  ;;  %v10488_v5 = vld [vmem:[%s13184_s1 + $0x3c4] ss:$8 sps:$4 sm:$0xff]   ;;  %v396_v6 = vmax.f32 %v388_v61, %v392_v42  ;;  %v805_v3 = vmax.f32 %v9965_v48, %v9967_v51 }
 0x1c3   :  { %2378 = vmatpush1.bf16.msra.mxu0 %v10153_v12  ;;  %2436 = vmatpush1.bf16.msra.mxu1 %v10153_v12  ;;  %v10308_v11 = vadd.f32 %v1278_v22, %v10047_v21  ;;  %v1275_v13 = vsel %vm1259_vm2, %v1271_v45, %v1247_v0  ;;  %v10333_v21 = vpop.f32.mrf.mxu0  ;;  %v10468_v0 = vld [vmem:[%s13184_s1 + $0x3d4] ss:$8 sps:$4 sm:$0xff]   ;;  %v10499_v49 = vld [vmem:[%s13184_s1 + $0x3c0] ss:$8 sps:$4 sm:$0xff]   ;;  %v1223_v51 = vmax.f32 %v10239_v43, %v10241_v58  ;;  %v10518_v4 = vld [vmem:[%s13184_s1 + $0x450] ss:$8 sps:$4 sm:$0xff]  }
 0x1c4   :  { %2379 = vmatprep.subr.bf16.mxu0 %v10160_v47  ;;  %2437 = vmatprep.subr.bf16.mxu1 %v10160_v47  ;;  %v1279_v8 = vsel %vm1251_vm3, %v1255_v1, %v1275_v13  ;;  %v813_v50 = vmax.f32 %v805_v3, %v809_v36  ;;  %v10506_v48 = vld [vmem:[%s13184_s1 + $0x454] ss:$8 sps:$4 sm:$0xff]   ;;  %v10511_v26 = vadd.f32 %v9934_v41, %v396_v6  ;;  %v7416_v43 = vld [vmem:[%s13186_s2 + $0x6] sm:$0x3]  ;;  %v10543_v13 = vld [vmem:[%s13184_s1 + $0x440] ss:$8 sps:$4 sm:$0xff]  }
 0x1c5   :  { %v10315_v9 = vadd.f32 %v1279_v8, %v10055_v25  ;;  %v10335_v25 = vpop.f32.mrf.mxu1  ;;  %v10531_v41 = vld [vmem:[%s13184_s1 + $0x444] ss:$8 sps:$4 sm:$0xff]   ;;  %v1656_v1 = vrot.slane %v7416_v43, %v9904_v34  ;;  %v8608_v61 = vld [vmem:[%s13185_s0 + $0x60] ss:$8 sps:$4 sm:$0xff]  }
 0x1c6   :  { %v1227_v16 = vmax.f32 %v10333_v21, %v10335_v25  ;;  %v10521_v17 = vadd.f32 %v9997_v2, %v813_v50  ;;  %v7225_v58 = vadd.f32 -4.0, %v10511_v26  ;;  %v8609_v36 = vld [vmem:[%s13185_s0 + $0x160] ss:$8 sps:$4 sm:$0xff]   ;;  %vm424_vm4 = vcmp.gt.f32.partialorder %v10511_v26, 4.0 }
 0x1c7   :  { %2380 = vmatpush1.bf16.msra.mxu0 %v10167_v52  ;;  %2438 = vmatpush1.bf16.msra.mxu1 %v10167_v52  ;;  %vm416_vm5 = vcmp.lt.f32.partialorder %v10511_v26, 0.0 }
 0x1c8   :  { %2381 = vmatprep.subr.bf16.mxu0 %v10174_v54  ;;  %2439 = vmatprep.subr.bf16.mxu1 %v10174_v54  ;;  %v1231_v27 = vmax.f32 %v1223_v51, %v1227_v16  ;;  %v7290_v8 = vadd.f32 -4.0, %v10521_v17  ;;  %vm842_vm7 = vcmp.gt.f32.partialorder %v10521_v17, 4.0  ;;  %vm834_vm12 = vcmp.lt.f32.partialorder %v10521_v17, 0.0 }
 0x1ca   :  { %v10535_v2 = vadd.f32 %v10267_v7, %v1231_v27  ;;  %v8610_v27 = vld [vmem:[%s13185_s0 + $0x264] ss:$8 sps:$4 sm:$0xff]  }
 0x1cb   :  { %2382 = vmatpush1.bf16.msra.mxu0 %v10181_v55  ;;  %2440 = vmatpush1.bf16.msra.mxu1 %v10181_v55 }
 0x1cc   :  { %2383 = vmatprep.subr.bf16.mxu0 %v10188_v14  ;;  %2441 = vmatprep.subr.bf16.mxu1 %v10188_v14  ;;  %v10356_v14 = vld [vmem:[%s13184_s1 + $0x434] ss:$8 sps:$4 sm:$0xff]   ;;  %v7355_v6 = vadd.f32 -4.0, %v10535_v2  ;;  %vm1260_vm10 = vcmp.gt.f32.partialorder %v10535_v2, 4.0  ;;  %vm1252_vm13 = vcmp.lt.f32.partialorder %v10535_v2, 0.0 }
 0x1cf   :  { %2384 = vmatpush1.bf16.msra.mxu0 %v10195_v15  ;;  %2442 = vmatpush1.bf16.msra.mxu1 %v10195_v15 }
 0x1d0   :  { %2385 = vmatprep.subr.bf16.mxu0 %v10202_v18  ;;  %2443 = vmatprep.subr.bf16.mxu1 %v10202_v18 }
 0x1d3   :  { %2386 = vmatpush1.bf16.msra.mxu0 %v10209_v19  ;;  %2444 = vmatpush1.bf16.msra.mxu1 %v10209_v19 }
 0x1d4   :  { %2387 = vmatprep.subr.bf16.mxu0 %v10216_v56  ;;  %2445 = vmatprep.subr.bf16.mxu1 %v10216_v56  ;;  %v8572_v56 = vld [vmem:[%s13185_s0 + $0x250] ss:$8 sps:$4 sm:$0xff]  }
 0x1d7   :  { %2388 = vmatpush1.bf16.msra.mxu0 %v10223_v57  ;;  %2446 = vmatpush1.bf16.msra.mxu1 %v10223_v57  ;;  %v8573_v57 = vld [vmem:[%s13185_s0 + $0x350] ss:$8 sps:$4 sm:$0xff]  }
 0x1d8   :  { %2401 = vmatprep.subr.bf16.mxu0 %v10230_v60  ;;  %2459 = vmatprep.subr.bf16.mxu1 %v10230_v60 }
 0x1da   :  { %v10339_v12 = vpop.f32.mrf.mxu0  ;;  %v10341_v47 = vpop.f32.mrf.mxu1 }
 0x1db   :  { %v1638_v52 = vmax.f32 %v10339_v12, %v10341_v47  ;;  %2402 = vmatpush2.bf16.msra.mxu0 %v10237_v20  ;;  %2460 = vmatpush2.bf16.msra.mxu1 %v10237_v20  ;;  %v10377_v20 = vld [vmem:[%s13184_s1 + $0x430] ss:$8 sps:$4 sm:$0xff]  }
 0x1dc   :  { %v10347_v54 = vpop.f32.mrf.mxu0  ;;  %v10349_v55 = vpop.f32.mrf.mxu1  ;;  %2403 = vmatprep.subr.bf16.mxu0 %v10251_v63  ;;  %2461 = vmatprep.subr.bf16.mxu1 %v10251_v63 }
 0x1dd   :  { %v1639_v15 = vmax.f32 %v10347_v54, %v10349_v55  ;;  %v8612_v54 = vld [vmem:[%s13185_s0 + $0x364] ss:$8 sps:$4 sm:$0xff]  }
 0x1de   :  { %v10360_v18 = vpop.f32.mrf.mxu0  ;;  %v10362_v19 = vpop.f32.mrf.mxu1 }
 0x1df   :  { %v1640_v60 = vmax.f32 %v10360_v18, %v10362_v19  ;;  %2404 = vmatpush2.bf16.msra.mxu0 %v10259_v23  ;;  %2462 = vmatpush2.bf16.msra.mxu1 %v10259_v23 }
 0x1e0   :  { %v10379_v63 = vpop.f32.mrf.mxu0  ;;  %v10381_v31 = vpop.f32.mrf.mxu1  ;;  %2675 = vmatprep.subr.bf16.mxu0 %v10356_v14  ;;  %2733 = vmatprep.subr.bf16.mxu1 %v10356_v14 }
 0x1e1   :  { %v1641_v23 = vmax.f32 %v10379_v63, %v10381_v31 }
 0x1e2   :  { %2406 = vmatmul.mubr.bf16.vlgmr.msra.gmra.mxu0 %v8572_v56  ;;  %2464 = vmatmul.mubr.bf16.vlgmr.msra.gmra.mxu1 %v8573_v57  ;;  %v432_v57 = vmul.f32 0.1, %v7225_v58 }
 0x1e3   :  { %2676 = vmatpush1.bf16.msra.mxu0 %v10377_v20  ;;  %2734 = vmatpush1.bf16.msra.mxu1 %v10377_v20 }
 0x1e4   :  { %2677 = vmatprep.subr.bf16.mxu0 %v10388_v46  ;;  %2735 = vmatprep.subr.bf16.mxu1 %v10388_v46  ;;  %v436_v55 = vadd.f32 4.0, %v432_v57 }
 0x1e5   :  { %7595 = vmatprep.mubr.msk.bf16.mxu0 %vm164_vm0, %v8604_v53  ;;  %7600 = vmatprep.mubr.msk.bf16.mxu1 %vm164_vm0, %v8606_v29  ;;  %v1660_v53 = vrot.slane %v7416_v43, %v9916_v37 }
 0x1e7   :  { %2678 = vmatpush1.bf16.msra.mxu0 %v10403_v30  ;;  %2736 = vmatpush1.bf16.msra.mxu1 %v10403_v30 }
 0x1e8   :  { %2679 = vmatprep.subr.bf16.mxu0 %v10410_v32  ;;  %2737 = vmatprep.subr.bf16.mxu1 %v10410_v32 }
 0x1eb   :  { %2680 = vmatpush1.bf16.msra.mxu0 %v10419_v10  ;;  %2738 = vmatpush1.bf16.msra.mxu1 %v10419_v10 }
 0x1ec   :  { %2681 = vmatprep.subr.bf16.mxu0 %v10426_v59  ;;  %2739 = vmatprep.subr.bf16.mxu1 %v10426_v59 }
 0x1ef   :  { %2682 = vmatpush1.bf16.msra.mxu0 %v10433_v33  ;;  %2740 = vmatpush1.bf16.msra.mxu1 %v10433_v33 }
 0x1f0   :  { %2683 = vmatprep.subr.bf16.mxu0 %v10440_v35  ;;  %2741 = vmatprep.subr.bf16.mxu1 %v10440_v35 }
 0x1f3   :  { %2684 = vmatpush1.bf16.msra.mxu0 %v10447_v40  ;;  %2742 = vmatpush1.bf16.msra.mxu1 %v10447_v40 }
 0x1f4   :  { %2685 = vmatprep.subr.bf16.mxu0 %v10454_v38  ;;  %2743 = vmatprep.subr.bf16.mxu1 %v10454_v38 }
 0x1f7   :  { %2686 = vmatpush1.bf16.msra.mxu0 %v10461_v62  ;;  %2744 = vmatpush1.bf16.msra.mxu1 %v10461_v62 }
 0x1f8   :  { %2687 = vmatprep.subr.bf16.mxu0 %v10468_v0  ;;  %2745 = vmatprep.subr.bf16.mxu1 %v10468_v0 }
 0x1fb   :  { %2688 = vmatpush1.bf16.msra.mxu0 %v10477_v44  ;;  %2746 = vmatpush1.bf16.msra.mxu1 %v10477_v44 }
 0x1fc   :  { %2689 = vmatprep.subr.bf16.mxu0 %v10488_v5  ;;  %2747 = vmatprep.subr.bf16.mxu1 %v10488_v5 }
 0x1ff   :  { %2690 = vmatpush1.bf16.msra.mxu0 %v10499_v49  ;;  %2748 = vmatpush1.bf16.msra.mxu1 %v10499_v49 }
 0x200   :  { %2703 = vmatprep.subr.bf16.mxu0 %v10506_v48  ;;  %2761 = vmatprep.subr.bf16.mxu1 %v10506_v48 }
 0x202   :  { %v1571_v24 = vpop.f32.mrf.mxu0  ;;  %v1629_v22 = vpop.f32.mrf.mxu1 }
 0x203   :  { %v1642_v45 = vmax.f32 %v1571_v24, %v1629_v22  ;;  %2704 = vmatpush2.bf16.msra.mxu0 %v10518_v4  ;;  %2762 = vmatpush2.bf16.msra.mxu1 %v10518_v4  ;;  %v1268_v24 = vmul.f32 0.1, %v7355_v6  ;;  %v420_v22 = vmul.f32 0.1, %v10511_v26 }
 0x204   :  { %v1573_v21 = vpop.f32.mrf.mxu0  ;;  %v1631_v25 = vpop.f32.mrf.mxu1  ;;  %2705 = vmatprep.subr.bf16.mxu0 %v10531_v41  ;;  %2763 = vmatprep.subr.bf16.mxu1 %v10531_v41 }
 0x205   :  { %v1646_v7 = vmax.f32 %v1638_v52, %v1642_v45  ;;  %v1643_v56 = vmax.f32 %v1573_v21, %v1631_v25  ;;  %v850_v52 = vmul.f32 0.1, %v7290_v8  ;;  %v838_v45 = vmul.f32 0.1, %v10521_v17 }
 0x206   :  { %v1575_v29 = vpop.f32.mrf.mxu0  ;;  %v1633_v42 = vpop.f32.mrf.mxu1  ;;  %v440_v21 = vsel %vm424_vm4, %v436_v55, %v10511_v26 }
 0x207   :  { %v1663_v3 = vadd.f32 %v1656_v1, %v1646_v7  ;;  %v1647_v12 = vmax.f32 %v1639_v15, %v1643_v56  ;;  %v1644_v47 = vmax.f32 %v1575_v29, %v1633_v42  ;;  %2706 = vmatpush2.bf16.msra.mxu0 %v10543_v13  ;;  %2764 = vmatpush2.bf16.msra.mxu1 %v10543_v13  ;;  %v854_v18 = vadd.f32 4.0, %v850_v52 }
 0x208   :  { %v1577_v16 = vpop.f32.mrf.mxu0  ;;  %v1635_v50 = vpop.f32.mrf.mxu1  ;;  %2791 = vmatprep.subr.bf16.mxu0 %v10356_v14  ;;  %2849 = vmatprep.subr.bf16.mxu1 %v10356_v14  ;;  %v444_v52 = vsel %vm416_vm5, %v420_v22, %v440_v21  ;;  %v10701_v22 = vld [vmem:[%s13184_s1 + $0x4c0] ss:$8 sps:$4 sm:$0xff]   ;;  %v10752_v21 = vld [vmem:[%s13184_s1 + $0x484] ss:$8 sps:$4 sm:$0xff]  }
 0x209   :  { %v7417_v51 = vadd.f32 -4.0, %v1663_v3  ;;  %v1664_v15 = vadd.f32 %v1660_v53, %v1647_v12  ;;  %v1648_v43 = vmax.f32 %v1640_v60, %v1644_v47  ;;  %v1645_v58 = vmax.f32 %v1577_v16, %v1635_v50 }
 0x20a   :  { %2708 = vmatmul.mubr.bf16.vlgmr.msra.gmra.mxu0 %v8608_v61  ;;  %2766 = vmatmul.mubr.bf16.vlgmr.msra.gmra.mxu1 %v8609_v36  ;;  %v1671_v25 = vmul.f32 0.1, %v1663_v3  ;;  %vm1675_vm6 = vcmp.gt.f32.partialorder %v1663_v3, 4.0  ;;  %vm1667_vm8 = vcmp.lt.f32.partialorder %v1663_v3, 0.0  ;;  %v858_v57 = vsel %vm842_vm7, %v854_v18, %v10521_v17  ;;  %v10724_v18 = vld [vmem:[%s13184_s1 + $0x4a4] ss:$8 sps:$4 sm:$0xff]  }
 0x20b   :  { %v1683_v14 = vmul.f32 0.1, %v7417_v51  ;;  %2792 = vmatpush1.bf16.msra.mxu0 %v10377_v20  ;;  %2850 = vmatpush1.bf16.msra.mxu1 %v10377_v20  ;;  %v7418_v8 = vadd.f32 -4.0, %v1664_v15  ;;  %v1665_v60 = vadd.f32 %v1656_v1, %v1648_v43  ;;  %v1649_v20 = vmax.f32 %v1641_v23, %v1645_v58  ;;  %v10686_v58 = vld [vmem:[%s13184_s1 + $0x4c4] ss:$8 sps:$4 sm:$0xff]  }
 0x20c   :  { %2793 = vmatprep.subr.bf16.mxu0 %v10388_v46  ;;  %2851 = vmatprep.subr.bf16.mxu1 %v10388_v46  ;;  %v1272_v46 = vadd.f32 4.0, %v1268_v24  ;;  %v1672_v42 = vmul.f32 0.1, %v1664_v15  ;;  %vm1676_vm9 = vcmp.gt.f32.partialorder %v1664_v15, 4.0  ;;  %vm1668_vm11 = vcmp.lt.f32.partialorder %v1664_v15, 0.0 }
 0x20d   :  { %v1687_v19 = vadd.f32 4.0, %v1683_v14  ;;  %7605 = vmatprep.mubr.msk.bf16.mxu0 %vm164_vm0, %v8610_v27  ;;  %7610 = vmatprep.mubr.msk.bf16.mxu1 %vm164_vm0, %v8612_v54  ;;  %v1684_v7 = vmul.f32 0.1, %v7418_v8  ;;  %v7419_v23 = vadd.f32 -4.0, %v1665_v60  ;;  %v1666_v1 = vadd.f32 %v1660_v53, %v1649_v20  ;;  %v8646_v24 = vld [vmem:[%s13185_s0 + $0x74] ss:$8 sps:$4 sm:$0xff]  }
 0x20e   :  { %v1276_v53 = vsel %vm1260_vm10, %v1272_v46, %v10535_v2  ;;  %v1673_v17 = vmul.f32 0.1, %v1665_v60  ;;  %vm1677_vm14 = vcmp.gt.f32.partialorder %v1665_v60, 4.0  ;;  %vm1669_vm15 = vcmp.lt.f32.partialorder %v1665_v60, 0.0  ;;  %v8648_v14 = vld [vmem:[%s13185_s0 + $0x174] ss:$8 sps:$4 sm:$0xff]  }
 0x20f   :  { %v1691_v56 = vsel %vm1675_vm6, %v1687_v19, %v1663_v3  ;;  %2794 = vmatpush1.bf16.msra.mxu0 %v10403_v30  ;;  %2852 = vmatpush1.bf16.msra.mxu1 %v10403_v30  ;;  %v1688_v31 = vadd.f32 4.0, %v1684_v7  ;;  %v1685_v30 = vmul.f32 0.1, %v7419_v23  ;;  %v7420_v6 = vadd.f32 -4.0, %v1666_v1  ;;  %v10717_v8 = vld [vmem:[%s13184_s1 + $0x4b0] ss:$8 sps:$4 sm:$0xff]  }
 0x210   :  { %v1695_v63 = vsel %vm1667_vm8, %v1671_v25, %v1691_v56  ;;  %2795 = vmatprep.subr.bf16.mxu0 %v10410_v32  ;;  %2853 = vmatprep.subr.bf16.mxu1 %v10410_v32  ;;  %v862_v32 = vsel %vm834_vm12, %v838_v45, %v858_v57  ;;  %vm1678_vm1 = vcmp.gt.f32.partialorder %v1666_v1, 4.0  ;;  %vm1670_vm2 = vcmp.lt.f32.partialorder %v1666_v1, 0.0  ;;  %v10708_v45 = vld [vmem:[%s13184_s1 + $0x4b4] ss:$8 sps:$4 sm:$0xff]   ;;  %v10731_v19 = vld [vmem:[%s13184_s1 + $0x4a0] ss:$8 sps:$4 sm:$0xff]  }
 0x211   :  { %v10596_v29 = vadd.f32 %v1695_v63, %v10303_v39  ;;  %v1692_v61 = vsel %vm1676_vm9, %v1688_v31, %v1664_v15  ;;  %v1256_v39 = vmul.f32 0.1, %v10535_v2  ;;  %v1689_v12 = vadd.f32 4.0, %v1685_v30  ;;  %v10745_v20 = vld [vmem:[%s13184_s1 + $0x490] ss:$8 sps:$4 sm:$0xff]  }
 0x212   :  { %v1696_v36 = vsel %vm1668_vm11, %v1672_v42, %v1692_v61  ;;  %v1686_v47 = vmul.f32 0.1, %v7420_v6  ;;  %v866_v50 = vadd.f32 %v862_v32, %v444_v52  ;;  %v1674_v2 = vmul.f32 0.1, %v1666_v1  ;;  %v10759_v25 = vld [vmem:[%s13184_s1 + $0x480] ss:$8 sps:$4 sm:$0xff]  }
 0x213   :  { %2796 = vmatpush1.bf16.msra.mxu0 %v10419_v10  ;;  %2854 = vmatpush1.bf16.msra.mxu1 %v10419_v10  ;;  %v10605_v3 = vadd.f32 %v1696_v36, %v10308_v11  ;;  %v1280_v10 = vsel %vm1252_vm13, %v1256_v39, %v1276_v53  ;;  %v1693_v16 = vsel %vm1677_vm14, %v1689_v12, %v1665_v60  ;;  %v10738_v60 = vld [vmem:[%s13184_s1 + $0x494] ss:$8 sps:$4 sm:$0xff]   ;;  %v10773_v46 = vld [vmem:[%s13184_s1 + $0x470] ss:$8 sps:$4 sm:$0xff]   ;;  %v10780_v56 = vld [vmem:[%s13184_s1 + $0x464] ss:$8 sps:$4 sm:$0xff]  }
 0x214   :  { %2797 = vmatprep.subr.bf16.mxu0 %v10426_v59  ;;  %2855 = vmatprep.subr.bf16.mxu1 %v10426_v59  ;;  %v1697_v51 = vsel %vm1669_vm15, %v1673_v17, %v1693_v16  ;;  %v1690_v11 = vadd.f32 4.0, %v1686_v47  ;;  %v1284_v26 = vadd.f32 %v1280_v10, %v866_v50  ;;  %v10766_v7 = vld [vmem:[%s13184_s1 + $0x474] ss:$8 sps:$4 sm:$0xff]   ;;  %v10787_v63 = vld [vmem:[%s13184_s1 + $0x460] ss:$8 sps:$4 sm:$0xff]  }
 0x215   :  { %v10615_v59 = vadd.f32 %v1697_v51, %v10315_v9  ;;  %v10794_v31 = vld [vmem:[%s13184_s1 + $0x4f4] ss:$8 sps:$4 sm:$0xff]   ;;  %v10801_v23 = vld [vmem:[%s13184_s1 + $0x4f0] ss:$8 sps:$4 sm:$0xff]   ;;  %v10811_v57 = vld [vmem:[%s13184_s1 + $0x4e4] ss:$8 sps:$4 sm:$0xff]  }
 0x216   :  { %v1694_v27 = vsel %vm1678_vm1, %v1690_v11, %v1666_v1  ;;  %v7481_v1 = vld [vmem:[%s13186_s2 + $0x8] sm:$0x3]  ;;  %v8650_v10 = vld [vmem:[%s13185_s0 + $0x70] ss:$8 sps:$4 sm:$0xff]  }
 0x217   :  { %2798 = vmatpush1.bf16.msra.mxu0 %v10433_v33  ;;  %2856 = vmatpush1.bf16.msra.mxu1 %v10433_v33  ;;  %v1698_v54 = vsel %vm1670_vm2, %v1674_v2, %v1694_v27  ;;  %v2074_v53 = vrot.slane %v7481_v1, %v9904_v34  ;;  %v10819_v36 = vld [vmem:[%s13184_s1 + $0x4e0] ss:$8 sps:$4 sm:$0xff]   ;;  %v2078_v17 = vrot.slane %v7481_v1, %v9916_v37  ;;  %v8651_v16 = vld [vmem:[%s13185_s0 + $0x170] ss:$8 sps:$4 sm:$0xff]  }
 0x218   :  { %2799 = vmatprep.subr.bf16.mxu0 %v10440_v35  ;;  %2857 = vmatprep.subr.bf16.mxu1 %v10440_v35  ;;  %v10619_v55 = vadd.f32 %v1698_v54, %v1284_v26  ;;  %v8652_v54 = vld [vmem:[%s13185_s0 + $0x274] ss:$8 sps:$4 sm:$0xff]  }
 0x21b   :  { %2800 = vmatpush1.bf16.msra.mxu0 %v10447_v40  ;;  %2858 = vmatpush1.bf16.msra.mxu1 %v10447_v40 }
 0x21c   :  { %2801 = vmatprep.subr.bf16.mxu0 %v10454_v38  ;;  %2859 = vmatprep.subr.bf16.mxu1 %v10454_v38 }
 0x21f   :  { %2802 = vmatpush1.bf16.msra.mxu0 %v10461_v62  ;;  %2860 = vmatpush1.bf16.msra.mxu1 %v10461_v62  ;;  %v10654_v62 = vld [vmem:[%s13184_s1 + $0x4d4] ss:$8 sps:$4 sm:$0xff]  }
 0x220   :  { %2803 = vmatprep.subr.bf16.mxu0 %v10468_v0  ;;  %2861 = vmatprep.subr.bf16.mxu1 %v10468_v0 }
 0x223   :  { %2804 = vmatpush1.bf16.msra.mxu0 %v10477_v44  ;;  %2862 = vmatpush1.bf16.msra.mxu1 %v10477_v44 }
 0x224   :  { %2805 = vmatprep.subr.bf16.mxu0 %v10488_v5  ;;  %2863 = vmatprep.subr.bf16.mxu1 %v10488_v5 }
 0x227   :  { %2806 = vmatpush1.bf16.msra.mxu0 %v10499_v49  ;;  %2864 = vmatpush1.bf16.msra.mxu1 %v10499_v49  ;;  %v8614_v49 = vld [vmem:[%s13185_s0 + $0x260] ss:$8 sps:$4 sm:$0xff]  }
 0x228   :  { %2819 = vmatprep.subr.bf16.mxu0 %v10506_v48  ;;  %2877 = vmatprep.subr.bf16.mxu1 %v10506_v48  ;;  %v8615_v48 = vld [vmem:[%s13185_s0 + $0x360] ss:$8 sps:$4 sm:$0xff]  }
 0x22a   :  { %v10637_v9 = vpop.f32.mrf.mxu0  ;;  %v10639_v33 = vpop.f32.mrf.mxu1 }
 0x22b   :  { %v2056_v35 = vmax.f32 %v10637_v9, %v10639_v33  ;;  %2820 = vmatpush2.bf16.msra.mxu0 %v10518_v4  ;;  %2878 = vmatpush2.bf16.msra.mxu1 %v10518_v4  ;;  %v8654_v9 = vld [vmem:[%s13185_s0 + $0x374] ss:$8 sps:$4 sm:$0xff]  }
 0x22c   :  { %v10645_v40 = vpop.f32.mrf.mxu0  ;;  %v10647_v38 = vpop.f32.mrf.mxu1  ;;  %2821 = vmatprep.subr.bf16.mxu0 %v10531_v41  ;;  %2879 = vmatprep.subr.bf16.mxu1 %v10531_v41  ;;  %v10675_v41 = vld [vmem:[%s13184_s1 + $0x4d0] ss:$8 sps:$4 sm:$0xff]  }
 0x22d   :  { %v2057_v0 = vmax.f32 %v10645_v40, %v10647_v38 }
 0x22e   :  { %v10658_v44 = vpop.f32.mrf.mxu0  ;;  %v10660_v5 = vpop.f32.mrf.mxu1 }
 0x22f   :  { %v2058_v4 = vmax.f32 %v10658_v44, %v10660_v5  ;;  %2822 = vmatpush2.bf16.msra.mxu0 %v10543_v13  ;;  %2880 = vmatpush2.bf16.msra.mxu1 %v10543_v13 }
 0x230   :  { %v10677_v15 = vpop.f32.mrf.mxu0  ;;  %v10679_v43 = vpop.f32.mrf.mxu1  ;;  %3093 = vmatprep.subr.bf16.mxu0 %v10654_v62  ;;  %3151 = vmatprep.subr.bf16.mxu1 %v10654_v62 }
 0x231   :  { %v2059_v13 = vmax.f32 %v10677_v15, %v10679_v43 }
 0x232   :  { %2824 = vmatmul.mubr.bf16.vlgmr.msra.gmra.mxu0 %v8614_v49  ;;  %2882 = vmatmul.mubr.bf16.vlgmr.msra.gmra.mxu1 %v8615_v48 }
 0x233   :  { %3094 = vmatpush1.bf16.msra.mxu0 %v10675_v41  ;;  %3152 = vmatpush1.bf16.msra.mxu1 %v10675_v41 }
 0x234   :  { %3095 = vmatprep.subr.bf16.mxu0 %v10686_v58  ;;  %3153 = vmatprep.subr.bf16.mxu1 %v10686_v58 }
 0x235   :  { %7660 = vmatprep.mubr.msk.bf16.mxu0 %vm164_vm0, %v8646_v24  ;;  %7665 = vmatprep.mubr.msk.bf16.mxu1 %vm164_vm0, %v8648_v14 }
 0x237   :  { %3096 = vmatpush1.bf16.msra.mxu0 %v10701_v22  ;;  %3154 = vmatpush1.bf16.msra.mxu1 %v10701_v22 }
 0x238   :  { %3097 = vmatprep.subr.bf16.mxu0 %v10708_v45  ;;  %3155 = vmatprep.subr.bf16.mxu1 %v10708_v45 }
 0x23b   :  { %3098 = vmatpush1.bf16.msra.mxu0 %v10717_v8  ;;  %3156 = vmatpush1.bf16.msra.mxu1 %v10717_v8 }
 0x23c   :  { %3099 = vmatprep.subr.bf16.mxu0 %v10724_v18  ;;  %3157 = vmatprep.subr.bf16.mxu1 %v10724_v18 }
 0x23f   :  { %3100 = vmatpush1.bf16.msra.mxu0 %v10731_v19  ;;  %3158 = vmatpush1.bf16.msra.mxu1 %v10731_v19 }
 0x240   :  { %3101 = vmatprep.subr.bf16.mxu0 %v10738_v60  ;;  %3159 = vmatprep.subr.bf16.mxu1 %v10738_v60 }
 0x243   :  { %3102 = vmatpush1.bf16.msra.mxu0 %v10745_v20  ;;  %3160 = vmatpush1.bf16.msra.mxu1 %v10745_v20 }
 0x244   :  { %3103 = vmatprep.subr.bf16.mxu0 %v10752_v21  ;;  %3161 = vmatprep.subr.bf16.mxu1 %v10752_v21 }
 0x247   :  { %3104 = vmatpush1.bf16.msra.mxu0 %v10759_v25  ;;  %3162 = vmatpush1.bf16.msra.mxu1 %v10759_v25 }
 0x248   :  { %3105 = vmatprep.subr.bf16.mxu0 %v10766_v7  ;;  %3163 = vmatprep.subr.bf16.mxu1 %v10766_v7 }
 0x24b   :  { %3106 = vmatpush1.bf16.msra.mxu0 %v10773_v46  ;;  %3164 = vmatpush1.bf16.msra.mxu1 %v10773_v46 }
 0x24c   :  { %3107 = vmatprep.subr.bf16.mxu0 %v10780_v56  ;;  %3165 = vmatprep.subr.bf16.mxu1 %v10780_v56 }
 0x24f   :  { %3108 = vmatpush1.bf16.msra.mxu0 %v10787_v63  ;;  %3166 = vmatpush1.bf16.msra.mxu1 %v10787_v63 }
 0x250   :  { %3121 = vmatprep.subr.bf16.mxu0 %v10794_v31  ;;  %3179 = vmatprep.subr.bf16.mxu1 %v10794_v31 }
 0x252   :  { %v1989_v42 = vpop.f32.mrf.mxu0  ;;  %v2047_v61 = vpop.f32.mrf.mxu1 }
 0x253   :  { %v2060_v30 = vmax.f32 %v1989_v42, %v2047_v61  ;;  %3122 = vmatpush2.bf16.msra.mxu0 %v10801_v23  ;;  %3180 = vmatpush2.bf16.msra.mxu1 %v10801_v23 }
 0x254   :  { %v1991_v6 = vpop.f32.mrf.mxu0  ;;  %v2049_v32 = vpop.f32.mrf.mxu1  ;;  %3123 = vmatprep.subr.bf16.mxu0 %v10811_v57  ;;  %3181 = vmatprep.subr.bf16.mxu1 %v10811_v57 }
 0x255   :  { %v2064_v39 = vmax.f32 %v2056_v35, %v2060_v30  ;;  %v2061_v12 = vmax.f32 %v1991_v6, %v2049_v32 }
 0x256   :  { %v1993_v47 = vpop.f32.mrf.mxu0  ;;  %v2051_v52 = vpop.f32.mrf.mxu1 }
 0x257   :  { %v2081_v50 = vadd.f32 %v2074_v53, %v2064_v39  ;;  %v2065_v51 = vmax.f32 %v2057_v0, %v2061_v12  ;;  %v2062_v11 = vmax.f32 %v1993_v47, %v2051_v52  ;;  %3124 = vmatpush2.bf16.msra.mxu0 %v10819_v36  ;;  %3182 = vmatpush2.bf16.msra.mxu1 %v10819_v36  ;;  %v10947_v47 = vld [vmem:[%s13184_s1 + $0x564] ss:$8 sps:$4 sm:$0xff]  }
 0x258   :  { %v1995_v2 = vpop.f32.mrf.mxu0  ;;  %v2053_v26 = vpop.f32.mrf.mxu1  ;;  %3209 = vmatprep.subr.bf16.mxu0 %v10654_v62  ;;  %3267 = vmatprep.subr.bf16.mxu1 %v10654_v62  ;;  %v8688_v52 = vld [vmem:[%s13185_s0 + $0x84] ss:$8 sps:$4 sm:$0xff]  }
 0x259   :  { %v7482_v27 = vadd.f32 -4.0, %v2081_v50  ;;  %v2082_v33 = vadd.f32 %v2078_v17, %v2065_v51  ;;  %v2066_v35 = vmax.f32 %v2058_v4, %v2062_v11  ;;  %v2063_v40 = vmax.f32 %v1995_v2, %v2053_v26  ;;  %v10978_v51 = vld [vmem:[%s13184_s1 + $0x550] ss:$8 sps:$4 sm:$0xff]   ;;  %v10985_v11 = vld [vmem:[%s13184_s1 + $0x544] ss:$8 sps:$4 sm:$0xff]  }
 0x25a   :  { %3126 = vmatmul.mubr.bf16.vlgmr.msra.gmra.mxu0 %v8650_v10  ;;  %3184 = vmatmul.mubr.bf16.vlgmr.msra.gmra.mxu1 %v8651_v16  ;;  %v2089_v5 = vmul.f32 0.1, %v2081_v50  ;;  %vm2093_vm3 = vcmp.gt.f32.partialorder %v2081_v50, 4.0  ;;  %vm2085_vm4 = vcmp.lt.f32.partialorder %v2081_v50, 0.0  ;;  %v8690_v10 = vld [vmem:[%s13185_s0 + $0x184] ss:$8 sps:$4 sm:$0xff]  }
 0x25b   :  { %v2101_v38 = vmul.f32 0.1, %v7482_v27  ;;  %3210 = vmatpush1.bf16.msra.mxu0 %v10675_v41  ;;  %3268 = vmatpush1.bf16.msra.mxu1 %v10675_v41  ;;  %v7483_v62 = vadd.f32 -4.0, %v2082_v33  ;;  %v2083_v49 = vadd.f32 %v2074_v53, %v2066_v35  ;;  %v2067_v44 = vmax.f32 %v2059_v13, %v2063_v40  ;;  %v10962_v16 = vld [vmem:[%s13184_s1 + $0x560] ss:$8 sps:$4 sm:$0xff]  }
 0x25c   :  { %3211 = vmatprep.subr.bf16.mxu0 %v10686_v58  ;;  %3269 = vmatprep.subr.bf16.mxu1 %v10686_v58  ;;  %v2090_v43 = vmul.f32 0.1, %v2082_v33  ;;  %vm2094_vm5 = vcmp.gt.f32.partialorder %v2082_v33, 4.0  ;;  %vm2086_vm6 = vcmp.lt.f32.partialorder %v2082_v33, 0.0  ;;  %v10992_v2 = vld [vmem:[%s13184_s1 + $0x540] ss:$8 sps:$4 sm:$0xff]  }
 0x25d   :  { %v2105_v0 = vadd.f32 4.0, %v2101_v38  ;;  %7670 = vmatprep.mubr.msk.bf16.mxu0 %vm164_vm0, %v8652_v54  ;;  %7675 = vmatprep.mubr.msk.bf16.mxu1 %vm164_vm0, %v8654_v9  ;;  %v2102_v48 = vmul.f32 0.1, %v7483_v62  ;;  %v7484_v24 = vadd.f32 -4.0, %v2083_v49  ;;  %v2084_v14 = vadd.f32 %v2078_v17, %v2067_v44  ;;  %v10999_v26 = vld [vmem:[%s13184_s1 + $0x534] ss:$8 sps:$4 sm:$0xff]  }
 0x25e   :  { %vm2095_vm7 = vcmp.gt.f32.partialorder %v2083_v49, 4.0  ;;  %vm2087_vm8 = vcmp.lt.f32.partialorder %v2083_v49, 0.0  ;;  %v11006_v27 = vld [vmem:[%s13184_s1 + $0x530] ss:$8 sps:$4 sm:$0xff]   ;;  %v11013_v54 = vld [vmem:[%s13184_s1 + $0x524] ss:$8 sps:$4 sm:$0xff]  }
 0x25f   :  { %v2109_v4 = vsel %vm2093_vm3, %v2105_v0, %v2081_v50  ;;  %3212 = vmatpush1.bf16.msra.mxu0 %v10701_v22  ;;  %3270 = vmatpush1.bf16.msra.mxu1 %v10701_v22  ;;  %v2106_v58 = vadd.f32 4.0, %v2102_v48  ;;  %v2103_v1 = vmul.f32 0.1, %v7484_v24  ;;  %v7485_v61 = vadd.f32 -4.0, %v2084_v14  ;;  %v10969_v50 = vld [vmem:[%s13184_s1 + $0x554] ss:$8 sps:$4 sm:$0xff]  }
 0x260   :  { %v2113_v41 = vsel %vm2085_vm4, %v2089_v5, %v2109_v4  ;;  %3213 = vmatprep.subr.bf16.mxu0 %v10708_v45  ;;  %3271 = vmatprep.subr.bf16.mxu1 %v10708_v45  ;;  %vm2096_vm9 = vcmp.gt.f32.partialorder %v2084_v14, 4.0  ;;  %vm2088_vm10 = vcmp.lt.f32.partialorder %v2084_v14, 0.0  ;;  %v11020_v9 = vld [vmem:[%s13184_s1 + $0x520] ss:$8 sps:$4 sm:$0xff]   ;;  %v11034_v35 = vld [vmem:[%s13184_s1 + $0x510] ss:$8 sps:$4 sm:$0xff]  }
 0x261   :  { %v10863_v15 = vadd.f32 %v2113_v41, %v10596_v29  ;;  %v2110_v13 = vsel %vm2094_vm5, %v2106_v58, %v2082_v33  ;;  %v2107_v30 = vadd.f32 4.0, %v2103_v1  ;;  %v2091_v29 = vmul.f32 0.1, %v2083_v49  ;;  %v11027_v33 = vld [vmem:[%s13184_s1 + $0x514] ss:$8 sps:$4 sm:$0xff]  }
 0x262   :  { %v2114_v42 = vsel %vm2086_vm6, %v2090_v43, %v2110_v13  ;;  %v2104_v45 = vmul.f32 0.1, %v7485_v61  ;;  %v11041_v40 = vld [vmem:[%s13184_s1 + $0x504] ss:$8 sps:$4 sm:$0xff]   ;;  %v11048_v38 = vld [vmem:[%s13184_s1 + $0x500] ss:$8 sps:$4 sm:$0xff]  }
 0x263   :  { %3214 = vmatpush1.bf16.msra.mxu0 %v10717_v8  ;;  %3272 = vmatpush1.bf16.msra.mxu1 %v10717_v8  ;;  %v10868_v22 = vadd.f32 %v2114_v42, %v10605_v3  ;;  %v2111_v53 = vsel %vm2095_vm7, %v2107_v30, %v2083_v49  ;;  %v2092_v3 = vmul.f32 0.1, %v2084_v14  ;;  %v11055_v62 = vld [vmem:[%s13184_s1 + $0x594] ss:$8 sps:$4 sm:$0xff]   ;;  %v11062_v0 = vld [vmem:[%s13184_s1 + $0x590] ss:$8 sps:$4 sm:$0xff]  }
 0x264   :  { %3215 = vmatprep.subr.bf16.mxu0 %v10724_v18  ;;  %3273 = vmatprep.subr.bf16.mxu1 %v10724_v18  ;;  %v2115_v6 = vsel %vm2087_vm8, %v2091_v29, %v2111_v53  ;;  %v2108_v32 = vadd.f32 4.0, %v2104_v45  ;;  %v7546_v49 = vld [vmem:[%s13186_s2 + $0xa] sm:$0x3]  ;;  %v11072_v44 = vld [vmem:[%s13184_s1 + $0x584] ss:$8 sps:$4 sm:$0xff]  }
 0x265   :  { %v10875_v8 = vadd.f32 %v2115_v6, %v10615_v59  ;;  %v2492_v41 = vrot.slane %v7546_v49, %v9904_v34  ;;  %v11080_v58 = vld [vmem:[%s13184_s1 + $0x580] ss:$8 sps:$4 sm:$0xff]   ;;  %v2496_v1 = vrot.slane %v7546_v49, %v9916_v37 }
 0x266   :  { %v2112_v18 = vsel %vm2096_vm9, %v2108_v32, %v2084_v14  ;;  %v8692_v30 = vld [vmem:[%s13185_s0 + $0x80] ss:$8 sps:$4 sm:$0xff]  }
 0x267   :  { %3216 = vmatpush1.bf16.msra.mxu0 %v10731_v19  ;;  %3274 = vmatpush1.bf16.msra.mxu1 %v10731_v19  ;;  %v2116_v39 = vsel %vm2088_vm10, %v2092_v3, %v2112_v18  ;;  %v8693_v29 = vld [vmem:[%s13185_s0 + $0x180] ss:$8 sps:$4 sm:$0xff]  }
 0x268   :  { %3217 = vmatprep.subr.bf16.mxu0 %v10738_v60  ;;  %3275 = vmatprep.subr.bf16.mxu1 %v10738_v60  ;;  %v10880_v12 = vadd.f32 %v2116_v39, %v10619_v55  ;;  %v8694_v39 = vld [vmem:[%s13185_s0 + $0x284] ss:$8 sps:$4 sm:$0xff]  }
 0x26b   :  { %3218 = vmatpush1.bf16.msra.mxu0 %v10745_v20  ;;  %3276 = vmatpush1.bf16.msra.mxu1 %v10745_v20 }
 0x26c   :  { %3219 = vmatprep.subr.bf16.mxu0 %v10752_v21  ;;  %3277 = vmatprep.subr.bf16.mxu1 %v10752_v21  ;;  %v10915_v21 = vld [vmem:[%s13184_s1 + $0x574] ss:$8 sps:$4 sm:$0xff]  }
 0x26f   :  { %3220 = vmatpush1.bf16.msra.mxu0 %v10759_v25  ;;  %3278 = vmatpush1.bf16.msra.mxu1 %v10759_v25 }
 0x270   :  { %3221 = vmatprep.subr.bf16.mxu0 %v10766_v7  ;;  %3279 = vmatprep.subr.bf16.mxu1 %v10766_v7 }
 0x273   :  { %3222 = vmatpush1.bf16.msra.mxu0 %v10773_v46  ;;  %3280 = vmatpush1.bf16.msra.mxu1 %v10773_v46 }
 0x274   :  { %3223 = vmatprep.subr.bf16.mxu0 %v10780_v56  ;;  %3281 = vmatprep.subr.bf16.mxu1 %v10780_v56  ;;  %v8656_v56 = vld [vmem:[%s13185_s0 + $0x270] ss:$8 sps:$4 sm:$0xff]  }
 0x277   :  { %3224 = vmatpush1.bf16.msra.mxu0 %v10787_v63  ;;  %3282 = vmatpush1.bf16.msra.mxu1 %v10787_v63  ;;  %v8657_v63 = vld [vmem:[%s13185_s0 + $0x370] ss:$8 sps:$4 sm:$0xff]  }
 0x278   :  { %3237 = vmatprep.subr.bf16.mxu0 %v10794_v31  ;;  %3295 = vmatprep.subr.bf16.mxu1 %v10794_v31 }
 0x27a   :  { %v10898_v59 = vpop.f32.mrf.mxu0  ;;  %v10900_v55 = vpop.f32.mrf.mxu1 }
 0x27b   :  { %v2474_v19 = vmax.f32 %v10898_v59, %v10900_v55  ;;  %3238 = vmatpush2.bf16.msra.mxu0 %v10801_v23  ;;  %3296 = vmatpush2.bf16.msra.mxu1 %v10801_v23  ;;  %v10936_v23 = vld [vmem:[%s13184_s1 + $0x570] ss:$8 sps:$4 sm:$0xff]   ;;  %v8696_v59 = vld [vmem:[%s13185_s0 + $0x384] ss:$8 sps:$4 sm:$0xff]  }
 0x27c   :  { %v10906_v60 = vpop.f32.mrf.mxu0  ;;  %v10908_v20 = vpop.f32.mrf.mxu1  ;;  %3239 = vmatprep.subr.bf16.mxu0 %v10811_v57  ;;  %3297 = vmatprep.subr.bf16.mxu1 %v10811_v57 }
 0x27d   :  { %v2475_v25 = vmax.f32 %v10906_v60, %v10908_v20 }
 0x27e   :  { %v10919_v7 = vpop.f32.mrf.mxu0  ;;  %v10921_v46 = vpop.f32.mrf.mxu1 }
 0x27f   :  { %v2476_v31 = vmax.f32 %v10919_v7, %v10921_v46  ;;  %3240 = vmatpush2.bf16.msra.mxu0 %v10819_v36  ;;  %3298 = vmatpush2.bf16.msra.mxu1 %v10819_v36 }
 0x280   :  { %v10938_v57 = vpop.f32.mrf.mxu0  ;;  %v10940_v17 = vpop.f32.mrf.mxu1  ;;  %3511 = vmatprep.subr.bf16.mxu0 %v10915_v21  ;;  %3569 = vmatprep.subr.bf16.mxu1 %v10915_v21 }
 0x281   :  { %v2477_v36 = vmax.f32 %v10938_v57, %v10940_v17 }
 0x282   :  { %3242 = vmatmul.mubr.bf16.vlgmr.msra.gmra.mxu0 %v8656_v56  ;;  %3300 = vmatmul.mubr.bf16.vlgmr.msra.gmra.mxu1 %v8657_v63 }
 0x283   :  { %3512 = vmatpush1.bf16.msra.mxu0 %v10936_v23  ;;  %3570 = vmatpush1.bf16.msra.mxu1 %v10936_v23 }
 0x284   :  { %3513 = vmatprep.subr.bf16.mxu0 %v10947_v47  ;;  %3571 = vmatprep.subr.bf16.mxu1 %v10947_v47 }
 0x285   :  { %7725 = vmatprep.mubr.msk.bf16.mxu0 %vm164_vm0, %v8688_v52  ;;  %7730 = vmatprep.mubr.msk.bf16.mxu1 %vm164_vm0, %v8690_v10 }
 0x287   :  { %3514 = vmatpush1.bf16.msra.mxu0 %v10962_v16  ;;  %3572 = vmatpush1.bf16.msra.mxu1 %v10962_v16 }
 0x288   :  { %3515 = vmatprep.subr.bf16.mxu0 %v10969_v50  ;;  %3573 = vmatprep.subr.bf16.mxu1 %v10969_v50 }
 0x28b   :  { %3516 = vmatpush1.bf16.msra.mxu0 %v10978_v51  ;;  %3574 = vmatpush1.bf16.msra.mxu1 %v10978_v51 }
 0x28c   :  { %3517 = vmatprep.subr.bf16.mxu0 %v10985_v11  ;;  %3575 = vmatprep.subr.bf16.mxu1 %v10985_v11 }
 0x28f   :  { %3518 = vmatpush1.bf16.msra.mxu0 %v10992_v2  ;;  %3576 = vmatpush1.bf16.msra.mxu1 %v10992_v2 }
 0x290   :  { %3519 = vmatprep.subr.bf16.mxu0 %v10999_v26  ;;  %3577 = vmatprep.subr.bf16.mxu1 %v10999_v26 }
 0x293   :  { %3520 = vmatpush1.bf16.msra.mxu0 %v11006_v27  ;;  %3578 = vmatpush1.bf16.msra.mxu1 %v11006_v27 }
 0x294   :  { %3521 = vmatprep.subr.bf16.mxu0 %v11013_v54  ;;  %3579 = vmatprep.subr.bf16.mxu1 %v11013_v54 }
 0x297   :  { %3522 = vmatpush1.bf16.msra.mxu0 %v11020_v9  ;;  %3580 = vmatpush1.bf16.msra.mxu1 %v11020_v9 }
 0x298   :  { %3523 = vmatprep.subr.bf16.mxu0 %v11027_v33  ;;  %3581 = vmatprep.subr.bf16.mxu1 %v11027_v33 }
 0x29b   :  { %3524 = vmatpush1.bf16.msra.mxu0 %v11034_v35  ;;  %3582 = vmatpush1.bf16.msra.mxu1 %v11034_v35 }
 0x29c   :  { %3525 = vmatprep.subr.bf16.mxu0 %v11041_v40  ;;  %3583 = vmatprep.subr.bf16.mxu1 %v11041_v40 }
 0x29f   :  { %3526 = vmatpush1.bf16.msra.mxu0 %v11048_v38  ;;  %3584 = vmatpush1.bf16.msra.mxu1 %v11048_v38 }
 0x2a0   :  { %3539 = vmatprep.subr.bf16.mxu0 %v11055_v62  ;;  %3597 = vmatprep.subr.bf16.mxu1 %v11055_v62 }
 0x2a2   :  { %v2407_v5 = vpop.f32.mrf.mxu0  ;;  %v2465_v48 = vpop.f32.mrf.mxu1 }
 0x2a3   :  { %v2478_v4 = vmax.f32 %v2407_v5, %v2465_v48  ;;  %3540 = vmatpush2.bf16.msra.mxu0 %v11062_v0  ;;  %3598 = vmatpush2.bf16.msra.mxu1 %v11062_v0 }
 0x2a4   :  { %v2409_v24 = vpop.f32.mrf.mxu0  ;;  %v2467_v14 = vpop.f32.mrf.mxu1  ;;  %3541 = vmatprep.subr.bf16.mxu0 %v11072_v44  ;;  %3599 = vmatprep.subr.bf16.mxu1 %v11072_v44 }
 0x2a5   :  { %v2482_v43 = vmax.f32 %v2474_v19, %v2478_v4  ;;  %v2479_v13 = vmax.f32 %v2409_v24, %v2467_v14 }
 0x2a6   :  { %v2411_v42 = vpop.f32.mrf.mxu0  ;;  %v2469_v61 = vpop.f32.mrf.mxu1 }
 0x2a7   :  { %v2499_v45 = vadd.f32 %v2492_v41, %v2482_v43  ;;  %v2483_v53 = vmax.f32 %v2475_v25, %v2479_v13  ;;  %v2480_v6 = vmax.f32 %v2411_v42, %v2469_v61  ;;  %3542 = vmatpush2.bf16.msra.mxu0 %v11080_v58  ;;  %3600 = vmatpush2.bf16.msra.mxu1 %v11080_v58  ;;  %v11208_v42 = vld [vmem:[%s13184_s1 + $0x604] ss:$8 sps:$4 sm:$0xff]   ;;  %v8730_v61 = vld [vmem:[%s13185_s0 + $0x94] ss:$8 sps:$4 sm:$0xff]  }
 0x2a8   :  { %v2413_v32 = vpop.f32.mrf.mxu0  ;;  %v2471_v3 = vpop.f32.mrf.mxu1  ;;  %3627 = vmatprep.subr.bf16.mxu0 %v10915_v21  ;;  %3685 = vmatprep.subr.bf16.mxu1 %v10915_v21 }
 0x2a9   :  { %v7547_v18 = vadd.f32 -4.0, %v2499_v45  ;;  %v2500_v55 = vadd.f32 %v2496_v1, %v2483_v53  ;;  %v2484_v19 = vmax.f32 %v2476_v31, %v2480_v6  ;;  %v2481_v60 = vmax.f32 %v2413_v32, %v2471_v3  ;;  %v11239_v53 = vld [vmem:[%s13184_s1 + $0x5f0] ss:$8 sps:$4 sm:$0xff]   ;;  %v11246_v6 = vld [vmem:[%s13184_s1 + $0x5e4] ss:$8 sps:$4 sm:$0xff]  }
 0x2aa   :  { %3544 = vmatmul.mubr.bf16.vlgmr.msra.gmra.mxu0 %v8692_v30  ;;  %3602 = vmatmul.mubr.bf16.vlgmr.msra.gmra.mxu1 %v8693_v29  ;;  %v2507_v46 = vmul.f32 0.1, %v2499_v45  ;;  %vm2511_vm11 = vcmp.gt.f32.partialorder %v2499_v45, 4.0  ;;  %vm2503_vm12 = vcmp.lt.f32.partialorder %v2499_v45, 0.0  ;;  %v8732_v30 = vld [vmem:[%s13185_s0 + $0x194] ss:$8 sps:$4 sm:$0xff]  }
 0x2ab   :  { %v2519_v20 = vmul.f32 0.1, %v7547_v18  ;;  %3628 = vmatpush1.bf16.msra.mxu0 %v10936_v23  ;;  %3686 = vmatpush1.bf16.msra.mxu1 %v10936_v23  ;;  %v7548_v21 = vadd.f32 -4.0, %v2500_v55  ;;  %v2501_v56 = vadd.f32 %v2492_v41, %v2484_v19  ;;  %v2485_v7 = vmax.f32 %v2477_v36, %v2481_v60  ;;  %v11223_v29 = vld [vmem:[%s13184_s1 + $0x600] ss:$8 sps:$4 sm:$0xff]  }
 0x2ac   :  { %3629 = vmatprep.subr.bf16.mxu0 %v10947_v47  ;;  %3687 = vmatprep.subr.bf16.mxu1 %v10947_v47  ;;  %v2508_v17 = vmul.f32 0.1, %v2500_v55  ;;  %vm2512_vm13 = vcmp.gt.f32.partialorder %v2500_v55, 4.0  ;;  %vm2504_vm14 = vcmp.lt.f32.partialorder %v2500_v55, 0.0  ;;  %v11253_v32 = vld [vmem:[%s13184_s1 + $0x5e0] ss:$8 sps:$4 sm:$0xff]  }
 0x2ad   :  { %v2523_v25 = vadd.f32 4.0, %v2519_v20  ;;  %7735 = vmatprep.mubr.msk.bf16.mxu0 %vm164_vm0, %v8694_v39  ;;  %7740 = vmatprep.mubr.msk.bf16.mxu1 %vm164_vm0, %v8696_v59  ;;  %v2520_v63 = vmul.f32 0.1, %v7548_v21  ;;  %v7549_v52 = vadd.f32 -4.0, %v2501_v56  ;;  %v2502_v10 = vadd.f32 %v2496_v1, %v2485_v7  ;;  %v11260_v3 = vld [vmem:[%s13184_s1 + $0x5d4] ss:$8 sps:$4 sm:$0xff]  }
 0x2ae   :  { %vm2513_vm15 = vcmp.gt.f32.partialorder %v2501_v56, 4.0  ;;  %vm2505_vm1 = vcmp.lt.f32.partialorder %v2501_v56, 0.0  ;;  %v11267_v18 = vld [vmem:[%s13184_s1 + $0x5d0] ss:$8 sps:$4 sm:$0xff]   ;;  %v11274_v39 = vld [vmem:[%s13184_s1 + $0x5c4] ss:$8 sps:$4 sm:$0xff]  }
 0x2af   :  { %v2527_v31 = vsel %vm2511_vm11, %v2523_v25, %v2499_v45  ;;  %3630 = vmatpush1.bf16.msra.mxu0 %v10962_v16  ;;  %3688 = vmatpush1.bf16.msra.mxu1 %v10962_v16  ;;  %v2524_v47 = vadd.f32 4.0, %v2520_v63  ;;  %v2521_v49 = vmul.f32 0.1, %v7549_v52  ;;  %v7550_v48 = vadd.f32 -4.0, %v2502_v10  ;;  %v11230_v45 = vld [vmem:[%s13184_s1 + $0x5f4] ss:$8 sps:$4 sm:$0xff]  }
 0x2b0   :  { %v2531_v23 = vsel %vm2503_vm12, %v2507_v46, %v2527_v31  ;;  %3631 = vmatprep.subr.bf16.mxu0 %v10969_v50  ;;  %3689 = vmatprep.subr.bf16.mxu1 %v10969_v50  ;;  %vm2514_vm2 = vcmp.gt.f32.partialorder %v2502_v10, 4.0  ;;  %vm2506_vm3 = vcmp.lt.f32.partialorder %v2502_v10, 0.0  ;;  %v11281_v59 = vld [vmem:[%s13184_s1 + $0x5c0] ss:$8 sps:$4 sm:$0xff]   ;;  %v11295_v19 = vld [vmem:[%s13184_s1 + $0x5b0] ss:$8 sps:$4 sm:$0xff]  }
 0x2b1   :  { %v11124_v57 = vadd.f32 %v2531_v23, %v10863_v15  ;;  %v2528_v36 = vsel %vm2512_vm13, %v2524_v47, %v2500_v55  ;;  %v2525_v4 = vadd.f32 4.0, %v2521_v49  ;;  %v2509_v15 = vmul.f32 0.1, %v2501_v56  ;;  %v11288_v55 = vld [vmem:[%s13184_s1 + $0x5b4] ss:$8 sps:$4 sm:$0xff]  }
 0x2b2   :  { %v2532_v5 = vsel %vm2504_vm14, %v2508_v17, %v2528_v36  ;;  %v2522_v50 = vmul.f32 0.1, %v7550_v48  ;;  %v11302_v60 = vld [vmem:[%s13184_s1 + $0x5a4] ss:$8 sps:$4 sm:$0xff]   ;;  %v11309_v20 = vld [vmem:[%s13184_s1 + $0x5a0] ss:$8 sps:$4 sm:$0xff]  }
 0x2b3   :  { %3632 = vmatpush1.bf16.msra.mxu0 %v10978_v51  ;;  %3690 = vmatpush1.bf16.msra.mxu1 %v10978_v51  ;;  %v11129_v16 = vadd.f32 %v2532_v5, %v10868_v22  ;;  %v2529_v41 = vsel %vm2513_vm15, %v2525_v4, %v2501_v56  ;;  %v2510_v22 = vmul.f32 0.1, %v2502_v10  ;;  %v11316_v21 = vld [vmem:[%s13184_s1 + $0x634] ss:$8 sps:$4 sm:$0xff]   ;;  %v11323_v25 = vld [vmem:[%s13184_s1 + $0x630] ss:$8 sps:$4 sm:$0xff]  }
 0x2b4   :  { %3633 = vmatprep.subr.bf16.mxu0 %v10985_v11  ;;  %3691 = vmatprep.subr.bf16.mxu1 %v10985_v11  ;;  %v2533_v24 = vsel %vm2505_vm1, %v2509_v15, %v2529_v41  ;;  %v2526_v14 = vadd.f32 4.0, %v2522_v50  ;;  %v7611_v56 = vld [vmem:[%s13186_s2 + $0xc] sm:$0x3]  ;;  %v11341_v47 = vld [vmem:[%s13184_s1 + $0x620] ss:$8 sps:$4 sm:$0xff]  }
 0x2b5   :  { %v11136_v51 = vadd.f32 %v2533_v24, %v10875_v8  ;;  %v11333_v7 = vld [vmem:[%s13184_s1 + $0x624] ss:$8 sps:$4 sm:$0xff]   ;;  %v2910_v23 = vrot.slane %v7611_v56, %v9904_v34  ;;  %v2914_v49 = vrot.slane %v7611_v56, %v9916_v37  ;;  %v8734_v4 = vld [vmem:[%s13185_s0 + $0x90] ss:$8 sps:$4 sm:$0xff]  }
 0x2b6   :  { %v2530_v11 = vsel %vm2514_vm2, %v2526_v14, %v2502_v10  ;;  %v8735_v15 = vld [vmem:[%s13185_s0 + $0x190] ss:$8 sps:$4 sm:$0xff]  }
 0x2b7   :  { %3634 = vmatpush1.bf16.msra.mxu0 %v10992_v2  ;;  %3692 = vmatpush1.bf16.msra.mxu1 %v10992_v2  ;;  %v2534_v43 = vsel %vm2506_vm3, %v2510_v22, %v2530_v11 }
 0x2b8   :  { %3635 = vmatprep.subr.bf16.mxu0 %v10999_v26  ;;  %3693 = vmatprep.subr.bf16.mxu1 %v10999_v26  ;;  %v11141_v13 = vadd.f32 %v2534_v43, %v10880_v12  ;;  %v8736_v43 = vld [vmem:[%s13185_s0 + $0x294] ss:$8 sps:$4 sm:$0xff]  }
 0x2bb   :  { %3636 = vmatpush1.bf16.msra.mxu0 %v11006_v27  ;;  %3694 = vmatpush1.bf16.msra.mxu1 %v11006_v27 }
 0x2bc   :  { %3637 = vmatprep.subr.bf16.mxu0 %v11013_v54  ;;  %3695 = vmatprep.subr.bf16.mxu1 %v11013_v54  ;;  %v11176_v54 = vld [vmem:[%s13184_s1 + $0x614] ss:$8 sps:$4 sm:$0xff]  }
 0x2bf   :  { %3638 = vmatpush1.bf16.msra.mxu0 %v11020_v9  ;;  %3696 = vmatpush1.bf16.msra.mxu1 %v11020_v9 }
 0x2c0   :  { %3639 = vmatprep.subr.bf16.mxu0 %v11027_v33  ;;  %3697 = vmatprep.subr.bf16.mxu1 %v11027_v33 }
 0x2c3   :  { %3640 = vmatpush1.bf16.msra.mxu0 %v11034_v35  ;;  %3698 = vmatpush1.bf16.msra.mxu1 %v11034_v35 }
 0x2c4   :  { %3641 = vmatprep.subr.bf16.mxu0 %v11041_v40  ;;  %3699 = vmatprep.subr.bf16.mxu1 %v11041_v40  ;;  %v8698_v40 = vld [vmem:[%s13185_s0 + $0x280] ss:$8 sps:$4 sm:$0xff]  }
 0x2c7   :  { %3642 = vmatpush1.bf16.msra.mxu0 %v11048_v38  ;;  %3700 = vmatpush1.bf16.msra.mxu1 %v11048_v38  ;;  %v8699_v38 = vld [vmem:[%s13185_s0 + $0x380] ss:$8 sps:$4 sm:$0xff]  }
 0x2c8   :  { %3655 = vmatprep.subr.bf16.mxu0 %v11055_v62  ;;  %3713 = vmatprep.subr.bf16.mxu1 %v11055_v62 }
 0x2ca   :  { %v11159_v8 = vpop.f32.mrf.mxu0  ;;  %v11161_v12 = vpop.f32.mrf.mxu1 }
 0x2cb   :  { %v2892_v2 = vmax.f32 %v11159_v8, %v11161_v12  ;;  %3656 = vmatpush2.bf16.msra.mxu0 %v11062_v0  ;;  %3714 = vmatpush2.bf16.msra.mxu1 %v11062_v0  ;;  %v11197_v0 = vld [vmem:[%s13184_s1 + $0x610] ss:$8 sps:$4 sm:$0xff]   ;;  %v8738_v8 = vld [vmem:[%s13185_s0 + $0x394] ss:$8 sps:$4 sm:$0xff]  }
 0x2cc   :  { %v11167_v26 = vpop.f32.mrf.mxu0  ;;  %v11169_v27 = vpop.f32.mrf.mxu1  ;;  %3657 = vmatprep.subr.bf16.mxu0 %v11072_v44  ;;  %3715 = vmatprep.subr.bf16.mxu1 %v11072_v44 }
 0x2cd   :  { %v2893_v9 = vmax.f32 %v11167_v26, %v11169_v27 }
 0x2ce   :  { %v11180_v33 = vpop.f32.mrf.mxu0  ;;  %v11182_v35 = vpop.f32.mrf.mxu1 }
 0x2cf   :  { %v2894_v62 = vmax.f32 %v11180_v33, %v11182_v35  ;;  %3658 = vmatpush2.bf16.msra.mxu0 %v11080_v58  ;;  %3716 = vmatpush2.bf16.msra.mxu1 %v11080_v58 }
 0x2d0   :  { %v11199_v44 = vpop.f32.mrf.mxu0  ;;  %v11201_v1 = vpop.f32.mrf.mxu1  ;;  %3929 = vmatprep.subr.bf16.mxu0 %v11176_v54  ;;  %3987 = vmatprep.subr.bf16.mxu1 %v11176_v54 }
 0x2d1   :  { %v2895_v58 = vmax.f32 %v11199_v44, %v11201_v1 }
 0x2d2   :  { %3660 = vmatmul.mubr.bf16.vlgmr.msra.gmra.mxu0 %v8698_v40  ;;  %3718 = vmatmul.mubr.bf16.vlgmr.msra.gmra.mxu1 %v8699_v38 }
 0x2d3   :  { %3930 = vmatpush1.bf16.msra.mxu0 %v11197_v0  ;;  %3988 = vmatpush1.bf16.msra.mxu1 %v11197_v0 }
 0x2d4   :  { %3931 = vmatprep.subr.bf16.mxu0 %v11208_v42  ;;  %3989 = vmatprep.subr.bf16.mxu1 %v11208_v42 }
 0x2d5   :  { %7790 = vmatprep.mubr.msk.bf16.mxu0 %vm164_vm0, %v8730_v61  ;;  %7795 = vmatprep.mubr.msk.bf16.mxu1 %vm164_vm0, %v8732_v30 }
 0x2d7   :  { %3932 = vmatpush1.bf16.msra.mxu0 %v11223_v29  ;;  %3990 = vmatpush1.bf16.msra.mxu1 %v11223_v29 }
 0x2d8   :  { %3933 = vmatprep.subr.bf16.mxu0 %v11230_v45  ;;  %3991 = vmatprep.subr.bf16.mxu1 %v11230_v45 }
 0x2db   :  { %3934 = vmatpush1.bf16.msra.mxu0 %v11239_v53  ;;  %3992 = vmatpush1.bf16.msra.mxu1 %v11239_v53 }
 0x2dc   :  { %3935 = vmatprep.subr.bf16.mxu0 %v11246_v6  ;;  %3993 = vmatprep.subr.bf16.mxu1 %v11246_v6 }
 0x2df   :  { %3936 = vmatpush1.bf16.msra.mxu0 %v11253_v32  ;;  %3994 = vmatpush1.bf16.msra.mxu1 %v11253_v32 }
 0x2e0   :  { %3937 = vmatprep.subr.bf16.mxu0 %v11260_v3  ;;  %3995 = vmatprep.subr.bf16.mxu1 %v11260_v3 }
 0x2e3   :  { %3938 = vmatpush1.bf16.msra.mxu0 %v11267_v18  ;;  %3996 = vmatpush1.bf16.msra.mxu1 %v11267_v18 }
 0x2e4   :  { %3939 = vmatprep.subr.bf16.mxu0 %v11274_v39  ;;  %3997 = vmatprep.subr.bf16.mxu1 %v11274_v39 }
 0x2e7   :  { %3940 = vmatpush1.bf16.msra.mxu0 %v11281_v59  ;;  %3998 = vmatpush1.bf16.msra.mxu1 %v11281_v59 }
 0x2e8   :  { %3941 = vmatprep.subr.bf16.mxu0 %v11288_v55  ;;  %3999 = vmatprep.subr.bf16.mxu1 %v11288_v55 }
 0x2eb   :  { %3942 = vmatpush1.bf16.msra.mxu0 %v11295_v19  ;;  %4000 = vmatpush1.bf16.msra.mxu1 %v11295_v19 }
 0x2ec   :  { %3943 = vmatprep.subr.bf16.mxu0 %v11302_v60  ;;  %4001 = vmatprep.subr.bf16.mxu1 %v11302_v60 }
 0x2ef   :  { %3944 = vmatpush1.bf16.msra.mxu0 %v11309_v20  ;;  %4002 = vmatpush1.bf16.msra.mxu1 %v11309_v20 }
 0x2f0   :  { %3957 = vmatprep.subr.bf16.mxu0 %v11316_v21  ;;  %4015 = vmatprep.subr.bf16.mxu1 %v11316_v21 }
 0x2f2   :  { %v2825_v46 = vpop.f32.mrf.mxu0  ;;  %v2883_v63 = vpop.f32.mrf.mxu1 }
 0x2f3   :  { %v2896_v31 = vmax.f32 %v2825_v46, %v2883_v63  ;;  %3958 = vmatpush2.bf16.msra.mxu0 %v11323_v25  ;;  %4016 = vmatpush2.bf16.msra.mxu1 %v11323_v25 }
 0x2f4   :  { %v2827_v52 = vpop.f32.mrf.mxu0  ;;  %v2885_v10 = vpop.f32.mrf.mxu1  ;;  %3959 = vmatprep.subr.bf16.mxu0 %v11333_v7  ;;  %4017 = vmatprep.subr.bf16.mxu1 %v11333_v7 }
 0x2f5   :  { %v2900_v17 = vmax.f32 %v2892_v2, %v2896_v31  ;;  %v2897_v36 = vmax.f32 %v2827_v52, %v2885_v10 }
 0x2f6   :  { %v2829_v5 = vpop.f32.mrf.mxu0  ;;  %v2887_v48 = vpop.f32.mrf.mxu1 }
 0x2f7   :  { %v2917_v50 = vadd.f32 %v2910_v23, %v2900_v17  ;;  %v2901_v41 = vmax.f32 %v2893_v9, %v2897_v36  ;;  %v2898_v24 = vmax.f32 %v2829_v5, %v2887_v48  ;;  %3960 = vmatpush2.bf16.msra.mxu0 %v11341_v47  ;;  %4018 = vmatpush2.bf16.msra.mxu1 %v11341_v47  ;;  %v11469_v5 = vld [vmem:[%s13184_s1 + $0x6a4] ss:$8 sps:$4 sm:$0xff]  }
 0x2f8   :  { %v2831_v14 = vpop.f32.mrf.mxu0  ;;  %v2889_v22 = vpop.f32.mrf.mxu1  ;;  %4045 = vmatprep.subr.bf16.mxu0 %v11176_v54  ;;  %4103 = vmatprep.subr.bf16.mxu1 %v11176_v54  ;;  %v8772_v48 = vld [vmem:[%s13185_s0 + $0xa4] ss:$8 sps:$4 sm:$0xff]  }
 0x2f9   :  { %v7612_v11 = vadd.f32 -4.0, %v2917_v50  ;;  %v2918_v12 = vadd.f32 %v2914_v49, %v2901_v41  ;;  %v2902_v2 = vmax.f32 %v2894_v62, %v2898_v24  ;;  %v2899_v26 = vmax.f32 %v2831_v14, %v2889_v22  ;;  %v11500_v41 = vld [vmem:[%s13184_s1 + $0x690] ss:$8 sps:$4 sm:$0xff]   ;;  %v11507_v24 = vld [vmem:[%s13184_s1 + $0x684] ss:$8 sps:$4 sm:$0xff]  }
 0x2fa   :  { %3962 = vmatmul.mubr.bf16.vlgmr.msra.gmra.mxu0 %v8734_v4  ;;  %4020 = vmatmul.mubr.bf16.vlgmr.msra.gmra.mxu1 %v8735_v15  ;;  %v2925_v35 = vmul.f32 0.1, %v2917_v50  ;;  %vm2929_vm4 = vcmp.gt.f32.partialorder %v2917_v50, 4.0  ;;  %vm2921_vm5 = vcmp.lt.f32.partialorder %v2917_v50, 0.0  ;;  %v8774_v4 = vld [vmem:[%s13185_s0 + $0x1a4] ss:$8 sps:$4 sm:$0xff]  }
 0x2fb   :  { %v2937_v27 = vmul.f32 0.1, %v7612_v11  ;;  %4046 = vmatpush1.bf16.msra.mxu0 %v11197_v0  ;;  %4104 = vmatpush1.bf16.msra.mxu1 %v11197_v0  ;;  %v7613_v54 = vadd.f32 -4.0, %v2918_v12  ;;  %v2919_v40 = vadd.f32 %v2910_v23, %v2902_v2  ;;  %v2903_v33 = vmax.f32 %v2895_v58, %v2899_v26  ;;  %v11484_v15 = vld [vmem:[%s13184_s1 + $0x6a0] ss:$8 sps:$4 sm:$0xff]  }
 0x2fc   :  { %4047 = vmatprep.subr.bf16.mxu0 %v11208_v42  ;;  %4105 = vmatprep.subr.bf16.mxu1 %v11208_v42  ;;  %v2926_v1 = vmul.f32 0.1, %v2918_v12  ;;  %vm2930_vm6 = vcmp.gt.f32.partialorder %v2918_v12, 4.0  ;;  %vm2922_vm7 = vcmp.lt.f32.partialorder %v2918_v12, 0.0  ;;  %v11514_v14 = vld [vmem:[%s13184_s1 + $0x680] ss:$8 sps:$4 sm:$0xff]  }
 0x2fd   :  { %v2941_v9 = vadd.f32 4.0, %v2937_v27  ;;  %7800 = vmatprep.mubr.msk.bf16.mxu0 %vm164_vm0, %v8736_v43  ;;  %7805 = vmatprep.mubr.msk.bf16.mxu1 %vm164_vm0, %v8738_v8  ;;  %v2938_v38 = vmul.f32 0.1, %v7613_v54  ;;  %v7614_v61 = vadd.f32 -4.0, %v2919_v40  ;;  %v2920_v30 = vadd.f32 %v2914_v49, %v2903_v33  ;;  %v11521_v22 = vld [vmem:[%s13184_s1 + $0x674] ss:$8 sps:$4 sm:$0xff]  }
 0x2fe   :  { %vm2931_vm8 = vcmp.gt.f32.partialorder %v2919_v40, 4.0  ;;  %vm2923_vm9 = vcmp.lt.f32.partialorder %v2919_v40, 0.0  ;;  %v11528_v11 = vld [vmem:[%s13184_s1 + $0x670] ss:$8 sps:$4 sm:$0xff]   ;;  %v11535_v43 = vld [vmem:[%s13184_s1 + $0x664] ss:$8 sps:$4 sm:$0xff]  }
 0x2ff   :  { %v2945_v62 = vsel %vm2929_vm4, %v2941_v9, %v2917_v50  ;;  %4048 = vmatpush1.bf16.msra.mxu0 %v11223_v29  ;;  %4106 = vmatpush1.bf16.msra.mxu1 %v11223_v29  ;;  %v2942_v42 = vadd.f32 4.0, %v2938_v38  ;;  %v2939_v56 = vmul.f32 0.1, %v7614_v61  ;;  %v7615_v63 = vadd.f32 -4.0, %v2920_v30  ;;  %v11491_v50 = vld [vmem:[%s13184_s1 + $0x694] ss:$8 sps:$4 sm:$0xff]  }
 0x300   :  { %v2949_v0 = vsel %vm2921_vm5, %v2925_v35, %v2945_v62  ;;  %4049 = vmatprep.subr.bf16.mxu0 %v11230_v45  ;;  %4107 = vmatprep.subr.bf16.mxu1 %v11230_v45  ;;  %vm2932_vm10 = vcmp.gt.f32.partialorder %v2920_v30, 4.0  ;;  %vm2924_vm11 = vcmp.lt.f32.partialorder %v2920_v30, 0.0  ;;  %v11542_v8 = vld [vmem:[%s13184_s1 + $0x660] ss:$8 sps:$4 sm:$0xff]   ;;  %v11556_v2 = vld [vmem:[%s13184_s1 + $0x650] ss:$8 sps:$4 sm:$0xff]  }
 0x301   :  { %v11385_v44 = vadd.f32 %v2949_v0, %v11124_v57  ;;  %v2946_v58 = vsel %vm2930_vm6, %v2942_v42, %v2918_v12  ;;  %v2943_v31 = vadd.f32 4.0, %v2939_v56  ;;  %v2927_v57 = vmul.f32 0.1, %v2919_v40  ;;  %v11549_v12 = vld [vmem:[%s13184_s1 + $0x654] ss:$8 sps:$4 sm:$0xff]  }
 0x302   :  { %v2950_v46 = vsel %vm2922_vm7, %v2926_v1, %v2946_v58  ;;  %v2940_v45 = vmul.f32 0.1, %v7615_v63  ;;  %v11563_v26 = vld [vmem:[%s13184_s1 + $0x644] ss:$8 sps:$4 sm:$0xff]   ;;  %v11570_v27 = vld [vmem:[%s13184_s1 + $0x640] ss:$8 sps:$4 sm:$0xff]  }
 0x303   :  { %4050 = vmatpush1.bf16.msra.mxu0 %v11239_v53  ;;  %4108 = vmatpush1.bf16.msra.mxu1 %v11239_v53  ;;  %v11390_v29 = vadd.f32 %v2950_v46, %v11129_v16  ;;  %v2947_v23 = vsel %vm2931_vm8, %v2943_v31, %v2919_v40  ;;  %v2928_v16 = vmul.f32 0.1, %v2920_v30  ;;  %v11577_v54 = vld [vmem:[%s13184_s1 + $0x6d4] ss:$8 sps:$4 sm:$0xff]   ;;  %v11584_v9 = vld [vmem:[%s13184_s1 + $0x6d0] ss:$8 sps:$4 sm:$0xff]  }
 0x304   :  { %4051 = vmatprep.subr.bf16.mxu0 %v11246_v6  ;;  %4109 = vmatprep.subr.bf16.mxu1 %v11246_v6  ;;  %v2951_v52 = vsel %vm2923_vm9, %v2927_v57, %v2947_v23  ;;  %v2944_v10 = vadd.f32 4.0, %v2940_v45  ;;  %v7676_v40 = vld [vmem:[%s13186_s2 + $0xe] sm:$0x3]  ;;  %v11602_v42 = vld [vmem:[%s13184_s1 + $0x6c0] ss:$8 sps:$4 sm:$0xff]  }
 0x305   :  { %v11397_v53 = vadd.f32 %v2951_v52, %v11136_v51  ;;  %v11594_v33 = vld [vmem:[%s13184_s1 + $0x6c4] ss:$8 sps:$4 sm:$0xff]   ;;  %v3328_v0 = vrot.slane %v7676_v40, %v9904_v34  ;;  %v3332_v56 = vrot.slane %v7676_v40, %v9916_v37  ;;  %v8776_v31 = vld [vmem:[%s13185_s0 + $0xa0] ss:$8 sps:$4 sm:$0xff]  }
 0x306   :  { %v2948_v6 = vsel %vm2932_vm10, %v2944_v10, %v2920_v30  ;;  %v8777_v57 = vld [vmem:[%s13185_s0 + $0x1a0] ss:$8 sps:$4 sm:$0xff]  }
 0x307   :  { %4052 = vmatpush1.bf16.msra.mxu0 %v11253_v32  ;;  %4110 = vmatpush1.bf16.msra.mxu1 %v11253_v32  ;;  %v2952_v17 = vsel %vm2924_vm11, %v2928_v16, %v2948_v6 }
 0x308   :  { %4053 = vmatprep.subr.bf16.mxu0 %v11260_v3  ;;  %4111 = vmatprep.subr.bf16.mxu1 %v11260_v3  ;;  %v11402_v36 = vadd.f32 %v2952_v17, %v11141_v13  ;;  %v8778_v17 = vld [vmem:[%s13185_s0 + $0x2a4] ss:$8 sps:$4 sm:$0xff]  }
 0x30b   :  { %4054 = vmatpush1.bf16.msra.mxu0 %v11267_v18  ;;  %4112 = vmatpush1.bf16.msra.mxu1 %v11267_v18 }
 0x30c   :  { %4055 = vmatprep.subr.bf16.mxu0 %v11274_v39  ;;  %4113 = vmatprep.subr.bf16.mxu1 %v11274_v39  ;;  %v11437_v39 = vld [vmem:[%s13184_s1 + $0x6b4] ss:$8 sps:$4 sm:$0xff]  }
 0x30f   :  { %4056 = vmatpush1.bf16.msra.mxu0 %v11281_v59  ;;  %4114 = vmatpush1.bf16.msra.mxu1 %v11281_v59 }
 0x310   :  { %4057 = vmatprep.subr.bf16.mxu0 %v11288_v55  ;;  %4115 = vmatprep.subr.bf16.mxu1 %v11288_v55 }
 0x313   :  { %4058 = vmatpush1.bf16.msra.mxu0 %v11295_v19  ;;  %4116 = vmatpush1.bf16.msra.mxu1 %v11295_v19 }
 0x314   :  { %4059 = vmatprep.subr.bf16.mxu0 %v11302_v60  ;;  %4117 = vmatprep.subr.bf16.mxu1 %v11302_v60  ;;  %v8740_v60 = vld [vmem:[%s13185_s0 + $0x290] ss:$8 sps:$4 sm:$0xff]  }
 0x317   :  { %4060 = vmatpush1.bf16.msra.mxu0 %v11309_v20  ;;  %4118 = vmatpush1.bf16.msra.mxu1 %v11309_v20  ;;  %v8741_v20 = vld [vmem:[%s13185_s0 + $0x390] ss:$8 sps:$4 sm:$0xff]  }
 0x318   :  { %4073 = vmatprep.subr.bf16.mxu0 %v11316_v21  ;;  %4131 = vmatprep.subr.bf16.mxu1 %v11316_v21 }
 0x31a   :  { %v11420_v51 = vpop.f32.mrf.mxu0  ;;  %v11422_v13 = vpop.f32.mrf.mxu1 }
 0x31b   :  { %v3310_v32 = vmax.f32 %v11420_v51, %v11422_v13  ;;  %4074 = vmatpush2.bf16.msra.mxu0 %v11323_v25  ;;  %4132 = vmatpush2.bf16.msra.mxu1 %v11323_v25  ;;  %v11458_v25 = vld [vmem:[%s13184_s1 + $0x6b0] ss:$8 sps:$4 sm:$0xff]   ;;  %v8780_v51 = vld [vmem:[%s13185_s0 + $0x3a4] ss:$8 sps:$4 sm:$0xff]  }
 0x31c   :  { %v11428_v3 = vpop.f32.mrf.mxu0  ;;  %v11430_v18 = vpop.f32.mrf.mxu1  ;;  %4075 = vmatprep.subr.bf16.mxu0 %v11333_v7  ;;  %4133 = vmatprep.subr.bf16.mxu1 %v11333_v7 }
 0x31d   :  { %v3311_v59 = vmax.f32 %v11428_v3, %v11430_v18 }
 0x31e   :  { %v11441_v55 = vpop.f32.mrf.mxu0  ;;  %v11443_v19 = vpop.f32.mrf.mxu1 }
 0x31f   :  { %v3312_v21 = vmax.f32 %v11441_v55, %v11443_v19  ;;  %4076 = vmatpush2.bf16.msra.mxu0 %v11341_v47  ;;  %4134 = vmatpush2.bf16.msra.mxu1 %v11341_v47 }
 0x320   :  { %v11460_v7 = vpop.f32.mrf.mxu0  ;;  %v11462_v49 = vpop.f32.mrf.mxu1  ;;  %4347 = vmatprep.subr.bf16.mxu0 %v11437_v39  ;;  %4405 = vmatprep.subr.bf16.mxu1 %v11437_v39 }
 0x321   :  { %v3313_v47 = vmax.f32 %v11460_v7, %v11462_v49 }
 0x322   :  { %4078 = vmatmul.mubr.bf16.vlgmr.msra.gmra.mxu0 %v8740_v60  ;;  %4136 = vmatmul.mubr.bf16.vlgmr.msra.gmra.mxu1 %v8741_v20 }
 0x323   :  { %4348 = vmatpush1.bf16.msra.mxu0 %v11458_v25  ;;  %4406 = vmatpush1.bf16.msra.mxu1 %v11458_v25 }
 0x324   :  { %4349 = vmatprep.subr.bf16.mxu0 %v11469_v5  ;;  %4407 = vmatprep.subr.bf16.mxu1 %v11469_v5 }
 0x325   :  { %7855 = vmatprep.mubr.msk.bf16.mxu0 %vm164_vm0, %v8772_v48  ;;  %7860 = vmatprep.mubr.msk.bf16.mxu1 %vm164_vm0, %v8774_v4 }
 0x327   :  { %4350 = vmatpush1.bf16.msra.mxu0 %v11484_v15  ;;  %4408 = vmatpush1.bf16.msra.mxu1 %v11484_v15 }
 0x328   :  { %4351 = vmatprep.subr.bf16.mxu0 %v11491_v50  ;;  %4409 = vmatprep.subr.bf16.mxu1 %v11491_v50 }
 0x32b   :  { %4352 = vmatpush1.bf16.msra.mxu0 %v11500_v41  ;;  %4410 = vmatpush1.bf16.msra.mxu1 %v11500_v41 }
 0x32c   :  { %4353 = vmatprep.subr.bf16.mxu0 %v11507_v24  ;;  %4411 = vmatprep.subr.bf16.mxu1 %v11507_v24 }
 0x32f   :  { %4354 = vmatpush1.bf16.msra.mxu0 %v11514_v14  ;;  %4412 = vmatpush1.bf16.msra.mxu1 %v11514_v14 }
 0x330   :  { %4355 = vmatprep.subr.bf16.mxu0 %v11521_v22  ;;  %4413 = vmatprep.subr.bf16.mxu1 %v11521_v22 }
 0x333   :  { %4356 = vmatpush1.bf16.msra.mxu0 %v11528_v11  ;;  %4414 = vmatpush1.bf16.msra.mxu1 %v11528_v11 }
 0x334   :  { %4357 = vmatprep.subr.bf16.mxu0 %v11535_v43  ;;  %4415 = vmatprep.subr.bf16.mxu1 %v11535_v43 }
 0x337   :  { %4358 = vmatpush1.bf16.msra.mxu0 %v11542_v8  ;;  %4416 = vmatpush1.bf16.msra.mxu1 %v11542_v8 }
 0x338   :  { %4359 = vmatprep.subr.bf16.mxu0 %v11549_v12  ;;  %4417 = vmatprep.subr.bf16.mxu1 %v11549_v12 }
 0x33b   :  { %4360 = vmatpush1.bf16.msra.mxu0 %v11556_v2  ;;  %4418 = vmatpush1.bf16.msra.mxu1 %v11556_v2 }
 0x33c   :  { %4361 = vmatprep.subr.bf16.mxu0 %v11563_v26  ;;  %4419 = vmatprep.subr.bf16.mxu1 %v11563_v26 }
 0x33f   :  { %4362 = vmatpush1.bf16.msra.mxu0 %v11570_v27  ;;  %4420 = vmatpush1.bf16.msra.mxu1 %v11570_v27 }
 0x340   :  { %4375 = vmatprep.subr.bf16.mxu0 %v11577_v54  ;;  %4433 = vmatprep.subr.bf16.mxu1 %v11577_v54 }
 0x342   :  { %v3243_v35 = vpop.f32.mrf.mxu0  ;;  %v3301_v38 = vpop.f32.mrf.mxu1 }
 0x343   :  { %v3314_v62 = vmax.f32 %v3243_v35, %v3301_v38  ;;  %4376 = vmatpush2.bf16.msra.mxu0 %v11584_v9  ;;  %4434 = vmatpush2.bf16.msra.mxu1 %v11584_v9 }
 0x344   :  { %v3245_v61 = vpop.f32.mrf.mxu0  ;;  %v3303_v30 = vpop.f32.mrf.mxu1  ;;  %4377 = vmatprep.subr.bf16.mxu0 %v11594_v33  ;;  %4435 = vmatprep.subr.bf16.mxu1 %v11594_v33 }
 0x345   :  { %v3318_v1 = vmax.f32 %v3310_v32, %v3314_v62  ;;  %v3315_v58 = vmax.f32 %v3245_v61, %v3303_v30 }
 0x346   :  { %v3247_v46 = vpop.f32.mrf.mxu0  ;;  %v3305_v63 = vpop.f32.mrf.mxu1 }
 0x347   :  { %v3335_v45 = vadd.f32 %v3328_v0, %v3318_v1  ;;  %v3319_v23 = vmax.f32 %v3311_v59, %v3315_v58  ;;  %v3316_v52 = vmax.f32 %v3247_v46, %v3305_v63  ;;  %4378 = vmatpush2.bf16.msra.mxu0 %v11602_v42  ;;  %4436 = vmatpush2.bf16.msra.mxu1 %v11602_v42  ;;  %v11730_v46 = vld [vmem:[%s13184_s1 + $0x744] ss:$8 sps:$4 sm:$0xff]   ;;  %v8814_v63 = vld [vmem:[%s13185_s0 + $0xb4] ss:$8 sps:$4 sm:$0xff]  }
 0x348   :  { %v3249_v10 = vpop.f32.mrf.mxu0  ;;  %v3307_v16 = vpop.f32.mrf.mxu1  ;;  %4463 = vmatprep.subr.bf16.mxu0 %v11437_v39  ;;  %4521 = vmatprep.subr.bf16.mxu1 %v11437_v39 }
 0x349   :  { %v7677_v6 = vadd.f32 -4.0, %v3335_v45  ;;  %v3336_v13 = vadd.f32 %v3332_v56, %v3319_v23  ;;  %v3320_v32 = vmax.f32 %v3312_v21, %v3316_v52  ;;  %v3317_v3 = vmax.f32 %v3249_v10, %v3307_v16  ;;  %v11761_v23 = vld [vmem:[%s13184_s1 + $0x730] ss:$8 sps:$4 sm:$0xff]   ;;  %v11768_v52 = vld [vmem:[%s13184_s1 + $0x724] ss:$8 sps:$4 sm:$0xff]  }
 0x34a   :  { %4380 = vmatmul.mubr.bf16.vlgmr.msra.gmra.mxu0 %v8776_v31  ;;  %4438 = vmatmul.mubr.bf16.vlgmr.msra.gmra.mxu1 %v8777_v57  ;;  %v3343_v19 = vmul.f32 0.1, %v3335_v45  ;;  %vm3347_vm12 = vcmp.gt.f32.partialorder %v3335_v45, 4.0  ;;  %vm3339_vm13 = vcmp.lt.f32.partialorder %v3335_v45, 0.0  ;;  %v8816_v31 = vld [vmem:[%s13185_s0 + $0x1b4] ss:$8 sps:$4 sm:$0xff]  }
 0x34b   :  { %v3355_v18 = vmul.f32 0.1, %v7677_v6  ;;  %4464 = vmatpush1.bf16.msra.mxu0 %v11458_v25  ;;  %4522 = vmatpush1.bf16.msra.mxu1 %v11458_v25  ;;  %v7678_v39 = vadd.f32 -4.0, %v3336_v13  ;;  %v3337_v60 = vadd.f32 %v3328_v0, %v3320_v32  ;;  %v3321_v55 = vmax.f32 %v3313_v47, %v3317_v3  ;;  %v11745_v57 = vld [vmem:[%s13184_s1 + $0x740] ss:$8 sps:$4 sm:$0xff]  }
 0x34c   :  { %4465 = vmatprep.subr.bf16.mxu0 %v11469_v5  ;;  %4523 = vmatprep.subr.bf16.mxu1 %v11469_v5  ;;  %v3344_v49 = vmul.f32 0.1, %v3336_v13  ;;  %vm3348_vm14 = vcmp.gt.f32.partialorder %v3336_v13, 4.0  ;;  %vm3340_vm15 = vcmp.lt.f32.partialorder %v3336_v13, 0.0  ;;  %v11775_v10 = vld [vmem:[%s13184_s1 + $0x720] ss:$8 sps:$4 sm:$0xff]  }
 0x34d   :  { %v3359_v59 = vadd.f32 4.0, %v3355_v18  ;;  %7865 = vmatprep.mubr.msk.bf16.mxu0 %vm164_vm0, %v8778_v17  ;;  %7870 = vmatprep.mubr.msk.bf16.mxu1 %vm164_vm0, %v8780_v51  ;;  %v3356_v20 = vmul.f32 0.1, %v7678_v39  ;;  %v7679_v48 = vadd.f32 -4.0, %v3337_v60  ;;  %v3338_v4 = vadd.f32 %v3332_v56, %v3321_v55  ;;  %v11782_v16 = vld [vmem:[%s13184_s1 + $0x714] ss:$8 sps:$4 sm:$0xff]  }
 0x34e   :  { %vm3349_vm1 = vcmp.gt.f32.partialorder %v3337_v60, 4.0  ;;  %vm3341_vm2 = vcmp.lt.f32.partialorder %v3337_v60, 0.0  ;;  %v11789_v6 = vld [vmem:[%s13184_s1 + $0x710] ss:$8 sps:$4 sm:$0xff]   ;;  %v11796_v17 = vld [vmem:[%s13184_s1 + $0x704] ss:$8 sps:$4 sm:$0xff]  }
 0x34f   :  { %v3363_v21 = vsel %vm3347_vm12, %v3359_v59, %v3335_v45  ;;  %4466 = vmatpush1.bf16.msra.mxu0 %v11484_v15  ;;  %4524 = vmatpush1.bf16.msra.mxu1 %v11484_v15  ;;  %v3360_v5 = vadd.f32 4.0, %v3356_v20  ;;  %v3357_v40 = vmul.f32 0.1, %v7679_v48  ;;  %v7680_v38 = vadd.f32 -4.0, %v3338_v4  ;;  %v11752_v45 = vld [vmem:[%s13184_s1 + $0x734] ss:$8 sps:$4 sm:$0xff]  }
 0x350   :  { %v3367_v25 = vsel %vm3339_vm13, %v3343_v19, %v3363_v21  ;;  %4467 = vmatprep.subr.bf16.mxu0 %v11491_v50  ;;  %4525 = vmatprep.subr.bf16.mxu1 %v11491_v50  ;;  %vm3350_vm3 = vcmp.gt.f32.partialorder %v3338_v4, 4.0  ;;  %vm3342_vm4 = vcmp.lt.f32.partialorder %v3338_v4, 0.0  ;;  %v11803_v51 = vld [vmem:[%s13184_s1 + $0x700] ss:$8 sps:$4 sm:$0xff]   ;;  %v11817_v32 = vld [vmem:[%s13184_s1 + $0x6f0] ss:$8 sps:$4 sm:$0xff]  }
 0x351   :  { %v11646_v7 = vadd.f32 %v3367_v25, %v11385_v44  ;;  %v3364_v47 = vsel %vm3348_vm14, %v3360_v5, %v3336_v13  ;;  %v3361_v62 = vadd.f32 4.0, %v3357_v40  ;;  %v3345_v44 = vmul.f32 0.1, %v3337_v60  ;;  %v11810_v13 = vld [vmem:[%s13184_s1 + $0x6f4] ss:$8 sps:$4 sm:$0xff]  }
 0x352   :  { %v3368_v35 = vsel %vm3340_vm15, %v3344_v49, %v3364_v47  ;;  %v3358_v50 = vmul.f32 0.1, %v7680_v38  ;;  %v11824_v3 = vld [vmem:[%s13184_s1 + $0x6e4] ss:$8 sps:$4 sm:$0xff]   ;;  %v11831_v18 = vld [vmem:[%s13184_s1 + $0x6e0] ss:$8 sps:$4 sm:$0xff]  }
 0x353   :  { %4468 = vmatpush1.bf16.msra.mxu0 %v11500_v41  ;;  %4526 = vmatpush1.bf16.msra.mxu1 %v11500_v41  ;;  %v11651_v15 = vadd.f32 %v3368_v35, %v11390_v29  ;;  %v3365_v0 = vsel %vm3349_vm1, %v3361_v62, %v3337_v60  ;;  %v3346_v29 = vmul.f32 0.1, %v3338_v4  ;;  %v11838_v39 = vld [vmem:[%s13184_s1 + $0x774] ss:$8 sps:$4 sm:$0xff]   ;;  %v11845_v59 = vld [vmem:[%s13184_s1 + $0x770] ss:$8 sps:$4 sm:$0xff]  }
 0x354   :  { %4469 = vmatprep.subr.bf16.mxu0 %v11507_v24  ;;  %4527 = vmatprep.subr.bf16.mxu1 %v11507_v24  ;;  %v3369_v61 = vsel %vm3341_vm2, %v3345_v44, %v3365_v0  ;;  %v3362_v30 = vadd.f32 4.0, %v3358_v50  ;;  %v7741_v60 = vld [vmem:[%s13186_s2 + $0x10] sm:$0x3]  ;;  %v11855_v55 = vld [vmem:[%s13184_s1 + $0x764] ss:$8 sps:$4 sm:$0xff]  }
 0x355   :  { %v11658_v41 = vadd.f32 %v3369_v61, %v11397_v53  ;;  %v3746_v25 = vrot.slane %v7741_v60, %v9904_v34  ;;  %v11863_v5 = vld [vmem:[%s13184_s1 + $0x760] ss:$8 sps:$4 sm:$0xff]   ;;  %v3750_v40 = vrot.slane %v7741_v60, %v9916_v37  ;;  %v8818_v62 = vld [vmem:[%s13185_s0 + $0xb0] ss:$8 sps:$4 sm:$0xff]  }
 0x356   :  { %v3366_v24 = vsel %vm3350_vm3, %v3362_v30, %v3338_v4  ;;  %v8819_v44 = vld [vmem:[%s13185_s0 + $0x1b0] ss:$8 sps:$4 sm:$0xff]  }
 0x357   :  { %4470 = vmatpush1.bf16.msra.mxu0 %v11514_v14  ;;  %4528 = vmatpush1.bf16.msra.mxu1 %v11514_v14  ;;  %v3370_v1 = vsel %vm3342_vm4, %v3346_v29, %v3366_v24 }
 0x358   :  { %4471 = vmatprep.subr.bf16.mxu0 %v11521_v22  ;;  %4529 = vmatprep.subr.bf16.mxu1 %v11521_v22  ;;  %v11663_v58 = vadd.f32 %v3370_v1, %v11402_v36  ;;  %v8820_v1 = vld [vmem:[%s13185_s0 + $0x2b4] ss:$8 sps:$4 sm:$0xff]  }
 0x35b   :  { %4472 = vmatpush1.bf16.msra.mxu0 %v11528_v11  ;;  %4530 = vmatpush1.bf16.msra.mxu1 %v11528_v11 }
 0x35c   :  { %4473 = vmatprep.subr.bf16.mxu0 %v11535_v43  ;;  %4531 = vmatprep.subr.bf16.mxu1 %v11535_v43  ;;  %v11698_v43 = vld [vmem:[%s13184_s1 + $0x754] ss:$8 sps:$4 sm:$0xff]  }
 0x35f   :  { %4474 = vmatpush1.bf16.msra.mxu0 %v11542_v8  ;;  %4532 = vmatpush1.bf16.msra.mxu1 %v11542_v8 }
 0x360   :  { %4475 = vmatprep.subr.bf16.mxu0 %v11549_v12  ;;  %4533 = vmatprep.subr.bf16.mxu1 %v11549_v12 }
 0x363   :  { %4476 = vmatpush1.bf16.msra.mxu0 %v11556_v2  ;;  %4534 = vmatpush1.bf16.msra.mxu1 %v11556_v2 }
 0x364   :  { %4477 = vmatprep.subr.bf16.mxu0 %v11563_v26  ;;  %4535 = vmatprep.subr.bf16.mxu1 %v11563_v26  ;;  %v8782_v26 = vld [vmem:[%s13185_s0 + $0x2a0] ss:$8 sps:$4 sm:$0xff]  }
 0x367   :  { %4478 = vmatpush1.bf16.msra.mxu0 %v11570_v27  ;;  %4536 = vmatpush1.bf16.msra.mxu1 %v11570_v27  ;;  %v8783_v27 = vld [vmem:[%s13185_s0 + $0x3a0] ss:$8 sps:$4 sm:$0xff]  }
 0x368   :  { %4491 = vmatprep.subr.bf16.mxu0 %v11577_v54  ;;  %4549 = vmatprep.subr.bf16.mxu1 %v11577_v54 }
 0x36a   :  { %v11681_v53 = vpop.f32.mrf.mxu0  ;;  %v11683_v36 = vpop.f32.mrf.mxu1 }
 0x36b   :  { %v3728_v14 = vmax.f32 %v11681_v53, %v11683_v36  ;;  %4492 = vmatpush2.bf16.msra.mxu0 %v11584_v9  ;;  %4550 = vmatpush2.bf16.msra.mxu1 %v11584_v9  ;;  %v11719_v9 = vld [vmem:[%s13184_s1 + $0x750] ss:$8 sps:$4 sm:$0xff]   ;;  %v8822_v53 = vld [vmem:[%s13185_s0 + $0x3b4] ss:$8 sps:$4 sm:$0xff]  }
 0x36c   :  { %v11689_v22 = vpop.f32.mrf.mxu0  ;;  %v11691_v11 = vpop.f32.mrf.mxu1  ;;  %4493 = vmatprep.subr.bf16.mxu0 %v11594_v33  ;;  %4551 = vmatprep.subr.bf16.mxu1 %v11594_v33 }
 0x36d   :  { %v3729_v8 = vmax.f32 %v11689_v22, %v11691_v11 }
 0x36e   :  { %v11702_v12 = vpop.f32.mrf.mxu0  ;;  %v11704_v2 = vpop.f32.mrf.mxu1 }
 0x36f   :  { %v3730_v54 = vmax.f32 %v11702_v12, %v11704_v2  ;;  %4494 = vmatpush2.bf16.msra.mxu0 %v11602_v42  ;;  %4552 = vmatpush2.bf16.msra.mxu1 %v11602_v42 }
 0x370   :  { %v11721_v33 = vpop.f32.mrf.mxu0  ;;  %v11723_v56 = vpop.f32.mrf.mxu1  ;;  %4765 = vmatprep.subr.bf16.mxu0 %v11698_v43  ;;  %4823 = vmatprep.subr.bf16.mxu1 %v11698_v43 }
 0x371   :  { %v3731_v42 = vmax.f32 %v11721_v33, %v11723_v56 }
 0x372   :  { %4496 = vmatmul.mubr.bf16.vlgmr.msra.gmra.mxu0 %v8782_v26  ;;  %4554 = vmatmul.mubr.bf16.vlgmr.msra.gmra.mxu1 %v8783_v27 }
 0x373   :  { %4766 = vmatpush1.bf16.msra.mxu0 %v11719_v9  ;;  %4824 = vmatpush1.bf16.msra.mxu1 %v11719_v9 }
 0x374   :  { %4767 = vmatprep.subr.bf16.mxu0 %v11730_v46  ;;  %4825 = vmatprep.subr.bf16.mxu1 %v11730_v46 }
 0x375   :  { %7920 = vmatprep.mubr.msk.bf16.mxu0 %vm164_vm0, %v8814_v63  ;;  %7925 = vmatprep.mubr.msk.bf16.mxu1 %vm164_vm0, %v8816_v31 }
 0x377   :  { %4768 = vmatpush1.bf16.msra.mxu0 %v11745_v57  ;;  %4826 = vmatpush1.bf16.msra.mxu1 %v11745_v57 }
 0x378   :  { %4769 = vmatprep.subr.bf16.mxu0 %v11752_v45  ;;  %4827 = vmatprep.subr.bf16.mxu1 %v11752_v45 }
 0x37b   :  { %4770 = vmatpush1.bf16.msra.mxu0 %v11761_v23  ;;  %4828 = vmatpush1.bf16.msra.mxu1 %v11761_v23 }
 0x37c   :  { %4771 = vmatprep.subr.bf16.mxu0 %v11768_v52  ;;  %4829 = vmatprep.subr.bf16.mxu1 %v11768_v52 }
 0x37f   :  { %4772 = vmatpush1.bf16.msra.mxu0 %v11775_v10  ;;  %4830 = vmatpush1.bf16.msra.mxu1 %v11775_v10 }
 0x380   :  { %4773 = vmatprep.subr.bf16.mxu0 %v11782_v16  ;;  %4831 = vmatprep.subr.bf16.mxu1 %v11782_v16 }
 0x383   :  { %4774 = vmatpush1.bf16.msra.mxu0 %v11789_v6  ;;  %4832 = vmatpush1.bf16.msra.mxu1 %v11789_v6 }
 0x384   :  { %4775 = vmatprep.subr.bf16.mxu0 %v11796_v17  ;;  %4833 = vmatprep.subr.bf16.mxu1 %v11796_v17 }
 0x387   :  { %4776 = vmatpush1.bf16.msra.mxu0 %v11803_v51  ;;  %4834 = vmatpush1.bf16.msra.mxu1 %v11803_v51 }
 0x388   :  { %4777 = vmatprep.subr.bf16.mxu0 %v11810_v13  ;;  %4835 = vmatprep.subr.bf16.mxu1 %v11810_v13 }
 0x38b   :  { %4778 = vmatpush1.bf16.msra.mxu0 %v11817_v32  ;;  %4836 = vmatpush1.bf16.msra.mxu1 %v11817_v32 }
 0x38c   :  { %4779 = vmatprep.subr.bf16.mxu0 %v11824_v3  ;;  %4837 = vmatprep.subr.bf16.mxu1 %v11824_v3 }
 0x38f   :  { %4780 = vmatpush1.bf16.msra.mxu0 %v11831_v18  ;;  %4838 = vmatpush1.bf16.msra.mxu1 %v11831_v18 }
 0x390   :  { %4793 = vmatprep.subr.bf16.mxu0 %v11838_v39  ;;  %4851 = vmatprep.subr.bf16.mxu1 %v11838_v39 }
 0x392   :  { %v3661_v19 = vpop.f32.mrf.mxu0  ;;  %v3719_v20 = vpop.f32.mrf.mxu1 }
 0x393   :  { %v3732_v21 = vmax.f32 %v3661_v19, %v3719_v20  ;;  %4794 = vmatpush2.bf16.msra.mxu0 %v11845_v59  ;;  %4852 = vmatpush2.bf16.msra.mxu1 %v11845_v59 }
 0x394   :  { %v3663_v48 = vpop.f32.mrf.mxu0  ;;  %v3721_v4 = vpop.f32.mrf.mxu1  ;;  %4795 = vmatprep.subr.bf16.mxu0 %v11855_v55  ;;  %4853 = vmatprep.subr.bf16.mxu1 %v11855_v55 }
 0x395   :  { %v3736_v49 = vmax.f32 %v3728_v14, %v3732_v21  ;;  %v3733_v47 = vmax.f32 %v3663_v48, %v3721_v4 }
 0x396   :  { %v3665_v35 = vpop.f32.mrf.mxu0  ;;  %v3723_v38 = vpop.f32.mrf.mxu1 }
 0x397   :  { %v3753_v50 = vadd.f32 %v3746_v25, %v3736_v49  ;;  %v3737_v0 = vmax.f32 %v3729_v8, %v3733_v47  ;;  %v3734_v61 = vmax.f32 %v3665_v35, %v3723_v38  ;;  %4796 = vmatpush2.bf16.msra.mxu0 %v11863_v5  ;;  %4854 = vmatpush2.bf16.msra.mxu1 %v11863_v5  ;;  %v11991_v35 = vld [vmem:[%s13184_s1 + $0x7e4] ss:$8 sps:$4 sm:$0xff]  }
 0x398   :  { %v3667_v30 = vpop.f32.mrf.mxu0  ;;  %v3725_v29 = vpop.f32.mrf.mxu1  ;;  %4881 = vmatprep.subr.bf16.mxu0 %v11698_v43  ;;  %4939 = vmatprep.subr.bf16.mxu1 %v11698_v43  ;;  %v8856_v38 = vld [vmem:[%s13185_s0 + $0xc4] ss:$8 sps:$4 sm:$0xff]  }
 0x399   :  { %v7742_v24 = vadd.f32 -4.0, %v3753_v50  ;;  %v3754_v36 = vadd.f32 %v3750_v40, %v3737_v0  ;;  %v3738_v14 = vmax.f32 %v3730_v54, %v3734_v61  ;;  %v3735_v22 = vmax.f32 %v3667_v30, %v3725_v29  ;;  %v12022_v0 = vld [vmem:[%s13184_s1 + $0x7d0] ss:$8 sps:$4 sm:$0xff]   ;;  %v12029_v61 = vld [vmem:[%s13184_s1 + $0x7c4] ss:$8 sps:$4 sm:$0xff]  }
 0x39a   :  { %4798 = vmatmul.mubr.bf16.vlgmr.msra.gmra.mxu0 %v8818_v62  ;;  %4856 = vmatmul.mubr.bf16.vlgmr.msra.gmra.mxu1 %v8819_v44  ;;  %v3761_v2 = vmul.f32 0.1, %v3753_v50  ;;  %vm3765_vm5 = vcmp.gt.f32.partialorder %v3753_v50, 4.0  ;;  %vm3757_vm6 = vcmp.lt.f32.partialorder %v3753_v50, 0.0  ;;  %v8858_v62 = vld [vmem:[%s13185_s0 + $0x1c4] ss:$8 sps:$4 sm:$0xff]  }
 0x39b   :  { %v3773_v11 = vmul.f32 0.1, %v7742_v24  ;;  %4882 = vmatpush1.bf16.msra.mxu0 %v11719_v9  ;;  %4940 = vmatpush1.bf16.msra.mxu1 %v11719_v9  ;;  %v7743_v43 = vadd.f32 -4.0, %v3754_v36  ;;  %v3755_v26 = vadd.f32 %v3746_v25, %v3738_v14  ;;  %v3739_v12 = vmax.f32 %v3731_v42, %v3735_v22  ;;  %v12006_v44 = vld [vmem:[%s13184_s1 + $0x7e0] ss:$8 sps:$4 sm:$0xff]  }
 0x39c   :  { %4883 = vmatprep.subr.bf16.mxu0 %v11730_v46  ;;  %4941 = vmatprep.subr.bf16.mxu1 %v11730_v46  ;;  %v3762_v56 = vmul.f32 0.1, %v3754_v36  ;;  %vm3766_vm7 = vcmp.gt.f32.partialorder %v3754_v36, 4.0  ;;  %vm3758_vm8 = vcmp.lt.f32.partialorder %v3754_v36, 0.0  ;;  %v12036_v30 = vld [vmem:[%s13184_s1 + $0x7c0] ss:$8 sps:$4 sm:$0xff]  }
 0x39d   :  { %v3777_v8 = vadd.f32 4.0, %v3773_v11  ;;  %7930 = vmatprep.mubr.msk.bf16.mxu0 %vm164_vm0, %v8820_v1  ;;  %7935 = vmatprep.mubr.msk.bf16.mxu1 %vm164_vm0, %v8822_v53  ;;  %v3774_v27 = vmul.f32 0.1, %v7743_v43  ;;  %v7744_v63 = vadd.f32 -4.0, %v3755_v26  ;;  %v3756_v31 = vadd.f32 %v3750_v40, %v3739_v12  ;;  %v12043_v29 = vld [vmem:[%s13184_s1 + $0x7b4] ss:$8 sps:$4 sm:$0xff]  }
 0x39e   :  { %vm3767_vm9 = vcmp.gt.f32.partialorder %v3755_v26, 4.0  ;;  %vm3759_vm10 = vcmp.lt.f32.partialorder %v3755_v26, 0.0  ;;  %v12050_v24 = vld [vmem:[%s13184_s1 + $0x7b0] ss:$8 sps:$4 sm:$0xff]   ;;  %v12057_v1 = vld [vmem:[%s13184_s1 + $0x7a4] ss:$8 sps:$4 sm:$0xff]  }
 0x39f   :  { %v3781_v54 = vsel %vm3765_vm5, %v3777_v8, %v3753_v50  ;;  %4884 = vmatpush1.bf16.msra.mxu0 %v11745_v57  ;;  %4942 = vmatpush1.bf16.msra.mxu1 %v11745_v57  ;;  %v3778_v46 = vadd.f32 4.0, %v3774_v27  ;;  %v3775_v60 = vmul.f32 0.1, %v7744_v63  ;;  %v7745_v20 = vadd.f32 -4.0, %v3756_v31  ;;  %v12013_v50 = vld [vmem:[%s13184_s1 + $0x7d4] ss:$8 sps:$4 sm:$0xff]  }
 0x3a0   :  { %v3785_v9 = vsel %vm3757_vm6, %v3761_v2, %v3781_v54  ;;  %4885 = vmatprep.subr.bf16.mxu0 %v11752_v45  ;;  %4943 = vmatprep.subr.bf16.mxu1 %v11752_v45  ;;  %v3764_v49 = vmul.f32 0.1, %v3756_v31  ;;  %vm3768_vm11 = vcmp.gt.f32.partialorder %v3756_v31, 4.0  ;;  %vm3760_vm12 = vcmp.lt.f32.partialorder %v3756_v31, 0.0  ;;  %v12064_v53 = vld [vmem:[%s13184_s1 + $0x7a0] ss:$8 sps:$4 sm:$0xff]  }
 0x3a1   :  { %v11907_v33 = vadd.f32 %v3785_v9, %v11646_v7  ;;  %v3782_v42 = vsel %vm3766_vm7, %v3778_v46, %v3754_v36  ;;  %v3779_v57 = vadd.f32 4.0, %v3775_v60  ;;  %v3763_v7 = vmul.f32 0.1, %v3755_v26  ;;  %v12071_v36 = vld [vmem:[%s13184_s1 + $0x794] ss:$8 sps:$4 sm:$0xff]  }
 0x3a2   :  { %v3786_v19 = vsel %vm3758_vm8, %v3762_v56, %v3782_v42  ;;  %v3776_v21 = vmul.f32 0.1, %v7745_v20  ;;  %v12078_v14 = vld [vmem:[%s13184_s1 + $0x790] ss:$8 sps:$4 sm:$0xff]   ;;  %v12085_v22 = vld [vmem:[%s13184_s1 + $0x784] ss:$8 sps:$4 sm:$0xff]  }
 0x3a3   :  { %4886 = vmatpush1.bf16.msra.mxu0 %v11761_v23  ;;  %4944 = vmatpush1.bf16.msra.mxu1 %v11761_v23  ;;  %v11914_v45 = vadd.f32 %v3786_v19, %v11651_v15  ;;  %v3783_v25 = vsel %vm3767_vm9, %v3779_v57, %v3755_v26  ;;  %v12092_v11 = vld [vmem:[%s13184_s1 + $0x780] ss:$8 sps:$4 sm:$0xff]   ;;  %v12099_v43 = vld [vmem:[%s13184_s1 + $0x814] ss:$8 sps:$4 sm:$0xff]   ;;  %v12106_v8 = vld [vmem:[%s13184_s1 + $0x810] ss:$8 sps:$4 sm:$0xff]  }
 0x3a4   :  { %4887 = vmatprep.subr.bf16.mxu0 %v11768_v52  ;;  %4945 = vmatprep.subr.bf16.mxu1 %v11768_v52  ;;  %v3787_v48 = vsel %vm3759_vm10, %v3763_v7, %v3783_v25  ;;  %v3780_v4 = vadd.f32 4.0, %v3776_v21  ;;  %v7806_v26 = vld [vmem:[%s13186_s2 + $0x12] sm:$0x3]  ;;  %v12116_v12 = vld [vmem:[%s13184_s1 + $0x804] ss:$8 sps:$4 sm:$0xff]  }
 0x3a5   :  { %v11919_v23 = vadd.f32 %v3787_v48, %v11658_v41  ;;  %v4164_v9 = vrot.slane %v7806_v26, %v9904_v34  ;;  %v12124_v46 = vld [vmem:[%s13184_s1 + $0x800] ss:$8 sps:$4 sm:$0xff]   ;;  %v4168_v60 = vrot.slane %v7806_v26, %v9916_v37 }
 0x3a6   :  { %v3784_v15 = vsel %vm3768_vm11, %v3780_v4, %v3756_v31  ;;  %v8860_v57 = vld [vmem:[%s13185_s0 + $0xc0] ss:$8 sps:$4 sm:$0xff]  }
 0x3a7   :  { %4888 = vmatpush1.bf16.msra.mxu0 %v11775_v10  ;;  %4946 = vmatpush1.bf16.msra.mxu1 %v11775_v10  ;;  %v3788_v52 = vsel %vm3760_vm12, %v3764_v49, %v3784_v15  ;;  %v8861_v7 = vld [vmem:[%s13185_s0 + $0x1c0] ss:$8 sps:$4 sm:$0xff]  }
 0x3a8   :  { %4889 = vmatprep.subr.bf16.mxu0 %v11782_v16  ;;  %4947 = vmatprep.subr.bf16.mxu1 %v11782_v16  ;;  %v11926_v47 = vadd.f32 %v3788_v52, %v11663_v58  ;;  %v8862_v52 = vld [vmem:[%s13185_s0 + $0x2c4] ss:$8 sps:$4 sm:$0xff]  }
 0x3ab   :  { %4890 = vmatpush1.bf16.msra.mxu0 %v11789_v6  ;;  %4948 = vmatpush1.bf16.msra.mxu1 %v11789_v6 }
 0x3ac   :  { %4891 = vmatprep.subr.bf16.mxu0 %v11796_v17  ;;  %4949 = vmatprep.subr.bf16.mxu1 %v11796_v17  ;;  %v11959_v17 = vld [vmem:[%s13184_s1 + $0x7f4] ss:$8 sps:$4 sm:$0xff]  }
 0x3af   :  { %4892 = vmatpush1.bf16.msra.mxu0 %v11803_v51  ;;  %4950 = vmatpush1.bf16.msra.mxu1 %v11803_v51 }
 0x3b0   :  { %4893 = vmatprep.subr.bf16.mxu0 %v11810_v13  ;;  %4951 = vmatprep.subr.bf16.mxu1 %v11810_v13 }
 0x3b3   :  { %4894 = vmatpush1.bf16.msra.mxu0 %v11817_v32  ;;  %4952 = vmatpush1.bf16.msra.mxu1 %v11817_v32 }
 0x3b4   :  { %4895 = vmatprep.subr.bf16.mxu0 %v11824_v3  ;;  %4953 = vmatprep.subr.bf16.mxu1 %v11824_v3  ;;  %v8824_v3 = vld [vmem:[%s13185_s0 + $0x2b0] ss:$8 sps:$4 sm:$0xff]  }
 0x3b7   :  { %4896 = vmatpush1.bf16.msra.mxu0 %v11831_v18  ;;  %4954 = vmatpush1.bf16.msra.mxu1 %v11831_v18  ;;  %v8825_v18 = vld [vmem:[%s13185_s0 + $0x3b0] ss:$8 sps:$4 sm:$0xff]  }
 0x3b8   :  { %4909 = vmatprep.subr.bf16.mxu0 %v11838_v39  ;;  %4967 = vmatprep.subr.bf16.mxu1 %v11838_v39 }
 0x3ba   :  { %v11942_v41 = vpop.f32.mrf.mxu0  ;;  %v11944_v58 = vpop.f32.mrf.mxu1 }
 0x3bb   :  { %v4146_v10 = vmax.f32 %v11942_v41, %v11944_v58  ;;  %4910 = vmatpush2.bf16.msra.mxu0 %v11845_v59  ;;  %4968 = vmatpush2.bf16.msra.mxu1 %v11845_v59  ;;  %v11980_v59 = vld [vmem:[%s13184_s1 + $0x7f0] ss:$8 sps:$4 sm:$0xff]   ;;  %v8864_v41 = vld [vmem:[%s13185_s0 + $0x3c4] ss:$8 sps:$4 sm:$0xff]  }
 0x3bc   :  { %v11950_v16 = vpop.f32.mrf.mxu0  ;;  %v11952_v6 = vpop.f32.mrf.mxu1  ;;  %4911 = vmatprep.subr.bf16.mxu0 %v11855_v55  ;;  %4969 = vmatprep.subr.bf16.mxu1 %v11855_v55 }
 0x3bd   :  { %v4147_v51 = vmax.f32 %v11950_v16, %v11952_v6 }
 0x3be   :  { %v11963_v13 = vpop.f32.mrf.mxu0  ;;  %v11965_v32 = vpop.f32.mrf.mxu1 }
 0x3bf   :  { %v4148_v39 = vmax.f32 %v11963_v13, %v11965_v32  ;;  %4912 = vmatpush2.bf16.msra.mxu0 %v11863_v5  ;;  %4970 = vmatpush2.bf16.msra.mxu1 %v11863_v5 }
 0x3c0   :  { %v11982_v55 = vpop.f32.mrf.mxu0  ;;  %v11984_v40 = vpop.f32.mrf.mxu1  ;;  %5183 = vmatprep.subr.bf16.mxu0 %v11959_v17  ;;  %5241 = vmatprep.subr.bf16.mxu1 %v11959_v17 }
 0x3c1   :  { %v4149_v5 = vmax.f32 %v11982_v55, %v11984_v40 }
 0x3c2   :  { %4914 = vmatmul.mubr.bf16.vlgmr.msra.gmra.mxu0 %v8824_v3  ;;  %4972 = vmatmul.mubr.bf16.vlgmr.msra.gmra.mxu1 %v8825_v18 }
 0x3c3   :  { %5184 = vmatpush1.bf16.msra.mxu0 %v11980_v59  ;;  %5242 = vmatpush1.bf16.msra.mxu1 %v11980_v59 }
 0x3c4   :  { %5185 = vmatprep.subr.bf16.mxu0 %v11991_v35  ;;  %5243 = vmatprep.subr.bf16.mxu1 %v11991_v35 }
 0x3c5   :  { %7985 = vmatprep.mubr.msk.bf16.mxu0 %vm164_vm0, %v8856_v38  ;;  %7990 = vmatprep.mubr.msk.bf16.mxu1 %vm164_vm0, %v8858_v62 }
 0x3c7   :  { %5186 = vmatpush1.bf16.msra.mxu0 %v12006_v44  ;;  %5244 = vmatpush1.bf16.msra.mxu1 %v12006_v44 }
 0x3c8   :  { %5187 = vmatprep.subr.bf16.mxu0 %v12013_v50  ;;  %5245 = vmatprep.subr.bf16.mxu1 %v12013_v50 }
 0x3cb   :  { %5188 = vmatpush1.bf16.msra.mxu0 %v12022_v0  ;;  %5246 = vmatpush1.bf16.msra.mxu1 %v12022_v0 }
 0x3cc   :  { %5189 = vmatprep.subr.bf16.mxu0 %v12029_v61  ;;  %5247 = vmatprep.subr.bf16.mxu1 %v12029_v61 }
 0x3cf   :  { %5190 = vmatpush1.bf16.msra.mxu0 %v12036_v30  ;;  %5248 = vmatpush1.bf16.msra.mxu1 %v12036_v30 }
 0x3d0   :  { %5191 = vmatprep.subr.bf16.mxu0 %v12043_v29  ;;  %5249 = vmatprep.subr.bf16.mxu1 %v12043_v29 }
 0x3d3   :  { %5192 = vmatpush1.bf16.msra.mxu0 %v12050_v24  ;;  %5250 = vmatpush1.bf16.msra.mxu1 %v12050_v24 }
 0x3d4   :  { %5193 = vmatprep.subr.bf16.mxu0 %v12057_v1  ;;  %5251 = vmatprep.subr.bf16.mxu1 %v12057_v1 }
 0x3d7   :  { %5194 = vmatpush1.bf16.msra.mxu0 %v12064_v53  ;;  %5252 = vmatpush1.bf16.msra.mxu1 %v12064_v53 }
 0x3d8   :  { %5195 = vmatprep.subr.bf16.mxu0 %v12071_v36  ;;  %5253 = vmatprep.subr.bf16.mxu1 %v12071_v36 }
 0x3db   :  { %5196 = vmatpush1.bf16.msra.mxu0 %v12078_v14  ;;  %5254 = vmatpush1.bf16.msra.mxu1 %v12078_v14 }
 0x3dc   :  { %5197 = vmatprep.subr.bf16.mxu0 %v12085_v22  ;;  %5255 = vmatprep.subr.bf16.mxu1 %v12085_v22 }
 0x3df   :  { %5198 = vmatpush1.bf16.msra.mxu0 %v12092_v11  ;;  %5256 = vmatpush1.bf16.msra.mxu1 %v12092_v11 }
 0x3e0   :  { %5211 = vmatprep.subr.bf16.mxu0 %v12099_v43  ;;  %5269 = vmatprep.subr.bf16.mxu1 %v12099_v43 }
 0x3e2   :  { %v4079_v2 = vpop.f32.mrf.mxu0  ;;  %v4137_v27 = vpop.f32.mrf.mxu1 }
 0x3e3   :  { %v4150_v54 = vmax.f32 %v4079_v2, %v4137_v27  ;;  %5212 = vmatpush2.bf16.msra.mxu0 %v12106_v8  ;;  %5270 = vmatpush2.bf16.msra.mxu1 %v12106_v8 }
 0x3e4   :  { %v4081_v63 = vpop.f32.mrf.mxu0  ;;  %v4139_v31 = vpop.f32.mrf.mxu1  ;;  %5213 = vmatprep.subr.bf16.mxu0 %v12116_v12  ;;  %5271 = vmatprep.subr.bf16.mxu1 %v12116_v12 }
 0x3e5   :  { %v4154_v56 = vmax.f32 %v4146_v10, %v4150_v54  ;;  %v4151_v42 = vmax.f32 %v4081_v63, %v4139_v31 }
 0x3e6   :  { %v4083_v19 = vpop.f32.mrf.mxu0  ;;  %v4141_v20 = vpop.f32.mrf.mxu1 }
 0x3e7   :  { %v4171_v21 = vadd.f32 %v4164_v9, %v4154_v56  ;;  %v4155_v25 = vmax.f32 %v4147_v51, %v4151_v42  ;;  %v4152_v48 = vmax.f32 %v4083_v19, %v4141_v20  ;;  %5214 = vmatpush2.bf16.msra.mxu0 %v12124_v46  ;;  %5272 = vmatpush2.bf16.msra.mxu1 %v12124_v46  ;;  %v12252_v19 = vld [vmem:[%s13184_s1 + $0x884] ss:$8 sps:$4 sm:$0xff]   ;;  %v8898_v20 = vld [vmem:[%s13185_s0 + $0xd4] ss:$8 sps:$4 sm:$0xff]  }
 0x3e8   :  { %v4085_v4 = vpop.f32.mrf.mxu0  ;;  %v4143_v49 = vpop.f32.mrf.mxu1  ;;  %5299 = vmatprep.subr.bf16.mxu0 %v11959_v17  ;;  %5357 = vmatprep.subr.bf16.mxu1 %v11959_v17 }
 0x3e9   :  { %v7807_v15 = vadd.f32 -4.0, %v4171_v21  ;;  %v4172_v58 = vadd.f32 %v4168_v60, %v4155_v25  ;;  %v4156_v10 = vmax.f32 %v4148_v39, %v4152_v48  ;;  %v4153_v16 = vmax.f32 %v4085_v4, %v4143_v49  ;;  %v12283_v25 = vld [vmem:[%s13184_s1 + $0x870] ss:$8 sps:$4 sm:$0xff]   ;;  %v12290_v48 = vld [vmem:[%s13184_s1 + $0x864] ss:$8 sps:$4 sm:$0xff]  }
 0x3ea   :  { %5216 = vmatmul.mubr.bf16.vlgmr.msra.gmra.mxu0 %v8860_v57  ;;  %5274 = vmatmul.mubr.bf16.vlgmr.msra.gmra.mxu1 %v8861_v7  ;;  %v4179_v32 = vmul.f32 0.1, %v4171_v21  ;;  %vm4183_vm13 = vcmp.gt.f32.partialorder %v4171_v21, 4.0  ;;  %vm4175_vm14 = vcmp.lt.f32.partialorder %v4171_v21, 0.0  ;;  %v8900_v57 = vld [vmem:[%s13185_s0 + $0x1d4] ss:$8 sps:$4 sm:$0xff]  }
 0x3eb   :  { %v4191_v6 = vmul.f32 0.1, %v7807_v15  ;;  %5300 = vmatpush1.bf16.msra.mxu0 %v11980_v59  ;;  %5358 = vmatpush1.bf16.msra.mxu1 %v11980_v59  ;;  %v7808_v17 = vadd.f32 -4.0, %v4172_v58  ;;  %v4173_v3 = vadd.f32 %v4164_v9, %v4156_v10  ;;  %v4157_v13 = vmax.f32 %v4149_v5, %v4153_v16  ;;  %v12267_v7 = vld [vmem:[%s13184_s1 + $0x880] ss:$8 sps:$4 sm:$0xff]  }
 0x3ec   :  { %5301 = vmatprep.subr.bf16.mxu0 %v11991_v35  ;;  %5359 = vmatprep.subr.bf16.mxu1 %v11991_v35  ;;  %v4180_v40 = vmul.f32 0.1, %v4172_v58  ;;  %vm4184_vm15 = vcmp.gt.f32.partialorder %v4172_v58, 4.0  ;;  %vm4176_vm1 = vcmp.lt.f32.partialorder %v4172_v58, 0.0  ;;  %v12297_v4 = vld [vmem:[%s13184_s1 + $0x860] ss:$8 sps:$4 sm:$0xff]  }
 0x3ed   :  { %v4195_v51 = vadd.f32 4.0, %v4191_v6  ;;  %7995 = vmatprep.mubr.msk.bf16.mxu0 %vm164_vm0, %v8862_v52  ;;  %8000 = vmatprep.mubr.msk.bf16.mxu1 %vm164_vm0, %v8864_v41  ;;  %v4192_v18 = vmul.f32 0.1, %v7808_v17  ;;  %v7809_v38 = vadd.f32 -4.0, %v4173_v3  ;;  %v4174_v62 = vadd.f32 %v4168_v60, %v4157_v13  ;;  %v12304_v49 = vld [vmem:[%s13184_s1 + $0x854] ss:$8 sps:$4 sm:$0xff]  }
 0x3ee   :  { %vm4185_vm2 = vcmp.gt.f32.partialorder %v4173_v3, 4.0  ;;  %vm4177_vm3 = vcmp.lt.f32.partialorder %v4173_v3, 0.0  ;;  %v12311_v15 = vld [vmem:[%s13184_s1 + $0x850] ss:$8 sps:$4 sm:$0xff]   ;;  %v12318_v52 = vld [vmem:[%s13184_s1 + $0x844] ss:$8 sps:$4 sm:$0xff]  }
 0x3ef   :  { %v4199_v39 = vsel %vm4183_vm13, %v4195_v51, %v4171_v21  ;;  %5302 = vmatpush1.bf16.msra.mxu0 %v12006_v44  ;;  %5360 = vmatpush1.bf16.msra.mxu1 %v12006_v44  ;;  %v4196_v35 = vadd.f32 4.0, %v4192_v18  ;;  %v4193_v26 = vmul.f32 0.1, %v7809_v38  ;;  %v7810_v2 = vadd.f32 -4.0, %v4174_v62  ;;  %v12274_v21 = vld [vmem:[%s13184_s1 + $0x874] ss:$8 sps:$4 sm:$0xff]  }
 0x3f0   :  { %v4203_v59 = vsel %vm4175_vm14, %v4179_v32, %v4199_v39  ;;  %5303 = vmatprep.subr.bf16.mxu0 %v12013_v50  ;;  %5361 = vmatprep.subr.bf16.mxu1 %v12013_v50  ;;  %v4182_v56 = vmul.f32 0.1, %v4174_v62  ;;  %vm4186_vm4 = vcmp.gt.f32.partialorder %v4174_v62, 4.0  ;;  %vm4178_vm5 = vcmp.lt.f32.partialorder %v4174_v62, 0.0  ;;  %v12325_v41 = vld [vmem:[%s13184_s1 + $0x840] ss:$8 sps:$4 sm:$0xff]  }
 0x3f1   :  { %v12168_v55 = vadd.f32 %v4203_v59, %v11907_v33  ;;  %v4200_v5 = vsel %vm4184_vm15, %v4196_v35, %v4172_v58  ;;  %v4197_v27 = vadd.f32 4.0, %v4193_v26  ;;  %v4181_v33 = vmul.f32 0.1, %v4173_v3  ;;  %v12332_v58 = vld [vmem:[%s13184_s1 + $0x834] ss:$8 sps:$4 sm:$0xff]  }
 0x3f2   :  { %v4204_v44 = vsel %vm4176_vm1, %v4180_v40, %v4200_v5  ;;  %v4194_v54 = vmul.f32 0.1, %v7810_v2  ;;  %v12339_v10 = vld [vmem:[%s13184_s1 + $0x830] ss:$8 sps:$4 sm:$0xff]   ;;  %v12346_v16 = vld [vmem:[%s13184_s1 + $0x824] ss:$8 sps:$4 sm:$0xff]  }
 0x3f3   :  { %5304 = vmatpush1.bf16.msra.mxu0 %v12022_v0  ;;  %5362 = vmatpush1.bf16.msra.mxu1 %v12022_v0  ;;  %v12175_v50 = vadd.f32 %v4204_v44, %v11914_v45  ;;  %v4201_v9 = vsel %vm4185_vm2, %v4197_v27, %v4173_v3  ;;  %v12353_v6 = vld [vmem:[%s13184_s1 + $0x820] ss:$8 sps:$4 sm:$0xff]   ;;  %v12360_v17 = vld [vmem:[%s13184_s1 + $0x8b4] ss:$8 sps:$4 sm:$0xff]   ;;  %v12367_v51 = vld [vmem:[%s13184_s1 + $0x8b0] ss:$8 sps:$4 sm:$0xff]  }
 0x3f4   :  { %5305 = vmatprep.subr.bf16.mxu0 %v12029_v61  ;;  %5363 = vmatprep.subr.bf16.mxu1 %v12029_v61  ;;  %v4205_v63 = vsel %vm4177_vm3, %v4181_v33, %v4201_v9  ;;  %v4198_v31 = vadd.f32 4.0, %v4194_v54  ;;  %v7871_v3 = vld [vmem:[%s13186_s2 + $0x14] sm:$0x3]  ;;  %v12377_v13 = vld [vmem:[%s13184_s1 + $0x8a4] ss:$8 sps:$4 sm:$0xff]  }
 0x3f5   :  { %v12180_v0 = vadd.f32 %v4205_v63, %v11919_v23  ;;  %v4582_v59 = vrot.slane %v7871_v3, %v9904_v34  ;;  %v12385_v35 = vld [vmem:[%s13184_s1 + $0x8a0] ss:$8 sps:$4 sm:$0xff]   ;;  %v4586_v26 = vrot.slane %v7871_v3, %v9916_v37  ;;  %v8902_v27 = vld [vmem:[%s13185_s0 + $0xd0] ss:$8 sps:$4 sm:$0xff]  }
 0x3f6   :  { %v4202_v45 = vsel %vm4186_vm4, %v4198_v31, %v4174_v62  ;;  %v8903_v33 = vld [vmem:[%s13185_s0 + $0x1d0] ss:$8 sps:$4 sm:$0xff]  }
 0x3f7   :  { %5306 = vmatpush1.bf16.msra.mxu0 %v12036_v30  ;;  %5364 = vmatpush1.bf16.msra.mxu1 %v12036_v30  ;;  %v4206_v61 = vsel %vm4178_vm5, %v4182_v56, %v4202_v45 }
 0x3f8   :  { %5307 = vmatprep.subr.bf16.mxu0 %v12043_v29  ;;  %5365 = vmatprep.subr.bf16.mxu1 %v12043_v29  ;;  %v12187_v42 = vadd.f32 %v4206_v61, %v11926_v47  ;;  %v8904_v61 = vld [vmem:[%s13185_s0 + $0x2d4] ss:$8 sps:$4 sm:$0xff]  }
 0x3fb   :  { %5308 = vmatpush1.bf16.msra.mxu0 %v12050_v24  ;;  %5366 = vmatpush1.bf16.msra.mxu1 %v12050_v24 }
 0x3fc   :  { %5309 = vmatprep.subr.bf16.mxu0 %v12057_v1  ;;  %5367 = vmatprep.subr.bf16.mxu1 %v12057_v1  ;;  %v12220_v1 = vld [vmem:[%s13184_s1 + $0x894] ss:$8 sps:$4 sm:$0xff]  }
 0x3ff   :  { %5310 = vmatpush1.bf16.msra.mxu0 %v12064_v53  ;;  %5368 = vmatpush1.bf16.msra.mxu1 %v12064_v53 }
 0x400   :  { %5311 = vmatprep.subr.bf16.mxu0 %v12071_v36  ;;  %5369 = vmatprep.subr.bf16.mxu1 %v12071_v36 }
 0x403   :  { %5312 = vmatpush1.bf16.msra.mxu0 %v12078_v14  ;;  %5370 = vmatpush1.bf16.msra.mxu1 %v12078_v14 }
 0x404   :  { %5313 = vmatprep.subr.bf16.mxu0 %v12085_v22  ;;  %5371 = vmatprep.subr.bf16.mxu1 %v12085_v22  ;;  %v8866_v22 = vld [vmem:[%s13185_s0 + $0x2c0] ss:$8 sps:$4 sm:$0xff]  }
 0x407   :  { %5314 = vmatpush1.bf16.msra.mxu0 %v12092_v11  ;;  %5372 = vmatpush1.bf16.msra.mxu1 %v12092_v11  ;;  %v8867_v11 = vld [vmem:[%s13185_s0 + $0x3c0] ss:$8 sps:$4 sm:$0xff]  }
 0x408   :  { %5327 = vmatprep.subr.bf16.mxu0 %v12099_v43  ;;  %5385 = vmatprep.subr.bf16.mxu1 %v12099_v43 }
 0x40a   :  { %v12203_v23 = vpop.f32.mrf.mxu0  ;;  %v12205_v47 = vpop.f32.mrf.mxu1 }
 0x40b   :  { %v4564_v30 = vmax.f32 %v12203_v23, %v12205_v47  ;;  %5328 = vmatpush2.bf16.msra.mxu0 %v12106_v8  ;;  %5386 = vmatpush2.bf16.msra.mxu1 %v12106_v8  ;;  %v12241_v8 = vld [vmem:[%s13184_s1 + $0x890] ss:$8 sps:$4 sm:$0xff]   ;;  %v8906_v23 = vld [vmem:[%s13185_s0 + $0x3d4] ss:$8 sps:$4 sm:$0xff]  }
 0x40c   :  { %v12211_v29 = vpop.f32.mrf.mxu0  ;;  %v12213_v24 = vpop.f32.mrf.mxu1  ;;  %5329 = vmatprep.subr.bf16.mxu0 %v12116_v12  ;;  %5387 = vmatprep.subr.bf16.mxu1 %v12116_v12 }
 0x40d   :  { %v4565_v53 = vmax.f32 %v12211_v29, %v12213_v24 }
 0x40e   :  { %v12224_v36 = vpop.f32.mrf.mxu0  ;;  %v12226_v14 = vpop.f32.mrf.mxu1 }
 0x40f   :  { %v4566_v43 = vmax.f32 %v12224_v36, %v12226_v14  ;;  %5330 = vmatpush2.bf16.msra.mxu0 %v12124_v46  ;;  %5388 = vmatpush2.bf16.msra.mxu1 %v12124_v46 }
 0x410   :  { %v12243_v12 = vpop.f32.mrf.mxu0  ;;  %v12245_v60 = vpop.f32.mrf.mxu1  ;;  %5601 = vmatprep.subr.bf16.mxu0 %v12220_v1  ;;  %5659 = vmatprep.subr.bf16.mxu1 %v12220_v1 }
 0x411   :  { %v4567_v46 = vmax.f32 %v12243_v12, %v12245_v60 }
 0x412   :  { %5332 = vmatmul.mubr.bf16.vlgmr.msra.gmra.mxu0 %v8866_v22  ;;  %5390 = vmatmul.mubr.bf16.vlgmr.msra.gmra.mxu1 %v8867_v11 }
 0x413   :  { %5602 = vmatpush1.bf16.msra.mxu0 %v12241_v8  ;;  %5660 = vmatpush1.bf16.msra.mxu1 %v12241_v8 }
 0x414   :  { %5603 = vmatprep.subr.bf16.mxu0 %v12252_v19  ;;  %5661 = vmatprep.subr.bf16.mxu1 %v12252_v19 }
 0x415   :  { %8050 = vmatprep.mubr.msk.bf16.mxu0 %vm164_vm0, %v8898_v20  ;;  %8055 = vmatprep.mubr.msk.bf16.mxu1 %vm164_vm0, %v8900_v57 }
 0x417   :  { %5604 = vmatpush1.bf16.msra.mxu0 %v12267_v7  ;;  %5662 = vmatpush1.bf16.msra.mxu1 %v12267_v7 }
 0x418   :  { %5605 = vmatprep.subr.bf16.mxu0 %v12274_v21  ;;  %5663 = vmatprep.subr.bf16.mxu1 %v12274_v21 }
 0x41b   :  { %5606 = vmatpush1.bf16.msra.mxu0 %v12283_v25  ;;  %5664 = vmatpush1.bf16.msra.mxu1 %v12283_v25 }
 0x41c   :  { %5607 = vmatprep.subr.bf16.mxu0 %v12290_v48  ;;  %5665 = vmatprep.subr.bf16.mxu1 %v12290_v48 }
 0x41f   :  { %5608 = vmatpush1.bf16.msra.mxu0 %v12297_v4  ;;  %5666 = vmatpush1.bf16.msra.mxu1 %v12297_v4 }
 0x420   :  { %5609 = vmatprep.subr.bf16.mxu0 %v12304_v49  ;;  %5667 = vmatprep.subr.bf16.mxu1 %v12304_v49 }
 0x423   :  { %5610 = vmatpush1.bf16.msra.mxu0 %v12311_v15  ;;  %5668 = vmatpush1.bf16.msra.mxu1 %v12311_v15 }
 0x424   :  { %5611 = vmatprep.subr.bf16.mxu0 %v12318_v52  ;;  %5669 = vmatprep.subr.bf16.mxu1 %v12318_v52 }
 0x427   :  { %5612 = vmatpush1.bf16.msra.mxu0 %v12325_v41  ;;  %5670 = vmatpush1.bf16.msra.mxu1 %v12325_v41 }
 0x428   :  { %5613 = vmatprep.subr.bf16.mxu0 %v12332_v58  ;;  %5671 = vmatprep.subr.bf16.mxu1 %v12332_v58 }
 0x42b   :  { %5614 = vmatpush1.bf16.msra.mxu0 %v12339_v10  ;;  %5672 = vmatpush1.bf16.msra.mxu1 %v12339_v10 }
 0x42c   :  { %5615 = vmatprep.subr.bf16.mxu0 %v12346_v16  ;;  %5673 = vmatprep.subr.bf16.mxu1 %v12346_v16 }
 0x42f   :  { %5616 = vmatpush1.bf16.msra.mxu0 %v12353_v6  ;;  %5674 = vmatpush1.bf16.msra.mxu1 %v12353_v6 }
 0x430   :  { %5629 = vmatprep.subr.bf16.mxu0 %v12360_v17  ;;  %5687 = vmatprep.subr.bf16.mxu1 %v12360_v17 }
 0x432   :  { %v4497_v32 = vpop.f32.mrf.mxu0  ;;  %v4555_v18 = vpop.f32.mrf.mxu1 }
 0x433   :  { %v4568_v39 = vmax.f32 %v4497_v32, %v4555_v18  ;;  %5630 = vmatpush2.bf16.msra.mxu0 %v12367_v51  ;;  %5688 = vmatpush2.bf16.msra.mxu1 %v12367_v51 }
 0x434   :  { %v4499_v38 = vpop.f32.mrf.mxu0  ;;  %v4557_v62 = vpop.f32.mrf.mxu1  ;;  %5631 = vmatprep.subr.bf16.mxu0 %v12377_v13  ;;  %5689 = vmatprep.subr.bf16.mxu1 %v12377_v13 }
 0x435   :  { %v4572_v40 = vmax.f32 %v4564_v30, %v4568_v39  ;;  %v4569_v5 = vmax.f32 %v4499_v38, %v4557_v62 }
 0x436   :  { %v4501_v2 = vpop.f32.mrf.mxu0  ;;  %v4559_v44 = vpop.f32.mrf.mxu1 }
 0x437   :  { %v4589_v54 = vadd.f32 %v4582_v59, %v4572_v40  ;;  %v4573_v9 = vmax.f32 %v4565_v53, %v4569_v5  ;;  %v4570_v63 = vmax.f32 %v4501_v2, %v4559_v44  ;;  %5632 = vmatpush2.bf16.msra.mxu0 %v12385_v35  ;;  %5690 = vmatpush2.bf16.msra.mxu1 %v12385_v35  ;;  %v12513_v2 = vld [vmem:[%s13184_s1 + $0x924] ss:$8 sps:$4 sm:$0xff]  }
 0x438   :  { %v4503_v31 = vpop.f32.mrf.mxu0  ;;  %v4561_v56 = vpop.f32.mrf.mxu1  ;;  %5717 = vmatprep.subr.bf16.mxu0 %v12220_v1  ;;  %5775 = vmatprep.subr.bf16.mxu1 %v12220_v1  ;;  %v8942_v44 = vld [vmem:[%s13185_s0 + $0xe4] ss:$8 sps:$4 sm:$0xff]  }
 0x439   :  { %v7872_v45 = vadd.f32 -4.0, %v4589_v54  ;;  %v4590_v47 = vadd.f32 %v4586_v26, %v4573_v9  ;;  %v4574_v30 = vmax.f32 %v4566_v43, %v4570_v63  ;;  %v4571_v29 = vmax.f32 %v4503_v31, %v4561_v56  ;;  %v12544_v9 = vld [vmem:[%s13184_s1 + $0x910] ss:$8 sps:$4 sm:$0xff]   ;;  %v12551_v63 = vld [vmem:[%s13184_s1 + $0x904] ss:$8 sps:$4 sm:$0xff]  }
 0x43a   :  { %5634 = vmatmul.mubr.bf16.vlgmr.msra.gmra.mxu0 %v8902_v27  ;;  %5692 = vmatmul.mubr.bf16.vlgmr.msra.gmra.mxu1 %v8903_v33  ;;  %v4597_v14 = vmul.f32 0.1, %v4589_v54  ;;  %vm4601_vm6 = vcmp.gt.f32.partialorder %v4589_v54, 4.0  ;;  %vm4593_vm7 = vcmp.lt.f32.partialorder %v4589_v54, 0.0  ;;  %v8945_v27 = vld [vmem:[%s13185_s0 + $0x1e4] ss:$8 sps:$4 sm:$0xff]  }
 0x43b   :  { %v4609_v24 = vmul.f32 0.1, %v7872_v45  ;;  %5718 = vmatpush1.bf16.msra.mxu0 %v12241_v8  ;;  %5776 = vmatpush1.bf16.msra.mxu1 %v12241_v8  ;;  %v7873_v1 = vadd.f32 -4.0, %v4590_v47  ;;  %v4591_v22 = vadd.f32 %v4582_v59, %v4574_v30  ;;  %v4575_v36 = vmax.f32 %v4567_v46, %v4571_v29  ;;  %v12528_v33 = vld [vmem:[%s13184_s1 + $0x920] ss:$8 sps:$4 sm:$0xff]  }
 0x43c   :  { %5719 = vmatprep.subr.bf16.mxu0 %v12252_v19  ;;  %5777 = vmatprep.subr.bf16.mxu1 %v12252_v19  ;;  %v4598_v60 = vmul.f32 0.1, %v4590_v47  ;;  %vm4602_vm8 = vcmp.gt.f32.partialorder %v4590_v47, 4.0  ;;  %vm4594_vm9 = vcmp.lt.f32.partialorder %v4590_v47, 0.0  ;;  %v12558_v31 = vld [vmem:[%s13184_s1 + $0x900] ss:$8 sps:$4 sm:$0xff]  }
 0x43d   :  { %v4613_v53 = vadd.f32 4.0, %v4609_v24  ;;  %8060 = vmatprep.mubr.msk.bf16.mxu0 %vm164_vm0, %v8904_v61  ;;  %8065 = vmatprep.mubr.msk.bf16.mxu1 %vm164_vm0, %v8906_v23  ;;  %v4610_v11 = vmul.f32 0.1, %v7873_v1  ;;  %v7874_v20 = vadd.f32 -4.0, %v4591_v22  ;;  %v4592_v57 = vadd.f32 %v4586_v26, %v4575_v36  ;;  %v12565_v56 = vld [vmem:[%s13184_s1 + $0x8f4] ss:$8 sps:$4 sm:$0xff]  }
 0x43e   :  { %vm4603_vm10 = vcmp.gt.f32.partialorder %v4591_v22, 4.0  ;;  %vm4595_vm11 = vcmp.lt.f32.partialorder %v4591_v22, 0.0  ;;  %v12572_v45 = vld [vmem:[%s13184_s1 + $0x8f0] ss:$8 sps:$4 sm:$0xff]   ;;  %v12579_v61 = vld [vmem:[%s13184_s1 + $0x8e4] ss:$8 sps:$4 sm:$0xff]  }
 0x43f   :  { %v4617_v43 = vsel %vm4601_vm6, %v4613_v53, %v4589_v54  ;;  %5720 = vmatpush1.bf16.msra.mxu0 %v12267_v7  ;;  %5778 = vmatpush1.bf16.msra.mxu1 %v12267_v7  ;;  %v4614_v19 = vadd.f32 4.0, %v4610_v11  ;;  %v4611_v3 = vmul.f32 0.1, %v7874_v20  ;;  %v7875_v32 = vadd.f32 -4.0, %v4592_v57  ;;  %v12535_v54 = vld [vmem:[%s13184_s1 + $0x914] ss:$8 sps:$4 sm:$0xff]  }
 0x440   :  { %v4621_v8 = vsel %vm4593_vm7, %v4597_v14, %v4617_v43  ;;  %5721 = vmatprep.subr.bf16.mxu0 %v12274_v21  ;;  %5779 = vmatprep.subr.bf16.mxu1 %v12274_v21  ;;  %v4600_v40 = vmul.f32 0.1, %v4592_v57  ;;  %vm4604_vm12 = vcmp.gt.f32.partialorder %v4592_v57, 4.0  ;;  %vm4596_vm13 = vcmp.lt.f32.partialorder %v4592_v57, 0.0  ;;  %v12586_v23 = vld [vmem:[%s13184_s1 + $0x8e0] ss:$8 sps:$4 sm:$0xff]  }
 0x441   :  { %v12429_v12 = vadd.f32 %v4621_v8, %v12168_v55  ;;  %v4618_v46 = vsel %vm4602_vm8, %v4614_v19, %v4590_v47  ;;  %v4615_v18 = vadd.f32 4.0, %v4611_v3  ;;  %v4599_v55 = vmul.f32 0.1, %v4591_v22  ;;  %v12593_v47 = vld [vmem:[%s13184_s1 + $0x8d4] ss:$8 sps:$4 sm:$0xff]  }
 0x442   :  { %v4622_v7 = vsel %vm4594_vm9, %v4598_v60, %v4618_v46  ;;  %v4612_v39 = vmul.f32 0.1, %v7875_v32  ;;  %v12600_v30 = vld [vmem:[%s13184_s1 + $0x8d0] ss:$8 sps:$4 sm:$0xff]   ;;  %v12607_v29 = vld [vmem:[%s13184_s1 + $0x8c4] ss:$8 sps:$4 sm:$0xff]  }
 0x443   :  { %5722 = vmatpush1.bf16.msra.mxu0 %v12283_v25  ;;  %5780 = vmatpush1.bf16.msra.mxu1 %v12283_v25  ;;  %v12436_v21 = vadd.f32 %v4622_v7, %v12175_v50  ;;  %v4619_v59 = vsel %vm4603_vm10, %v4615_v18, %v4591_v22  ;;  %v12614_v24 = vld [vmem:[%s13184_s1 + $0x8c0] ss:$8 sps:$4 sm:$0xff]   ;;  %v12621_v1 = vld [vmem:[%s13184_s1 + $0x954] ss:$8 sps:$4 sm:$0xff]   ;;  %v12628_v53 = vld [vmem:[%s13184_s1 + $0x950] ss:$8 sps:$4 sm:$0xff]  }
 0x444   :  { %5723 = vmatprep.subr.bf16.mxu0 %v12290_v48  ;;  %5781 = vmatprep.subr.bf16.mxu1 %v12290_v48  ;;  %v4623_v38 = vsel %vm4595_vm11, %v4599_v55, %v4619_v59  ;;  %v4616_v62 = vadd.f32 4.0, %v4612_v39  ;;  %v7936_v22 = vld [vmem:[%s13186_s2 + $0x16] sm:$0x3]  ;;  %v12638_v36 = vld [vmem:[%s13184_s1 + $0x944] ss:$8 sps:$4 sm:$0xff]  }
 0x445   :  { %v12441_v25 = vadd.f32 %v4623_v38, %v12180_v0  ;;  %v5000_v8 = vrot.slane %v7936_v22, %v9904_v34  ;;  %v12646_v19 = vld [vmem:[%s13184_s1 + $0x940] ss:$8 sps:$4 sm:$0xff]   ;;  %v5004_v3 = vrot.slane %v7936_v22, %v9916_v37 }
 0x446   :  { %v4620_v50 = vsel %vm4604_vm12, %v4616_v62, %v4592_v57  ;;  %v8940_v18 = vld [vmem:[%s13185_s0 + $0xe0] ss:$8 sps:$4 sm:$0xff]  }
 0x447   :  { %5724 = vmatpush1.bf16.msra.mxu0 %v12297_v4  ;;  %5782 = vmatpush1.bf16.msra.mxu1 %v12297_v4  ;;  %v4624_v48 = vsel %vm4596_vm13, %v4600_v40, %v4620_v50  ;;  %v8943_v55 = vld [vmem:[%s13185_s0 + $0x1e0] ss:$8 sps:$4 sm:$0xff]  }
 0x448   :  { %5725 = vmatprep.subr.bf16.mxu0 %v12304_v49  ;;  %5783 = vmatprep.subr.bf16.mxu1 %v12304_v49  ;;  %v12448_v5 = vadd.f32 %v4624_v48, %v12187_v42  ;;  %v8948_v48 = vld [vmem:[%s13185_s0 + $0x2e4] ss:$8 sps:$4 sm:$0xff]  }
 0x44b   :  { %5726 = vmatpush1.bf16.msra.mxu0 %v12311_v15  ;;  %5784 = vmatpush1.bf16.msra.mxu1 %v12311_v15 }
 0x44c   :  { %5727 = vmatprep.subr.bf16.mxu0 %v12318_v52  ;;  %5785 = vmatprep.subr.bf16.mxu1 %v12318_v52  ;;  %v12481_v52 = vld [vmem:[%s13184_s1 + $0x934] ss:$8 sps:$4 sm:$0xff]  }
 0x44f   :  { %5728 = vmatpush1.bf16.msra.mxu0 %v12325_v41  ;;  %5786 = vmatpush1.bf16.msra.mxu1 %v12325_v41 }
 0x450   :  { %5729 = vmatprep.subr.bf16.mxu0 %v12332_v58  ;;  %5787 = vmatprep.subr.bf16.mxu1 %v12332_v58 }
 0x453   :  { %5730 = vmatpush1.bf16.msra.mxu0 %v12339_v10  ;;  %5788 = vmatpush1.bf16.msra.mxu1 %v12339_v10 }
 0x454   :  { %5731 = vmatprep.subr.bf16.mxu0 %v12346_v16  ;;  %5789 = vmatprep.subr.bf16.mxu1 %v12346_v16  ;;  %v8908_v16 = vld [vmem:[%s13185_s0 + $0x2d0] ss:$8 sps:$4 sm:$0xff]  }
 0x457   :  { %5732 = vmatpush1.bf16.msra.mxu0 %v12353_v6  ;;  %5790 = vmatpush1.bf16.msra.mxu1 %v12353_v6  ;;  %v8909_v6 = vld [vmem:[%s13185_s0 + $0x3d0] ss:$8 sps:$4 sm:$0xff]  }
 0x458   :  { %5745 = vmatprep.subr.bf16.mxu0 %v12360_v17  ;;  %5803 = vmatprep.subr.bf16.mxu1 %v12360_v17 }
 0x45a   :  { %v12464_v0 = vpop.f32.mrf.mxu0  ;;  %v12466_v42 = vpop.f32.mrf.mxu1 }
 0x45b   :  { %v4982_v4 = vmax.f32 %v12464_v0, %v12466_v42  ;;  %5746 = vmatpush2.bf16.msra.mxu0 %v12367_v51  ;;  %5804 = vmatpush2.bf16.msra.mxu1 %v12367_v51  ;;  %v12502_v51 = vld [vmem:[%s13184_s1 + $0x930] ss:$8 sps:$4 sm:$0xff]   ;;  %v8951_v0 = vld [vmem:[%s13185_s0 + $0x3e4] ss:$8 sps:$4 sm:$0xff]  }
 0x45c   :  { %v12472_v49 = vpop.f32.mrf.mxu0  ;;  %v12474_v15 = vpop.f32.mrf.mxu1  ;;  %5747 = vmatprep.subr.bf16.mxu0 %v12377_v13  ;;  %5805 = vmatprep.subr.bf16.mxu1 %v12377_v13 }
 0x45d   :  { %v4983_v41 = vmax.f32 %v12472_v49, %v12474_v15 }
 0x45e   :  { %v12485_v58 = vpop.f32.mrf.mxu0  ;;  %v12487_v10 = vpop.f32.mrf.mxu1 }
 0x45f   :  { %v4984_v17 = vmax.f32 %v12485_v58, %v12487_v10  ;;  %5748 = vmatpush2.bf16.msra.mxu0 %v12385_v35  ;;  %5806 = vmatpush2.bf16.msra.mxu1 %v12385_v35 }
 0x460   :  { %v12504_v13 = vpop.f32.mrf.mxu0  ;;  %v12506_v26 = vpop.f32.mrf.mxu1  ;;  %6019 = vmatprep.subr.bf16.mxu0 %v12481_v52  ;;  %6077 = vmatprep.subr.bf16.mxu1 %v12481_v52 }
 0x461   :  { %v4985_v35 = vmax.f32 %v12504_v13, %v12506_v26 }
 0x462   :  { %5750 = vmatmul.mubr.bf16.vlgmr.msra.gmra.mxu0 %v8908_v16  ;;  %5808 = vmatmul.mubr.bf16.vlgmr.msra.gmra.mxu1 %v8909_v6 }
 0x463   :  { %6020 = vmatpush1.bf16.msra.mxu0 %v12502_v51  ;;  %6078 = vmatpush1.bf16.msra.mxu1 %v12502_v51 }
 0x464   :  { %6021 = vmatprep.subr.bf16.mxu0 %v12513_v2  ;;  %6079 = vmatprep.subr.bf16.mxu1 %v12513_v2 }
 0x465   :  { %8115 = vmatprep.mubr.msk.bf16.mxu0 %vm164_vm0, %v8942_v44  ;;  %8120 = vmatprep.mubr.msk.bf16.mxu1 %vm164_vm0, %v8945_v27 }
 0x467   :  { %6022 = vmatpush1.bf16.msra.mxu0 %v12528_v33  ;;  %6080 = vmatpush1.bf16.msra.mxu1 %v12528_v33 }
 0x468   :  { %6023 = vmatprep.subr.bf16.mxu0 %v12535_v54  ;;  %6081 = vmatprep.subr.bf16.mxu1 %v12535_v54 }
 0x46b   :  { %6024 = vmatpush1.bf16.msra.mxu0 %v12544_v9  ;;  %6082 = vmatpush1.bf16.msra.mxu1 %v12544_v9 }
 0x46c   :  { %6025 = vmatprep.subr.bf16.mxu0 %v12551_v63  ;;  %6083 = vmatprep.subr.bf16.mxu1 %v12551_v63 }
 0x46f   :  { %6026 = vmatpush1.bf16.msra.mxu0 %v12558_v31  ;;  %6084 = vmatpush1.bf16.msra.mxu1 %v12558_v31 }
 0x470   :  { %6027 = vmatprep.subr.bf16.mxu0 %v12565_v56  ;;  %6085 = vmatprep.subr.bf16.mxu1 %v12565_v56 }
 0x473   :  { %6028 = vmatpush1.bf16.msra.mxu0 %v12572_v45  ;;  %6086 = vmatpush1.bf16.msra.mxu1 %v12572_v45 }
 0x474   :  { %6029 = vmatprep.subr.bf16.mxu0 %v12579_v61  ;;  %6087 = vmatprep.subr.bf16.mxu1 %v12579_v61 }
 0x477   :  { %6030 = vmatpush1.bf16.msra.mxu0 %v12586_v23  ;;  %6088 = vmatpush1.bf16.msra.mxu1 %v12586_v23 }
 0x478   :  { %6031 = vmatprep.subr.bf16.mxu0 %v12593_v47  ;;  %6089 = vmatprep.subr.bf16.mxu1 %v12593_v47 }
 0x47b   :  { %6032 = vmatpush1.bf16.msra.mxu0 %v12600_v30  ;;  %6090 = vmatpush1.bf16.msra.mxu1 %v12600_v30 }
 0x47c   :  { %6033 = vmatprep.subr.bf16.mxu0 %v12607_v29  ;;  %6091 = vmatprep.subr.bf16.mxu1 %v12607_v29 }
 0x47f   :  { %6034 = vmatpush1.bf16.msra.mxu0 %v12614_v24  ;;  %6092 = vmatpush1.bf16.msra.mxu1 %v12614_v24 }
 0x480   :  { %6047 = vmatprep.subr.bf16.mxu0 %v12621_v1  ;;  %6105 = vmatprep.subr.bf16.mxu1 %v12621_v1 }
 0x482   :  { %v4915_v14 = vpop.f32.mrf.mxu0  ;;  %v4973_v11 = vpop.f32.mrf.mxu1 }
 0x483   :  { %v4986_v43 = vmax.f32 %v4915_v14, %v4973_v11  ;;  %6048 = vmatpush2.bf16.msra.mxu0 %v12628_v53  ;;  %6106 = vmatpush2.bf16.msra.mxu1 %v12628_v53 }
 0x484   :  { %v4917_v20 = vpop.f32.mrf.mxu0  ;;  %v4975_v57 = vpop.f32.mrf.mxu1  ;;  %6049 = vmatprep.subr.bf16.mxu0 %v12638_v36  ;;  %6107 = vmatprep.subr.bf16.mxu1 %v12638_v36 }
 0x485   :  { %v4990_v60 = vmax.f32 %v4982_v4, %v4986_v43  ;;  %v4987_v46 = vmax.f32 %v4917_v20, %v4975_v57 }
 0x486   :  { %v4919_v32 = vpop.f32.mrf.mxu0  ;;  %v4977_v7 = vpop.f32.mrf.mxu1 }
 0x487   :  { %v5007_v39 = vadd.f32 %v5000_v8, %v4990_v60  ;;  %v4991_v59 = vmax.f32 %v4983_v41, %v4987_v46  ;;  %v4988_v38 = vmax.f32 %v4919_v32, %v4977_v7  ;;  %6050 = vmatpush2.bf16.msra.mxu0 %v12646_v19  ;;  %6108 = vmatpush2.bf16.msra.mxu1 %v12646_v19  ;;  %v8970_v32 = vld [vmem:[%s13184_s1 + $0x974] ss:$8 sps:$4 sm:$0xff]   ;;  %v8972_v7 = vld [vmem:[%s13184_s1 + $0x970] ss:$8 sps:$4 sm:$0xff]  }
 0x488   :  { %v4921_v62 = vpop.f32.mrf.mxu0  ;;  %v4979_v40 = vpop.f32.mrf.mxu1  ;;  %6135 = vmatprep.subr.bf16.mxu0 %v12481_v52  ;;  %6193 = vmatprep.subr.bf16.mxu1 %v12481_v52 }
 0x489   :  { %v7937_v50 = vadd.f32 -4.0, %v5007_v39  ;;  %v5008_v42 = vadd.f32 %v5004_v3, %v4991_v59  ;;  %v4992_v4 = vmax.f32 %v4984_v17, %v4988_v38  ;;  %v4989_v49 = vmax.f32 %v4921_v62, %v4979_v40  ;;  %v8978_v59 = vld [vmem:[%s13184_s1 + $0x9f0] ss:$8 sps:$4 sm:$0xff]   ;;  %v8979_v38 = vld [vmem:[%s13184_s1 + $0x9e4] ss:$8 sps:$4 sm:$0xff]  }
 0x48a   :  { %6052 = vmatmul.mubr.bf16.vlgmr.msra.gmra.mxu0 %v8940_v18  ;;  %6110 = vmatmul.mubr.bf16.vlgmr.msra.gmra.mxu1 %v8943_v55  ;;  %v5015_v10 = vmul.f32 0.1, %v5007_v39  ;;  %vm5019_vm14 = vcmp.gt.f32.partialorder %v5007_v39, 4.0  ;;  %vm5011_vm15 = vcmp.lt.f32.partialorder %v5007_v39, 0.0  ;;  %v8973_v18 = vld [vmem:[%s13184_s1 + $0x964] ss:$8 sps:$4 sm:$0xff]  }
 0x48b   :  { %v5027_v15 = vmul.f32 0.1, %v7937_v50  ;;  %6136 = vmatpush1.bf16.msra.mxu0 %v12502_v51  ;;  %6194 = vmatpush1.bf16.msra.mxu1 %v12502_v51  ;;  %v7938_v52 = vadd.f32 -4.0, %v5008_v42  ;;  %v5009_v16 = vadd.f32 %v5000_v8, %v4992_v4  ;;  %v4993_v58 = vmax.f32 %v4985_v35, %v4989_v49  ;;  %v8975_v55 = vld [vmem:[%s13184_s1 + $0x960] ss:$8 sps:$4 sm:$0xff]   ;;  %v8994_v49 = vld [vmem:[%s13187_s3 + $0x78] sm:$0xff]  }
 0x48c   :  { %6137 = vmatprep.subr.bf16.mxu0 %v12513_v2  ;;  %6195 = vmatprep.subr.bf16.mxu1 %v12513_v2  ;;  %v5016_v26 = vmul.f32 0.1, %v5008_v42  ;;  %vm5020_vm1 = vcmp.gt.f32.partialorder %v5008_v42, 4.0  ;;  %vm5012_vm2 = vcmp.lt.f32.partialorder %v5008_v42, 0.0  ;;  %v8981_v62 = vld [vmem:[%s13184_s1 + $0x9e0] ss:$8 sps:$4 sm:$0xff]  }
 0x48d   :  { %v5031_v41 = vadd.f32 4.0, %v5027_v15  ;;  %8125 = vmatprep.mubr.msk.bf16.mxu0 %vm164_vm0, %v8948_v48  ;;  %8130 = vmatprep.mubr.msk.bf16.mxu1 %vm164_vm0, %v8951_v0  ;;  %v5028_v6 = vmul.f32 0.1, %v7938_v52  ;;  %v7939_v44 = vadd.f32 -4.0, %v5009_v16  ;;  %v5010_v27 = vadd.f32 %v5004_v3, %v4993_v58  ;;  %v8969_v3 = vld [vmem:[%s13184_s1 + $0x980] ss:$8 sps:$4 sm:$0xff]  }
 0x48e   :  { %vm5021_vm3 = vcmp.gt.f32.partialorder %v5009_v16, 4.0  ;;  %vm5013_vm4 = vcmp.lt.f32.partialorder %v5009_v16, 0.0  ;;  %v8982_v40 = vld [vmem:[%s13185_s0 + $0xf0] ss:$8 sps:$4 sm:$0xff]   ;;  %v8990_v48 = vld [vmem:[%s13185_s0 + $0x2f4] ss:$8 sps:$4 sm:$0xff]  }
 0x48f   :  { %v5035_v17 = vsel %vm5019_vm14, %v5031_v41, %v5007_v39  ;;  %6138 = vmatpush1.bf16.msra.mxu0 %v12528_v33  ;;  %6196 = vmatpush1.bf16.msra.mxu1 %v12528_v33  ;;  %v5032_v2 = vadd.f32 4.0, %v5028_v6  ;;  %v5029_v22 = vmul.f32 0.1, %v7939_v44  ;;  %v7940_v14 = vadd.f32 -4.0, %v5010_v27  ;;  %v8976_v39 = vld [vmem:[%s13184_s1 + $0x9f4] ss:$8 sps:$4 sm:$0xff]  }
 0x490   :  { %v5039_v51 = vsel %vm5011_vm15, %v5015_v10, %v5035_v17  ;;  %6139 = vmatprep.subr.bf16.mxu0 %v12535_v54  ;;  %6197 = vmatprep.subr.bf16.mxu1 %v12535_v54  ;;  %v5018_v60 = vmul.f32 0.1, %v5010_v27  ;;  %vm5022_vm5 = vcmp.gt.f32.partialorder %v5010_v27, 4.0  ;;  %vm5014_vm6 = vcmp.lt.f32.partialorder %v5010_v27, 0.0  ;;  %v8985_v50 = vld [vmem:[%s13185_s0 + $0x1f0] ss:$8 sps:$4 sm:$0xff]  }
 0x491   :  { %v12690_v13 = vadd.f32 %v5039_v51, %v12429_v12  ;;  %v5036_v35 = vsel %vm5020_vm1, %v5032_v2, %v5008_v42  ;;  %v5033_v11 = vadd.f32 4.0, %v5029_v22  ;;  %v5017_v12 = vmul.f32 0.1, %v5009_v16  ;;  %v8993_v0 = vld [vmem:[%s13185_s0 + $0x3f4] ss:$8 sps:$4 sm:$0xff]   ;;  %v8999_v58 = vld [vmem:[%s13187_s3 + $0x28] sm:$0xff]  }
 0x492   :  { %v5040_v33 = vsel %vm5012_vm2, %v5016_v26, %v5036_v35  ;;  %v5030_v43 = vmul.f32 0.1, %v7940_v14  ;;  %v8988_v42 = vld [vmem:[%s13185_s0 + $0x2f0] ss:$8 sps:$4 sm:$0xff]   ;;  %v9000_v10 = vld [vmem:[%s13187_s3 + $0x60] sm:$0xff]   ;;  %v9007_v26 = vld [vmem:[%s13187_s3 + $0x8] sm:$0xff]  }
 0x493   :  { %6140 = vmatpush1.bf16.msra.mxu0 %v12544_v9  ;;  %6198 = vmatpush1.bf16.msra.mxu1 %v12544_v9  ;;  %v12697_v54 = vadd.f32 %v5040_v33, %v12436_v21  ;;  %v5037_v8 = vsel %vm5021_vm3, %v5033_v11, %v5009_v16  ;;  %v8991_v4 = vld [vmem:[%s13185_s0 + $0x3f0] ss:$8 sps:$4 sm:$0xff]   ;;  %v8998_v16 = vld [vmem:[%s13187_s3 + $0x68] sm:$0xff]   ;;  %v9001_v6 = vld [vmem:[%s13187_s3 + $0x20] sm:$0xff]   ;;  %v9034_v14 = vmov 0.0  }
 0x494   :  { %6141 = vmatprep.subr.bf16.mxu0 %v12551_v63  ;;  %6199 = vmatprep.subr.bf16.mxu1 %v12551_v63  ;;  %v5041_v20 = vsel %vm5013_vm4, %v5017_v12, %v5037_v8  ;;  %v5034_v57 = vadd.f32 4.0, %v5030_v43  ;;  %v8995_v15 = vld [vmem:[%s13187_s3 + $0x38] sm:$0xff]   ;;  %v8996_v52 = vld [vmem:[%s13187_s3 + $0x70] sm:$0xff]   ;;  %v9008_v35 = vld [vmem:[%s13187_s3 + $0x40] sm:$0xff]  }
 0x495   :  { %v12702_v9 = vadd.f32 %v5041_v20, %v12441_v25  ;;  %v12732_v25 = vld [vmem:[%s13184_s1 + $0x9d4] ss:$8 sps:$4 sm:$0xff]   ;;  %v9009_v22 = vld [vmem:[%s13187_s3] sm:$0xff]  }
 0x496   :  { %v5038_v21 = vsel %vm5022_vm5, %v5034_v57, %v5010_v27  ;;  %v8997_v41 = vld [vmem:[%s13187_s3 + $0x30] sm:$0xff]   ;;  %v9002_v17 = vld [vmem:[%s13187_s3 + $0x58] sm:$0xff]   ;;  %v9006_v27 = vld [vmem:[%s13187_s3 + $0x48] sm:$0xff]  }
 0x497   :  { %6142 = vmatpush1.bf16.msra.mxu0 %v12558_v31  ;;  %6200 = vmatpush1.bf16.msra.mxu1 %v12558_v31  ;;  %v5042_v63 = vsel %vm5014_vm6, %v5018_v60, %v5038_v21  ;;  %v8949_v31 = vld [vmem:[%s13185_s0 + $0x3e0] ss:$8 sps:$4 sm:$0xff]   ;;  %v9003_v51 = vld [vmem:[%s13187_s3 + $0x18] sm:$0xff]   ;;  %v9004_v2 = vld [vmem:[%s13187_s3 + $0x50] sm:$0xff]  }
 0x498   :  { %6143 = vmatprep.subr.bf16.mxu0 %v12565_v56  ;;  %6201 = vmatprep.subr.bf16.mxu1 %v12565_v56  ;;  %v12709_v46 = vadd.f32 %v5042_v63, %v12448_v5  ;;  %v8946_v5 = vld [vmem:[%s13185_s0 + $0x2e0] ss:$8 sps:$4 sm:$0xff]   ;;  %v12745_v56 = vld [vmem:[%s13184_s1 + $0x9d0] ss:$8 sps:$4 sm:$0xff]  }
 0x499   :  { %v9005_v44 = vld [vmem:[%s13187_s3 + $0x10] sm:$0xff]   ;;  %v9010_v33 = vld [vmem:[%s13188_s5 + $0x38] sm:$0xff]   ;;  %v9012_v57 = vld [vmem:[%s13188_s5 + $0x28] sm:$0xff]  }
 0x49a   :  { %v9011_v43 = vld [vmem:[%s13188_s5 + $0x30] sm:$0xff]  }
 0x49b   :  { %6144 = vmatpush1.bf16.msra.mxu0 %v12572_v45  ;;  %6202 = vmatpush1.bf16.msra.mxu1 %v12572_v45  ;;  %v12752_v45 = vld [vmem:[%s13184_s1 + $0x9c4] ss:$8 sps:$4 sm:$0xff]  }
 0x49c   :  { %6145 = vmatprep.subr.bf16.mxu0 %v12579_v61  ;;  %6203 = vmatprep.subr.bf16.mxu1 %v12579_v61  ;;  %v8984_v61 = vld [vmem:[%s13185_s0 + $0xf4] ss:$8 sps:$4 sm:$0xff]  }
 0x49f   :  { %6146 = vmatpush1.bf16.msra.mxu0 %v12586_v23  ;;  %6204 = vmatpush1.bf16.msra.mxu1 %v12586_v23  ;;  %v8987_v23 = vld [vmem:[%s13185_s0 + $0x1f4] ss:$8 sps:$4 sm:$0xff]  }
 0x4a0   :  { %6147 = vmatprep.subr.bf16.mxu0 %v12593_v47  ;;  %6205 = vmatprep.subr.bf16.mxu1 %v12593_v47  ;;  %v12765_v47 = vld [vmem:[%s13184_s1 + $0x9c0] ss:$8 sps:$4 sm:$0xff]  }
 0x4a3   :  { %6148 = vmatpush1.bf16.msra.mxu0 %v12600_v30  ;;  %6206 = vmatpush1.bf16.msra.mxu1 %v12600_v30  ;;  %v12772_v30 = vld [vmem:[%s13184_s1 + $0x9b4] ss:$8 sps:$4 sm:$0xff]  }
 0x4a4   :  { %6149 = vmatprep.subr.bf16.mxu0 %v12607_v29  ;;  %6207 = vmatprep.subr.bf16.mxu1 %v12607_v29  ;;  %v12781_v29 = vld [vmem:[%s13184_s1 + $0x9b0] ss:$8 sps:$4 sm:$0xff]  }
 0x4a7   :  { %6150 = vmatpush1.bf16.msra.mxu0 %v12614_v24  ;;  %6208 = vmatpush1.bf16.msra.mxu1 %v12614_v24  ;;  %v12788_v24 = vld [vmem:[%s13184_s1 + $0x9a4] ss:$8 sps:$4 sm:$0xff]  }
 0x4a8   :  { %6163 = vmatprep.subr.bf16.mxu0 %v12621_v1  ;;  %6221 = vmatprep.subr.bf16.mxu1 %v12621_v1  ;;  %v12795_v1 = vld [vmem:[%s13184_s1 + $0x9a0] ss:$8 sps:$4 sm:$0xff]  }
 0x4aa   :  { %v5217_v11 = vpop.f32.mrf.mxu0  ;;  %v5275_v12 = vpop.f32.mrf.mxu1 }
 0x4ab   :  { %6164 = vmatpush2.bf16.msra.mxu0 %v12628_v53  ;;  %6222 = vmatpush2.bf16.msra.mxu1 %v12628_v53  ;;  %v8964_v53 = vld [vmem:[%s13184_s1 + $0x994] ss:$8 sps:$4 sm:$0xff]  }
 0x4ac   :  { %6165 = vmatprep.subr.bf16.mxu0 %v12638_v36  ;;  %6223 = vmatprep.subr.bf16.mxu1 %v12638_v36  ;;  %v8966_v36 = vld [vmem:[%s13184_s1 + $0x990] ss:$8 sps:$4 sm:$0xff]   ;;  %v5219_v8 = vpop.f32.mrf.mxu0  ;;  %v5277_v20 = vpop.f32.mrf.mxu1 }
 0x4ae   :  { %v5221_v60 = vpop.f32.mrf.mxu0  ;;  %v5279_v21 = vpop.f32.mrf.mxu1 }
 0x4af   :  { %6166 = vmatpush2.bf16.msra.mxu0 %v12646_v19  ;;  %6224 = vmatpush2.bf16.msra.mxu1 %v12646_v19  ;;  %v8967_v19 = vld [vmem:[%s13184_s1 + $0x984] ss:$8 sps:$4 sm:$0xff]  }
 0x4b0   :  { %6437 = vmatprep.subr.bf16.mxu0 %v12732_v25  ;;  %6495 = vmatprep.subr.bf16.mxu1 %v12732_v25  ;;  %v5223_v63 = vpop.f32.mrf.mxu0 }
 0x4b2   :  { %6168 = vmatmul.mubr.bf16.vlgmr.msra.gmra.mxu0 %v8946_v5  ;;  %6226 = vmatmul.mubr.bf16.vlgmr.msra.gmra.mxu1 %v8949_v31 }
 0x4b3   :  { %6438 = vmatpush1.bf16.msra.mxu0 %v12745_v56  ;;  %6496 = vmatpush1.bf16.msra.mxu1 %v12745_v56 }
 0x4b4   :  { %6439 = vmatprep.subr.bf16.mxu0 %v12752_v45  ;;  %6497 = vmatprep.subr.bf16.mxu1 %v12752_v45 }
 0x4b5   :  { %8180 = vmatprep.mubr.msk.bf16.mxu0 %vm164_vm0, %v8984_v61  ;;  %8185 = vmatprep.mubr.msk.bf16.mxu1 %vm164_vm0, %v8987_v23 }
 0x4b7   :  { %6440 = vmatpush1.bf16.msra.mxu0 %v12765_v47  ;;  %6498 = vmatpush1.bf16.msra.mxu1 %v12765_v47 }
 0x4b8   :  { %6441 = vmatprep.subr.bf16.mxu0 %v12772_v30  ;;  %6499 = vmatprep.subr.bf16.mxu1 %v12772_v30 }
 0x4bb   :  { %6442 = vmatpush1.bf16.msra.mxu0 %v12781_v29  ;;  %6500 = vmatpush1.bf16.msra.mxu1 %v12781_v29 }
 0x4bc   :  { %6443 = vmatprep.subr.bf16.mxu0 %v12788_v24  ;;  %6501 = vmatprep.subr.bf16.mxu1 %v12788_v24 }
 0x4bf   :  { %6444 = vmatpush1.bf16.msra.mxu0 %v12795_v1  ;;  %6502 = vmatpush1.bf16.msra.mxu1 %v12795_v1 }
 0x4c0   :  { %6445 = vmatprep.subr.bf16.mxu0 %v8964_v53  ;;  %6503 = vmatprep.subr.bf16.mxu1 %v8964_v53 }
 0x4c3   :  { %6446 = vmatpush1.bf16.msra.mxu0 %v8966_v36  ;;  %6504 = vmatpush1.bf16.msra.mxu1 %v8966_v36 }
 0x4c4   :  { %6447 = vmatprep.subr.bf16.mxu0 %v8967_v19  ;;  %6505 = vmatprep.subr.bf16.mxu1 %v8967_v19 }
 0x4c7   :  { %6448 = vmatpush1.bf16.msra.mxu0 %v8969_v3  ;;  %6506 = vmatpush1.bf16.msra.mxu1 %v8969_v3 }
 0x4c8   :  { %6449 = vmatprep.subr.bf16.mxu0 %v8970_v32  ;;  %6507 = vmatprep.subr.bf16.mxu1 %v8970_v32 }
 0x4cb   :  { %6450 = vmatpush1.bf16.msra.mxu0 %v8972_v7  ;;  %6508 = vmatpush1.bf16.msra.mxu1 %v8972_v7 }
 0x4cc   :  { %6451 = vmatprep.subr.bf16.mxu0 %v8973_v18  ;;  %6509 = vmatprep.subr.bf16.mxu1 %v8973_v18 }
 0x4cf   :  { %6452 = vmatpush1.bf16.msra.mxu0 %v8975_v55  ;;  %6510 = vmatpush1.bf16.msra.mxu1 %v8975_v55 }
 0x4d0   :  { %6465 = vmatprep.subr.bf16.mxu0 %v8976_v39  ;;  %6523 = vmatprep.subr.bf16.mxu1 %v8976_v39 }
 0x4d2   :  { %v5333_v5 = vpop.f32.mrf.mxu0 }
 0x4d3   :  { %6466 = vmatpush2.bf16.msra.mxu0 %v8978_v59  ;;  %6524 = vmatpush2.bf16.msra.mxu1 %v8978_v59 }
 0x4d4   :  { %6467 = vmatprep.subr.bf16.mxu0 %v8979_v38  ;;  %6525 = vmatprep.subr.bf16.mxu1 %v8979_v38 }
 0x4d7   :  { %6468 = vmatpush2.bf16.msra.mxu0 %v8981_v62  ;;  %6526 = vmatpush2.bf16.msra.mxu1 %v8981_v62 }
 0x4d8   :  { %6553 = vmatprep.subr.bf16.mxu0 %v12732_v25  ;;  %6611 = vmatprep.subr.bf16.mxu1 %v12732_v25  ;;  %v5281_v25 = vpop.f32.mrf.mxu1 }
 0x4da   :  { %6470 = vmatmul.mubr.bf16.vlgmr.msra.gmra.mxu0 %v8982_v40  ;;  %6528 = vmatmul.mubr.bf16.vlgmr.msra.gmra.mxu1 %v8985_v50  ;;  %v5391_v31 = vpop.f32.mrf.mxu1  ;;  %v8001_v40 = vld [vmem:[%s13186_s2 + $0x18] sm:$0x3] }
 0x4db   :  { %6554 = vmatpush1.bf16.msra.mxu0 %v12745_v56  ;;  %6612 = vmatpush1.bf16.msra.mxu1 %v12745_v56  ;;  %v5335_v56 = vpop.f32.mrf.mxu0 }
 0x4dc   :  { %6555 = vmatprep.subr.bf16.mxu0 %v12752_v45  ;;  %6613 = vmatprep.subr.bf16.mxu1 %v12752_v45  ;;  %v5393_v45 = vpop.f32.mrf.mxu1 }
 0x4dd   :  { %8190 = vmatprep.mubr.msk.bf16.mxu0 %vm164_vm0, %v8990_v48  ;;  %8195 = vmatprep.mubr.msk.bf16.mxu1 %vm164_vm0, %v8993_v0  ;;  %v5337_v61 = vpop.f32.mrf.mxu0  ;;  %v5400_v0 = vmax.f32 %v5217_v11, %v5275_v12 }
 0x4de   :  { %v5395_v23 = vpop.f32.mrf.mxu1 }
 0x4df   :  { %6556 = vmatpush1.bf16.msra.mxu0 %v12765_v47  ;;  %6614 = vmatpush1.bf16.msra.mxu1 %v12765_v47  ;;  %v5339_v47 = vpop.f32.mrf.mxu0 }
 0x4e0   :  { %6557 = vmatprep.subr.bf16.mxu0 %v12772_v30  ;;  %6615 = vmatprep.subr.bf16.mxu1 %v12772_v30  ;;  %v5397_v30 = vpop.f32.mrf.mxu1 }
 0x4e3   :  { %6558 = vmatpush1.bf16.msra.mxu0 %v12781_v29  ;;  %6616 = vmatpush1.bf16.msra.mxu1 %v12781_v29 }
 0x4e4   :  { %6559 = vmatprep.subr.bf16.mxu0 %v12788_v24  ;;  %6617 = vmatprep.subr.bf16.mxu1 %v12788_v24 }
 0x4e7   :  { %6560 = vmatpush1.bf16.msra.mxu0 %v12795_v1  ;;  %6618 = vmatpush1.bf16.msra.mxu1 %v12795_v1 }
 0x4e8   :  { %6561 = vmatprep.subr.bf16.mxu0 %v8964_v53  ;;  %6619 = vmatprep.subr.bf16.mxu1 %v8964_v53 }
 0x4eb   :  { %6562 = vmatpush1.bf16.msra.mxu0 %v8966_v36  ;;  %6620 = vmatpush1.bf16.msra.mxu1 %v8966_v36 }
 0x4ec   :  { %6563 = vmatprep.subr.bf16.mxu0 %v8967_v19  ;;  %6621 = vmatprep.subr.bf16.mxu1 %v8967_v19 }
 0x4ef   :  { %6564 = vmatpush1.bf16.msra.mxu0 %v8969_v3  ;;  %6622 = vmatpush1.bf16.msra.mxu1 %v8969_v3 }
 0x4f0   :  { %6565 = vmatprep.subr.bf16.mxu0 %v8970_v32  ;;  %6623 = vmatprep.subr.bf16.mxu1 %v8970_v32 }
 0x4f3   :  { %6566 = vmatpush1.bf16.msra.mxu0 %v8972_v7  ;;  %6624 = vmatpush1.bf16.msra.mxu1 %v8972_v7 }
 0x4f4   :  { %6567 = vmatprep.subr.bf16.mxu0 %v8973_v18  ;;  %6625 = vmatprep.subr.bf16.mxu1 %v8973_v18 }
 0x4f7   :  { %6568 = vmatpush1.bf16.msra.mxu0 %v8975_v55  ;;  %6626 = vmatpush1.bf16.msra.mxu1 %v8975_v55 }
 0x4f8   :  { %6581 = vmatprep.subr.bf16.mxu0 %v8976_v39  ;;  %6639 = vmatprep.subr.bf16.mxu1 %v8976_v39 }
 0x4fa   :  { %v5635_v29 = vpop.f32.mrf.mxu0  ;;  %v5693_v24 = vpop.f32.mrf.mxu1 }
 0x4fb   :  { %6582 = vmatpush2.bf16.msra.mxu0 %v8978_v59  ;;  %6640 = vmatpush2.bf16.msra.mxu1 %v8978_v59 }
 0x4fc   :  { %6583 = vmatprep.subr.bf16.mxu0 %v8979_v38  ;;  %6641 = vmatprep.subr.bf16.mxu1 %v8979_v38  ;;  %v5637_v1 = vpop.f32.mrf.mxu0  ;;  %v5695_v53 = vpop.f32.mrf.mxu1 }
 0x4fe   :  { %v5639_v36 = vpop.f32.mrf.mxu0  ;;  %v5697_v19 = vpop.f32.mrf.mxu1 }
 0x4ff   :  { %6584 = vmatpush2.bf16.msra.mxu0 %v8981_v62  ;;  %6642 = vmatpush2.bf16.msra.mxu1 %v8981_v62  ;;  %v5404_v62 = vmax.f32 %v5333_v5, %v5391_v31  ;;  %v5818_v5 = vmax.f32 %v5635_v29, %v5693_v24  ;;  %v5819_v31 = vmax.f32 %v5637_v1, %v5695_v53 }
 0x500   :  { %8240 = vmatprep.subr.bf16.mxu0 %v8994_v49  ;;  %8280 = vmatprep.subr.bf16.mxu1 %v9034_v14  ;;  %v5641_v3 = vpop.f32.mrf.mxu0  ;;  %v5699_v32 = vpop.f32.mrf.mxu1 }
 0x501   :  { %v5408_v49 = vmax.f32 %v5400_v0, %v5404_v62 }
 0x502   :  { %6586 = vmatmul.mubr.bf16.vlgmr.msra.gmra.mxu0 %v8988_v42  ;;  %6644 = vmatmul.mubr.bf16.vlgmr.msra.gmra.mxu1 %v8991_v4 }
 0x503   :  { %8241 = vmatpush3.bf16.msra.mxu0 %v8995_v15  ;;  %8281 = vmatpush3.bf16.msra.mxu1 %v9010_v33  ;;  %v5418_v15 = vrot.slane %v8001_v40, %v9904_v34 }
 0x504   :  { %8242 = vmatprep.subr.bf16.mxu0 %v8996_v52  ;;  %8282 = vmatprep.subr.bf16.mxu1 %v9034_v14 }
 0x507   :  { %8243 = vmatpush3.bf16.msra.mxu0 %v8997_v41  ;;  %8283 = vmatpush3.bf16.msra.mxu1 %v9011_v43  ;;  %v8066_v43 = vld [vmem:[%s13186_s2 + $0x1a] sm:$0x3] }
 0x508   :  { %8244 = vmatprep.subr.bf16.mxu0 %v8998_v16  ;;  %8284 = vmatprep.subr.bf16.mxu1 %v9034_v14  ;;  %v12947_v16 = vadd.f32 %v5418_v15, %v5408_v49 }
 0x50a   :  { %vm5437_vm0 = vcmp.gt.f32.partialorder %v12947_v16, 4.0  ;;  %vm5429_vm7 = vcmp.lt.f32.partialorder %v12947_v16, 0.0 }
 0x50b   :  { %8245 = vmatpush3.bf16.msra.mxu0 %v8999_v58  ;;  %8285 = vmatpush3.bf16.msra.mxu1 %v9012_v57  ;;  %v5405_v58 = vmax.f32 %v5335_v56, %v5393_v45 }
 0x50c   :  { %8246 = vmatprep.subr.bf16.mxu0 %v9000_v10  ;;  %8286 = vmatprep.subr.bf16.mxu1 %v9034_v14  ;;  %v5406_v10 = vmax.f32 %v5337_v61, %v5395_v23 }
 0x50f   :  { %8247 = vmatpush3.bf16.msra.mxu0 %v9001_v6  ;;  %v5407_v6 = vmax.f32 %v5339_v47, %v5397_v30  ;;  %v5836_v47 = vrot.slane %v8066_v43, %v9904_v34  ;;  %v5840_v30 = vrot.slane %v8066_v43, %v9916_v37 }
 0x510   :  { %8248 = vmatprep.subr.bf16.mxu0 %v9002_v17  ;;  %v5401_v17 = vmax.f32 %v5219_v8, %v5277_v20 }
 0x513   :  { %8249 = vmatpush3.bf16.msra.mxu0 %v9003_v51  ;;  %v5402_v51 = vmax.f32 %v5221_v60, %v5279_v21 }
 0x514   :  { %8250 = vmatprep.subr.bf16.mxu0 %v9004_v2  ;;  %v5403_v2 = vmax.f32 %v5223_v63, %v5281_v25 }
 0x515   :  { %v5410_v33 = vmax.f32 %v5402_v51, %v5406_v10 }
 0x516   :  { %v5411_v11 = vmax.f32 %v5403_v2, %v5407_v6 }
 0x517   :  { %8251 = vmatpush3.bf16.msra.mxu0 %v9005_v44  ;;  %v5422_v44 = vrot.slane %v8001_v40, %v9916_v37  ;;  %v12964_v63 = vadd.f32 %v5418_v15, %v5410_v33 }
 0x518   :  { %8252 = vmatprep.subr.bf16.mxu0 %v9006_v27 }
 0x519   :  { %v12966_v25 = vadd.f32 %v5422_v44, %v5411_v11  ;;  %v8004_v40 = vadd.f32 -4.0, %v12964_v63  ;;  %vm5431_vm9 = vcmp.lt.f32.partialorder %v12964_v63, 0.0  ;;  %vm5439_vm10 = vcmp.gt.f32.partialorder %v12964_v63, 4.0 }
 0x51b   :  { %8253 = vmatpush3.bf16.msra.mxu0 %v9007_v26  ;;  %v8005_v29 = vadd.f32 -4.0, %v12966_v25  ;;  %v5436_v11 = vmul.f32 0.1, %v12966_v25  ;;  %vm5440_vm12 = vcmp.gt.f32.partialorder %v12966_v25, 4.0  ;;  %vm5432_vm13 = vcmp.lt.f32.partialorder %v12966_v25, 0.0 }
 0x51c   :  { %8254 = vmatprep.subr.bf16.mxu0 %v9008_v35  ;;  %v8002_v35 = vadd.f32 -4.0, %v12947_v16 }
 0x51e   :  { %v5445_v60 = vmul.f32 0.1, %v8002_v35  ;;  %v8131_v35 = vld [vmem:[%s13186_s2 + $0x1c] sm:$0x3] }
 0x51f   :  { %8255 = vmatpush3.bf16.msra.mxu0 %v9009_v22  ;;  %v5409_v22 = vmax.f32 %v5401_v17, %v5405_v58  ;;  %v5435_v17 = vmul.f32 0.1, %v12964_v63 }
 0x520   :  { %8300 = vmatprep.subr.bf16.mxu0 %v9034_v14  ;;  %v5449_v0 = vadd.f32 4.0, %v5445_v60 }
 0x521   :  { %v12962_v21 = vadd.f32 %v5422_v44, %v5409_v22 }
 0x522   :  { %v5751_v7 = vpop.f32.mrf.mxu0  ;;  %v5809_v18 = vpop.f32.mrf.mxu1 }
 0x523   :  { %v5822_v12 = vmax.f32 %v5751_v7, %v5809_v18  ;;  %v5820_v7 = vmax.f32 %v5639_v36, %v5697_v19  ;;  %v5821_v18 = vmax.f32 %v5641_v3, %v5699_v32  ;;  %v8003_v62 = vadd.f32 -4.0, %v12962_v21 }
 0x524   :  { %v5753_v55 = vpop.f32.mrf.mxu0  ;;  %v5811_v39 = vpop.f32.mrf.mxu1  ;;  %v5447_v19 = vmul.f32 0.1, %v8004_v40  ;;  %v5453_v3 = vsel %vm5437_vm0, %v5449_v0, %v12947_v16  ;;  %v5448_v32 = vmul.f32 0.1, %v8005_v29  ;;  %v5434_v6 = vmul.f32 0.1, %v12962_v21 }
 0x525   :  { %v5823_v57 = vmax.f32 %v5753_v55, %v5811_v39  ;;  %v5826_v55 = vmax.f32 %v5818_v5, %v5822_v12  ;;  %v5446_v36 = vmul.f32 0.1, %v8003_v62  ;;  %vm5438_vm8 = vcmp.gt.f32.partialorder %v12962_v21, 4.0 }
 0x526   :  { %v5755_v59 = vpop.f32.mrf.mxu0  ;;  %v5813_v38 = vpop.f32.mrf.mxu1  ;;  %vm5430_vm11 = vcmp.lt.f32.partialorder %v12962_v21, 0.0  ;;  %v5451_v33 = vadd.f32 4.0, %v5447_v19  ;;  %v5452_v12 = vadd.f32 4.0, %v5448_v32 }
 0x527   :  { %v5824_v56 = vmax.f32 %v5755_v59, %v5813_v38  ;;  %v5827_v39 = vmax.f32 %v5819_v31, %v5823_v57  ;;  %v5433_v38 = vmul.f32 0.1, %v12947_v16  ;;  %v5450_v22 = vadd.f32 4.0, %v5446_v36 }
 0x528   :  { %v5757_v50 = vpop.f32.mrf.mxu0  ;;  %v5815_v48 = vpop.f32.mrf.mxu1  ;;  %v5456_v29 = vsel %vm5440_vm12, %v5452_v12, %v12966_v25 }
 0x529   :  { %v5825_v45 = vmax.f32 %v5757_v50, %v5815_v48  ;;  %v5828_v24 = vmax.f32 %v5820_v7, %v5824_v56  ;;  %v12974_v50 = vadd.f32 %v5836_v47, %v5826_v55  ;;  %v12976_v48 = vadd.f32 %v5840_v30, %v5827_v39 }
 0x52a   :  { %v5457_v16 = vsel %vm5429_vm7, %v5433_v38, %v5453_v3  ;;  %v6254_v56 = vrot.slane %v8131_v35, %v9904_v34  ;;  %v5454_v39 = vsel %vm5438_vm8, %v5450_v22, %v12962_v21 }
 0x52b   :  { %v5829_v1 = vmax.f32 %v5821_v18, %v5825_v45  ;;  %v12980_v49 = vadd.f32 %v5836_v47, %v5828_v24  ;;  %v8067_v51 = vadd.f32 -4.0, %v12974_v50  ;;  %v8068_v2 = vadd.f32 -4.0, %v12976_v48 }
 0x52c   :  { %vm5847_vm14 = vcmp.lt.f32.partialorder %v12974_v50, 0.0  ;;  %vm5855_vm15 = vcmp.gt.f32.partialorder %v12974_v50, 4.0  ;;  %vm5848_vm1 = vcmp.lt.f32.partialorder %v12976_v48, 0.0  ;;  %vm5856_vm2 = vcmp.gt.f32.partialorder %v12976_v48, 4.0 }
 0x52d   :  { %v12982_v15 = vadd.f32 %v5840_v30, %v5829_v1  ;;  %v8069_v43 = vadd.f32 -4.0, %v12980_v49  ;;  %v6258_v1 = vrot.slane %v8131_v35, %v9916_v37  ;;  %vm5857_vm3 = vcmp.gt.f32.partialorder %v12980_v49, 4.0 }
 0x52e   :  { %vm5849_vm5 = vcmp.lt.f32.partialorder %v12980_v49, 0.0  ;;  %v5853_v35 = vmul.f32 0.1, %v12980_v49 }
 0x52f   :  { %v8070_v57 = vadd.f32 -4.0, %v12982_v15  ;;  %v5865_v62 = vmul.f32 0.1, %v8069_v43  ;;  %vm5858_vm4 = vcmp.gt.f32.partialorder %v12982_v15, 4.0  ;;  %vm5850_vm6 = vcmp.lt.f32.partialorder %v12982_v15, 0.0 }
 0x531   :  { %v5866_v40 = vmul.f32 0.1, %v8070_v57  ;;  %v5869_v32 = vadd.f32 4.0, %v5865_v62 }
 0x54a   :  { %v12938_v42 = vpop.f32.mrf.mxu0  ;;  %v12940_v4 = vpop.f32.mrf.mxu1 }
 0x54b   :  { %v6236_v60 = vmax.f32 %v12938_v42, %v12940_v4  ;;  %v5455_v42 = vsel %vm5439_vm10, %v5451_v33, %v12964_v63 }
 0x54c   :  { %v12943_v52 = vpop.f32.mrf.mxu0  ;;  %v12945_v41 = vpop.f32.mrf.mxu1 }
 0x54d   :  { %v6237_v0 = vmax.f32 %v12943_v52, %v12945_v41  ;;  %v5459_v41 = vsel %vm5431_vm9, %v5435_v17, %v5455_v42 }
 0x54e   :  { %v12950_v27 = vpop.f32.mrf.mxu0  ;;  %v12952_v26 = vpop.f32.mrf.mxu1 }
 0x54f   :  { %v6238_v4 = vmax.f32 %v12950_v27, %v12952_v26  ;;  %v5461_v26 = vadd.f32 %v5457_v16, %v12690_v13  ;;  %v5851_v13 = vmul.f32 0.1, %v12974_v50  ;;  %v5873_v16 = vsel %vm5857_vm3, %v5869_v32, %v12980_v49 }
 0x550   :  { %v12958_v8 = vpop.f32.mrf.mxu0  ;;  %v12960_v20 = vpop.f32.mrf.mxu1 }
 0x551   :  { %v6239_v24 = vmax.f32 %v12958_v8, %v12960_v20  ;;  %v5458_v8 = vsel %vm5430_vm11, %v5434_v6, %v5454_v39  ;;  %v5460_v20 = vsel %vm5432_vm13, %v5436_v11, %v5456_v29  ;;  %v5854_v11 = vmul.f32 0.1, %v12982_v15 }
 0x572   :  { %v6169_v61 = vpop.f32.mrf.mxu0  ;;  %v6227_v23 = vpop.f32.mrf.mxu1 }
 0x573   :  { %v6240_v44 = vmax.f32 %v6169_v61, %v6227_v23  ;;  %v5863_v61 = vmul.f32 0.1, %v8067_v51  ;;  %v5864_v23 = vmul.f32 0.1, %v8068_v2 }
 0x574   :  { %v6171_v53 = vpop.f32.mrf.mxu0  ;;  %v6229_v59 = vpop.f32.mrf.mxu1 }
 0x575   :  { %v6244_v47 = vmax.f32 %v6236_v60, %v6240_v44  ;;  %v6241_v30 = vmax.f32 %v6171_v53, %v6229_v59  ;;  %v5867_v53 = vadd.f32 4.0, %v5863_v61  ;;  %v5868_v52 = vadd.f32 4.0, %v5864_v23 }
 0x576   :  { %v6173_v58 = vpop.f32.mrf.mxu0  ;;  %v6231_v10 = vpop.f32.mrf.mxu1  ;;  %v5852_v44 = vmul.f32 0.1, %v12976_v48 }
 0x577   :  { %v6242_v45 = vmax.f32 %v6173_v58, %v6231_v10  ;;  %v13025_v59 = vadd.f32 %v6254_v56, %v6244_v47  ;;  %v6245_v38 = vmax.f32 %v6237_v0, %v6241_v30  ;;  %v5870_v58 = vadd.f32 4.0, %v5866_v40 }
 0x578   :  { %v6175_v5 = vpop.f32.mrf.mxu0  ;;  %v6233_v31 = vpop.f32.mrf.mxu1  ;;  %v5871_v21 = vsel %vm5855_vm15, %v5867_v53, %v12974_v50  ;;  %v5872_v51 = vsel %vm5856_vm2, %v5868_v52, %v12976_v48  ;;  %v5877_v50 = vsel %vm5849_vm5, %v5853_v35, %v5873_v16  ;;  %v5464_v30 = vadd.f32 %v5460_v20, %v12709_v46 }
 0x579   :  { %v6243_v55 = vmax.f32 %v6175_v5, %v6233_v31  ;;  %v6246_v27 = vmax.f32 %v6238_v4, %v6242_v45  ;;  %v8132_v63 = vadd.f32 -4.0, %v13025_v59  ;;  %v13046_v25 = vadd.f32 %v6258_v1, %v6245_v38  ;;  %v8196_v31 = vld [vmem:[%s13186_s2 + $0x1e] sm:$0x3] }
 0x57a   :  { %v5874_v22 = vsel %vm5858_vm4, %v5870_v58, %v12982_v15  ;;  %v5876_v12 = vsel %vm5848_vm1, %v5852_v44, %v5872_v51  ;;  %v5875_v43 = vsel %vm5847_vm14, %v5851_v13, %v5871_v21  ;;  %v5463_v4 = vadd.f32 %v5459_v41, %v12702_v9 }
 0x57b   :  { %v6247_v3 = vmax.f32 %v6239_v24, %v6243_v55  ;;  %v13040_v10 = vadd.f32 %v6254_v56, %v6246_v27  ;;  %v6281_v57 = vmul.f32 0.1, %v8132_v63  ;;  %v5462_v56 = vadd.f32 %v5458_v8, %v12697_v54 }
 0x57c   :  { %v8133_v45 = vadd.f32 -4.0, %v13046_v25  ;;  %v5878_v61 = vsel %vm5850_vm6, %v5854_v11, %v5874_v22  ;;  %v13081_v55 = vadd.f32 %v5875_v43, %v5461_v26  ;;  %v6672_v62 = vrot.slane %v8196_v31, %v9904_v34 }
 0x57d   :  { %v13054_v2 = vadd.f32 %v6258_v1, %v6247_v3  ;;  %v8134_v33 = vadd.f32 -4.0, %v13040_v10  ;;  %v13078_v42 = vadd.f32 %v5876_v12, %v5462_v56  ;;  %v6285_v40 = vadd.f32 4.0, %v6281_v57 }
 0x57e   :  { %v13086_v29 = vadd.f32 %v5878_v61, %v5464_v30  ;;  %v6282_v24 = vmul.f32 0.1, %v8133_v45  ;;  %v5881_v46 = vadd.f32 %v5877_v50, %v5463_v4  ;;  %vm6265_vm0 = vcmp.lt.f32.partialorder %v13025_v59, 0.0 }
 0x57f   :  { %v8135_v48 = vadd.f32 -4.0, %v13054_v2  ;;  %v6283_v54 = vmul.f32 0.1, %v8134_v33  ;;  %vm6273_vm7 = vcmp.gt.f32.partialorder %v13025_v59, 4.0  ;;  %v6676_v34 = vrot.slane %v8196_v31, %v9916_v37 }
 0x580   :  { %vm6275_vm8 = vcmp.gt.f32.partialorder %v13040_v10, 4.0  ;;  %vm6266_vm9 = vcmp.lt.f32.partialorder %v13046_v25, 0.0  ;;  %v6270_v20 = vmul.f32 0.1, %v13046_v25  ;;  %v6289_v13 = vsel %vm6273_vm7, %v6285_v40, %v13025_v59 }
 0x581   :  { %v6284_v26 = vmul.f32 0.1, %v8135_v48  ;;  %v6287_v38 = vadd.f32 4.0, %v6283_v54  ;;  %v6286_v32 = vadd.f32 4.0, %v6282_v24  ;;  %vm6267_vm10 = vcmp.lt.f32.partialorder %v13040_v10, 0.0 }
 0x582   :  { %vm6274_vm11 = vcmp.gt.f32.partialorder %v13046_v25, 4.0  ;;  %vm6276_vm12 = vcmp.gt.f32.partialorder %v13054_v2, 4.0  ;;  %vm6268_vm13 = vcmp.lt.f32.partialorder %v13054_v2, 0.0 }
 0x583   :  { %v6288_v58 = vadd.f32 4.0, %v6284_v26  ;;  %v6291_v35 = vsel %vm6275_vm8, %v6287_v38, %v13040_v10  ;;  %v6290_v12 = vsel %vm6274_vm11, %v6286_v32, %v13046_v25 }
 0x584   :  { %v6294_v61 = vsel %vm6266_vm9, %v6270_v20, %v6290_v12  ;;  %v9021_v20 = vld [vmem:[%s13189_s7 + $0x20] sm:$0xff]  }
 0x59a   :  { %v13004_v7 = vpop.f32.mrf.mxu0  ;;  %v13006_v18 = vpop.f32.mrf.mxu1 }
 0x59b   :  { %v6654_v15 = vmax.f32 %v13004_v7, %v13006_v18  ;;  %v6269_v7 = vmul.f32 0.1, %v13025_v59 }
 0x59c   :  { %v13027_v36 = vpop.f32.mrf.mxu0  ;;  %v13029_v19 = vpop.f32.mrf.mxu1 }
 0x59d   :  { %v6655_v1 = vmax.f32 %v13027_v36, %v13029_v19  ;;  %v6293_v33 = vsel %vm6265_vm0, %v6269_v7, %v6289_v13  ;;  %vm9035_vm0 = vmmov 0  }
 0x59e   :  { %v13048_v6 = vpop.f32.mrf.mxu0  ;;  %v13050_v17 = vpop.f32.mrf.mxu1  ;;  %v6297_v48 = vadd.f32 %v6293_v33, %v13081_v55  ;;  %8296 = vmatprep.mubr.msk.bf16.mxu1 %vm9035_vm0, %v9034_v14 }
 0x59f   :  { %v6656_v36 = vmax.f32 %v13048_v6, %v13050_v17  ;;  %v6271_v17 = vmul.f32 0.1, %v13040_v10  ;;  %v6272_v10 = vmul.f32 0.1, %v13054_v2 }
 0x5a0   :  { %v6477_v60 = vpop.f32.mrf.mxu0  ;;  %v6535_v5 = vpop.f32.mrf.mxu1 }
 0x5a1   :  { %v6657_v21 = vmax.f32 %v6477_v60, %v6535_v5  ;;  %v6292_v60 = vsel %vm6276_vm12, %v6288_v58, %v13054_v2  ;;  %v6295_v5 = vsel %vm6267_vm10, %v6271_v17, %v6291_v35 }
 0x5a2   :  { %v6299_v30 = vadd.f32 %v6295_v5, %v5881_v46 }
 0x5c2   :  { %v6587_v23 = vpop.f32.mrf.mxu0  ;;  %v6645_v47 = vpop.f32.mrf.mxu1 }
 0x5c3   :  { %v6658_v39 = vmax.f32 %v6587_v23, %v6645_v47  ;;  %v6296_v23 = vsel %vm6268_vm13, %v6272_v10, %v6292_v60 }
 0x5c4   :  { %v6589_v49 = vpop.f32.mrf.mxu0  ;;  %v6647_v0 = vpop.f32.mrf.mxu1 }
 0x5c5   :  { %v6662_v9 = vmax.f32 %v6654_v15, %v6658_v39  ;;  %v6659_v27 = vmax.f32 %v6589_v49, %v6647_v0 }
 0x5c6   :  { %v6591_v18 = vpop.f32.mrf.mxu0  ;;  %v6649_v53 = vpop.f32.mrf.mxu1 }
 0x5c7   :  { %v6679_v52 = vadd.f32 %v6672_v62, %v6662_v9  ;;  %v6663_v41 = vmax.f32 %v6655_v1, %v6659_v27  ;;  %v6660_v3 = vmax.f32 %v6591_v18, %v6649_v53  ;;  %v6298_v9 = vadd.f32 %v6294_v61, %v13078_v42  ;;  %v9014_v42 = vld [vmem:[%s13188_s5 + $0x18] sm:$0xff]   ;;  %v9025_v61 = vld [vmem:[%s13189_s7] sm:$0xff]  }
 0x5c8   :  { %v6593_v19 = vpop.f32.mrf.mxu0  ;;  %v6651_v8 = vpop.f32.mrf.mxu1  ;;  %v6300_v27 = vadd.f32 %v6296_v23, %v13086_v29  ;;  %v9015_v29 = vld [vmem:[%s13188_s5 + $0x10] sm:$0xff]  }
 0x5c9   :  { %v8197_v37 = vadd.f32 -4.0, %v6679_v52  ;;  %v6680_v63 = vadd.f32 %v6676_v34, %v6663_v41  ;;  %v6664_v51 = vmax.f32 %v6656_v36, %v6660_v3  ;;  %v6661_v44 = vmax.f32 %v6593_v19, %v6651_v8  ;;  %v9016_v41 = vld [vmem:[%s13188_s5 + $0x8] sm:$0xff]   ;;  %v9017_v3 = vld [vmem:[%s13188_s5] sm:$0xff]   ;;  %v9018_v36 = vld [vmem:[%s13189_s7 + $0x38] sm:$0xff]  }
 0x5ca   :  { %vm6691_vm14 = vcmp.gt.f32.partialorder %v6679_v52, 4.0  ;;  %v6687_v50 = vmul.f32 0.1, %v6679_v52  ;;  %vm6683_vm15 = vcmp.lt.f32.partialorder %v6679_v52, 0.0  ;;  %v9019_v19 = vld [vmem:[%s13189_s7 + $0x30] sm:$0xff]   ;;  %v9020_v8 = vld [vmem:[%s13189_s7 + $0x28] sm:$0xff]  }
 0x5cb   :  { %v6699_v6 = vmul.f32 0.1, %v8197_v37  ;;  %v6681_v16 = vadd.f32 %v6672_v62, %v6664_v51  ;;  %v6665_v22 = vmax.f32 %v6657_v21, %v6661_v44  ;;  %v8198_v43 = vadd.f32 -4.0, %v6680_v63  ;;  %v8201_v37 = vld [vmem:[%s13190_s4] ss:$0 sm:$0xff] }
 0x5cc   :  { %vm6692_vm1 = vcmp.gt.f32.partialorder %v6680_v63, 4.0  ;;  %v6688_v40 = vmul.f32 0.1, %v6680_v63  ;;  %vm6684_vm4 = vcmp.lt.f32.partialorder %v6680_v63, 0.0 }
 0x5cd   :  { %v6703_v11 = vadd.f32 4.0, %v6699_v6  ;;  %v8199_v57 = vadd.f32 -4.0, %v6681_v16  ;;  %v6682_v31 = vadd.f32 %v6676_v34, %v6665_v22  ;;  %v6700_v56 = vmul.f32 0.1, %v8198_v43 }
 0x5ce   :  { %v6689_v15 = vmul.f32 0.1, %v6681_v16  ;;  %vm6693_vm2 = vcmp.gt.f32.partialorder %v6681_v16, 4.0  ;;  %vm6685_vm3 = vcmp.lt.f32.partialorder %v6681_v16, 0.0 }
 0x5cf   :  { %v6707_v45 = vsel %vm6691_vm14, %v6703_v11, %v6679_v52  ;;  %v6701_v59 = vmul.f32 0.1, %v8199_v57  ;;  %v8200_v47 = vadd.f32 -4.0, %v6682_v31  ;;  %v6704_v54 = vadd.f32 4.0, %v6700_v56  ;;  %v9013_v52 = vld [vmem:[%s13188_s5 + $0x20] sm:$0xff]   ;;  %v9022_v56 = vld [vmem:[%s13189_s7 + $0x18] sm:$0xff]  }
 0x5d0   :  { %v6711_v2 = vsel %vm6683_vm15, %v6687_v50, %v6707_v45  ;;  %v6690_v25 = vmul.f32 0.1, %v6682_v31  ;;  %vm6694_vm5 = vcmp.gt.f32.partialorder %v6682_v31, 4.0  ;;  %vm6686_vm6 = vcmp.lt.f32.partialorder %v6682_v31, 0.0  ;;  %8287 = vmatpush3.bf16.msra.mxu1 %v9013_v52  ;;  %v9023_v45 = vld [vmem:[%s13189_s7 + $0x10] sm:$0xff]  }
 0x5d1   :  { %v6705_v4 = vadd.f32 4.0, %v6701_v59  ;;  %v6702_v39 = vmul.f32 0.1, %v8200_v47  ;;  %v6708_v49 = vsel %vm6692_vm1, %v6704_v54, %v6680_v63  ;;  %v6715_v1 = vadd.f32 %v6711_v2, %v6297_v48  ;;  %8288 = vmatprep.subr.bf16.mxu1 %v9034_v14  ;;  %v9024_v59 = vld [vmem:[%s13189_s7 + $0x8] sm:$0xff]   ;;  %v8220_v48 = vld [vmem:[%s13191_s6] ss:$0 sm:$0xff] }
 0x5d2   :  { %v6712_v24 = vsel %vm6684_vm4, %v6688_v40, %v6708_v49 }
 0x5d3   :  { %v6709_v62 = vsel %vm6693_vm2, %v6705_v4, %v6681_v16  ;;  %v6706_v0 = vadd.f32 4.0, %v6702_v39  ;;  %v6716_v18 = vadd.f32 %v6712_v24, %v6298_v9  ;;  %v7156_v9 = vand.u32 127, %v399_v28 }
 0x5d4   :  { %v6713_v55 = vsel %vm6685_vm3, %v6689_v15, %v6709_v62  ;;  %8289 = vmatpush3.bf16.msra.mxu1 %v9014_v42 }
 0x5d5   :  { %v6717_v46 = vadd.f32 %v6713_v55, %v6299_v30  ;;  %v6710_v26 = vsel %vm6694_vm5, %v6706_v0, %v6682_v31  ;;  %8290 = vmatprep.subr.bf16.mxu1 %v9034_v14  ;;  %vm7157_vm15 = vcmp.lt.s32.totalorder %v7156_v9, 10 }
 0x5d6   :  { %v6714_v7 = vsel %vm6686_vm6, %v6690_v25, %v6710_v26 }
 0x5d7   :  { %v6719_v34 = vpack.c.bf16 %v6717_v46, %v6715_v1  ;;  %v6718_v53 = vadd.f32 %v6714_v7, %v6300_v27  ;;  %v8231_v27 = vld [vmem:[%s13192_s8] ss:$0 sm:$0xff] }
 0x5d8   :  { %8291 = vmatpush3.bf16.msra.mxu1 %v9015_v29 }
 0x5d9   :  { %v6720_v38 = vpack.c.bf16 %v6718_v53, %v6716_v18  ;;  %8292 = vmatprep.subr.bf16.mxu1 %v9034_v14 }
 0x5db   :  { %6888 = vmatprep.mubr.bf16.mxu0 %v6720_v38 }
 0x5dc   :  { %6889 = vmatmul.mubr.bf16.vlgmr.msra.gmra.mxu0 %v6719_v34  ;;  %8293 = vmatpush3.bf16.msra.mxu1 %v9016_v41 }
 0x5dd   :  { %8294 = vmatprep.subr.bf16.mxu1 %v9034_v14  ;;  %8316 = vmatprep.mubr.msk.bf16.mxu0 %vm9035_vm0, %v9034_v14 }
 0x5de   :  { %8301 = vmatpush3.bf16.msra.mxu0 %v9018_v36 }
 0x5df   :  { %8302 = vmatprep.subr.bf16.mxu0 %v9034_v14 }
 0x5e0   :  { %8295 = vmatpush3.bf16.msra.mxu1 %v9017_v3 }
 0x5e2   :  { %8303 = vmatpush3.bf16.msra.mxu0 %v9019_v19 }
 0x5e3   :  { %8304 = vmatprep.subr.bf16.mxu0 %v9034_v14 }
 0x5e6   :  { %8305 = vmatpush3.bf16.msra.mxu0 %v9020_v8 }
 0x5e7   :  { %8306 = vmatprep.subr.bf16.mxu0 %v9034_v14 }
 0x5ea   :  { %8307 = vmatpush3.bf16.msra.mxu0 %v9021_v20 }
 0x5eb   :  { %8308 = vmatprep.subr.bf16.mxu0 %v9034_v14 }
 0x5ee   :  { %8309 = vmatpush3.bf16.msra.mxu0 %v9022_v56 }
 0x5ef   :  { %8310 = vmatprep.subr.bf16.mxu0 %v9034_v14 }
 0x5f2   :  { %8311 = vmatpush3.bf16.msra.mxu0 %v9023_v45 }
 0x5f3   :  { %8312 = vmatprep.subr.bf16.mxu0 %v9034_v14 }
 0x5f6   :  { %8313 = vmatpush3.bf16.msra.mxu0 %v9024_v59 }
 0x5f7   :  { %8314 = vmatprep.subr.bf16.mxu0 %v9034_v14 }
 0x5fa   :  { %8315 = vmatpush3.bf16.msra.mxu0 %v9025_v61 }
 0x69c   :  { %v8256_v13 = vpop.f32.mrf.mxu0 }
 0x69e   :  { %v8257_v32 = vpop.f32.mrf.mxu0 }
 0x69f   :  { %v8258_v58 = vadd.f32 %v8257_v32, %v8256_v13 }
 0x6a0   :  { %v8259_v21 = vpop.f32.mrf.mxu0 }
 0x6a1   :  { %v6891_v63 = vadd.f32 %v8258_v58, %v8201_v37 }
 0x6a2   :  { %v8260_v51 = vpop.f32.mrf.mxu0 }
 0x6a3   :  { %v8218_v44 = vadd.f32 -4.0, %v6891_v63  ;;  %v8261_v35 = vadd.f32 %v8260_v51, %v8259_v21  ;;  %vm6901_vm7 = vcmp.gt.f32.partialorder %v6891_v63, 4.0  ;;  %v6899_v43 = vmul.f32 0.1, %v6891_v63 }
 0x6a4   :  { %vm6897_vm9 = vcmp.lt.f32.partialorder %v6891_v63, 0.0 }
 0x6a5   :  { %v6905_v6 = vmul.f32 0.1, %v8218_v44  ;;  %v6894_v17 = vadd.f32 %v8261_v35, %v8201_v37 }
 0x6a7   :  { %v6907_v16 = vadd.f32 4.0, %v6905_v6  ;;  %v8219_v22 = vadd.f32 -4.0, %v6894_v17  ;;  %v6900_v57 = vmul.f32 0.1, %v6894_v17  ;;  %vm6902_vm8 = vcmp.gt.f32.partialorder %v6894_v17, 4.0 }
 0x6a8   :  { %vm6898_vm10 = vcmp.lt.f32.partialorder %v6894_v17, 0.0 }
 0x6a9   :  { %v6906_v33 = vmul.f32 0.1, %v8219_v22  ;;  %v6909_v11 = vsel %vm6901_vm7, %v6907_v16, %v6891_v63 }
 0x6aa   :  { %v6911_v5 = vsel %vm6897_vm9, %v6899_v43, %v6909_v11 }
 0x6ab   :  { %v6908_v12 = vadd.f32 4.0, %v6906_v33 }
 0x6ad   :  { %v6910_v60 = vsel %vm6902_vm8, %v6908_v12, %v6894_v17 }
 0x6ae   :  { %v6912_v31 = vsel %vm6898_vm10, %v6900_v57, %v6910_v60 }
 0x6af   :  { %v6913_v10 = vpack.c.bf16 %v6912_v31, %v6911_v5 }
 0x6b1   :  { %8297 = vmatmul.mubr.bf16.vlgmr.msra.gmra.mxu1 %v6913_v10 }
 0x771   :  { %v7019_v50 = vpop.f32.mrf.mxu1 }
 0x772   :  { %v7020_v23 = vadd.f32 %v8220_v48, %v7019_v50 }
 0x773   :  { %v8298_v47 = vpop.f32.mrf.mxu1 }
 0x774   :  { %v8229_v30 = vadd.f32 -3.0, %v7020_v23  ;;  %vm7030_vm11 = vcmp.gt.f32.partialorder %v7020_v23, 3.0  ;;  %v7028_v14 = vmul.f32 0.1, %v7020_v23  ;;  %vm7026_vm13 = vcmp.lt.f32.partialorder %v7020_v23, 0.0 }
 0x775   :  { %v7022_v4 = vpop.f32.mrf.mxu1 }
 0x776   :  { %v7034_v54 = vmul.f32 0.1, %v8229_v30  ;;  %v7023_v15 = vadd.f32 %v8220_v48, %v7022_v4 }
 0x777   :  { %v8299_v39 = vpop.f32.mrf.mxu1 }
 0x778   :  { %v7036_v2 = vadd.f32 3.0, %v7034_v54  ;;  %v8230_v62 = vadd.f32 -3.0, %v7023_v15  ;;  %v7029_v0 = vmul.f32 0.1, %v7023_v15  ;;  %vm7031_vm12 = vcmp.gt.f32.partialorder %v7023_v15, 3.0 }
 0x779   :  { %vm7027_vm14 = vcmp.lt.f32.partialorder %v7023_v15, 0.0 }
 0x77a   :  { %v7035_v40 = vmul.f32 0.1, %v8230_v62  ;;  %v7038_v49 = vsel %vm7030_vm11, %v7036_v2, %v7020_v23 }
 0x77b   :  { %v7040_v24 = vsel %vm7026_vm13, %v7028_v14, %v7038_v49 }
 0x77c   :  { %v7037_v25 = vadd.f32 3.0, %v7035_v40 }
 0x77e   :  { %v7039_v55 = vsel %vm7031_vm12, %v7037_v25, %v7023_v15 }
 0x77f   :  { %v7041_v1 = vsel %vm7027_vm14, %v7029_v0, %v7039_v55 }
 0x780   :  { %v7042_v46 = vpack.c.bf16 %v7041_v1, %v7040_v24 }
 0x782   :  { %8317 = vmatmul.mubr.bf16.vlgmr.msra.gmra.mxu0 %v7042_v46 }
 0x842   :  { %v7148_v26 = vpop.f32.mrf.mxu0 }
 0x843   :  { %v7149_v7 = vadd.f32 %v8231_v27, %v7148_v26 }
 0x844   :  { %v8318_v34 = vpop.f32.mrf.mxu0 }
 0x845   :  { %v7158_v18 = vsel %vm7157_vm15, %v7149_v7, -inf }
 0x846   :  { %7160 = vmax.xlane.f32.xlu0 %v7158_v18  ;;  %v7151_v53 = vpop.f32.mrf.mxu0 }
 0x847   :  { %v7152_v38 = vadd.f32 %v8231_v27, %v7151_v53 }
 0x848   :  { %v8319_v52 = vpop.f32.mrf.mxu0 }
 0x849   :  { %v7159_v42 = vsel %vm7157_vm15, %v7152_v38, -inf }
 0x84a   :  { %7162 = vmax.xlane.f32.xlu0 %v7159_v42 }
 0x8cf   :  { %v7161_v29 = vpop.xlane.xlu0 %7160 }
 0x8d0   :  { %v7164_v41 = vsub.f32 %v7158_v18, %v7161_v29 }
 0x8d2   :  { %v7166_v3 = vmul.f32 1.442695, %v7164_v41 }
 0x8d3   :  { %v7163_v36 = vpop.xlane.xlu0 %7162 }
 0x8d4   :  { %9026 = vpow2.f32 %v7166_v3  ;;  %v7165_v28 = vsub.f32 %v7159_v42, %v7163_v36 }
 0x8d6   :  { %v7168_v19 = vmul.f32 1.442695, %v7165_v28 }
 0x8d8   :  { %9028 = vpow2.f32 %v7168_v19 }
 0x8e1   :  { %v9027_v8 = vpop.eup %9026 }
 0x8e2   :  { %7170 = vadd.xlane.f32.xlu1 %v9027_v8 }
 0x8e5   :  { %v9029_v20 = vpop.eup %9028 }
 0x8e6   :  { %7172 = vadd.xlane.f32.xlu1 %v9029_v20 }
 0x96b   :  { %v7171_v13 = vpop.xlane.xlu1 %7170 }
 0x96c   :  { %9030 = vrcp.f32 %v7171_v13 }
 0x96f   :  { %v7173_v37 = vpop.xlane.xlu1 %7172 }
 0x970   :  { %9032 = vrcp.f32 %v7173_v37 }
 0x979   :  { %v9031_v32 = vpop.eup %9030 }
 0x97a   :  { %v7175_v58 = vmul.f32 %v9031_v32, %v9027_v8 }
 0x97c   :  { %7178 = vst [vmem:[%s13193_s9] sm:$0xff] %v7175_v58 }
 0x97d   :  { %v9033_v21 = vpop.eup %9032 }
 0x97e   :  { %v7177_v63 = vmul.f32 %v9033_v21, %v9029_v20 }
 0x980   :  { %7179 = vst [vmem:[%s13193_s9 + $0x8] sm:$0xff] %v7177_v63 }

</bundles_post_ra>
